<compile_context>
chip_gen: v7x
topology: tpu7x:2x2x1
jax: 0.10.0
libtpu: 0.0.40
codegen_flags: <defaults>
</compile_context>

<pallas_src>
import math
from functools import partial

import jax
import jax.numpy as jnp
from jax.experimental import pallas as pl
from jax.experimental.pallas import tpu as pltpu

MXU_DTYPE = jnp.bfloat16          # MXU operand dtype (f32 accumulation everywhere)
VMEM_LIMIT = 32 * 1024 * 1024     # explicit scoped-VMEM budget (safe on v5e/v6e/v7x)
LN_EPS = 1e-5


# ----------------------------- shared in-kernel helpers -----------------------------

def _cparams(*sem):
    return pltpu.CompilerParams(dimension_semantics=sem, vmem_limit_bytes=VMEM_LIMIT)


def _round_up(x, m):
    return (x + m - 1) // m * m


def _act(y, act):
    if act == "relu":
        return jnp.maximum(y, 0.0)
    if act == "gelu":
        # TODO(synk): PyTorch nn.GELU default is erf-based; tanh approximation used
        # (this path is unexercised with the reference config, activation='relu').
        return jax.nn.gelu(y, approximate=True)
    return y


def _mxu_dot(a, b):
    """bf16 MXU matmul with f32 accumulation."""
    return jnp.dot(a.astype(MXU_DTYPE), b.astype(MXU_DTYPE),
                   preferred_element_type=jnp.float32)


def _avg_matrix(L, k):
    """[L, L] f32 operator A s.t. (A @ s) == edge-replicated moving average (window k, odd)."""
    pad = (k - 1) // 2
    row = jax.lax.broadcasted_iota(jnp.int32, (L, L), 0)
    col = jax.lax.broadcasted_iota(jnp.int32, (L, L), 1)
    a = jnp.zeros((L, L), jnp.float32)
    for off in range(-pad, pad + 1):
        src = jnp.clip(row + off, 0, L - 1)
        a = a + jnp.where(col == src, 1.0, 0.0)
    return a / float(k)


def _shift_matrix(L, off):
    """[L, L] f32 operator S s.t. (S @ s)[t] == s[(t + off) mod L] (circular shift)."""
    row = jax.lax.broadcasted_iota(jnp.int32, (L, L), 0)
    col = jax.lax.broadcasted_iota(jnp.int32, (L, L), 1)
    return jnp.where(col == (row + off + L) % L, 1.0, 0.0)


def _moving_avg(s, k):
    """Edge-replicated moving average over axis 0 of a 2-D [L, D] f32 value (exact f32 matmul)."""
    return jnp.dot(_avg_matrix(s.shape[0], k), s, preferred_element_type=jnp.float32)


def _layer_norm(s, g, b, eps):
    mu = jnp.mean(s, axis=-1, keepdims=True)
    var = jnp.mean(jnp.square(s - mu), axis=-1, keepdims=True)
    return (s - mu) * jax.lax.rsqrt(var + eps) * g + b


# ----------------------------- generic tiled linear -----------------------------

def _linear_kernel(*refs, act, has_bias):
    if has_bias:
        x_ref, w_ref, b_ref, o_ref, acc_ref = refs
    else:
        x_ref, w_ref, o_ref, acc_ref = refs
        b_ref = None

    @pl.when(pl.program_id(2) == 0)
    def _init():
        acc_ref[...] = jnp.zeros_like(acc_ref)

    acc_ref[...] += _mxu_dot(x_ref[...], w_ref[...])

    @pl.when(pl.program_id(2) == pl.num_programs(2) - 1)
    def _fin():
        y = acc_ref[...]
        if b_ref is not None:
            y = y + b_ref[...]
        o_ref[...] = _act(y, act)


def linear(x, w, b=None, act="none", tm=256, tn=256, tk=512):
    """act(x @ w [+ b]); x: [..., K] f32, w: [K, N] (bf16 ok), b: [N] f32 or None."""
    lead = x.shape[:-1]
    K = x.shape[-1]
    N = w.shape[-1]
    M = int(math.prod(lead)) if lead else 1
    x2 = x.reshape(M, K).astype(jnp.float32)

    bm = M if M <= tm else tm
    bn = N if N <= tn else tn
    bk = K if K <= tk else tk
    Mp = M if bm == M else _round_up(M, bm)
    Np = N if bn == N else _round_up(N, bn)
    Kp = K if bk == K else _round_up(K, bk)
    if (Mp, Kp) != (M, K):
        x2 = jnp.pad(x2, ((0, Mp - M), (0, Kp - K)))
    w2 = w
    if (Kp, Np) != (K, N):
        w2 = jnp.pad(w2, ((0, Kp - K), (0, Np - N)))

    in_specs = [pl.BlockSpec((bm, bk), lambda i, j, k: (i, k)),
                pl.BlockSpec((bk, bn), lambda i, j, k: (k, j))]
    args = [x2, w2]
    has_bias = b is not None
    if has_bias:
        b2 = b.reshape(1, N).astype(jnp.float32)
        if Np != N:
            b2 = jnp.pad(b2, ((0, 0), (0, Np - N)))
        in_specs.append(pl.BlockSpec((1, bn), lambda i, j, k: (0, j)))
        args.append(b2)

    out = pl.pallas_call(
        partial(_linear_kernel, act=act, has_bias=has_bias),
        grid=(Mp // bm, Np // bn, Kp // bk),
        out_shape=jax.ShapeDtypeStruct((Mp, Np), jnp.float32),
        in_specs=in_specs,
        out_specs=pl.BlockSpec((bm, bn), lambda i, j, k: (i, j)),
        scratch_shapes=[pltpu.VMEM((bm, bn), jnp.float32)],
        compiler_params=_cparams("parallel", "parallel", "arbitrary"),
    )(*args)
    if (Mp, Np) != (M, N):
        out = out[:M, :N]
    return out.reshape(lead + (N,))


# ----------------------------- fused per-batch kernels -----------------------------

def _embed_kernel(x_ref, xm_ref, wp_ref, wc_ref, wn_ref, wt_ref, o_ref):
    # DataEmbedding_wo_pos: circular Conv1d(k=3, no bias) + TimeFeatureEmbedding (no bias).
    x = x_ref[...]                              # [L, C] f32
    L = x.shape[0]
    x_prev = jnp.dot(_shift_matrix(L, -1), x, preferred_element_type=jnp.float32)
    x_next = jnp.dot(_shift_matrix(L, 1), x, preferred_element_type=jnp.float32)
    o_ref[...] = (_mxu_dot(x_prev, wp_ref[...]) + _mxu_dot(x, wc_ref[...]) +
                  _mxu_dot(x_next, wn_ref[...]) + _mxu_dot(xm_ref[...], wt_ref[...]))


def data_embedding(p, x, x_mark):
    B, L, C = x.shape
    D = p['wt'].shape[-1]
    seq = pl.BlockSpec((None, L, C), lambda b: (b, 0, 0))
    wsp = pl.BlockSpec((C, D), lambda b: (0, 0))
    return pl.pallas_call(
        _embed_kernel,
        grid=(B,),
        out_shape=jax.ShapeDtypeStruct((B, L, D), jnp.float32),
        in_specs=[seq, seq, wsp, wsp, wsp, wsp],
        out_specs=pl.BlockSpec((None, L, D), lambda b: (b, 0, 0)),
        compiler_params=_cparams("parallel"),
    )(x.astype(jnp.float32), x_mark.astype(jnp.float32),
      p['wp'], p['wc'], p['wn'], p['wt'])


def _circconv_kernel(x_ref, wp_ref, wc_ref, wn_ref, o_ref):
    x = x_ref[...]
    L = x.shape[0]
    x_prev = jnp.dot(_shift_matrix(L, -1), x, preferred_element_type=jnp.float32)
    x_next = jnp.dot(_shift_matrix(L, 1), x, preferred_element_type=jnp.float32)
    o_ref[...] = (_mxu_dot(x_prev, wp_ref[...]) + _mxu_dot(x, wc_ref[...]) +
                  _mxu_dot(x_next, wn_ref[...]))


def circular_conv1d(x, wp, wc, wn):
    """Conv1d kernel=3, circular padding, no bias; taps (t-1, t, t+1)."""
    B, L, C = x.shape
    N = wc.shape[-1]
    wsp = pl.BlockSpec((C, N), lambda b: (0, 0))
    return pl.pallas_call(
        _circconv_kernel,
        grid=(B,),
        out_shape=jax.ShapeDtypeStruct((B, L, N), jnp.float32),
        in_specs=[pl.BlockSpec((None, L, C), lambda b: (b, 0, 0)), wsp, wsp, wsp],
        out_specs=pl.BlockSpec((None, L, N), lambda b: (b, 0, 0)),
        compiler_params=_cparams("parallel"),
    )(x.astype(jnp.float32), wp, wc, wn)


def _decomp_kernel(x_ref, res_ref, mean_ref, *, k):
    s = x_ref[...]
    ma = _moving_avg(s, k)
    res_ref[...] = s - ma
    mean_ref[...] = ma


def series_decomp(x, k):
    """Autoformer series_decomp (edge-replicated moving average, odd k)."""
    B, L, D = x.shape
    seq = pl.BlockSpec((None, L, D), lambda b: (b, 0, 0))
    return pl.pallas_call(
        partial(_decomp_kernel, k=k),
        grid=(B,),
        out_shape=(jax.ShapeDtypeStruct((B, L, D), jnp.float32),
                   jax.ShapeDtypeStruct((B, L, D), jnp.float32)),
        in_specs=[seq],
        out_specs=(seq, seq),
        compiler_params=_cparams("parallel"),
    )(x.astype(jnp.float32))


def _mm_add_decomp_kernel(a_ref, w_ref, b_ref, x_ref, res_ref, mean_ref, *, k):
    y = _mxu_dot(a_ref[...], w_ref[...]) + b_ref[...]
    s = x_ref[...] + y
    ma = _moving_avg(s, k)
    res_ref[...] = s - ma
    mean_ref[...] = ma


def matmul_add_decomp(a, w, b, x, k):
    """series_decomp(x + (a @ w + b)) fused in one kernel."""
    B, L, K = a.shape
    N = w.shape[-1]
    seq = pl.BlockSpec((None, L, N), lambda i: (i, 0, 0))
    return pl.pallas_call(
        partial(_mm_add_decomp_kernel, k=k),
        grid=(B,),
        out_shape=(jax.ShapeDtypeStruct((B, L, N), jnp.float32),
                   jax.ShapeDtypeStruct((B, L, N), jnp.float32)),
        in_specs=[pl.BlockSpec((None, L, K), lambda i: (i, 0, 0)),
                  pl.BlockSpec((K, N), lambda i: (0, 0)),
                  pl.BlockSpec((1, N), lambda i: (0, 0)),
                  seq],
        out_specs=(seq, seq),
        compiler_params=_cparams("parallel"),
    )(a.astype(jnp.float32), w, b.reshape(1, N).astype(jnp.float32),
      x.astype(jnp.float32))


def _ffn_add_decomp_kernel(x_ref, w1_ref, w2_ref, res_ref, mean_ref, *, k, act):
    x = x_ref[...]
    h = _act(_mxu_dot(x, w1_ref[...]), act)
    y = _mxu_dot(h, w2_ref[...])
    s = x + y
    ma = _moving_avg(s, k)
    res_ref[...] = s - ma
    mean_ref[...] = ma


def ffn_add_decomp(x, w1, w2, k, act):
    """series_decomp(x + conv2(act(conv1(x)))) fused (k=1 convs, no bias)."""
    B, L, D = x.shape
    F = w1.shape[-1]
    seq = pl.BlockSpec((None, L, D), lambda i: (i, 0, 0))
    return pl.pallas_call(
        partial(_ffn_add_decomp_kernel, k=k, act=act),
        grid=(B,),
        out_shape=(jax.ShapeDtypeStruct((B, L, D), jnp.float32),
                   jax.ShapeDtypeStruct((B, L, D), jnp.float32)),
        in_specs=[seq,
                  pl.BlockSpec((D, F), lambda i: (0, 0)),
                  pl.BlockSpec((F, D), lambda i: (0, 0))],
        out_specs=(seq, seq),
        compiler_params=_cparams("parallel"),
    )(x.astype(jnp.float32), w1, w2)


def _my_ln_kernel(x_ref, g_ref, b_ref, o_ref, *, eps):
    xh = _layer_norm(x_ref[...], g_ref[...], b_ref[...], eps)
    o_ref[...] = xh - jnp.mean(xh, axis=0, keepdims=True)


def my_layernorm(p, x, eps=LN_EPS):
    """my_Layernorm: LayerNorm + subtraction of the time-mean, fused."""
    B, L, D = x.shape
    return pl.pallas_call(
        partial(_my_ln_kernel, eps=eps),
        grid=(B,),
        out_shape=jax.ShapeDtypeStruct((B, L, D), jnp.float32),
        in_specs=[pl.BlockSpec((None, L, D), lambda i: (i, 0, 0)),
                  pl.BlockSpec((1, D), lambda i: (0, 0)),
                  pl.BlockSpec((1, D), lambda i: (0, 0))],
        out_specs=pl.BlockSpec((None, L, D), lambda i: (i, 0, 0)),
        compiler_params=_cparams("parallel"),
    )(x.astype(jnp.float32), p['g'].reshape(1, D).astype(jnp.float32),
      p['b'].reshape(1, D).astype(jnp.float32))


def _mm_add_ln_kernel(a_ref, w_ref, b_ref, x_ref, g_ref, bb_ref, o_ref, *, eps):
    y = _mxu_dot(a_ref[...], w_ref[...]) + b_ref[...]
    o_ref[...] = _layer_norm(x_ref[...] + y, g_ref[...], bb_ref[...], eps)


def matmul_add_layernorm(a, w, b, x, g, beta, eps=LN_EPS):
    """LayerNorm(x + (a @ w + b)) fused in one kernel."""
    B, L, K = a.shape
    N = w.shape[-1]
    vec = pl.BlockSpec((1, N), lambda i: (0, 0))
    return pl.pallas_call(
        partial(_mm_add_ln_kernel, eps=eps),
        grid=(B,),
        out_shape=jax.ShapeDtypeStruct((B, L, N), jnp.float32),
        in_specs=[pl.BlockSpec((None, L, K), lambda i: (i, 0, 0)),
                  pl.BlockSpec((K, N), lambda i: (0, 0)),
                  vec,
                  pl.BlockSpec((None, L, N), lambda i: (i, 0, 0)),
                  vec, vec],
        out_specs=pl.BlockSpec((None, L, N), lambda i: (i, 0, 0)),
        compiler_params=_cparams("parallel"),
    )(a.astype(jnp.float32), w, b.reshape(1, N).astype(jnp.float32),
      x.astype(jnp.float32), g.reshape(1, N).astype(jnp.float32),
      beta.reshape(1, N).astype(jnp.float32))


def _ffn_ln_kernel(x_ref, w1_ref, b1_ref, w2_ref, b2_ref, g_ref, bb_ref, o_ref, *, eps, act):
    x = x_ref[...]
    h = _act(_mxu_dot(x, w1_ref[...]) + b1_ref[...], act)
    y = _mxu_dot(h, w2_ref[...]) + b2_ref[...]
    o_ref[...] = _layer_norm(x + y, g_ref[...], bb_ref[...], eps)


def ffn_layernorm(x, w1, b1, w2, b2, g, beta, act="relu", eps=LN_EPS):
    """LayerNorm(x + FFN(x)) fused in one kernel."""
    B, L, D = x.shape
    F = w1.shape[-1]
    dvec = pl.BlockSpec((1, D), lambda i: (0, 0))
    return pl.pallas_call(
        partial(_ffn_ln_kernel, eps=eps, act=act),
        grid=(B,),
        out_shape=jax.ShapeDtypeStruct((B, L, D), jnp.float32),
        in_specs=[pl.BlockSpec((None, L, D), lambda i: (i, 0, 0)),
                  pl.BlockSpec((D, F), lambda i: (0, 0)),
                  pl.BlockSpec((1, F), lambda i: (0, 0)),
                  pl.BlockSpec((F, D), lambda i: (0, 0)),
                  dvec, dvec, dvec],
        out_specs=pl.BlockSpec((None, L, D), lambda i: (i, 0, 0)),
        compiler_params=_cparams("parallel"),
    )(x.astype(jnp.float32), w1, b1.reshape(1, F).astype(jnp.float32),
      w2, b2.reshape(1, D).astype(jnp.float32),
      g.reshape(1, D).astype(jnp.float32), beta.reshape(1, D).astype(jnp.float32))


def _mha_kernel(q_ref, k_ref, v_ref, m_ref, o_ref, *, scale):
    q = q_ref[...].astype(MXU_DTYPE)            # [H, L, Dh]
    k = k_ref[...].astype(MXU_DTYPE)
    v = v_ref[...].astype(MXU_DTYPE)
    m = m_ref[...]                              # [1, L] key-validity mask
    s = jax.lax.dot_general(q, k, (((2,), (2,)), ((0,), (0,))),
                            preferred_element_type=jnp.float32) * scale   # [H, Lq, Lk]
    s = jnp.where(m[None, :, :] > 0, s, -1e9)
    s = s - jnp.max(s, axis=-1, keepdims=True)
    p = jnp.exp(s)
    p = p * pl.reciprocal(jnp.sum(p, axis=-1, keepdims=True), approx=True)
    o_ref[...] = jax.lax.dot_general(p.astype(MXU_DTYPE), v,
                                     (((2,), (1,)), ((0,), (0,))),
                                     preferred_element_type=jnp.float32)


def masked_mha(q, k, v, mask):
    """q,k,v: [B, H, L, Dh]; mask: [B, L] key-padding mask. All heads batched per kernel call."""
    B, H, L, Dh = q.shape
    m = mask.reshape(B, 1, L).astype(jnp.float32)
    scale = 1.0 / math.sqrt(Dh)
    qspec = pl.BlockSpec((None, H, L, Dh), lambda b: (b, 0, 0, 0))
    return pl.pallas_call(
        partial(_mha_kernel, scale=scale),
        grid=(B,),
        out_shape=jax.ShapeDtypeStruct((B, H, L, Dh), jnp.float32),
        in_specs=[qspec, qspec, qspec,
                  pl.BlockSpec((None, 1, L), lambda b: (b, 0, 0))],
        out_specs=pl.BlockSpec((None, H, L, Dh), lambda b: (b, 0, 0, 0)),
        compiler_params=_cparams("parallel"),
    )(q.astype(jnp.float32), k.astype(jnp.float32), v.astype(jnp.float32), m)


# ----------------------------- model components -----------------------------

def autocorrelation(q, k, v, factor):
    """AutoCorrelation (inference delay aggregation). q:[B,L,H,E], k,v:[B,S,H,E]."""
    B, L, H, E = q.shape
    S = k.shape[1]
    if L > S:
        z = jnp.zeros((B, L - S, H, E), q.dtype)
        k = jnp.concatenate([k, z], axis=1)
        v = jnp.concatenate([v, z], axis=1)
    else:
        k = k[:, :L]
        v = v[:, :L]
    qp = jnp.transpose(q, (0, 2, 3, 1))   # [B,H,E,L]
    kp = jnp.transpose(k, (0, 2, 3, 1))
    vp = jnp.transpose(v, (0, 2, 3, 1))
    # TODO(synk): torch.fft.rfft/irfft period correlation has no Pallas TPU primitive; XLA FFT used.
    qf = jnp.fft.rfft(qp, axis=-1)
    kf = jnp.fft.rfft(kp, axis=-1)
    corr = jnp.fft.irfft(qf * jnp.conj(kf), n=L, axis=-1)      # [B,H,E,L]
    top_k = int(factor * math.log(L))
    mean_value = jnp.mean(corr, axis=(1, 2))                   # [B, L]
    weights, delay = jax.lax.top_k(mean_value, top_k)
    tmp_corr = jax.nn.softmax(weights, axis=-1)                # [B, top_k]
    # single stacked circular gather (modular indexing) instead of top_k serial gathers
    idx = (jnp.arange(L, dtype=jnp.int32)[None, None, :] + delay[:, :, None]) % L   # [B,K,L]
    idx = jnp.broadcast_to(idx[:, :, None, None, :], (B, top_k, H, E, L))
    gathered = jnp.take_along_axis(vp[:, None], idx, axis=-1)  # [B,K,H,E,L]
    agg = jnp.einsum('bk,bkhel->bhel', tmp_corr, gathered)
    return jnp.transpose(agg, (0, 3, 1, 2))                    # [B,L,H,E]


def self_autocorr_qkv(p, x, n_heads):
    """Fused q/k/v projection for self auto-correlation (one matmul)."""
    B, L, D = x.shape
    qkv = linear(x, p['qkv']['w'], p['qkv']['b'])
    q, k, v = jnp.split(qkv, 3, axis=-1)
    E = D // n_heads
    return (q.reshape(B, L, n_heads, E), k.reshape(B, L, n_heads, E),
            v.reshape(B, L, n_heads, E))


def cross_autocorr_qkv(p, x, cross, n_heads):
    """q from x, fused k/v projection from cross."""
    B, L, D = x.shape
    S = cross.shape[1]
    q = linear(x, p['q']['w'], p['q']['b'])
    kv = linear(cross, p['kv']['w'], p['kv']['b'])
    k, v = jnp.split(kv, 2, axis=-1)
    E = D // n_heads
    return (q.reshape(B, L, n_heads, E), k.reshape(B, S, n_heads, E),
            v.reshape(B, S, n_heads, E))


def encoder_layer(p, x, cfg):
    B, L, D = x.shape
    q, k, v = self_autocorr_qkv(p['attn'], x, cfg['n_heads'])
    attn = autocorrelation(q, k, v, cfg['factor']).reshape(B, L, D)
    # out-projection + residual + series_decomp fused
    x, _ = matmul_add_decomp(attn, p['attn']['o']['w'], p['attn']['o']['b'], x,
                             cfg['moving_avg'])
    # conv1(k=1) + act + conv2(k=1) + residual + series_decomp fused
    res, _ = ffn_add_decomp(x, p['conv1_w'], p['conv2_w'], cfg['moving_avg'],
                            cfg['activation'])
    return res


def encoder(p, x, cfg):
    for lp in p['layers']:
        x = encoder_layer(lp, x, cfg)
    return my_layernorm(p['norm'], x)


def cond_decoder_layer(p, x, cross, cond, cfg):
    pred_len = cfg['duration']
    ma = cfg['moving_avg']
    H = cfg['n_heads']
    B, L, D = x.shape

    # self auto-correlation
    q, k, v = self_autocorr_qkv(p['self_attn'], x, H)
    attn = autocorrelation(q, k, v, cfg['factor']).reshape(B, L, D)
    x, trend1 = matmul_add_decomp(attn, p['self_attn']['o']['w'],
                                  p['self_attn']['o']['b'], x, ma)

    # cross auto-correlation against encoder output
    q, k, v = cross_autocorr_qkv(p['cross_attn'], x, cross, H)
    attn = autocorrelation(q, k, v, cfg['factor']).reshape(B, L, D)
    x, trend2 = matmul_add_decomp(attn, p['cross_attn']['o']['w'],
                                  p['cross_attn']['o']['b'], x, ma)

    # TODO(synk): exact CondDecoderLayer / CondAutoCorrelation source unavailable; conditional
    # auto-correlation is applied to the prediction segment against `cond` (as in prior version).
    x_pred = x[:, -pred_len:, :]
    q, k, v = cross_autocorr_qkv(p['cond_attn'], x_pred, cond, H)
    attn = autocorrelation(q, k, v, cfg['factor']).reshape(B, pred_len, D)
    attn = linear(attn, p['cond_attn']['o']['w'], p['cond_attn']['o']['b'])
    x = jnp.concatenate([x[:, :-pred_len, :], x_pred + attn], axis=1)
    x, trend3 = series_decomp(x, ma)

    x, trend4 = ffn_add_decomp(x, p['conv1_w'], p['conv2_w'], ma, cfg['activation'])

    residual_trend = trend1 + trend2 + trend3 + trend4
    residual_trend = circular_conv1d(residual_trend, p['trend_wp'], p['trend_wc'],
                                     p['trend_wn'])                      # d_model -> c_out
    return x, residual_trend


def decoder(p, x, cross, trend, cond, cfg):
    for lp in p['layers']:
        x, rt = cond_decoder_layer(lp, x, cross, cond, cfg)
        trend = trend + rt
    x = my_layernorm(p['norm'], x)
    x = linear(x, p['proj']['w'], p['proj']['b'])
    return x, trend


def transformer_block(p, x, mask, n_heads):
    # TODO(synk): exact TransformerBlock source unavailable; standard post-LN self-attention
    # block with key-padding mask + FFN (same semantics as the previous accepted version).
    B, L, D = x.shape
    dh = D // n_heads
    qkv = linear(x, p['qkv']['w'], p['qkv']['b'])           # fused q/k/v projection
    q, k, v = jnp.split(qkv, 3, axis=-1)
    q = q.reshape(B, L, n_heads, dh).transpose(0, 2, 1, 3)
    k = k.reshape(B, L, n_heads, dh).transpose(0, 2, 1, 3)
    v = v.reshape(B, L, n_heads, dh).transpose(0, 2, 1, 3)
    o = masked_mha(q, k, v, mask).transpose(0, 2, 1, 3).reshape(B, L, D)
    # out-proj + residual + LayerNorm fused; FFN + residual + LayerNorm fused
    x = matmul_add_layernorm(o, p['o']['w'], p['o']['b'], x, p['ln1_g'], p['ln1_b'])
    return ffn_layernorm(x, p['ff1']['w'], p['ff1']['b'], p['ff2']['w'], p['ff2']['b'],
                         p['ln2_g'], p['ln2_b'], act='relu')


def cond_autoformer_forward(params, cfg, x_enc, cond):
    pred_len = cfg['duration']
    B, _, C = x_enc.shape
    mean = jnp.repeat(jnp.mean(x_enc, axis=1, keepdims=True), pred_len, axis=1)
    zeros = jnp.zeros((B, pred_len, C), jnp.float32)
    seasonal_init, trend_init = series_decomp(x_enc, cfg['moving_avg'])
    trend_init = jnp.concatenate([trend_init, mean], axis=1)
    seasonal_init = jnp.concatenate([seasonal_init, zeros], axis=1)

    enc_out = data_embedding(params['enc_emb'], x_enc, x_enc)
    enc_out = encoder(params['encoder'], enc_out, cfg)

    dec_out = data_embedding(params['dec_emb'], seasonal_init, seasonal_init)

    cond_e = linear(cond, params['cond_embed']['w'], params['cond_embed']['b'])
    mask_idx = (cond_e[:, :, 0] != 0).astype(jnp.float32)          # [B, Lc]
    attcond = transformer_block(params['cond_att0'], cond_e, mask_idx, cfg['n_heads'])
    attcond = transformer_block(params['cond_att1'], attcond, mask_idx, cfg['n_heads'])
    cond_vec = jnp.repeat(jnp.mean(attcond, axis=1, keepdims=True), pred_len, axis=1)

    dec_out = jnp.concatenate(
        [dec_out[:, :-pred_len, :], dec_out[:, -pred_len:, :] + cond_vec], axis=1)

    seasonal_part, trend_part = decoder(params['decoder'], dec_out, enc_out,
                                        trend_init, cond_vec, cfg)
    out = trend_part + seasonal_part
    return jnp.mean(out[:, -pred_len:, :], axis=1)                 # [B, c_out]


# ----------------------------- deterministic params -----------------------------

class ParamFactory:
    def __init__(self, seed):
        self.key = jax.random.PRNGKey(seed)

    def normal(self, shape, scale, dtype=MXU_DTYPE):
        self.key, sub = jax.random.split(self.key)
        return (scale * jax.random.normal(sub, shape)).astype(dtype)

    def dense(self, d_in, d_out):
        # matmul weights kept in bf16 (MXU operand); biases in f32 (VPU epilogue)
        return {'w': self.normal((d_in, d_out), 1.0 / math.sqrt(d_in)),
                'b': jnp.zeros((d_out,), jnp.float32)}

    def self_attn(self, d_model):
        return {'qkv': self.dense(d_model, 3 * d_model),
                'o': self.dense(d_model, d_model)}

    def cross_attn(self, d_model):
        return {'q': self.dense(d_model, d_model),
                'kv': self.dense(d_model, 2 * d_model),
                'o': self.dense(d_model, d_model)}


def init_params(seed, cfg):
    pf = ParamFactory(seed)
    d_model, enc_in, d_ff, c_out = cfg['d_model'], cfg['enc_in'], cfg['d_ff'], cfg['c_out']

    def embedding_params():
        s3 = 1.0 / math.sqrt(3 * enc_in)
        return {'wp': pf.normal((enc_in, d_model), s3),
                'wc': pf.normal((enc_in, d_model), s3),
                'wn': pf.normal((enc_in, d_model), s3),
                'wt': pf.normal((enc_in, d_model), 1.0 / math.sqrt(enc_in))}

    def norm_params():
        return {'g': jnp.ones((d_model,), jnp.float32),
                'b': jnp.zeros((d_model,), jnp.float32)}

    enc_layers = [{'attn': pf.self_attn(d_model),
                   'conv1_w': pf.normal((d_model, d_ff), 1.0 / math.sqrt(d_model)),
                   'conv2_w': pf.normal((d_ff, d_model), 1.0 / math.sqrt(d_ff))}
                  for _ in range(cfg['e_layers'])]

    st = 1.0 / math.sqrt(3 * d_model)
    dec_layers = [{'self_attn': pf.self_attn(d_model),
                   'cross_attn': pf.cross_attn(d_model),
                   'cond_attn': pf.cross_attn(d_model),
                   'conv1_w': pf.normal((d_model, d_ff), 1.0 / math.sqrt(d_model)),
                   'conv2_w': pf.normal((d_ff, d_model), 1.0 / math.sqrt(d_ff)),
                   'trend_wp': pf.normal((d_model, c_out), st),
                   'trend_wc': pf.normal((d_model, c_out), st),
                   'trend_wn': pf.normal((d_model, c_out), st)}
                  for _ in range(cfg['d_layers'])]

    def tblock():
        return {'qkv': pf.dense(d_model, 3 * d_model),
                'o': pf.dense(d_model, d_model),
                'ln1_g': jnp.ones((d_model,), jnp.float32),
                'ln1_b': jnp.zeros((d_model,), jnp.float32),
                'ln2_g': jnp.ones((d_model,), jnp.float32),
                'ln2_b': jnp.zeros((d_model,), jnp.float32),
                'ff1': pf.dense(d_model, 4 * d_model),
                'ff2': pf.dense(4 * d_model, d_model)}

    return {
        'enc_emb': embedding_params(),
        'dec_emb': embedding_params(),
        'encoder': {'layers': enc_layers, 'norm': norm_params()},
        'decoder': {'layers': dec_layers, 'norm': norm_params(),
                    'proj': pf.dense(d_model, c_out)},
        'cond_embed': pf.dense(cfg['text_indim'], d_model),    # xavier-normal-like
        'cond_att0': tblock(),
        'cond_att1': tblock(),
    }


if __name__ == "__main__":
    cfg = dict(duration=8, moving_avg=5, enc_in=4, d_model=32, d_ff=64,
               n_heads=4, e_layers=1, d_layers=1, c_out=4, factor=1,
               dropout=0.0, activation='relu', embed='timeF', text_indim=16)
    params = init_params(0, cfg)

    k1, k2 = jax.random.split(jax.random.PRNGKey(0))
    B, seq_len, n_cond = 2, 16, 6
    x_enc = jax.random.normal(k1, (B, seq_len, cfg['enc_in']), jnp.float32)
    cond = jax.random.normal(k2, (B, n_cond, cfg['text_indim']), jnp.float32)

    fwd = jax.jit(lambda p, xe, cd: cond_autoformer_forward(p, cfg, xe, cd))
    out = jax.block_until_ready(fwd(params, x_enc, cond))
    assert out.shape == (B, cfg['c_out'])
    assert bool(jnp.all(jnp.isfinite(out)))
    print("KERNEL_OK")
</pallas_src>

<mosaic_0001>
module attributes {stable_mosaic.version = 11 : i64} {
  func.func @_linear_kernel(%arg0: i32, %arg1: i32, %arg2: i32, %arg3: memref<12x16xf32, #tpu.memory_space<vmem>>, %arg4: memref<16x32xbf16, #tpu.memory_space<vmem>>, %arg5: memref<1x32xf32, #tpu.memory_space<vmem>>, %arg6: memref<12x32xf32, #tpu.memory_space<vmem>>, %arg7: memref<12x32xf32, #tpu.memory_space<vmem>>) attributes {dimension_semantics = [#tpu.dimension_semantics<parallel>, #tpu.dimension_semantics<parallel>, #tpu.dimension_semantics<arbitrary>], iteration_bounds = array<i64: 1, 1, 1>, scalar_prefetch = 0 : i64, scratch_operands = 1 : i64, tpu.core_type = #tpu.core_type<tc>, window_params = [{transform_indices = @transform_0, window_bounds = array<i64: 12, 16>}, {transform_indices = @transform_1, window_bounds = array<i64: 16, 32>}, {transform_indices = @transform_2, window_bounds = array<i64: 1, 32>}, {transform_indices = @transform_3, window_bounds = array<i64: 12, 32>}]} {
    %c0_i32 = arith.constant 0 : i32
    %0 = arith.cmpi eq, %arg2, %c0_i32 : i32
    %1 = arith.extui %0 : i1 to i32
    %c0_i32_0 = arith.constant 0 : i32
    %2 = arith.cmpi ne, %1, %c0_i32_0 : i32
    scf.if %2 {
      %cst_10 = arith.constant 0.000000e+00 : f32
      %13 = vector.broadcast %cst_10 : f32 to vector<12x32xf32>
      %c0_11 = arith.constant 0 : index
      %c0_12 = arith.constant 0 : index
      %14 = vector.load %arg7[%c0_11, %c0_12] : memref<12x32xf32, #tpu.memory_space<vmem>>, vector<12x32xf32>
      tpu.vector_store %arg7[%c0_11, %c0_12], %13 {strides = array<i32>} : memref<12x32xf32, #tpu.memory_space<vmem>>, vector<12x32xf32>,
    } else {
    }
    %c0 = arith.constant 0 : index
    %c0_1 = arith.constant 0 : index
    %3 = vector.load %arg7[%c0, %c0_1] : memref<12x32xf32, #tpu.memory_space<vmem>>, vector<12x32xf32>
    %c0_2 = arith.constant 0 : index
    %c0_3 = arith.constant 0 : index
    %4 = vector.load %arg3[%c0_2, %c0_3] : memref<12x16xf32, #tpu.memory_space<vmem>>, vector<12x16xf32>
    %c0_4 = arith.constant 0 : index
    %c0_5 = arith.constant 0 : index
    %5 = vector.load %arg4[%c0_4, %c0_5] : memref<16x32xbf16, #tpu.memory_space<vmem>>, vector<16x32xbf16>
    %6 = arith.truncf %4 : vector<12x16xf32> to vector<12x16xbf16>
    %cst = arith.constant dense<0.000000e+00> : vector<12x32xf32>
    %7 = tpu.matmul %6, %5, %cst {dimension_numbers = #tpu.dot_dimension_numbers<[1], [0], [0], [1], [0, 0, 1, 1], [], []>} : vector<12x16xbf16>, vector<16x32xbf16>, vector<12x32xf32> -> vector<12x32xf32>
    %8 = arith.addf %3, %7 : vector<12x32xf32>
    %c0_6 = arith.constant 0 : index
    %c0_7 = arith.constant 0 : index
    %9 = vector.load %arg7[%c0_6, %c0_7] : memref<12x32xf32, #tpu.memory_space<vmem>>, vector<12x32xf32>
    tpu.vector_store %arg7[%c0_6, %c0_7], %8 {strides = array<i32>} : memref<12x32xf32, #tpu.memory_space<vmem>>, vector<12x32xf32>,
    %c0_i32_8 = arith.constant 0 : i32
    %10 = arith.cmpi eq, %arg2, %c0_i32_8 : i32
    %11 = arith.extui %10 : i1 to i32
    %c0_i32_9 = arith.constant 0 : i32
    %12 = arith.cmpi ne, %11, %c0_i32_9 : i32
    scf.if %12 {
      %c0_10 = arith.constant 0 : index
      %c0_11 = arith.constant 0 : index
      %13 = vector.load %arg7[%c0_10, %c0_11] : memref<12x32xf32, #tpu.memory_space<vmem>>, vector<12x32xf32>
      %c0_12 = arith.constant 0 : index
      %c0_13 = arith.constant 0 : index
      %14 = vector.load %arg5[%c0_12, %c0_13] : memref<1x32xf32, #tpu.memory_space<vmem>>, vector<1x32xf32>
      %15 = vector.broadcast %14 : vector<1x32xf32> to vector<12x32xf32>
      %16 = arith.addf %13, %15 : vector<12x32xf32>
      %c0_14 = arith.constant 0 : index
      %c0_15 = arith.constant 0 : index
      %17 = vector.load %arg6[%c0_14, %c0_15] : memref<12x32xf32, #tpu.memory_space<vmem>>, vector<12x32xf32>
      tpu.vector_store %arg6[%c0_14, %c0_15], %16 {strides = array<i32>} : memref<12x32xf32, #tpu.memory_space<vmem>>, vector<12x32xf32>,
    } else {
    }
    return
  }
  func.func @transform_0(%arg0: i32, %arg1: i32, %arg2: i32) -> (i32, i32) {
    %c0_i32 = arith.constant 0 : i32
    return %arg0, %arg2 : i32, i32
  }
  func.func @transform_1(%arg0: i32, %arg1: i32, %arg2: i32) -> (i32, i32) {
    %c0_i32 = arith.constant 0 : i32
    return %arg2, %arg1 : i32, i32
  }
  func.func @transform_2(%arg0: i32, %arg1: i32, %arg2: i32) -> (i32, i32) {
    %c0_i32 = arith.constant 0 : i32
    %c0_i32_0 = arith.constant 0 : i32
    return %c0_i32, %arg1 : i32, i32
  }
  func.func @transform_3(%arg0: i32, %arg1: i32, %arg2: i32) -> (i32, i32) {
    %c0_i32 = arith.constant 0 : i32
    return %arg0, %arg1 : i32, i32
  }
}

module attributes {stable_mosaic.version = 11 : i64} {
  func.func @_linear_kernel(%arg0: i32, %arg1: i32, %arg2: i32, %arg3: memref<12x32xf32, #tpu.memory_space<vmem>>, %arg4: memref<32x96xbf16, #tpu.memory_space<vmem>>, %arg5: memref<1x96xf32, #tpu.memory_space<vmem>>, %arg6: memref<12x96xf32, #tpu.memory_space<vmem>>, %arg7: memref<12x96xf32, #tpu.memory_space<vmem>>) attributes {dimension_semantics = [#tpu.dimension_semantics<parallel>, #tpu.dimension_semantics<parallel>, #tpu.dimension_semantics<arbitrary>], iteration_bounds = array<i64: 1, 1, 1>, scalar_prefetch = 0 : i64, scratch_operands = 1 : i64, tpu.core_type = #tpu.core_type<tc>, window_params = [{transform_indices = @transform_0, window_bounds = array<i64: 12, 32>}, {transform_indices = @transform_1, window_bounds = array<i64: 32, 96>}, {transform_indices = @transform_2, window_bounds = array<i64: 1, 96>}, {transform_indices = @transform_3, window_bounds = array<i64: 12, 96>}]} {
    %c0_i32 = arith.constant 0 : i32
    %0 = arith.cmpi eq, %arg2, %c0_i32 : i32
    %1 = arith.extui %0 : i1 to i32
    %c0_i32_0 = arith.constant 0 : i32
    %2 = arith.cmpi ne, %1, %c0_i32_0 : i32
    scf.if %2 {
      %cst_10 = arith.constant 0.000000e+00 : f32
      %13 = vector.broadcast %cst_10 : f32 to vector<12x96xf32>
      %c0_11 = arith.constant 0 : index
      %c0_12 = arith.constant 0 : index
      %14 = vector.load %arg7[%c0_11, %c0_12] : memref<12x96xf32, #tpu.memory_space<vmem>>, vector<12x96xf32>
      tpu.vector_store %arg7[%c0_11, %c0_12], %13 {strides = array<i32>} : memref<12x96xf32, #tpu.memory_space<vmem>>, vector<12x96xf32>,
    } else {
    }
    %c0 = arith.constant 0 : index
    %c0_1 = arith.constant 0 : index
    %3 = vector.load %arg7[%c0, %c0_1] : memref<12x96xf32, #tpu.memory_space<vmem>>, vector<12x96xf32>
    %c0_2 = arith.constant 0 : index
    %c0_3 = arith.constant 0 : index
    %4 = vector.load %arg3[%c0_2, %c0_3] : memref<12x32xf32, #tpu.memory_space<vmem>>, vector<12x32xf32>
    %c0_4 = arith.constant 0 : index
    %c0_5 = arith.constant 0 : index
    %5 = vector.load %arg4[%c0_4, %c0_5] : memref<32x96xbf16, #tpu.memory_space<vmem>>, vector<32x96xbf16>
    %6 = arith.truncf %4 : vector<12x32xf32> to vector<12x32xbf16>
    %cst = arith.constant dense<0.000000e+00> : vector<12x96xf32>
    %7 = tpu.matmul %6, %5, %cst {dimension_numbers = #tpu.dot_dimension_numbers<[1], [0], [0], [1], [0, 0, 1, 1], [], []>} : vector<12x32xbf16>, vector<32x96xbf16>, vector<12x96xf32> -> vector<12x96xf32>
    %8 = arith.addf %3, %7 : vector<12x96xf32>
    %c0_6 = arith.constant 0 : index
    %c0_7 = arith.constant 0 : index
    %9 = vector.load %arg7[%c0_6, %c0_7] : memref<12x96xf32, #tpu.memory_space<vmem>>, vector<12x96xf32>
    tpu.vector_store %arg7[%c0_6, %c0_7], %8 {strides = array<i32>} : memref<12x96xf32, #tpu.memory_space<vmem>>, vector<12x96xf32>,
    %c0_i32_8 = arith.constant 0 : i32
    %10 = arith.cmpi eq, %arg2, %c0_i32_8 : i32
    %11 = arith.extui %10 : i1 to i32
    %c0_i32_9 = arith.constant 0 : i32
    %12 = arith.cmpi ne, %11, %c0_i32_9 : i32
    scf.if %12 {
      %c0_10 = arith.constant 0 : index
      %c0_11 = arith.constant 0 : index
      %13 = vector.load %arg7[%c0_10, %c0_11] : memref<12x96xf32, #tpu.memory_space<vmem>>, vector<12x96xf32>
      %c0_12 = arith.constant 0 : index
      %c0_13 = arith.constant 0 : index
      %14 = vector.load %arg5[%c0_12, %c0_13] : memref<1x96xf32, #tpu.memory_space<vmem>>, vector<1x96xf32>
      %15 = vector.broadcast %14 : vector<1x96xf32> to vector<12x96xf32>
      %16 = arith.addf %13, %15 : vector<12x96xf32>
      %c0_14 = arith.constant 0 : index
      %c0_15 = arith.constant 0 : index
      %17 = vector.load %arg6[%c0_14, %c0_15] : memref<12x96xf32, #tpu.memory_space<vmem>>, vector<12x96xf32>
      tpu.vector_store %arg6[%c0_14, %c0_15], %16 {strides = array<i32>} : memref<12x96xf32, #tpu.memory_space<vmem>>, vector<12x96xf32>,
    } else {
    }
    return
  }
  func.func @transform_0(%arg0: i32, %arg1: i32, %arg2: i32) -> (i32, i32) {
    %c0_i32 = arith.constant 0 : i32
    return %arg0, %arg2 : i32, i32
  }
  func.func @transform_1(%arg0: i32, %arg1: i32, %arg2: i32) -> (i32, i32) {
    %c0_i32 = arith.constant 0 : i32
    return %arg2, %arg1 : i32, i32
  }
  func.func @transform_2(%arg0: i32, %arg1: i32, %arg2: i32) -> (i32, i32) {
    %c0_i32 = arith.constant 0 : i32
    %c0_i32_0 = arith.constant 0 : i32
    return %c0_i32, %arg1 : i32, i32
  }
  func.func @transform_3(%arg0: i32, %arg1: i32, %arg2: i32) -> (i32, i32) {
    %c0_i32 = arith.constant 0 : i32
    return %arg0, %arg1 : i32, i32
  }
}

module attributes {stable_mosaic.version = 11 : i64} {
  func.func @_mha_kernel(%arg0: i32, %arg1: memref<1x4x6x8xf32, #tpu.memory_space<vmem>>, %arg2: memref<1x4x6x8xf32, #tpu.memory_space<vmem>>, %arg3: memref<1x4x6x8xf32, #tpu.memory_space<vmem>>, %arg4: memref<1x1x6xf32, #tpu.memory_space<vmem>>, %arg5: memref<1x4x6x8xf32, #tpu.memory_space<vmem>>) attributes {dimension_semantics = [#tpu.dimension_semantics<parallel>], iteration_bounds = array<i64: 2>, scalar_prefetch = 0 : i64, scratch_operands = 0 : i64, tpu.core_type = #tpu.core_type<tc>, window_params = [{transform_indices = @transform_0, window_bounds = array<i64: 1, 4, 6, 8>}, {transform_indices = @transform_1, window_bounds = array<i64: 1, 4, 6, 8>}, {transform_indices = @transform_2, window_bounds = array<i64: 1, 4, 6, 8>}, {transform_indices = @transform_3, window_bounds = array<i64: 1, 1, 6>}, {transform_indices = @transform_4, window_bounds = array<i64: 1, 4, 6, 8>}]} {
    %c0 = arith.constant 0 : index
    %c0_0 = arith.constant 0 : index
    %c0_1 = arith.constant 0 : index
    %c0_2 = arith.constant 0 : index
    %0 = vector.load %arg1[%c0, %c0_0, %c0_1, %c0_2] : memref<1x4x6x8xf32, #tpu.memory_space<vmem>>, vector<1x4x6x8xf32>
    %1 = vector.shape_cast %0 : vector<1x4x6x8xf32> to vector<4x6x8xf32>
    %2 = arith.truncf %1 : vector<4x6x8xf32> to vector<4x6x8xbf16>
    %c0_3 = arith.constant 0 : index
    %c0_4 = arith.constant 0 : index
    %c0_5 = arith.constant 0 : index
    %c0_6 = arith.constant 0 : index
    %3 = vector.load %arg2[%c0_3, %c0_4, %c0_5, %c0_6] : memref<1x4x6x8xf32, #tpu.memory_space<vmem>>, vector<1x4x6x8xf32>
    %4 = vector.shape_cast %3 : vector<1x4x6x8xf32> to vector<4x6x8xf32>
    %5 = arith.truncf %4 : vector<4x6x8xf32> to vector<4x6x8xbf16>
    %c0_7 = arith.constant 0 : index
    %c0_8 = arith.constant 0 : index
    %c0_9 = arith.constant 0 : index
    %c0_10 = arith.constant 0 : index
    %6 = vector.load %arg3[%c0_7, %c0_8, %c0_9, %c0_10] : memref<1x4x6x8xf32, #tpu.memory_space<vmem>>, vector<1x4x6x8xf32>
    %7 = vector.shape_cast %6 : vector<1x4x6x8xf32> to vector<4x6x8xf32>
    %8 = arith.truncf %7 : vector<4x6x8xf32> to vector<4x6x8xbf16>
    %c0_11 = arith.constant 0 : index
    %c0_12 = arith.constant 0 : index
    %c0_13 = arith.constant 0 : index
    %9 = vector.load %arg4[%c0_11, %c0_12, %c0_13] : memref<1x1x6xf32, #tpu.memory_space<vmem>>, vector<1x1x6xf32>
    %10 = vector.shape_cast %9 : vector<1x1x6xf32> to vector<1x6xf32>
    %cst = arith.constant dense<0.000000e+00> : vector<4x6x6xf32>
    %11 = tpu.matmul %2, %5, %cst {dimension_numbers = #tpu.dot_dimension_numbers<[2], [2], [1], [1], [0, 0, 0, 1, 1, 1], [0], [0]>} : vector<4x6x8xbf16>, vector<4x6x8xbf16>, vector<4x6x6xf32> -> vector<4x6x6xf32>
    %cst_14 = arith.constant 0.353553385 : f32
    %12 = vector.broadcast %cst_14 : f32 to vector<4x6x6xf32>
    %13 = arith.mulf %11, %12 : vector<4x6x6xf32>
    %14 = vector.shape_cast %10 : vector<1x6xf32> to vector<1x1x6xf32>
    %cst_15 = arith.constant 0.000000e+00 : f32
    %15 = vector.broadcast %cst_15 : f32 to vector<1x1x6xf32>
    %16 = arith.cmpf ogt, %14, %15 : vector<1x1x6xf32>
    %cst_16 = arith.constant -1.000000e+09 : f32
    %17 = vector.shape_cast %16 : vector<1x1x6xi1> to vector<1x1x6xi1>
    %18 = vector.broadcast %17 : vector<1x1x6xi1> to vector<4x6x6xi1>
    %19 = vector.broadcast %cst_16 : f32 to vector<4x6x6xf32>
    %20 = arith.select %18, %13, %19 : vector<4x6x6xi1>, vector<4x6x6xf32>
    %cst_17 = arith.constant dense<0xFF800000> : vector<4x6xf32>
    %21 = vector.multi_reduction <maximumf>, %20, %cst_17 [2] : vector<4x6x6xf32> to vector<4x6xf32>
    %22 = vector.shape_cast %21 : vector<4x6xf32> to vector<4x6x1xf32>
    %23 = vector.broadcast %22 : vector<4x6x1xf32> to vector<4x6x6xf32>
    %24 = arith.subf %20, %23 : vector<4x6x6xf32>
    %25 = math.exp %24 : vector<4x6x6xf32>
    %cst_18 = arith.constant dense<0.000000e+00> : vector<4x6xf32>
    %26 = vector.multi_reduction <add>, %25, %cst_18 [2] : vector<4x6x6xf32> to vector<4x6xf32>
    %27 = vector.shape_cast %26 : vector<4x6xf32> to vector<4x6x1xf32>
    %28 = tpu.reciprocal %27 {approx = true} : vector<4x6x1xf32> -> vector<4x6x1xf32>
    %29 = vector.broadcast %28 : vector<4x6x1xf32> to vector<4x6x6xf32>
    %30 = arith.mulf %25, %29 : vector<4x6x6xf32>
    %31 = arith.truncf %30 : vector<4x6x6xf32> to vector<4x6x6xbf16>
    %cst_19 = arith.constant dense<0.000000e+00> : vector<4x6x8xf32>
    %32 = tpu.matmul %31, %8, %cst_19 {dimension_numbers = #tpu.dot_dimension_numbers<[2], [1], [1], [2], [0, 0, 0, 1, 1, 2], [0], [0]>} : vector<4x6x6xbf16>, vector<4x6x8xbf16>, vector<4x6x8xf32> -> vector<4x6x8xf32>
    %c0_20 = arith.constant 0 : index
    %c0_21 = arith.constant 0 : index
    %c0_22 = arith.constant 0 : index
    %c0_23 = arith.constant 0 : index
    %33 = vector.load %arg5[%c0_20, %c0_21, %c0_22, %c0_23] : memref<1x4x6x8xf32, #tpu.memory_space<vmem>>, vector<1x4x6x8xf32>
    %34 = vector.shape_cast %33 : vector<1x4x6x8xf32> to vector<4x6x8xf32>
    %35 = vector.shape_cast %32 : vector<4x6x8xf32> to vector<1x4x6x8xf32>
    tpu.vector_store %arg5[%c0_20, %c0_21, %c0_22, %c0_23], %35 {strides = array<i32>} : memref<1x4x6x8xf32, #tpu.memory_space<vmem>>, vector<1x4x6x8xf32>,
    return
  }
  func.func @transform_0(%arg0: i32) -> (i32, i32, i32, i32) {
    %c0_i32 = arith.constant 0 : i32
    %c0_i32_0 = arith.constant 0 : i32
    %c0_i32_1 = arith.constant 0 : i32
    %c0_i32_2 = arith.constant 0 : i32
    return %arg0, %c0_i32, %c0_i32_0, %c0_i32_1 : i32, i32, i32, i32
  }
  func.func @transform_1(%arg0: i32) -> (i32, i32, i32, i32) {
    %c0_i32 = arith.constant 0 : i32
    %c0_i32_0 = arith.constant 0 : i32
    %c0_i32_1 = arith.constant 0 : i32
    %c0_i32_2 = arith.constant 0 : i32
    return %arg0, %c0_i32, %c0_i32_0, %c0_i32_1 : i32, i32, i32, i32
  }
  func.func @transform_2(%arg0: i32) -> (i32, i32, i32, i32) {
    %c0_i32 = arith.constant 0 : i32
    %c0_i32_0 = arith.constant 0 : i32
    %c0_i32_1 = arith.constant 0 : i32
    %c0_i32_2 = arith.constant 0 : i32
    return %arg0, %c0_i32, %c0_i32_0, %c0_i32_1 : i32, i32, i32, i32
  }
  func.func @transform_3(%arg0: i32) -> (i32, i32, i32) {
    %c0_i32 = arith.constant 0 : i32
    %c0_i32_0 = arith.constant 0 : i32
    %c0_i32_1 = arith.constant 0 : i32
    return %arg0, %c0_i32, %c0_i32_0 : i32, i32, i32
  }
  func.func @transform_4(%arg0: i32) -> (i32, i32, i32, i32) {
    %c0_i32 = arith.constant 0 : i32
    %c0_i32_0 = arith.constant 0 : i32
    %c0_i32_1 = arith.constant 0 : i32
    %c0_i32_2 = arith.constant 0 : i32
    return %arg0, %c0_i32, %c0_i32_0, %c0_i32_1 : i32, i32, i32, i32
  }
}

module attributes {stable_mosaic.version = 11 : i64} {
  func.func @_ffn_ln_kernel(%arg0: i32, %arg1: memref<1x6x32xf32, #tpu.memory_space<vmem>>, %arg2: memref<32x128xbf16, #tpu.memory_space<vmem>>, %arg3: memref<1x128xf32, #tpu.memory_space<vmem>>, %arg4: memref<128x32xbf16, #tpu.memory_space<vmem>>, %arg5: memref<1x32xf32, #tpu.memory_space<vmem>>, %arg6: memref<1x32xf32, #tpu.memory_space<vmem>>, %arg7: memref<1x32xf32, #tpu.memory_space<vmem>>, %arg8: memref<1x6x32xf32, #tpu.memory_space<vmem>>) attributes {dimension_semantics = [#tpu.dimension_semantics<parallel>], iteration_bounds = array<i64: 2>, scalar_prefetch = 0 : i64, scratch_operands = 0 : i64, tpu.core_type = #tpu.core_type<tc>, window_params = [{transform_indices = @transform_0, window_bounds = array<i64: 1, 6, 32>}, {pipeline_mode = #tpu.pipeline_mode<synchronous>, transform_indices = @transform_1, window_bounds = array<i64: 32, 128>}, {pipeline_mode = #tpu.pipeline_mode<synchronous>, transform_indices = @transform_2, window_bounds = array<i64: 1, 128>}, {pipeline_mode = #tpu.pipeline_mode<synchronous>, transform_indices = @transform_3, window_bounds = array<i64: 128, 32>}, {pipeline_mode = #tpu.pipeline_mode<synchronous>, transform_indices = @transform_4, window_bounds = array<i64: 1, 32>}, {pipeline_mode = #tpu.pipeline_mode<synchronous>, transform_indices = @transform_5, window_bounds = array<i64: 1, 32>}, {pipeline_mode = #tpu.pipeline_mode<synchronous>, transform_indices = @transform_6, window_bounds = array<i64: 1, 32>}, {transform_indices = @transform_7, window_bounds = array<i64: 1, 6, 32>}]} {
    %c0 = arith.constant 0 : index
    %c0_0 = arith.constant 0 : index
    %c0_1 = arith.constant 0 : index
    %0 = vector.load %arg1[%c0, %c0_0, %c0_1] : memref<1x6x32xf32, #tpu.memory_space<vmem>>, vector<1x6x32xf32>
    %1 = vector.shape_cast %0 : vector<1x6x32xf32> to vector<6x32xf32>
    %c0_2 = arith.constant 0 : index
    %c0_3 = arith.constant 0 : index
    %2 = vector.load %arg2[%c0_2, %c0_3] : memref<32x128xbf16, #tpu.memory_space<vmem>>, vector<32x128xbf16>
    %3 = arith.truncf %1 : vector<6x32xf32> to vector<6x32xbf16>
    %cst = arith.constant dense<0.000000e+00> : vector<6x128xf32>
    %4 = tpu.matmul %3, %2, %cst {dimension_numbers = #tpu.dot_dimension_numbers<[1], [0], [0], [1], [0, 0, 1, 1], [], []>} : vector<6x32xbf16>, vector<32x128xbf16>, vector<6x128xf32> -> vector<6x128xf32>
    %c0_4 = arith.constant 0 : index
    %c0_5 = arith.constant 0 : index
    %5 = vector.load %arg3[%c0_4, %c0_5] : memref<1x128xf32, #tpu.memory_space<vmem>>, vector<1x128xf32>
    %6 = vector.broadcast %5 : vector<1x128xf32> to vector<6x128xf32>
    %7 = arith.addf %4, %6 : vector<6x128xf32>
    %cst_6 = arith.constant 0.000000e+00 : f32
    %8 = vector.broadcast %cst_6 : f32 to vector<6x128xf32>
    %9 = arith.maximumf %7, %8 : vector<6x128xf32>
    %c0_7 = arith.constant 0 : index
    %c0_8 = arith.constant 0 : index
    %10 = vector.load %arg4[%c0_7, %c0_8] : memref<128x32xbf16, #tpu.memory_space<vmem>>, vector<128x32xbf16>
    %11 = arith.truncf %9 : vector<6x128xf32> to vector<6x128xbf16>
    %cst_9 = arith.constant dense<0.000000e+00> : vector<6x32xf32>
    %12 = tpu.matmul %11, %10, %cst_9 {dimension_numbers = #tpu.dot_dimension_numbers<[1], [0], [0], [1], [0, 0, 1, 1], [], []>} : vector<6x128xbf16>, vector<128x32xbf16>, vector<6x32xf32> -> vector<6x32xf32>
    %c0_10 = arith.constant 0 : index
    %c0_11 = arith.constant 0 : index
    %13 = vector.load %arg5[%c0_10, %c0_11] : memref<1x32xf32, #tpu.memory_space<vmem>>, vector<1x32xf32>
    %14 = vector.broadcast %13 : vector<1x32xf32> to vector<6x32xf32>
    %15 = arith.addf %12, %14 : vector<6x32xf32>
    %16 = arith.addf %1, %15 : vector<6x32xf32>
    %c0_12 = arith.constant 0 : index
    %c0_13 = arith.constant 0 : index
    %17 = vector.load %arg6[%c0_12, %c0_13] : memref<1x32xf32, #tpu.memory_space<vmem>>, vector<1x32xf32>
    %c0_14 = arith.constant 0 : index
    %c0_15 = arith.constant 0 : index
    %18 = vector.load %arg7[%c0_14, %c0_15] : memref<1x32xf32, #tpu.memory_space<vmem>>, vector<1x32xf32>
    %cst_16 = arith.constant dense<0.000000e+00> : vector<6xf32>
    %19 = vector.multi_reduction <add>, %16, %cst_16 [1] : vector<6x32xf32> to vector<6xf32>
    %20 = vector.shape_cast %19 : vector<6xf32> to vector<6x1xf32>
    %cst_17 = arith.constant 3.200000e+01 : f32
    %21 = vector.broadcast %cst_17 : f32 to vector<6x1xf32>
    %22 = arith.divf %20, %21 : vector<6x1xf32>
    %23 = vector.broadcast %22 : vector<6x1xf32> to vector<6x32xf32>
    %24 = arith.subf %16, %23 : vector<6x32xf32>
    %25 = arith.mulf %24, %24 : vector<6x32xf32>
    %cst_18 = arith.constant dense<0.000000e+00> : vector<6xf32>
    %26 = vector.multi_reduction <add>, %25, %cst_18 [1] : vector<6x32xf32> to vector<6xf32>
    %27 = vector.shape_cast %26 : vector<6xf32> to vector<6x1xf32>
    %cst_19 = arith.constant 3.200000e+01 : f32
    %28 = vector.broadcast %cst_19 : f32 to vector<6x1xf32>
    %29 = arith.divf %27, %28 : vector<6x1xf32>
    %30 = vector.broadcast %22 : vector<6x1xf32> to vector<6x32xf32>
    %31 = arith.subf %16, %30 : vector<6x32xf32>
    %cst_20 = arith.constant 9.99999974E-6 : f32
    %32 = vector.broadcast %cst_20 : f32 to vector<6x1xf32>
    %33 = arith.addf %29, %32 : vector<6x1xf32>
    %34 = math.rsqrt %33 : vector<6x1xf32>
    %35 = vector.broadcast %34 : vector<6x1xf32> to vector<6x32xf32>
    %36 = arith.mulf %31, %35 : vector<6x32xf32>
    %37 = vector.broadcast %17 : vector<1x32xf32> to vector<6x32xf32>
    %38 = arith.mulf %36, %37 : vector<6x32xf32>
    %39 = vector.broadcast %18 : vector<1x32xf32> to vector<6x32xf32>
    %40 = arith.addf %38, %39 : vector<6x32xf32>
    %c0_21 = arith.constant 0 : index
    %c0_22 = arith.constant 0 : index
    %c0_23 = arith.constant 0 : index
    %41 = vector.load %arg8[%c0_21, %c0_22, %c0_23] : memref<1x6x32xf32, #tpu.memory_space<vmem>>, vector<1x6x32xf32>
    %42 = vector.shape_cast %41 : vector<1x6x32xf32> to vector<6x32xf32>
    %43 = vector.shape_cast %40 : vector<6x32xf32> to vector<1x6x32xf32>
    tpu.vector_store %arg8[%c0_21, %c0_22, %c0_23], %43 {strides = array<i32>} : memref<1x6x32xf32, #tpu.memory_space<vmem>>, vector<1x6x32xf32>,
    return
  }
  func.func @transform_0(%arg0: i32) -> (i32, i32, i32) {
    %c0_i32 = arith.constant 0 : i32
    %c0_i32_0 = arith.constant 0 : i32
    %c0_i32_1 = arith.constant 0 : i32
    return %arg0, %c0_i32, %c0_i32_0 : i32, i32, i32
  }
  func.func @transform_1(%arg0: i32) -> (i32, i32) {
    %c0_i32 = arith.constant 0 : i32
    %c0_i32_0 = arith.constant 0 : i32
    %c0_i32_1 = arith.constant 0 : i32
    return %c0_i32, %c0_i32_0 : i32, i32
  }
  func.func @transform_2(%arg0: i32) -> (i32, i32) {
    %c0_i32 = arith.constant 0 : i32
    %c0_i32_0 = arith.constant 0 : i32
    %c0_i32_1 = arith.constant 0 : i32
    return %c0_i32, %c0_i32_0 : i32, i32
  }
  func.func @transform_3(%arg0: i32) -> (i32, i32) {
    %c0_i32 = arith.constant 0 : i32
    %c0_i32_0 = arith.constant 0 : i32
    %c0_i32_1 = arith.constant 0 : i32
    return %c0_i32, %c0_i32_0 : i32, i32
  }
  func.func @transform_4(%arg0: i32) -> (i32, i32) {
    %c0_i32 = arith.constant 0 : i32
    %c0_i32_0 = arith.constant 0 : i32
    %c0_i32_1 = arith.constant 0 : i32
    return %c0_i32, %c0_i32_0 : i32, i32
  }
  func.func @transform_5(%arg0: i32) -> (i32, i32) {
    %c0_i32 = arith.constant 0 : i32
    %c0_i32_0 = arith.constant 0 : i32
    %c0_i32_1 = arith.constant 0 : i32
    return %c0_i32, %c0_i32_0 : i32, i32
  }
  func.func @transform_6(%arg0: i32) -> (i32, i32) {
    %c0_i32 = arith.constant 0 : i32
    %c0_i32_0 = arith.constant 0 : i32
    %c0_i32_1 = arith.constant 0 : i32
    return %c0_i32, %c0_i32_0 : i32, i32
  }
  func.func @transform_7(%arg0: i32) -> (i32, i32, i32) {
    %c0_i32 = arith.constant 0 : i32
    %c0_i32_0 = arith.constant 0 : i32
    %c0_i32_1 = arith.constant 0 : i32
    return %arg0, %c0_i32, %c0_i32_0 : i32, i32, i32
  }
}

module attributes {stable_mosaic.version = 11 : i64} {
  func.func @_mm_add_ln_kernel(%arg0: i32, %arg1: memref<1x6x32xf32, #tpu.memory_space<vmem>>, %arg2: memref<32x32xbf16, #tpu.memory_space<vmem>>, %arg3: memref<1x32xf32, #tpu.memory_space<vmem>>, %arg4: memref<1x6x32xf32, #tpu.memory_space<vmem>>, %arg5: memref<1x32xf32, #tpu.memory_space<vmem>>, %arg6: memref<1x32xf32, #tpu.memory_space<vmem>>, %arg7: memref<1x6x32xf32, #tpu.memory_space<vmem>>) attributes {dimension_semantics = [#tpu.dimension_semantics<parallel>], iteration_bounds = array<i64: 2>, scalar_prefetch = 0 : i64, scratch_operands = 0 : i64, tpu.core_type = #tpu.core_type<tc>, window_params = [{transform_indices = @transform_0, window_bounds = array<i64: 1, 6, 32>}, {pipeline_mode = #tpu.pipeline_mode<synchronous>, transform_indices = @transform_1, window_bounds = array<i64: 32, 32>}, {pipeline_mode = #tpu.pipeline_mode<synchronous>, transform_indices = @transform_2, window_bounds = array<i64: 1, 32>}, {transform_indices = @transform_3, window_bounds = array<i64: 1, 6, 32>}, {pipeline_mode = #tpu.pipeline_mode<synchronous>, transform_indices = @transform_4, window_bounds = array<i64: 1, 32>}, {pipeline_mode = #tpu.pipeline_mode<synchronous>, transform_indices = @transform_5, window_bounds = array<i64: 1, 32>}, {transform_indices = @transform_6, window_bounds = array<i64: 1, 6, 32>}]} {
    %c0 = arith.constant 0 : index
    %c0_0 = arith.constant 0 : index
    %c0_1 = arith.constant 0 : index
    %0 = vector.load %arg1[%c0, %c0_0, %c0_1] : memref<1x6x32xf32, #tpu.memory_space<vmem>>, vector<1x6x32xf32>
    %1 = vector.shape_cast %0 : vector<1x6x32xf32> to vector<6x32xf32>
    %c0_2 = arith.constant 0 : index
    %c0_3 = arith.constant 0 : index
    %2 = vector.load %arg2[%c0_2, %c0_3] : memref<32x32xbf16, #tpu.memory_space<vmem>>, vector<32x32xbf16>
    %3 = arith.truncf %1 : vector<6x32xf32> to vector<6x32xbf16>
    %cst = arith.constant dense<0.000000e+00> : vector<6x32xf32>
    %4 = tpu.matmul %3, %2, %cst {dimension_numbers = #tpu.dot_dimension_numbers<[1], [0], [0], [1], [0, 0, 1, 1], [], []>} : vector<6x32xbf16>, vector<32x32xbf16>, vector<6x32xf32> -> vector<6x32xf32>
    %c0_4 = arith.constant 0 : index
    %c0_5 = arith.constant 0 : index
    %5 = vector.load %arg3[%c0_4, %c0_5] : memref<1x32xf32, #tpu.memory_space<vmem>>, vector<1x32xf32>
    %6 = vector.broadcast %5 : vector<1x32xf32> to vector<6x32xf32>
    %7 = arith.addf %4, %6 : vector<6x32xf32>
    %c0_6 = arith.constant 0 : index
    %c0_7 = arith.constant 0 : index
    %c0_8 = arith.constant 0 : index
    %8 = vector.load %arg4[%c0_6, %c0_7, %c0_8] : memref<1x6x32xf32, #tpu.memory_space<vmem>>, vector<1x6x32xf32>
    %9 = vector.shape_cast %8 : vector<1x6x32xf32> to vector<6x32xf32>
    %10 = arith.addf %9, %7 : vector<6x32xf32>
    %c0_9 = arith.constant 0 : index
    %c0_10 = arith.constant 0 : index
    %11 = vector.load %arg5[%c0_9, %c0_10] : memref<1x32xf32, #tpu.memory_space<vmem>>, vector<1x32xf32>
    %c0_11 = arith.constant 0 : index
    %c0_12 = arith.constant 0 : index
    %12 = vector.load %arg6[%c0_11, %c0_12] : memref<1x32xf32, #tpu.memory_space<vmem>>, vector<1x32xf32>
    %cst_13 = arith.constant dense<0.000000e+00> : vector<6xf32>
    %13 = vector.multi_reduction <add>, %10, %cst_13 [1] : vector<6x32xf32> to vector<6xf32>
    %14 = vector.shape_cast %13 : vector<6xf32> to vector<6x1xf32>
    %cst_14 = arith.constant 3.200000e+01 : f32
    %15 = vector.broadcast %cst_14 : f32 to vector<6x1xf32>
    %16 = arith.divf %14, %15 : vector<6x1xf32>
    %17 = vector.broadcast %16 : vector<6x1xf32> to vector<6x32xf32>
    %18 = arith.subf %10, %17 : vector<6x32xf32>
    %19 = arith.mulf %18, %18 : vector<6x32xf32>
    %cst_15 = arith.constant dense<0.000000e+00> : vector<6xf32>
    %20 = vector.multi_reduction <add>, %19, %cst_15 [1] : vector<6x32xf32> to vector<6xf32>
    %21 = vector.shape_cast %20 : vector<6xf32> to vector<6x1xf32>
    %cst_16 = arith.constant 3.200000e+01 : f32
    %22 = vector.broadcast %cst_16 : f32 to vector<6x1xf32>
    %23 = arith.divf %21, %22 : vector<6x1xf32>
    %24 = vector.broadcast %16 : vector<6x1xf32> to vector<6x32xf32>
    %25 = arith.subf %10, %24 : vector<6x32xf32>
    %cst_17 = arith.constant 9.99999974E-6 : f32
    %26 = vector.broadcast %cst_17 : f32 to vector<6x1xf32>
    %27 = arith.addf %23, %26 : vector<6x1xf32>
    %28 = math.rsqrt %27 : vector<6x1xf32>
    %29 = vector.broadcast %28 : vector<6x1xf32> to vector<6x32xf32>
    %30 = arith.mulf %25, %29 : vector<6x32xf32>
    %31 = vector.broadcast %11 : vector<1x32xf32> to vector<6x32xf32>
    %32 = arith.mulf %30, %31 : vector<6x32xf32>
    %33 = vector.broadcast %12 : vector<1x32xf32> to vector<6x32xf32>
    %34 = arith.addf %32, %33 : vector<6x32xf32>
    %c0_18 = arith.constant 0 : index
    %c0_19 = arith.constant 0 : index
    %c0_20 = arith.constant 0 : index
    %35 = vector.load %arg7[%c0_18, %c0_19, %c0_20] : memref<1x6x32xf32, #tpu.memory_space<vmem>>, vector<1x6x32xf32>
    %36 = vector.shape_cast %35 : vector<1x6x32xf32> to vector<6x32xf32>
    %37 = vector.shape_cast %34 : vector<6x32xf32> to vector<1x6x32xf32>
    tpu.vector_store %arg7[%c0_18, %c0_19, %c0_20], %37 {strides = array<i32>} : memref<1x6x32xf32, #tpu.memory_space<vmem>>, vector<1x6x32xf32>,
    return
  }
  func.func @transform_0(%arg0: i32) -> (i32, i32, i32) {
    %c0_i32 = arith.constant 0 : i32
    %c0_i32_0 = arith.constant 0 : i32
    %c0_i32_1 = arith.constant 0 : i32
    return %arg0, %c0_i32, %c0_i32_0 : i32, i32, i32
  }
  func.func @transform_1(%arg0: i32) -> (i32, i32) {
    %c0_i32 = arith.constant 0 : i32
    %c0_i32_0 = arith.constant 0 : i32
    %c0_i32_1 = arith.constant 0 : i32
    return %c0_i32, %c0_i32_0 : i32, i32
  }
  func.func @transform_2(%arg0: i32) -> (i32, i32) {
    %c0_i32 = arith.constant 0 : i32
    %c0_i32_0 = arith.constant 0 : i32
    %c0_i32_1 = arith.constant 0 : i32
    return %c0_i32, %c0_i32_0 : i32, i32
  }
  func.func @transform_3(%arg0: i32) -> (i32, i32, i32) {
    %c0_i32 = arith.constant 0 : i32
    %c0_i32_0 = arith.constant 0 : i32
    %c0_i32_1 = arith.constant 0 : i32
    return %arg0, %c0_i32, %c0_i32_0 : i32, i32, i32
  }
  func.func @transform_4(%arg0: i32) -> (i32, i32) {
    %c0_i32 = arith.constant 0 : i32
    %c0_i32_0 = arith.constant 0 : i32
    %c0_i32_1 = arith.constant 0 : i32
    return %c0_i32, %c0_i32_0 : i32, i32
  }
  func.func @transform_5(%arg0: i32) -> (i32, i32) {
    %c0_i32 = arith.constant 0 : i32
    %c0_i32_0 = arith.constant 0 : i32
    %c0_i32_1 = arith.constant 0 : i32
    return %c0_i32, %c0_i32_0 : i32, i32
  }
  func.func @transform_6(%arg0: i32) -> (i32, i32, i32) {
    %c0_i32 = arith.constant 0 : i32
    %c0_i32_0 = arith.constant 0 : i32
    %c0_i32_1 = arith.constant 0 : i32
    return %arg0, %c0_i32, %c0_i32_0 : i32, i32, i32
  }
}

module attributes {stable_mosaic.version = 11 : i64} {
  func.func @_decomp_kernel(%arg0: i32, %arg1: memref<1x16x4xf32, #tpu.memory_space<vmem>>, %arg2: memref<1x16x4xf32, #tpu.memory_space<vmem>>, %arg3: memref<1x16x4xf32, #tpu.memory_space<vmem>>) attributes {dimension_semantics = [#tpu.dimension_semantics<parallel>], iteration_bounds = array<i64: 2>, scalar_prefetch = 0 : i64, scratch_operands = 0 : i64, tpu.core_type = #tpu.core_type<tc>, window_params = [{transform_indices = @transform_0, window_bounds = array<i64: 1, 16, 4>}, {transform_indices = @transform_1, window_bounds = array<i64: 1, 16, 4>}, {transform_indices = @transform_2, window_bounds = array<i64: 1, 16, 4>}]} {
    %c0 = arith.constant 0 : index
    %c0_0 = arith.constant 0 : index
    %c0_1 = arith.constant 0 : index
    %0 = vector.load %arg1[%c0, %c0_0, %c0_1] : memref<1x16x4xf32, #tpu.memory_space<vmem>>, vector<1x16x4xf32>
    %1 = vector.shape_cast %0 : vector<1x16x4xf32> to vector<16x4xf32>
    %2 = tpu.iota {dimensions = array<i32: 0>} : vector<16x16xi32>
    %3 = tpu.iota {dimensions = array<i32: 1>} : vector<16x16xi32>
    %cst = arith.constant 0.000000e+00 : f32
    %4 = vector.broadcast %cst : f32 to vector<16x16xf32>
    %c-2_i32 = arith.constant -2 : i32
    %5 = vector.broadcast %c-2_i32 : i32 to vector<16x16xi32>
    %6 = arith.addi %2, %5 : vector<16x16xi32>
    %c0_i32 = arith.constant 0 : i32
    %c15_i32 = arith.constant 15 : i32
    %7 = vector.broadcast %c0_i32 : i32 to vector<16x16xi32>
    %8 = arith.maxsi %7, %6 : vector<16x16xi32>
    %9 = vector.broadcast %c15_i32 : i32 to vector<16x16xi32>
    %10 = arith.minsi %9, %8 : vector<16x16xi32>
    %11 = arith.cmpi eq, %3, %10 : vector<16x16xi32>
    %cst_2 = arith.constant 1.000000e+00 : f32
    %cst_3 = arith.constant 0.000000e+00 : f32
    %12 = vector.broadcast %cst_2 : f32 to vector<16x16xf32>
    %13 = vector.broadcast %cst_3 : f32 to vector<16x16xf32>
    %14 = arith.select %11, %12, %13 : vector<16x16xi1>, vector<16x16xf32>
    %15 = arith.addf %4, %14 : vector<16x16xf32>
    %c-1_i32 = arith.constant -1 : i32
    %16 = vector.broadcast %c-1_i32 : i32 to vector<16x16xi32>
    %17 = arith.addi %2, %16 : vector<16x16xi32>
    %c0_i32_4 = arith.constant 0 : i32
    %c15_i32_5 = arith.constant 15 : i32
    %18 = vector.broadcast %c0_i32_4 : i32 to vector<16x16xi32>
    %19 = arith.maxsi %18, %17 : vector<16x16xi32>
    %20 = vector.broadcast %c15_i32_5 : i32 to vector<16x16xi32>
    %21 = arith.minsi %20, %19 : vector<16x16xi32>
    %22 = arith.cmpi eq, %3, %21 : vector<16x16xi32>
    %cst_6 = arith.constant 1.000000e+00 : f32
    %cst_7 = arith.constant 0.000000e+00 : f32
    %23 = vector.broadcast %cst_6 : f32 to vector<16x16xf32>
    %24 = vector.broadcast %cst_7 : f32 to vector<16x16xf32>
    %25 = arith.select %22, %23, %24 : vector<16x16xi1>, vector<16x16xf32>
    %26 = arith.addf %15, %25 : vector<16x16xf32>
    %c0_i32_8 = arith.constant 0 : i32
    %27 = vector.broadcast %c0_i32_8 : i32 to vector<16x16xi32>
    %28 = arith.addi %2, %27 : vector<16x16xi32>
    %c0_i32_9 = arith.constant 0 : i32
    %c15_i32_10 = arith.constant 15 : i32
    %29 = vector.broadcast %c0_i32_9 : i32 to vector<16x16xi32>
    %30 = arith.maxsi %29, %28 : vector<16x16xi32>
    %31 = vector.broadcast %c15_i32_10 : i32 to vector<16x16xi32>
    %32 = arith.minsi %31, %30 : vector<16x16xi32>
    %33 = arith.cmpi eq, %3, %32 : vector<16x16xi32>
    %cst_11 = arith.constant 1.000000e+00 : f32
    %cst_12 = arith.constant 0.000000e+00 : f32
    %34 = vector.broadcast %cst_11 : f32 to vector<16x16xf32>
    %35 = vector.broadcast %cst_12 : f32 to vector<16x16xf32>
    %36 = arith.select %33, %34, %35 : vector<16x16xi1>, vector<16x16xf32>
    %37 = arith.addf %26, %36 : vector<16x16xf32>
    %c1_i32 = arith.constant 1 : i32
    %38 = vector.broadcast %c1_i32 : i32 to vector<16x16xi32>
    %39 = arith.addi %2, %38 : vector<16x16xi32>
    %c0_i32_13 = arith.constant 0 : i32
    %c15_i32_14 = arith.constant 15 : i32
    %40 = vector.broadcast %c0_i32_13 : i32 to vector<16x16xi32>
    %41 = arith.maxsi %40, %39 : vector<16x16xi32>
    %42 = vector.broadcast %c15_i32_14 : i32 to vector<16x16xi32>
    %43 = arith.minsi %42, %41 : vector<16x16xi32>
    %44 = arith.cmpi eq, %3, %43 : vector<16x16xi32>
    %cst_15 = arith.constant 1.000000e+00 : f32
    %cst_16 = arith.constant 0.000000e+00 : f32
    %45 = vector.broadcast %cst_15 : f32 to vector<16x16xf32>
    %46 = vector.broadcast %cst_16 : f32 to vector<16x16xf32>
    %47 = arith.select %44, %45, %46 : vector<16x16xi1>, vector<16x16xf32>
    %48 = arith.addf %37, %47 : vector<16x16xf32>
    %c2_i32 = arith.constant 2 : i32
    %49 = vector.broadcast %c2_i32 : i32 to vector<16x16xi32>
    %50 = arith.addi %2, %49 : vector<16x16xi32>
    %c0_i32_17 = arith.constant 0 : i32
    %c15_i32_18 = arith.constant 15 : i32
    %51 = vector.broadcast %c0_i32_17 : i32 to vector<16x16xi32>
    %52 = arith.maxsi %51, %50 : vector<16x16xi32>
    %53 = vector.broadcast %c15_i32_18 : i32 to vector<16x16xi32>
    %54 = arith.minsi %53, %52 : vector<16x16xi32>
    %55 = arith.cmpi eq, %3, %54 : vector<16x16xi32>
    %cst_19 = arith.constant 1.000000e+00 : f32
    %cst_20 = arith.constant 0.000000e+00 : f32
    %56 = vector.broadcast %cst_19 : f32 to vector<16x16xf32>
    %57 = vector.broadcast %cst_20 : f32 to vector<16x16xf32>
    %58 = arith.select %55, %56, %57 : vector<16x16xi1>, vector<16x16xf32>
    %59 = arith.addf %48, %58 : vector<16x16xf32>
    %cst_21 = arith.constant 5.000000e+00 : f32
    %60 = vector.broadcast %cst_21 : f32 to vector<16x16xf32>
    %61 = arith.divf %59, %60 : vector<16x16xf32>
    %cst_22 = arith.constant dense<0.000000e+00> : vector<16x4xf32>
    %62 = tpu.matmul %61, %1, %cst_22 {dimension_numbers = #tpu.dot_dimension_numbers<[1], [0], [0], [1], [0, 0, 1, 1], [], []>} : vector<16x16xf32>, vector<16x4xf32>, vector<16x4xf32> -> vector<16x4xf32>
    %63 = arith.subf %1, %62 : vector<16x4xf32>
    %c0_23 = arith.constant 0 : index
    %c0_24 = arith.constant 0 : index
    %c0_25 = arith.constant 0 : index
    %64 = vector.load %arg2[%c0_23, %c0_24, %c0_25] : memref<1x16x4xf32, #tpu.memory_space<vmem>>, vector<1x16x4xf32>
    %65 = vector.shape_cast %64 : vector<1x16x4xf32> to vector<16x4xf32>
    %66 = vector.shape_cast %63 : vector<16x4xf32> to vector<1x16x4xf32>
    tpu.vector_store %arg2[%c0_23, %c0_24, %c0_25], %66 {strides = array<i32>} : memref<1x16x4xf32, #tpu.memory_space<vmem>>, vector<1x16x4xf32>,
    %c0_26 = arith.constant 0 : index
    %c0_27 = arith.constant 0 : index
    %c0_28 = arith.constant 0 : index
    %67 = vector.load %arg3[%c0_26, %c0_27, %c0_28] : memref<1x16x4xf32, #tpu.memory_space<vmem>>, vector<1x16x4xf32>
    %68 = vector.shape_cast %67 : vector<1x16x4xf32> to vector<16x4xf32>
    %69 = vector.shape_cast %62 : vector<16x4xf32> to vector<1x16x4xf32>
    tpu.vector_store %arg3[%c0_26, %c0_27, %c0_28], %69 {strides = array<i32>} : memref<1x16x4xf32, #tpu.memory_space<vmem>>, vector<1x16x4xf32>,
    return
  }
  func.func @transform_0(%arg0: i32) -> (i32, i32, i32) {
    %c0_i32 = arith.constant 0 : i32
    %c0_i32_0 = arith.constant 0 : i32
    %c0_i32_1 = arith.constant 0 : i32
    return %arg0, %c0_i32, %c0_i32_0 : i32, i32, i32
  }
  func.func @transform_1(%arg0: i32) -> (i32, i32, i32) {
    %c0_i32 = arith.constant 0 : i32
    %c0_i32_0 = arith.constant 0 : i32
    %c0_i32_1 = arith.constant 0 : i32
    return %arg0, %c0_i32, %c0_i32_0 : i32, i32, i32
  }
  func.func @transform_2(%arg0: i32) -> (i32, i32, i32) {
    %c0_i32 = arith.constant 0 : i32
    %c0_i32_0 = arith.constant 0 : i32
    %c0_i32_1 = arith.constant 0 : i32
    return %arg0, %c0_i32, %c0_i32_0 : i32, i32, i32
  }
}

module attributes {stable_mosaic.version = 11 : i64} {
  func.func @_embed_kernel(%arg0: i32, %arg1: memref<1x24x4xf32, #tpu.memory_space<vmem>>, %arg2: memref<1x24x4xf32, #tpu.memory_space<vmem>>, %arg3: memref<4x32xbf16, #tpu.memory_space<vmem>>, %arg4: memref<4x32xbf16, #tpu.memory_space<vmem>>, %arg5: memref<4x32xbf16, #tpu.memory_space<vmem>>, %arg6: memref<4x32xbf16, #tpu.memory_space<vmem>>, %arg7: memref<1x24x32xf32, #tpu.memory_space<vmem>>) attributes {dimension_semantics = [#tpu.dimension_semantics<parallel>], iteration_bounds = array<i64: 2>, scalar_prefetch = 0 : i64, scratch_operands = 0 : i64, tpu.core_type = #tpu.core_type<tc>, window_params = [{transform_indices = @transform_0, window_bounds = array<i64: 1, 24, 4>}, {transform_indices = @transform_1, window_bounds = array<i64: 1, 24, 4>}, {pipeline_mode = #tpu.pipeline_mode<synchronous>, transform_indices = @transform_2, window_bounds = array<i64: 4, 32>}, {pipeline_mode = #tpu.pipeline_mode<synchronous>, transform_indices = @transform_3, window_bounds = array<i64: 4, 32>}, {pipeline_mode = #tpu.pipeline_mode<synchronous>, transform_indices = @transform_4, window_bounds = array<i64: 4, 32>}, {pipeline_mode = #tpu.pipeline_mode<synchronous>, transform_indices = @transform_5, window_bounds = array<i64: 4, 32>}, {transform_indices = @transform_6, window_bounds = array<i64: 1, 24, 32>}]} {
    %c0 = arith.constant 0 : index
    %c0_0 = arith.constant 0 : index
    %c0_1 = arith.constant 0 : index
    %0 = vector.load %arg1[%c0, %c0_0, %c0_1] : memref<1x24x4xf32, #tpu.memory_space<vmem>>, vector<1x24x4xf32>
    %1 = vector.shape_cast %0 : vector<1x24x4xf32> to vector<24x4xf32>
    %2 = tpu.iota {dimensions = array<i32: 0>} : vector<24x24xi32>
    %3 = tpu.iota {dimensions = array<i32: 1>} : vector<24x24xi32>
    %c-1_i32 = arith.constant -1 : i32
    %4 = vector.broadcast %c-1_i32 : i32 to vector<24x24xi32>
    %5 = arith.addi %2, %4 : vector<24x24xi32>
    %c24_i32 = arith.constant 24 : i32
    %6 = vector.broadcast %c24_i32 : i32 to vector<24x24xi32>
    %7 = arith.addi %5, %6 : vector<24x24xi32>
    %c24_i32_2 = arith.constant 24 : i32
    %c0_i32 = arith.constant 0 : i32
    %8 = arith.cmpi eq, %c24_i32_2, %c0_i32 : i32
    %c1_i32 = arith.constant 1 : i32
    %9 = arith.select %8, %c1_i32, %c24_i32_2 : i32
    %10 = vector.broadcast %9 : i32 to vector<24x24xi32>
    %11 = arith.remsi %7, %10 : vector<24x24xi32>
    %c0_i32_3 = arith.constant 0 : i32
    %12 = vector.broadcast %c0_i32_3 : i32 to vector<24x24xi32>
    %13 = arith.cmpi ne, %11, %12 : vector<24x24xi32>
    %c0_i32_4 = arith.constant 0 : i32
    %14 = vector.broadcast %c0_i32_4 : i32 to vector<24x24xi32>
    %15 = arith.cmpi slt, %11, %14 : vector<24x24xi32>
    %c0_i32_5 = arith.constant 0 : i32
    %16 = arith.cmpi slt, %9, %c0_i32_5 : i32
    %17 = vector.broadcast %16 : i1 to vector<24x24xi1>
    %18 = vector.broadcast %17 : vector<24x24xi1> to vector<24x24xi1>
    %19 = arith.xori %15, %18 : vector<24x24xi1>
    %20 = arith.andi %19, %13 : vector<24x24xi1>
    %21 = vector.broadcast %9 : i32 to vector<24x24xi32>
    %22 = arith.addi %11, %21 : vector<24x24xi32>
    %23 = arith.select %20, %22, %11 : vector<24x24xi1>, vector<24x24xi32>
    %24 = arith.cmpi eq, %3, %23 : vector<24x24xi32>
    %cst = arith.constant 1.000000e+00 : f32
    %cst_6 = arith.constant 0.000000e+00 : f32
    %25 = vector.broadcast %cst : f32 to vector<24x24xf32>
    %26 = vector.broadcast %cst_6 : f32 to vector<24x24xf32>
    %27 = arith.select %24, %25, %26 : vector<24x24xi1>, vector<24x24xf32>
    %cst_7 = arith.constant dense<0.000000e+00> : vector<24x4xf32>
    %28 = tpu.matmul %27, %1, %cst_7 {dimension_numbers = #tpu.dot_dimension_numbers<[1], [0], [0], [1], [0, 0, 1, 1], [], []>} : vector<24x24xf32>, vector<24x4xf32>, vector<24x4xf32> -> vector<24x4xf32>
    %29 = tpu.iota {dimensions = array<i32: 0>} : vector<24x24xi32>
    %30 = tpu.iota {dimensions = array<i32: 1>} : vector<24x24xi32>
    %c1_i32_8 = arith.constant 1 : i32
    %31 = vector.broadcast %c1_i32_8 : i32 to vector<24x24xi32>
    %32 = arith.addi %29, %31 : vector<24x24xi32>
    %c24_i32_9 = arith.constant 24 : i32
    %33 = vector.broadcast %c24_i32_9 : i32 to vector<24x24xi32>
    %34 = arith.addi %32, %33 : vector<24x24xi32>
    %c24_i32_10 = arith.constant 24 : i32
    %c0_i32_11 = arith.constant 0 : i32
    %35 = arith.cmpi eq, %c24_i32_10, %c0_i32_11 : i32
    %c1_i32_12 = arith.constant 1 : i32
    %36 = arith.select %35, %c1_i32_12, %c24_i32_10 : i32
    %37 = vector.broadcast %36 : i32 to vector<24x24xi32>
    %38 = arith.remsi %34, %37 : vector<24x24xi32>
    %c0_i32_13 = arith.constant 0 : i32
    %39 = vector.broadcast %c0_i32_13 : i32 to vector<24x24xi32>
    %40 = arith.cmpi ne, %38, %39 : vector<24x24xi32>
    %c0_i32_14 = arith.constant 0 : i32
    %41 = vector.broadcast %c0_i32_14 : i32 to vector<24x24xi32>
    %42 = arith.cmpi slt, %38, %41 : vector<24x24xi32>
    %c0_i32_15 = arith.constant 0 : i32
    %43 = arith.cmpi slt, %36, %c0_i32_15 : i32
    %44 = vector.broadcast %43 : i1 to vector<24x24xi1>
    %45 = vector.broadcast %44 : vector<24x24xi1> to vector<24x24xi1>
    %46 = arith.xori %42, %45 : vector<24x24xi1>
    %47 = arith.andi %46, %40 : vector<24x24xi1>
    %48 = vector.broadcast %36 : i32 to vector<24x24xi32>
    %49 = arith.addi %38, %48 : vector<24x24xi32>
    %50 = arith.select %47, %49, %38 : vector<24x24xi1>, vector<24x24xi32>
    %51 = arith.cmpi eq, %30, %50 : vector<24x24xi32>
    %cst_16 = arith.constant 1.000000e+00 : f32
    %cst_17 = arith.constant 0.000000e+00 : f32
    %52 = vector.broadcast %cst_16 : f32 to vector<24x24xf32>
    %53 = vector.broadcast %cst_17 : f32 to vector<24x24xf32>
    %54 = arith.select %51, %52, %53 : vector<24x24xi1>, vector<24x24xf32>
    %cst_18 = arith.constant dense<0.000000e+00> : vector<24x4xf32>
    %55 = tpu.matmul %54, %1, %cst_18 {dimension_numbers = #tpu.dot_dimension_numbers<[1], [0], [0], [1], [0, 0, 1, 1], [], []>} : vector<24x24xf32>, vector<24x4xf32>, vector<24x4xf32> -> vector<24x4xf32>
    %c0_19 = arith.constant 0 : index
    %c0_20 = arith.constant 0 : index
    %56 = vector.load %arg3[%c0_19, %c0_20] : memref<4x32xbf16, #tpu.memory_space<vmem>>, vector<4x32xbf16>
    %57 = arith.truncf %28 : vector<24x4xf32> to vector<24x4xbf16>
    %cst_21 = arith.constant dense<0.000000e+00> : vector<24x32xf32>
    %58 = tpu.matmul %57, %56, %cst_21 {dimension_numbers = #tpu.dot_dimension_numbers<[1], [0], [0], [1], [0, 0, 1, 1], [], []>} : vector<24x4xbf16>, vector<4x32xbf16>, vector<24x32xf32> -> vector<24x32xf32>
    %c0_22 = arith.constant 0 : index
    %c0_23 = arith.constant 0 : index
    %59 = vector.load %arg4[%c0_22, %c0_23] : memref<4x32xbf16, #tpu.memory_space<vmem>>, vector<4x32xbf16>
    %60 = arith.truncf %1 : vector<24x4xf32> to vector<24x4xbf16>
    %cst_24 = arith.constant dense<0.000000e+00> : vector<24x32xf32>
    %61 = tpu.matmul %60, %59, %cst_24 {dimension_numbers = #tpu.dot_dimension_numbers<[1], [0], [0], [1], [0, 0, 1, 1], [], []>} : vector<24x4xbf16>, vector<4x32xbf16>, vector<24x32xf32> -> vector<24x32xf32>
    %62 = arith.addf %58, %61 : vector<24x32xf32>
    %c0_25 = arith.constant 0 : index
    %c0_26 = arith.constant 0 : index
    %63 = vector.load %arg5[%c0_25, %c0_26] : memref<4x32xbf16, #tpu.memory_space<vmem>>, vector<4x32xbf16>
    %64 = arith.truncf %55 : vector<24x4xf32> to vector<24x4xbf16>
    %cst_27 = arith.constant dense<0.000000e+00> : vector<24x32xf32>
    %65 = tpu.matmul %64, %63, %cst_27 {dimension_numbers = #tpu.dot_dimension_numbers<[1], [0], [0], [1], [0, 0, 1, 1], [], []>} : vector<24x4xbf16>, vector<4x32xbf16>, vector<24x32xf32> -> vector<24x32xf32>
    %66 = arith.addf %62, %65 : vector<24x32xf32>
    %c0_28 = arith.constant 0 : index
    %c0_29 = arith.constant 0 : index
    %c0_30 = arith.constant 0 : index
    %67 = vector.load %arg2[%c0_28, %c0_29, %c0_30] : memref<1x24x4xf32, #tpu.memory_space<vmem>>, vector<1x24x4xf32>
    %68 = vector.shape_cast %67 : vector<1x24x4xf32> to vector<24x4xf32>
    %c0_31 = arith.constant 0 : index
    %c0_32 = arith.constant 0 : index
    %69 = vector.load %arg6[%c0_31, %c0_32] : memref<4x32xbf16, #tpu.memory_space<vmem>>, vector<4x32xbf16>
    %70 = arith.truncf %68 : vector<24x4xf32> to vector<24x4xbf16>
    %cst_33 = arith.constant dense<0.000000e+00> : vector<24x32xf32>
    %71 = tpu.matmul %70, %69, %cst_33 {dimension_numbers = #tpu.dot_dimension_numbers<[1], [0], [0], [1], [0, 0, 1, 1], [], []>} : vector<24x4xbf16>, vector<4x32xbf16>, vector<24x32xf32> -> vector<24x32xf32>
    %72 = arith.addf %66, %71 : vector<24x32xf32>
    %c0_34 = arith.constant 0 : index
    %c0_35 = arith.constant 0 : index
    %c0_36 = arith.constant 0 : index
    %73 = vector.load %arg7[%c0_34, %c0_35, %c0_36] : memref<1x24x32xf32, #tpu.memory_space<vmem>>, vector<1x24x32xf32>
    %74 = vector.shape_cast %73 : vector<1x24x32xf32> to vector<24x32xf32>
    %75 = vector.shape_cast %72 : vector<24x32xf32> to vector<1x24x32xf32>
    tpu.vector_store %arg7[%c0_34, %c0_35, %c0_36], %75 {strides = array<i32>} : memref<1x24x32xf32, #tpu.memory_space<vmem>>, vector<1x24x32xf32>,
    return
  }
  func.func @transform_0(%arg0: i32) -> (i32, i32, i32) {
    %c0_i32 = arith.constant 0 : i32
    %c0_i32_0 = arith.constant 0 : i32
    %c0_i32_1 = arith.constant 0 : i32
    return %arg0, %c0_i32, %c0_i32_0 : i32, i32, i32
  }
  func.func @transform_1(%arg0: i32) -> (i32, i32, i32) {
    %c0_i32 = arith.constant 0 : i32
    %c0_i32_0 = arith.constant 0 : i32
    %c0_i32_1 = arith.constant 0 : i32
    return %arg0, %c0_i32, %c0_i32_0 : i32, i32, i32
  }
  func.func @transform_2(%arg0: i32) -> (i32, i32) {
    %c0_i32 = arith.constant 0 : i32
    %c0_i32_0 = arith.constant 0 : i32
    %c0_i32_1 = arith.constant 0 : i32
    return %c0_i32, %c0_i32_0 : i32, i32
  }
  func.func @transform_3(%arg0: i32) -> (i32, i32) {
    %c0_i32 = arith.constant 0 : i32
    %c0_i32_0 = arith.constant 0 : i32
    %c0_i32_1 = arith.constant 0 : i32
    return %c0_i32, %c0_i32_0 : i32, i32
  }
  func.func @transform_4(%arg0: i32) -> (i32, i32) {
    %c0_i32 = arith.constant 0 : i32
    %c0_i32_0 = arith.constant 0 : i32
    %c0_i32_1 = arith.constant 0 : i32
    return %c0_i32, %c0_i32_0 : i32, i32
  }
  func.func @transform_5(%arg0: i32) -> (i32, i32) {
    %c0_i32 = arith.constant 0 : i32
    %c0_i32_0 = arith.constant 0 : i32
    %c0_i32_1 = arith.constant 0 : i32
    return %c0_i32, %c0_i32_0 : i32, i32
  }
  func.func @transform_6(%arg0: i32) -> (i32, i32, i32) {
    %c0_i32 = arith.constant 0 : i32
    %c0_i32_0 = arith.constant 0 : i32
    %c0_i32_1 = arith.constant 0 : i32
    return %arg0, %c0_i32, %c0_i32_0 : i32, i32, i32
  }
}

module attributes {stable_mosaic.version = 11 : i64} {
  func.func @_linear_kernel(%arg0: i32, %arg1: i32, %arg2: i32, %arg3: memref<48x32xf32, #tpu.memory_space<vmem>>, %arg4: memref<32x96xbf16, #tpu.memory_space<vmem>>, %arg5: memref<1x96xf32, #tpu.memory_space<vmem>>, %arg6: memref<48x96xf32, #tpu.memory_space<vmem>>, %arg7: memref<48x96xf32, #tpu.memory_space<vmem>>) attributes {dimension_semantics = [#tpu.dimension_semantics<parallel>, #tpu.dimension_semantics<parallel>, #tpu.dimension_semantics<arbitrary>], iteration_bounds = array<i64: 1, 1, 1>, scalar_prefetch = 0 : i64, scratch_operands = 1 : i64, tpu.core_type = #tpu.core_type<tc>, window_params = [{transform_indices = @transform_0, window_bounds = array<i64: 48, 32>}, {transform_indices = @transform_1, window_bounds = array<i64: 32, 96>}, {transform_indices = @transform_2, window_bounds = array<i64: 1, 96>}, {transform_indices = @transform_3, window_bounds = array<i64: 48, 96>}]} {
    %c0_i32 = arith.constant 0 : i32
    %0 = arith.cmpi eq, %arg2, %c0_i32 : i32
    %1 = arith.extui %0 : i1 to i32
    %c0_i32_0 = arith.constant 0 : i32
    %2 = arith.cmpi ne, %1, %c0_i32_0 : i32
    scf.if %2 {
      %cst_10 = arith.constant 0.000000e+00 : f32
      %13 = vector.broadcast %cst_10 : f32 to vector<48x96xf32>
      %c0_11 = arith.constant 0 : index
      %c0_12 = arith.constant 0 : index
      %14 = vector.load %arg7[%c0_11, %c0_12] : memref<48x96xf32, #tpu.memory_space<vmem>>, vector<48x96xf32>
      tpu.vector_store %arg7[%c0_11, %c0_12], %13 {strides = array<i32>} : memref<48x96xf32, #tpu.memory_space<vmem>>, vector<48x96xf32>,
    } else {
    }
    %c0 = arith.constant 0 : index
    %c0_1 = arith.constant 0 : index
    %3 = vector.load %arg7[%c0, %c0_1] : memref<48x96xf32, #tpu.memory_space<vmem>>, vector<48x96xf32>
    %c0_2 = arith.constant 0 : index
    %c0_3 = arith.constant 0 : index
    %4 = vector.load %arg3[%c0_2, %c0_3] : memref<48x32xf32, #tpu.memory_space<vmem>>, vector<48x32xf32>
    %c0_4 = arith.constant 0 : index
    %c0_5 = arith.constant 0 : index
    %5 = vector.load %arg4[%c0_4, %c0_5] : memref<32x96xbf16, #tpu.memory_space<vmem>>, vector<32x96xbf16>
    %6 = arith.truncf %4 : vector<48x32xf32> to vector<48x32xbf16>
    %cst = arith.constant dense<0.000000e+00> : vector<48x96xf32>
    %7 = tpu.matmul %6, %5, %cst {dimension_numbers = #tpu.dot_dimension_numbers<[1], [0], [0], [1], [0, 0, 1, 1], [], []>} : vector<48x32xbf16>, vector<32x96xbf16>, vector<48x96xf32> -> vector<48x96xf32>
    %8 = arith.addf %3, %7 : vector<48x96xf32>
    %c0_6 = arith.constant 0 : index
    %c0_7 = arith.constant 0 : index
    %9 = vector.load %arg7[%c0_6, %c0_7] : memref<48x96xf32, #tpu.memory_space<vmem>>, vector<48x96xf32>
    tpu.vector_store %arg7[%c0_6, %c0_7], %8 {strides = array<i32>} : memref<48x96xf32, #tpu.memory_space<vmem>>, vector<48x96xf32>,
    %c0_i32_8 = arith.constant 0 : i32
    %10 = arith.cmpi eq, %arg2, %c0_i32_8 : i32
    %11 = arith.extui %10 : i1 to i32
    %c0_i32_9 = arith.constant 0 : i32
    %12 = arith.cmpi ne, %11, %c0_i32_9 : i32
    scf.if %12 {
      %c0_10 = arith.constant 0 : index
      %c0_11 = arith.constant 0 : index
      %13 = vector.load %arg7[%c0_10, %c0_11] : memref<48x96xf32, #tpu.memory_space<vmem>>, vector<48x96xf32>
      %c0_12 = arith.constant 0 : index
      %c0_13 = arith.constant 0 : index
      %14 = vector.load %arg5[%c0_12, %c0_13] : memref<1x96xf32, #tpu.memory_space<vmem>>, vector<1x96xf32>
      %15 = vector.broadcast %14 : vector<1x96xf32> to vector<48x96xf32>
      %16 = arith.addf %13, %15 : vector<48x96xf32>
      %c0_14 = arith.constant 0 : index
      %c0_15 = arith.constant 0 : index
      %17 = vector.load %arg6[%c0_14, %c0_15] : memref<48x96xf32, #tpu.memory_space<vmem>>, vector<48x96xf32>
      tpu.vector_store %arg6[%c0_14, %c0_15], %16 {strides = array<i32>} : memref<48x96xf32, #tpu.memory_space<vmem>>, vector<48x96xf32>,
    } else {
    }
    return
  }
  func.func @transform_0(%arg0: i32, %arg1: i32, %arg2: i32) -> (i32, i32) {
    %c0_i32 = arith.constant 0 : i32
    return %arg0, %arg2 : i32, i32
  }
  func.func @transform_1(%arg0: i32, %arg1: i32, %arg2: i32) -> (i32, i32) {
    %c0_i32 = arith.constant 0 : i32
    return %arg2, %arg1 : i32, i32
  }
  func.func @transform_2(%arg0: i32, %arg1: i32, %arg2: i32) -> (i32, i32) {
    %c0_i32 = arith.constant 0 : i32
    %c0_i32_0 = arith.constant 0 : i32
    return %c0_i32, %arg1 : i32, i32
  }
  func.func @transform_3(%arg0: i32, %arg1: i32, %arg2: i32) -> (i32, i32) {
    %c0_i32 = arith.constant 0 : i32
    return %arg0, %arg1 : i32, i32
  }
}

module attributes {stable_mosaic.version = 11 : i64} {
  func.func @_mm_add_decomp_kernel(%arg0: i32, %arg1: memref<1x24x32xf32, #tpu.memory_space<vmem>>, %arg2: memref<32x32xbf16, #tpu.memory_space<vmem>>, %arg3: memref<1x32xf32, #tpu.memory_space<vmem>>, %arg4: memref<1x24x32xf32, #tpu.memory_space<vmem>>, %arg5: memref<1x24x32xf32, #tpu.memory_space<vmem>>, %arg6: memref<1x24x32xf32, #tpu.memory_space<vmem>>) attributes {dimension_semantics = [#tpu.dimension_semantics<parallel>], iteration_bounds = array<i64: 2>, scalar_prefetch = 0 : i64, scratch_operands = 0 : i64, tpu.core_type = #tpu.core_type<tc>, window_params = [{transform_indices = @transform_0, window_bounds = array<i64: 1, 24, 32>}, {pipeline_mode = #tpu.pipeline_mode<synchronous>, transform_indices = @transform_1, window_bounds = array<i64: 32, 32>}, {pipeline_mode = #tpu.pipeline_mode<synchronous>, transform_indices = @transform_2, window_bounds = array<i64: 1, 32>}, {transform_indices = @transform_3, window_bounds = array<i64: 1, 24, 32>}, {transform_indices = @transform_4, window_bounds = array<i64: 1, 24, 32>}, {transform_indices = @transform_5, window_bounds = array<i64: 1, 24, 32>}]} {
    %c0 = arith.constant 0 : index
    %c0_0 = arith.constant 0 : index
    %c0_1 = arith.constant 0 : index
    %0 = vector.load %arg1[%c0, %c0_0, %c0_1] : memref<1x24x32xf32, #tpu.memory_space<vmem>>, vector<1x24x32xf32>
    %1 = vector.shape_cast %0 : vector<1x24x32xf32> to vector<24x32xf32>
    %c0_2 = arith.constant 0 : index
    %c0_3 = arith.constant 0 : index
    %2 = vector.load %arg2[%c0_2, %c0_3] : memref<32x32xbf16, #tpu.memory_space<vmem>>, vector<32x32xbf16>
    %3 = arith.truncf %1 : vector<24x32xf32> to vector<24x32xbf16>
    %cst = arith.constant dense<0.000000e+00> : vector<24x32xf32>
    %4 = tpu.matmul %3, %2, %cst {dimension_numbers = #tpu.dot_dimension_numbers<[1], [0], [0], [1], [0, 0, 1, 1], [], []>} : vector<24x32xbf16>, vector<32x32xbf16>, vector<24x32xf32> -> vector<24x32xf32>
    %c0_4 = arith.constant 0 : index
    %c0_5 = arith.constant 0 : index
    %5 = vector.load %arg3[%c0_4, %c0_5] : memref<1x32xf32, #tpu.memory_space<vmem>>, vector<1x32xf32>
    %6 = vector.broadcast %5 : vector<1x32xf32> to vector<24x32xf32>
    %7 = arith.addf %4, %6 : vector<24x32xf32>
    %c0_6 = arith.constant 0 : index
    %c0_7 = arith.constant 0 : index
    %c0_8 = arith.constant 0 : index
    %8 = vector.load %arg4[%c0_6, %c0_7, %c0_8] : memref<1x24x32xf32, #tpu.memory_space<vmem>>, vector<1x24x32xf32>
    %9 = vector.shape_cast %8 : vector<1x24x32xf32> to vector<24x32xf32>
    %10 = arith.addf %9, %7 : vector<24x32xf32>
    %11 = tpu.iota {dimensions = array<i32: 0>} : vector<24x24xi32>
    %12 = tpu.iota {dimensions = array<i32: 1>} : vector<24x24xi32>
    %cst_9 = arith.constant 0.000000e+00 : f32
    %13 = vector.broadcast %cst_9 : f32 to vector<24x24xf32>
    %c-2_i32 = arith.constant -2 : i32
    %14 = vector.broadcast %c-2_i32 : i32 to vector<24x24xi32>
    %15 = arith.addi %11, %14 : vector<24x24xi32>
    %c0_i32 = arith.constant 0 : i32
    %c23_i32 = arith.constant 23 : i32
    %16 = vector.broadcast %c0_i32 : i32 to vector<24x24xi32>
    %17 = arith.maxsi %16, %15 : vector<24x24xi32>
    %18 = vector.broadcast %c23_i32 : i32 to vector<24x24xi32>
    %19 = arith.minsi %18, %17 : vector<24x24xi32>
    %20 = arith.cmpi eq, %12, %19 : vector<24x24xi32>
    %cst_10 = arith.constant 1.000000e+00 : f32
    %cst_11 = arith.constant 0.000000e+00 : f32
    %21 = vector.broadcast %cst_10 : f32 to vector<24x24xf32>
    %22 = vector.broadcast %cst_11 : f32 to vector<24x24xf32>
    %23 = arith.select %20, %21, %22 : vector<24x24xi1>, vector<24x24xf32>
    %24 = arith.addf %13, %23 : vector<24x24xf32>
    %c-1_i32 = arith.constant -1 : i32
    %25 = vector.broadcast %c-1_i32 : i32 to vector<24x24xi32>
    %26 = arith.addi %11, %25 : vector<24x24xi32>
    %c0_i32_12 = arith.constant 0 : i32
    %c23_i32_13 = arith.constant 23 : i32
    %27 = vector.broadcast %c0_i32_12 : i32 to vector<24x24xi32>
    %28 = arith.maxsi %27, %26 : vector<24x24xi32>
    %29 = vector.broadcast %c23_i32_13 : i32 to vector<24x24xi32>
    %30 = arith.minsi %29, %28 : vector<24x24xi32>
    %31 = arith.cmpi eq, %12, %30 : vector<24x24xi32>
    %cst_14 = arith.constant 1.000000e+00 : f32
    %cst_15 = arith.constant 0.000000e+00 : f32
    %32 = vector.broadcast %cst_14 : f32 to vector<24x24xf32>
    %33 = vector.broadcast %cst_15 : f32 to vector<24x24xf32>
    %34 = arith.select %31, %32, %33 : vector<24x24xi1>, vector<24x24xf32>
    %35 = arith.addf %24, %34 : vector<24x24xf32>
    %c0_i32_16 = arith.constant 0 : i32
    %36 = vector.broadcast %c0_i32_16 : i32 to vector<24x24xi32>
    %37 = arith.addi %11, %36 : vector<24x24xi32>
    %c0_i32_17 = arith.constant 0 : i32
    %c23_i32_18 = arith.constant 23 : i32
    %38 = vector.broadcast %c0_i32_17 : i32 to vector<24x24xi32>
    %39 = arith.maxsi %38, %37 : vector<24x24xi32>
    %40 = vector.broadcast %c23_i32_18 : i32 to vector<24x24xi32>
    %41 = arith.minsi %40, %39 : vector<24x24xi32>
    %42 = arith.cmpi eq, %12, %41 : vector<24x24xi32>
    %cst_19 = arith.constant 1.000000e+00 : f32
    %cst_20 = arith.constant 0.000000e+00 : f32
    %43 = vector.broadcast %cst_19 : f32 to vector<24x24xf32>
    %44 = vector.broadcast %cst_20 : f32 to vector<24x24xf32>
    %45 = arith.select %42, %43, %44 : vector<24x24xi1>, vector<24x24xf32>
    %46 = arith.addf %35, %45 : vector<24x24xf32>
    %c1_i32 = arith.constant 1 : i32
    %47 = vector.broadcast %c1_i32 : i32 to vector<24x24xi32>
    %48 = arith.addi %11, %47 : vector<24x24xi32>
    %c0_i32_21 = arith.constant 0 : i32
    %c23_i32_22 = arith.constant 23 : i32
    %49 = vector.broadcast %c0_i32_21 : i32 to vector<24x24xi32>
    %50 = arith.maxsi %49, %48 : vector<24x24xi32>
    %51 = vector.broadcast %c23_i32_22 : i32 to vector<24x24xi32>
    %52 = arith.minsi %51, %50 : vector<24x24xi32>
    %53 = arith.cmpi eq, %12, %52 : vector<24x24xi32>
    %cst_23 = arith.constant 1.000000e+00 : f32
    %cst_24 = arith.constant 0.000000e+00 : f32
    %54 = vector.broadcast %cst_23 : f32 to vector<24x24xf32>
    %55 = vector.broadcast %cst_24 : f32 to vector<24x24xf32>
    %56 = arith.select %53, %54, %55 : vector<24x24xi1>, vector<24x24xf32>
    %57 = arith.addf %46, %56 : vector<24x24xf32>
    %c2_i32 = arith.constant 2 : i32
    %58 = vector.broadcast %c2_i32 : i32 to vector<24x24xi32>
    %59 = arith.addi %11, %58 : vector<24x24xi32>
    %c0_i32_25 = arith.constant 0 : i32
    %c23_i32_26 = arith.constant 23 : i32
    %60 = vector.broadcast %c0_i32_25 : i32 to vector<24x24xi32>
    %61 = arith.maxsi %60, %59 : vector<24x24xi32>
    %62 = vector.broadcast %c23_i32_26 : i32 to vector<24x24xi32>
    %63 = arith.minsi %62, %61 : vector<24x24xi32>
    %64 = arith.cmpi eq, %12, %63 : vector<24x24xi32>
    %cst_27 = arith.constant 1.000000e+00 : f32
    %cst_28 = arith.constant 0.000000e+00 : f32
    %65 = vector.broadcast %cst_27 : f32 to vector<24x24xf32>
    %66 = vector.broadcast %cst_28 : f32 to vector<24x24xf32>
    %67 = arith.select %64, %65, %66 : vector<24x24xi1>, vector<24x24xf32>
    %68 = arith.addf %57, %67 : vector<24x24xf32>
    %cst_29 = arith.constant 5.000000e+00 : f32
    %69 = vector.broadcast %cst_29 : f32 to vector<24x24xf32>
    %70 = arith.divf %68, %69 : vector<24x24xf32>
    %cst_30 = arith.constant dense<0.000000e+00> : vector<24x32xf32>
    %71 = tpu.matmul %70, %10, %cst_30 {dimension_numbers = #tpu.dot_dimension_numbers<[1], [0], [0], [1], [0, 0, 1, 1], [], []>} : vector<24x24xf32>, vector<24x32xf32>, vector<24x32xf32> -> vector<24x32xf32>
    %72 = arith.subf %10, %71 : vector<24x32xf32>
    %c0_31 = arith.constant 0 : index
    %c0_32 = arith.constant 0 : index
    %c0_33 = arith.constant 0 : index
    %73 = vector.load %arg5[%c0_31, %c0_32, %c0_33] : memref<1x24x32xf32, #tpu.memory_space<vmem>>, vector<1x24x32xf32>
    %74 = vector.shape_cast %73 : vector<1x24x32xf32> to vector<24x32xf32>
    %75 = vector.shape_cast %72 : vector<24x32xf32> to vector<1x24x32xf32>
    tpu.vector_store %arg5[%c0_31, %c0_32, %c0_33], %75 {strides = array<i32>} : memref<1x24x32xf32, #tpu.memory_space<vmem>>, vector<1x24x32xf32>,
    %c0_34 = arith.constant 0 : index
    %c0_35 = arith.constant 0 : index
    %c0_36 = arith.constant 0 : index
    %76 = vector.load %arg6[%c0_34, %c0_35, %c0_36] : memref<1x24x32xf32, #tpu.memory_space<vmem>>, vector<1x24x32xf32>
    %77 = vector.shape_cast %76 : vector<1x24x32xf32> to vector<24x32xf32>
    %78 = vector.shape_cast %71 : vector<24x32xf32> to vector<1x24x32xf32>
    tpu.vector_store %arg6[%c0_34, %c0_35, %c0_36], %78 {strides = array<i32>} : memref<1x24x32xf32, #tpu.memory_space<vmem>>, vector<1x24x32xf32>,
    return
  }
  func.func @transform_0(%arg0: i32) -> (i32, i32, i32) {
    %c0_i32 = arith.constant 0 : i32
    %c0_i32_0 = arith.constant 0 : i32
    %c0_i32_1 = arith.constant 0 : i32
    return %arg0, %c0_i32, %c0_i32_0 : i32, i32, i32
  }
  func.func @transform_1(%arg0: i32) -> (i32, i32) {
    %c0_i32 = arith.constant 0 : i32
    %c0_i32_0 = arith.constant 0 : i32
    %c0_i32_1 = arith.constant 0 : i32
    return %c0_i32, %c0_i32_0 : i32, i32
  }
  func.func @transform_2(%arg0: i32) -> (i32, i32) {
    %c0_i32 = arith.constant 0 : i32
    %c0_i32_0 = arith.constant 0 : i32
    %c0_i32_1 = arith.constant 0 : i32
    return %c0_i32, %c0_i32_0 : i32, i32
  }
  func.func @transform_3(%arg0: i32) -> (i32, i32, i32) {
    %c0_i32 = arith.constant 0 : i32
    %c0_i32_0 = arith.constant 0 : i32
    %c0_i32_1 = arith.constant 0 : i32
    return %arg0, %c0_i32, %c0_i32_0 : i32, i32, i32
  }
  func.func @transform_4(%arg0: i32) -> (i32, i32, i32) {
    %c0_i32 = arith.constant 0 : i32
    %c0_i32_0 = arith.constant 0 : i32
    %c0_i32_1 = arith.constant 0 : i32
    return %arg0, %c0_i32, %c0_i32_0 : i32, i32, i32
  }
  func.func @transform_5(%arg0: i32) -> (i32, i32, i32) {
    %c0_i32 = arith.constant 0 : i32
    %c0_i32_0 = arith.constant 0 : i32
    %c0_i32_1 = arith.constant 0 : i32
    return %arg0, %c0_i32, %c0_i32_0 : i32, i32, i32
  }
}

module attributes {stable_mosaic.version = 11 : i64} {
  func.func @_linear_kernel(%arg0: i32, %arg1: i32, %arg2: i32, %arg3: memref<48x32xf32, #tpu.memory_space<vmem>>, %arg4: memref<32x32xbf16, #tpu.memory_space<vmem>>, %arg5: memref<1x32xf32, #tpu.memory_space<vmem>>, %arg6: memref<48x32xf32, #tpu.memory_space<vmem>>, %arg7: memref<48x32xf32, #tpu.memory_space<vmem>>) attributes {dimension_semantics = [#tpu.dimension_semantics<parallel>, #tpu.dimension_semantics<parallel>, #tpu.dimension_semantics<arbitrary>], iteration_bounds = array<i64: 1, 1, 1>, scalar_prefetch = 0 : i64, scratch_operands = 1 : i64, tpu.core_type = #tpu.core_type<tc>, window_params = [{transform_indices = @transform_0, window_bounds = array<i64: 48, 32>}, {transform_indices = @transform_1, window_bounds = array<i64: 32, 32>}, {transform_indices = @transform_2, window_bounds = array<i64: 1, 32>}, {transform_indices = @transform_3, window_bounds = array<i64: 48, 32>}]} {
    %c0_i32 = arith.constant 0 : i32
    %0 = arith.cmpi eq, %arg2, %c0_i32 : i32
    %1 = arith.extui %0 : i1 to i32
    %c0_i32_0 = arith.constant 0 : i32
    %2 = arith.cmpi ne, %1, %c0_i32_0 : i32
    scf.if %2 {
      %cst_10 = arith.constant 0.000000e+00 : f32
      %13 = vector.broadcast %cst_10 : f32 to vector<48x32xf32>
      %c0_11 = arith.constant 0 : index
      %c0_12 = arith.constant 0 : index
      %14 = vector.load %arg7[%c0_11, %c0_12] : memref<48x32xf32, #tpu.memory_space<vmem>>, vector<48x32xf32>
      tpu.vector_store %arg7[%c0_11, %c0_12], %13 {strides = array<i32>} : memref<48x32xf32, #tpu.memory_space<vmem>>, vector<48x32xf32>,
    } else {
    }
    %c0 = arith.constant 0 : index
    %c0_1 = arith.constant 0 : index
    %3 = vector.load %arg7[%c0, %c0_1] : memref<48x32xf32, #tpu.memory_space<vmem>>, vector<48x32xf32>
    %c0_2 = arith.constant 0 : index
    %c0_3 = arith.constant 0 : index
    %4 = vector.load %arg3[%c0_2, %c0_3] : memref<48x32xf32, #tpu.memory_space<vmem>>, vector<48x32xf32>
    %c0_4 = arith.constant 0 : index
    %c0_5 = arith.constant 0 : index
    %5 = vector.load %arg4[%c0_4, %c0_5] : memref<32x32xbf16, #tpu.memory_space<vmem>>, vector<32x32xbf16>
    %6 = arith.truncf %4 : vector<48x32xf32> to vector<48x32xbf16>
    %cst = arith.constant dense<0.000000e+00> : vector<48x32xf32>
    %7 = tpu.matmul %6, %5, %cst {dimension_numbers = #tpu.dot_dimension_numbers<[1], [0], [0], [1], [0, 0, 1, 1], [], []>} : vector<48x32xbf16>, vector<32x32xbf16>, vector<48x32xf32> -> vector<48x32xf32>
    %8 = arith.addf %3, %7 : vector<48x32xf32>
    %c0_6 = arith.constant 0 : index
    %c0_7 = arith.constant 0 : index
    %9 = vector.load %arg7[%c0_6, %c0_7] : memref<48x32xf32, #tpu.memory_space<vmem>>, vector<48x32xf32>
    tpu.vector_store %arg7[%c0_6, %c0_7], %8 {strides = array<i32>} : memref<48x32xf32, #tpu.memory_space<vmem>>, vector<48x32xf32>,
    %c0_i32_8 = arith.constant 0 : i32
    %10 = arith.cmpi eq, %arg2, %c0_i32_8 : i32
    %11 = arith.extui %10 : i1 to i32
    %c0_i32_9 = arith.constant 0 : i32
    %12 = arith.cmpi ne, %11, %c0_i32_9 : i32
    scf.if %12 {
      %c0_10 = arith.constant 0 : index
      %c0_11 = arith.constant 0 : index
      %13 = vector.load %arg7[%c0_10, %c0_11] : memref<48x32xf32, #tpu.memory_space<vmem>>, vector<48x32xf32>
      %c0_12 = arith.constant 0 : index
      %c0_13 = arith.constant 0 : index
      %14 = vector.load %arg5[%c0_12, %c0_13] : memref<1x32xf32, #tpu.memory_space<vmem>>, vector<1x32xf32>
      %15 = vector.broadcast %14 : vector<1x32xf32> to vector<48x32xf32>
      %16 = arith.addf %13, %15 : vector<48x32xf32>
      %c0_14 = arith.constant 0 : index
      %c0_15 = arith.constant 0 : index
      %17 = vector.load %arg6[%c0_14, %c0_15] : memref<48x32xf32, #tpu.memory_space<vmem>>, vector<48x32xf32>
      tpu.vector_store %arg6[%c0_14, %c0_15], %16 {strides = array<i32>} : memref<48x32xf32, #tpu.memory_space<vmem>>, vector<48x32xf32>,
    } else {
    }
    return
  }
  func.func @transform_0(%arg0: i32, %arg1: i32, %arg2: i32) -> (i32, i32) {
    %c0_i32 = arith.constant 0 : i32
    return %arg0, %arg2 : i32, i32
  }
  func.func @transform_1(%arg0: i32, %arg1: i32, %arg2: i32) -> (i32, i32) {
    %c0_i32 = arith.constant 0 : i32
    return %arg2, %arg1 : i32, i32
  }
  func.func @transform_2(%arg0: i32, %arg1: i32, %arg2: i32) -> (i32, i32) {
    %c0_i32 = arith.constant 0 : i32
    %c0_i32_0 = arith.constant 0 : i32
    return %c0_i32, %arg1 : i32, i32
  }
  func.func @transform_3(%arg0: i32, %arg1: i32, %arg2: i32) -> (i32, i32) {
    %c0_i32 = arith.constant 0 : i32
    return %arg0, %arg1 : i32, i32
  }
}

module attributes {stable_mosaic.version = 11 : i64} {
  func.func @_embed_kernel(%arg0: i32, %arg1: memref<1x16x4xf32, #tpu.memory_space<vmem>>, %arg2: memref<1x16x4xf32, #tpu.memory_space<vmem>>, %arg3: memref<4x32xbf16, #tpu.memory_space<vmem>>, %arg4: memref<4x32xbf16, #tpu.memory_space<vmem>>, %arg5: memref<4x32xbf16, #tpu.memory_space<vmem>>, %arg6: memref<4x32xbf16, #tpu.memory_space<vmem>>, %arg7: memref<1x16x32xf32, #tpu.memory_space<vmem>>) attributes {dimension_semantics = [#tpu.dimension_semantics<parallel>], iteration_bounds = array<i64: 2>, scalar_prefetch = 0 : i64, scratch_operands = 0 : i64, tpu.core_type = #tpu.core_type<tc>, window_params = [{transform_indices = @transform_0, window_bounds = array<i64: 1, 16, 4>}, {transform_indices = @transform_1, window_bounds = array<i64: 1, 16, 4>}, {pipeline_mode = #tpu.pipeline_mode<synchronous>, transform_indices = @transform_2, window_bounds = array<i64: 4, 32>}, {pipeline_mode = #tpu.pipeline_mode<synchronous>, transform_indices = @transform_3, window_bounds = array<i64: 4, 32>}, {pipeline_mode = #tpu.pipeline_mode<synchronous>, transform_indices = @transform_4, window_bounds = array<i64: 4, 32>}, {pipeline_mode = #tpu.pipeline_mode<synchronous>, transform_indices = @transform_5, window_bounds = array<i64: 4, 32>}, {transform_indices = @transform_6, window_bounds = array<i64: 1, 16, 32>}]} {
    %c0 = arith.constant 0 : index
    %c0_0 = arith.constant 0 : index
    %c0_1 = arith.constant 0 : index
    %0 = vector.load %arg1[%c0, %c0_0, %c0_1] : memref<1x16x4xf32, #tpu.memory_space<vmem>>, vector<1x16x4xf32>
    %1 = vector.shape_cast %0 : vector<1x16x4xf32> to vector<16x4xf32>
    %2 = tpu.iota {dimensions = array<i32: 0>} : vector<16x16xi32>
    %3 = tpu.iota {dimensions = array<i32: 1>} : vector<16x16xi32>
    %c-1_i32 = arith.constant -1 : i32
    %4 = vector.broadcast %c-1_i32 : i32 to vector<16x16xi32>
    %5 = arith.addi %2, %4 : vector<16x16xi32>
    %c16_i32 = arith.constant 16 : i32
    %6 = vector.broadcast %c16_i32 : i32 to vector<16x16xi32>
    %7 = arith.addi %5, %6 : vector<16x16xi32>
    %c16_i32_2 = arith.constant 16 : i32
    %c0_i32 = arith.constant 0 : i32
    %8 = arith.cmpi eq, %c16_i32_2, %c0_i32 : i32
    %c1_i32 = arith.constant 1 : i32
    %9 = arith.select %8, %c1_i32, %c16_i32_2 : i32
    %10 = vector.broadcast %9 : i32 to vector<16x16xi32>
    %11 = arith.remsi %7, %10 : vector<16x16xi32>
    %c0_i32_3 = arith.constant 0 : i32
    %12 = vector.broadcast %c0_i32_3 : i32 to vector<16x16xi32>
    %13 = arith.cmpi ne, %11, %12 : vector<16x16xi32>
    %c0_i32_4 = arith.constant 0 : i32
    %14 = vector.broadcast %c0_i32_4 : i32 to vector<16x16xi32>
    %15 = arith.cmpi slt, %11, %14 : vector<16x16xi32>
    %c0_i32_5 = arith.constant 0 : i32
    %16 = arith.cmpi slt, %9, %c0_i32_5 : i32
    %17 = vector.broadcast %16 : i1 to vector<16x16xi1>
    %18 = vector.broadcast %17 : vector<16x16xi1> to vector<16x16xi1>
    %19 = arith.xori %15, %18 : vector<16x16xi1>
    %20 = arith.andi %19, %13 : vector<16x16xi1>
    %21 = vector.broadcast %9 : i32 to vector<16x16xi32>
    %22 = arith.addi %11, %21 : vector<16x16xi32>
    %23 = arith.select %20, %22, %11 : vector<16x16xi1>, vector<16x16xi32>
    %24 = arith.cmpi eq, %3, %23 : vector<16x16xi32>
    %cst = arith.constant 1.000000e+00 : f32
    %cst_6 = arith.constant 0.000000e+00 : f32
    %25 = vector.broadcast %cst : f32 to vector<16x16xf32>
    %26 = vector.broadcast %cst_6 : f32 to vector<16x16xf32>
    %27 = arith.select %24, %25, %26 : vector<16x16xi1>, vector<16x16xf32>
    %cst_7 = arith.constant dense<0.000000e+00> : vector<16x4xf32>
    %28 = tpu.matmul %27, %1, %cst_7 {dimension_numbers = #tpu.dot_dimension_numbers<[1], [0], [0], [1], [0, 0, 1, 1], [], []>} : vector<16x16xf32>, vector<16x4xf32>, vector<16x4xf32> -> vector<16x4xf32>
    %29 = tpu.iota {dimensions = array<i32: 0>} : vector<16x16xi32>
    %30 = tpu.iota {dimensions = array<i32: 1>} : vector<16x16xi32>
    %c1_i32_8 = arith.constant 1 : i32
    %31 = vector.broadcast %c1_i32_8 : i32 to vector<16x16xi32>
    %32 = arith.addi %29, %31 : vector<16x16xi32>
    %c16_i32_9 = arith.constant 16 : i32
    %33 = vector.broadcast %c16_i32_9 : i32 to vector<16x16xi32>
    %34 = arith.addi %32, %33 : vector<16x16xi32>
    %c16_i32_10 = arith.constant 16 : i32
    %c0_i32_11 = arith.constant 0 : i32
    %35 = arith.cmpi eq, %c16_i32_10, %c0_i32_11 : i32
    %c1_i32_12 = arith.constant 1 : i32
    %36 = arith.select %35, %c1_i32_12, %c16_i32_10 : i32
    %37 = vector.broadcast %36 : i32 to vector<16x16xi32>
    %38 = arith.remsi %34, %37 : vector<16x16xi32>
    %c0_i32_13 = arith.constant 0 : i32
    %39 = vector.broadcast %c0_i32_13 : i32 to vector<16x16xi32>
    %40 = arith.cmpi ne, %38, %39 : vector<16x16xi32>
    %c0_i32_14 = arith.constant 0 : i32
    %41 = vector.broadcast %c0_i32_14 : i32 to vector<16x16xi32>
    %42 = arith.cmpi slt, %38, %41 : vector<16x16xi32>
    %c0_i32_15 = arith.constant 0 : i32
    %43 = arith.cmpi slt, %36, %c0_i32_15 : i32
    %44 = vector.broadcast %43 : i1 to vector<16x16xi1>
    %45 = vector.broadcast %44 : vector<16x16xi1> to vector<16x16xi1>
    %46 = arith.xori %42, %45 : vector<16x16xi1>
    %47 = arith.andi %46, %40 : vector<16x16xi1>
    %48 = vector.broadcast %36 : i32 to vector<16x16xi32>
    %49 = arith.addi %38, %48 : vector<16x16xi32>
    %50 = arith.select %47, %49, %38 : vector<16x16xi1>, vector<16x16xi32>
    %51 = arith.cmpi eq, %30, %50 : vector<16x16xi32>
    %cst_16 = arith.constant 1.000000e+00 : f32
    %cst_17 = arith.constant 0.000000e+00 : f32
    %52 = vector.broadcast %cst_16 : f32 to vector<16x16xf32>
    %53 = vector.broadcast %cst_17 : f32 to vector<16x16xf32>
    %54 = arith.select %51, %52, %53 : vector<16x16xi1>, vector<16x16xf32>
    %cst_18 = arith.constant dense<0.000000e+00> : vector<16x4xf32>
    %55 = tpu.matmul %54, %1, %cst_18 {dimension_numbers = #tpu.dot_dimension_numbers<[1], [0], [0], [1], [0, 0, 1, 1], [], []>} : vector<16x16xf32>, vector<16x4xf32>, vector<16x4xf32> -> vector<16x4xf32>
    %c0_19 = arith.constant 0 : index
    %c0_20 = arith.constant 0 : index
    %56 = vector.load %arg3[%c0_19, %c0_20] : memref<4x32xbf16, #tpu.memory_space<vmem>>, vector<4x32xbf16>
    %57 = arith.truncf %28 : vector<16x4xf32> to vector<16x4xbf16>
    %cst_21 = arith.constant dense<0.000000e+00> : vector<16x32xf32>
    %58 = tpu.matmul %57, %56, %cst_21 {dimension_numbers = #tpu.dot_dimension_numbers<[1], [0], [0], [1], [0, 0, 1, 1], [], []>} : vector<16x4xbf16>, vector<4x32xbf16>, vector<16x32xf32> -> vector<16x32xf32>
    %c0_22 = arith.constant 0 : index
    %c0_23 = arith.constant 0 : index
    %59 = vector.load %arg4[%c0_22, %c0_23] : memref<4x32xbf16, #tpu.memory_space<vmem>>, vector<4x32xbf16>
    %60 = arith.truncf %1 : vector<16x4xf32> to vector<16x4xbf16>
    %cst_24 = arith.constant dense<0.000000e+00> : vector<16x32xf32>
    %61 = tpu.matmul %60, %59, %cst_24 {dimension_numbers = #tpu.dot_dimension_numbers<[1], [0], [0], [1], [0, 0, 1, 1], [], []>} : vector<16x4xbf16>, vector<4x32xbf16>, vector<16x32xf32> -> vector<16x32xf32>
    %62 = arith.addf %58, %61 : vector<16x32xf32>
    %c0_25 = arith.constant 0 : index
    %c0_26 = arith.constant 0 : index
    %63 = vector.load %arg5[%c0_25, %c0_26] : memref<4x32xbf16, #tpu.memory_space<vmem>>, vector<4x32xbf16>
    %64 = arith.truncf %55 : vector<16x4xf32> to vector<16x4xbf16>
    %cst_27 = arith.constant dense<0.000000e+00> : vector<16x32xf32>
    %65 = tpu.matmul %64, %63, %cst_27 {dimension_numbers = #tpu.dot_dimension_numbers<[1], [0], [0], [1], [0, 0, 1, 1], [], []>} : vector<16x4xbf16>, vector<4x32xbf16>, vector<16x32xf32> -> vector<16x32xf32>
    %66 = arith.addf %62, %65 : vector<16x32xf32>
    %c0_28 = arith.constant 0 : index
    %c0_29 = arith.constant 0 : index
    %c0_30 = arith.constant 0 : index
    %67 = vector.load %arg2[%c0_28, %c0_29, %c0_30] : memref<1x16x4xf32, #tpu.memory_space<vmem>>, vector<1x16x4xf32>
    %68 = vector.shape_cast %67 : vector<1x16x4xf32> to vector<16x4xf32>
    %c0_31 = arith.constant 0 : index
    %c0_32 = arith.constant 0 : index
    %69 = vector.load %arg6[%c0_31, %c0_32] : memref<4x32xbf16, #tpu.memory_space<vmem>>, vector<4x32xbf16>
    %70 = arith.truncf %68 : vector<16x4xf32> to vector<16x4xbf16>
    %cst_33 = arith.constant dense<0.000000e+00> : vector<16x32xf32>
    %71 = tpu.matmul %70, %69, %cst_33 {dimension_numbers = #tpu.dot_dimension_numbers<[1], [0], [0], [1], [0, 0, 1, 1], [], []>} : vector<16x4xbf16>, vector<4x32xbf16>, vector<16x32xf32> -> vector<16x32xf32>
    %72 = arith.addf %66, %71 : vector<16x32xf32>
    %c0_34 = arith.constant 0 : index
    %c0_35 = arith.constant 0 : index
    %c0_36 = arith.constant 0 : index
    %73 = vector.load %arg7[%c0_34, %c0_35, %c0_36] : memref<1x16x32xf32, #tpu.memory_space<vmem>>, vector<1x16x32xf32>
    %74 = vector.shape_cast %73 : vector<1x16x32xf32> to vector<16x32xf32>
    %75 = vector.shape_cast %72 : vector<16x32xf32> to vector<1x16x32xf32>
    tpu.vector_store %arg7[%c0_34, %c0_35, %c0_36], %75 {strides = array<i32>} : memref<1x16x32xf32, #tpu.memory_space<vmem>>, vector<1x16x32xf32>,
    return
  }
  func.func @transform_0(%arg0: i32) -> (i32, i32, i32) {
    %c0_i32 = arith.constant 0 : i32
    %c0_i32_0 = arith.constant 0 : i32
    %c0_i32_1 = arith.constant 0 : i32
    return %arg0, %c0_i32, %c0_i32_0 : i32, i32, i32
  }
  func.func @transform_1(%arg0: i32) -> (i32, i32, i32) {
    %c0_i32 = arith.constant 0 : i32
    %c0_i32_0 = arith.constant 0 : i32
    %c0_i32_1 = arith.constant 0 : i32
    return %arg0, %c0_i32, %c0_i32_0 : i32, i32, i32
  }
  func.func @transform_2(%arg0: i32) -> (i32, i32) {
    %c0_i32 = arith.constant 0 : i32
    %c0_i32_0 = arith.constant 0 : i32
    %c0_i32_1 = arith.constant 0 : i32
    return %c0_i32, %c0_i32_0 : i32, i32
  }
  func.func @transform_3(%arg0: i32) -> (i32, i32) {
    %c0_i32 = arith.constant 0 : i32
    %c0_i32_0 = arith.constant 0 : i32
    %c0_i32_1 = arith.constant 0 : i32
    return %c0_i32, %c0_i32_0 : i32, i32
  }
  func.func @transform_4(%arg0: i32) -> (i32, i32) {
    %c0_i32 = arith.constant 0 : i32
    %c0_i32_0 = arith.constant 0 : i32
    %c0_i32_1 = arith.constant 0 : i32
    return %c0_i32, %c0_i32_0 : i32, i32
  }
  func.func @transform_5(%arg0: i32) -> (i32, i32) {
    %c0_i32 = arith.constant 0 : i32
    %c0_i32_0 = arith.constant 0 : i32
    %c0_i32_1 = arith.constant 0 : i32
    return %c0_i32, %c0_i32_0 : i32, i32
  }
  func.func @transform_6(%arg0: i32) -> (i32, i32, i32) {
    %c0_i32 = arith.constant 0 : i32
    %c0_i32_0 = arith.constant 0 : i32
    %c0_i32_1 = arith.constant 0 : i32
    return %arg0, %c0_i32, %c0_i32_0 : i32, i32, i32
  }
}

module attributes {stable_mosaic.version = 11 : i64} {
  func.func @_linear_kernel(%arg0: i32, %arg1: i32, %arg2: i32, %arg3: memref<32x32xf32, #tpu.memory_space<vmem>>, %arg4: memref<32x96xbf16, #tpu.memory_space<vmem>>, %arg5: memref<1x96xf32, #tpu.memory_space<vmem>>, %arg6: memref<32x96xf32, #tpu.memory_space<vmem>>, %arg7: memref<32x96xf32, #tpu.memory_space<vmem>>) attributes {dimension_semantics = [#tpu.dimension_semantics<parallel>, #tpu.dimension_semantics<parallel>, #tpu.dimension_semantics<arbitrary>], iteration_bounds = array<i64: 1, 1, 1>, scalar_prefetch = 0 : i64, scratch_operands = 1 : i64, tpu.core_type = #tpu.core_type<tc>, window_params = [{transform_indices = @transform_0, window_bounds = array<i64: 32, 32>}, {transform_indices = @transform_1, window_bounds = array<i64: 32, 96>}, {transform_indices = @transform_2, window_bounds = array<i64: 1, 96>}, {transform_indices = @transform_3, window_bounds = array<i64: 32, 96>}]} {
    %c0_i32 = arith.constant 0 : i32
    %0 = arith.cmpi eq, %arg2, %c0_i32 : i32
    %1 = arith.extui %0 : i1 to i32
    %c0_i32_0 = arith.constant 0 : i32
    %2 = arith.cmpi ne, %1, %c0_i32_0 : i32
    scf.if %2 {
      %cst_10 = arith.constant 0.000000e+00 : f32
      %13 = vector.broadcast %cst_10 : f32 to vector<32x96xf32>
      %c0_11 = arith.constant 0 : index
      %c0_12 = arith.constant 0 : index
      %14 = vector.load %arg7[%c0_11, %c0_12] : memref<32x96xf32, #tpu.memory_space<vmem>>, vector<32x96xf32>
      tpu.vector_store %arg7[%c0_11, %c0_12], %13 {strides = array<i32>} : memref<32x96xf32, #tpu.memory_space<vmem>>, vector<32x96xf32>,
    } else {
    }
    %c0 = arith.constant 0 : index
    %c0_1 = arith.constant 0 : index
    %3 = vector.load %arg7[%c0, %c0_1] : memref<32x96xf32, #tpu.memory_space<vmem>>, vector<32x96xf32>
    %c0_2 = arith.constant 0 : index
    %c0_3 = arith.constant 0 : index
    %4 = vector.load %arg3[%c0_2, %c0_3] : memref<32x32xf32, #tpu.memory_space<vmem>>, vector<32x32xf32>
    %c0_4 = arith.constant 0 : index
    %c0_5 = arith.constant 0 : index
    %5 = vector.load %arg4[%c0_4, %c0_5] : memref<32x96xbf16, #tpu.memory_space<vmem>>, vector<32x96xbf16>
    %6 = arith.truncf %4 : vector<32x32xf32> to vector<32x32xbf16>
    %cst = arith.constant dense<0.000000e+00> : vector<32x96xf32>
    %7 = tpu.matmul %6, %5, %cst {dimension_numbers = #tpu.dot_dimension_numbers<[1], [0], [0], [1], [0, 0, 1, 1], [], []>} : vector<32x32xbf16>, vector<32x96xbf16>, vector<32x96xf32> -> vector<32x96xf32>
    %8 = arith.addf %3, %7 : vector<32x96xf32>
    %c0_6 = arith.constant 0 : index
    %c0_7 = arith.constant 0 : index
    %9 = vector.load %arg7[%c0_6, %c0_7] : memref<32x96xf32, #tpu.memory_space<vmem>>, vector<32x96xf32>
    tpu.vector_store %arg7[%c0_6, %c0_7], %8 {strides = array<i32>} : memref<32x96xf32, #tpu.memory_space<vmem>>, vector<32x96xf32>,
    %c0_i32_8 = arith.constant 0 : i32
    %10 = arith.cmpi eq, %arg2, %c0_i32_8 : i32
    %11 = arith.extui %10 : i1 to i32
    %c0_i32_9 = arith.constant 0 : i32
    %12 = arith.cmpi ne, %11, %c0_i32_9 : i32
    scf.if %12 {
      %c0_10 = arith.constant 0 : index
      %c0_11 = arith.constant 0 : index
      %13 = vector.load %arg7[%c0_10, %c0_11] : memref<32x96xf32, #tpu.memory_space<vmem>>, vector<32x96xf32>
      %c0_12 = arith.constant 0 : index
      %c0_13 = arith.constant 0 : index
      %14 = vector.load %arg5[%c0_12, %c0_13] : memref<1x96xf32, #tpu.memory_space<vmem>>, vector<1x96xf32>
      %15 = vector.broadcast %14 : vector<1x96xf32> to vector<32x96xf32>
      %16 = arith.addf %13, %15 : vector<32x96xf32>
      %c0_14 = arith.constant 0 : index
      %c0_15 = arith.constant 0 : index
      %17 = vector.load %arg6[%c0_14, %c0_15] : memref<32x96xf32, #tpu.memory_space<vmem>>, vector<32x96xf32>
      tpu.vector_store %arg6[%c0_14, %c0_15], %16 {strides = array<i32>} : memref<32x96xf32, #tpu.memory_space<vmem>>, vector<32x96xf32>,
    } else {
    }
    return
  }
  func.func @transform_0(%arg0: i32, %arg1: i32, %arg2: i32) -> (i32, i32) {
    %c0_i32 = arith.constant 0 : i32
    return %arg0, %arg2 : i32, i32
  }
  func.func @transform_1(%arg0: i32, %arg1: i32, %arg2: i32) -> (i32, i32) {
    %c0_i32 = arith.constant 0 : i32
    return %arg2, %arg1 : i32, i32
  }
  func.func @transform_2(%arg0: i32, %arg1: i32, %arg2: i32) -> (i32, i32) {
    %c0_i32 = arith.constant 0 : i32
    %c0_i32_0 = arith.constant 0 : i32
    return %c0_i32, %arg1 : i32, i32
  }
  func.func @transform_3(%arg0: i32, %arg1: i32, %arg2: i32) -> (i32, i32) {
    %c0_i32 = arith.constant 0 : i32
    return %arg0, %arg1 : i32, i32
  }
}

module attributes {stable_mosaic.version = 11 : i64} {
  func.func @_mm_add_decomp_kernel(%arg0: i32, %arg1: memref<1x16x32xf32, #tpu.memory_space<vmem>>, %arg2: memref<32x32xbf16, #tpu.memory_space<vmem>>, %arg3: memref<1x32xf32, #tpu.memory_space<vmem>>, %arg4: memref<1x16x32xf32, #tpu.memory_space<vmem>>, %arg5: memref<1x16x32xf32, #tpu.memory_space<vmem>>, %arg6: memref<1x16x32xf32, #tpu.memory_space<vmem>>) attributes {dimension_semantics = [#tpu.dimension_semantics<parallel>], iteration_bounds = array<i64: 2>, scalar_prefetch = 0 : i64, scratch_operands = 0 : i64, tpu.core_type = #tpu.core_type<tc>, window_params = [{transform_indices = @transform_0, window_bounds = array<i64: 1, 16, 32>}, {pipeline_mode = #tpu.pipeline_mode<synchronous>, transform_indices = @transform_1, window_bounds = array<i64: 32, 32>}, {pipeline_mode = #tpu.pipeline_mode<synchronous>, transform_indices = @transform_2, window_bounds = array<i64: 1, 32>}, {transform_indices = @transform_3, window_bounds = array<i64: 1, 16, 32>}, {transform_indices = @transform_4, window_bounds = array<i64: 1, 16, 32>}, {transform_indices = @transform_5, window_bounds = array<i64: 1, 16, 32>}]} {
    %c0 = arith.constant 0 : index
    %c0_0 = arith.constant 0 : index
    %c0_1 = arith.constant 0 : index
    %0 = vector.load %arg1[%c0, %c0_0, %c0_1] : memref<1x16x32xf32, #tpu.memory_space<vmem>>, vector<1x16x32xf32>
    %1 = vector.shape_cast %0 : vector<1x16x32xf32> to vector<16x32xf32>
    %c0_2 = arith.constant 0 : index
    %c0_3 = arith.constant 0 : index
    %2 = vector.load %arg2[%c0_2, %c0_3] : memref<32x32xbf16, #tpu.memory_space<vmem>>, vector<32x32xbf16>
    %3 = arith.truncf %1 : vector<16x32xf32> to vector<16x32xbf16>
    %cst = arith.constant dense<0.000000e+00> : vector<16x32xf32>
    %4 = tpu.matmul %3, %2, %cst {dimension_numbers = #tpu.dot_dimension_numbers<[1], [0], [0], [1], [0, 0, 1, 1], [], []>} : vector<16x32xbf16>, vector<32x32xbf16>, vector<16x32xf32> -> vector<16x32xf32>
    %c0_4 = arith.constant 0 : index
    %c0_5 = arith.constant 0 : index
    %5 = vector.load %arg3[%c0_4, %c0_5] : memref<1x32xf32, #tpu.memory_space<vmem>>, vector<1x32xf32>
    %6 = vector.broadcast %5 : vector<1x32xf32> to vector<16x32xf32>
    %7 = arith.addf %4, %6 : vector<16x32xf32>
    %c0_6 = arith.constant 0 : index
    %c0_7 = arith.constant 0 : index
    %c0_8 = arith.constant 0 : index
    %8 = vector.load %arg4[%c0_6, %c0_7, %c0_8] : memref<1x16x32xf32, #tpu.memory_space<vmem>>, vector<1x16x32xf32>
    %9 = vector.shape_cast %8 : vector<1x16x32xf32> to vector<16x32xf32>
    %10 = arith.addf %9, %7 : vector<16x32xf32>
    %11 = tpu.iota {dimensions = array<i32: 0>} : vector<16x16xi32>
    %12 = tpu.iota {dimensions = array<i32: 1>} : vector<16x16xi32>
    %cst_9 = arith.constant 0.000000e+00 : f32
    %13 = vector.broadcast %cst_9 : f32 to vector<16x16xf32>
    %c-2_i32 = arith.constant -2 : i32
    %14 = vector.broadcast %c-2_i32 : i32 to vector<16x16xi32>
    %15 = arith.addi %11, %14 : vector<16x16xi32>
    %c0_i32 = arith.constant 0 : i32
    %c15_i32 = arith.constant 15 : i32
    %16 = vector.broadcast %c0_i32 : i32 to vector<16x16xi32>
    %17 = arith.maxsi %16, %15 : vector<16x16xi32>
    %18 = vector.broadcast %c15_i32 : i32 to vector<16x16xi32>
    %19 = arith.minsi %18, %17 : vector<16x16xi32>
    %20 = arith.cmpi eq, %12, %19 : vector<16x16xi32>
    %cst_10 = arith.constant 1.000000e+00 : f32
    %cst_11 = arith.constant 0.000000e+00 : f32
    %21 = vector.broadcast %cst_10 : f32 to vector<16x16xf32>
    %22 = vector.broadcast %cst_11 : f32 to vector<16x16xf32>
    %23 = arith.select %20, %21, %22 : vector<16x16xi1>, vector<16x16xf32>
    %24 = arith.addf %13, %23 : vector<16x16xf32>
    %c-1_i32 = arith.constant -1 : i32
    %25 = vector.broadcast %c-1_i32 : i32 to vector<16x16xi32>
    %26 = arith.addi %11, %25 : vector<16x16xi32>
    %c0_i32_12 = arith.constant 0 : i32
    %c15_i32_13 = arith.constant 15 : i32
    %27 = vector.broadcast %c0_i32_12 : i32 to vector<16x16xi32>
    %28 = arith.maxsi %27, %26 : vector<16x16xi32>
    %29 = vector.broadcast %c15_i32_13 : i32 to vector<16x16xi32>
    %30 = arith.minsi %29, %28 : vector<16x16xi32>
    %31 = arith.cmpi eq, %12, %30 : vector<16x16xi32>
    %cst_14 = arith.constant 1.000000e+00 : f32
    %cst_15 = arith.constant 0.000000e+00 : f32
    %32 = vector.broadcast %cst_14 : f32 to vector<16x16xf32>
    %33 = vector.broadcast %cst_15 : f32 to vector<16x16xf32>
    %34 = arith.select %31, %32, %33 : vector<16x16xi1>, vector<16x16xf32>
    %35 = arith.addf %24, %34 : vector<16x16xf32>
    %c0_i32_16 = arith.constant 0 : i32
    %36 = vector.broadcast %c0_i32_16 : i32 to vector<16x16xi32>
    %37 = arith.addi %11, %36 : vector<16x16xi32>
    %c0_i32_17 = arith.constant 0 : i32
    %c15_i32_18 = arith.constant 15 : i32
    %38 = vector.broadcast %c0_i32_17 : i32 to vector<16x16xi32>
    %39 = arith.maxsi %38, %37 : vector<16x16xi32>
    %40 = vector.broadcast %c15_i32_18 : i32 to vector<16x16xi32>
    %41 = arith.minsi %40, %39 : vector<16x16xi32>
    %42 = arith.cmpi eq, %12, %41 : vector<16x16xi32>
    %cst_19 = arith.constant 1.000000e+00 : f32
    %cst_20 = arith.constant 0.000000e+00 : f32
    %43 = vector.broadcast %cst_19 : f32 to vector<16x16xf32>
    %44 = vector.broadcast %cst_20 : f32 to vector<16x16xf32>
    %45 = arith.select %42, %43, %44 : vector<16x16xi1>, vector<16x16xf32>
    %46 = arith.addf %35, %45 : vector<16x16xf32>
    %c1_i32 = arith.constant 1 : i32
    %47 = vector.broadcast %c1_i32 : i32 to vector<16x16xi32>
    %48 = arith.addi %11, %47 : vector<16x16xi32>
    %c0_i32_21 = arith.constant 0 : i32
    %c15_i32_22 = arith.constant 15 : i32
    %49 = vector.broadcast %c0_i32_21 : i32 to vector<16x16xi32>
    %50 = arith.maxsi %49, %48 : vector<16x16xi32>
    %51 = vector.broadcast %c15_i32_22 : i32 to vector<16x16xi32>
    %52 = arith.minsi %51, %50 : vector<16x16xi32>
    %53 = arith.cmpi eq, %12, %52 : vector<16x16xi32>
    %cst_23 = arith.constant 1.000000e+00 : f32
    %cst_24 = arith.constant 0.000000e+00 : f32
    %54 = vector.broadcast %cst_23 : f32 to vector<16x16xf32>
    %55 = vector.broadcast %cst_24 : f32 to vector<16x16xf32>
    %56 = arith.select %53, %54, %55 : vector<16x16xi1>, vector<16x16xf32>
    %57 = arith.addf %46, %56 : vector<16x16xf32>
    %c2_i32 = arith.constant 2 : i32
    %58 = vector.broadcast %c2_i32 : i32 to vector<16x16xi32>
    %59 = arith.addi %11, %58 : vector<16x16xi32>
    %c0_i32_25 = arith.constant 0 : i32
    %c15_i32_26 = arith.constant 15 : i32
    %60 = vector.broadcast %c0_i32_25 : i32 to vector<16x16xi32>
    %61 = arith.maxsi %60, %59 : vector<16x16xi32>
    %62 = vector.broadcast %c15_i32_26 : i32 to vector<16x16xi32>
    %63 = arith.minsi %62, %61 : vector<16x16xi32>
    %64 = arith.cmpi eq, %12, %63 : vector<16x16xi32>
    %cst_27 = arith.constant 1.000000e+00 : f32
    %cst_28 = arith.constant 0.000000e+00 : f32
    %65 = vector.broadcast %cst_27 : f32 to vector<16x16xf32>
    %66 = vector.broadcast %cst_28 : f32 to vector<16x16xf32>
    %67 = arith.select %64, %65, %66 : vector<16x16xi1>, vector<16x16xf32>
    %68 = arith.addf %57, %67 : vector<16x16xf32>
    %cst_29 = arith.constant 5.000000e+00 : f32
    %69 = vector.broadcast %cst_29 : f32 to vector<16x16xf32>
    %70 = arith.divf %68, %69 : vector<16x16xf32>
    %cst_30 = arith.constant dense<0.000000e+00> : vector<16x32xf32>
    %71 = tpu.matmul %70, %10, %cst_30 {dimension_numbers = #tpu.dot_dimension_numbers<[1], [0], [0], [1], [0, 0, 1, 1], [], []>} : vector<16x16xf32>, vector<16x32xf32>, vector<16x32xf32> -> vector<16x32xf32>
    %72 = arith.subf %10, %71 : vector<16x32xf32>
    %c0_31 = arith.constant 0 : index
    %c0_32 = arith.constant 0 : index
    %c0_33 = arith.constant 0 : index
    %73 = vector.load %arg5[%c0_31, %c0_32, %c0_33] : memref<1x16x32xf32, #tpu.memory_space<vmem>>, vector<1x16x32xf32>
    %74 = vector.shape_cast %73 : vector<1x16x32xf32> to vector<16x32xf32>
    %75 = vector.shape_cast %72 : vector<16x32xf32> to vector<1x16x32xf32>
    tpu.vector_store %arg5[%c0_31, %c0_32, %c0_33], %75 {strides = array<i32>} : memref<1x16x32xf32, #tpu.memory_space<vmem>>, vector<1x16x32xf32>,
    %c0_34 = arith.constant 0 : index
    %c0_35 = arith.constant 0 : index
    %c0_36 = arith.constant 0 : index
    %76 = vector.load %arg6[%c0_34, %c0_35, %c0_36] : memref<1x16x32xf32, #tpu.memory_space<vmem>>, vector<1x16x32xf32>
    %77 = vector.shape_cast %76 : vector<1x16x32xf32> to vector<16x32xf32>
    %78 = vector.shape_cast %71 : vector<16x32xf32> to vector<1x16x32xf32>
    tpu.vector_store %arg6[%c0_34, %c0_35, %c0_36], %78 {strides = array<i32>} : memref<1x16x32xf32, #tpu.memory_space<vmem>>, vector<1x16x32xf32>,
    return
  }
  func.func @transform_0(%arg0: i32) -> (i32, i32, i32) {
    %c0_i32 = arith.constant 0 : i32
    %c0_i32_0 = arith.constant 0 : i32
    %c0_i32_1 = arith.constant 0 : i32
    return %arg0, %c0_i32, %c0_i32_0 : i32, i32, i32
  }
  func.func @transform_1(%arg0: i32) -> (i32, i32) {
    %c0_i32 = arith.constant 0 : i32
    %c0_i32_0 = arith.constant 0 : i32
    %c0_i32_1 = arith.constant 0 : i32
    return %c0_i32, %c0_i32_0 : i32, i32
  }
  func.func @transform_2(%arg0: i32) -> (i32, i32) {
    %c0_i32 = arith.constant 0 : i32
    %c0_i32_0 = arith.constant 0 : i32
    %c0_i32_1 = arith.constant 0 : i32
    return %c0_i32, %c0_i32_0 : i32, i32
  }
  func.func @transform_3(%arg0: i32) -> (i32, i32, i32) {
    %c0_i32 = arith.constant 0 : i32
    %c0_i32_0 = arith.constant 0 : i32
    %c0_i32_1 = arith.constant 0 : i32
    return %arg0, %c0_i32, %c0_i32_0 : i32, i32, i32
  }
  func.func @transform_4(%arg0: i32) -> (i32, i32, i32) {
    %c0_i32 = arith.constant 0 : i32
    %c0_i32_0 = arith.constant 0 : i32
    %c0_i32_1 = arith.constant 0 : i32
    return %arg0, %c0_i32, %c0_i32_0 : i32, i32, i32
  }
  func.func @transform_5(%arg0: i32) -> (i32, i32, i32) {
    %c0_i32 = arith.constant 0 : i32
    %c0_i32_0 = arith.constant 0 : i32
    %c0_i32_1 = arith.constant 0 : i32
    return %arg0, %c0_i32, %c0_i32_0 : i32, i32, i32
  }
}

module attributes {stable_mosaic.version = 11 : i64} {
  func.func @_ffn_add_decomp_kernel(%arg0: i32, %arg1: memref<1x16x32xf32, #tpu.memory_space<vmem>>, %arg2: memref<32x64xbf16, #tpu.memory_space<vmem>>, %arg3: memref<64x32xbf16, #tpu.memory_space<vmem>>, %arg4: memref<1x16x32xf32, #tpu.memory_space<vmem>>, %arg5: memref<1x16x32xf32, #tpu.memory_space<vmem>>) attributes {dimension_semantics = [#tpu.dimension_semantics<parallel>], iteration_bounds = array<i64: 2>, scalar_prefetch = 0 : i64, scratch_operands = 0 : i64, tpu.core_type = #tpu.core_type<tc>, window_params = [{transform_indices = @transform_0, window_bounds = array<i64: 1, 16, 32>}, {pipeline_mode = #tpu.pipeline_mode<synchronous>, transform_indices = @transform_1, window_bounds = array<i64: 32, 64>}, {pipeline_mode = #tpu.pipeline_mode<synchronous>, transform_indices = @transform_2, window_bounds = array<i64: 64, 32>}, {transform_indices = @transform_3, window_bounds = array<i64: 1, 16, 32>}, {transform_indices = @transform_4, window_bounds = array<i64: 1, 16, 32>}]} {
    %c0 = arith.constant 0 : index
    %c0_0 = arith.constant 0 : index
    %c0_1 = arith.constant 0 : index
    %0 = vector.load %arg1[%c0, %c0_0, %c0_1] : memref<1x16x32xf32, #tpu.memory_space<vmem>>, vector<1x16x32xf32>
    %1 = vector.shape_cast %0 : vector<1x16x32xf32> to vector<16x32xf32>
    %c0_2 = arith.constant 0 : index
    %c0_3 = arith.constant 0 : index
    %2 = vector.load %arg2[%c0_2, %c0_3] : memref<32x64xbf16, #tpu.memory_space<vmem>>, vector<32x64xbf16>
    %3 = arith.truncf %1 : vector<16x32xf32> to vector<16x32xbf16>
    %cst = arith.constant dense<0.000000e+00> : vector<16x64xf32>
    %4 = tpu.matmul %3, %2, %cst {dimension_numbers = #tpu.dot_dimension_numbers<[1], [0], [0], [1], [0, 0, 1, 1], [], []>} : vector<16x32xbf16>, vector<32x64xbf16>, vector<16x64xf32> -> vector<16x64xf32>
    %cst_4 = arith.constant 0.000000e+00 : f32
    %5 = vector.broadcast %cst_4 : f32 to vector<16x64xf32>
    %6 = arith.maximumf %4, %5 : vector<16x64xf32>
    %c0_5 = arith.constant 0 : index
    %c0_6 = arith.constant 0 : index
    %7 = vector.load %arg3[%c0_5, %c0_6] : memref<64x32xbf16, #tpu.memory_space<vmem>>, vector<64x32xbf16>
    %8 = arith.truncf %6 : vector<16x64xf32> to vector<16x64xbf16>
    %cst_7 = arith.constant dense<0.000000e+00> : vector<16x32xf32>
    %9 = tpu.matmul %8, %7, %cst_7 {dimension_numbers = #tpu.dot_dimension_numbers<[1], [0], [0], [1], [0, 0, 1, 1], [], []>} : vector<16x64xbf16>, vector<64x32xbf16>, vector<16x32xf32> -> vector<16x32xf32>
    %10 = arith.addf %1, %9 : vector<16x32xf32>
    %11 = tpu.iota {dimensions = array<i32: 0>} : vector<16x16xi32>
    %12 = tpu.iota {dimensions = array<i32: 1>} : vector<16x16xi32>
    %cst_8 = arith.constant 0.000000e+00 : f32
    %13 = vector.broadcast %cst_8 : f32 to vector<16x16xf32>
    %c-2_i32 = arith.constant -2 : i32
    %14 = vector.broadcast %c-2_i32 : i32 to vector<16x16xi32>
    %15 = arith.addi %11, %14 : vector<16x16xi32>
    %c0_i32 = arith.constant 0 : i32
    %c15_i32 = arith.constant 15 : i32
    %16 = vector.broadcast %c0_i32 : i32 to vector<16x16xi32>
    %17 = arith.maxsi %16, %15 : vector<16x16xi32>
    %18 = vector.broadcast %c15_i32 : i32 to vector<16x16xi32>
    %19 = arith.minsi %18, %17 : vector<16x16xi32>
    %20 = arith.cmpi eq, %12, %19 : vector<16x16xi32>
    %cst_9 = arith.constant 1.000000e+00 : f32
    %cst_10 = arith.constant 0.000000e+00 : f32
    %21 = vector.broadcast %cst_9 : f32 to vector<16x16xf32>
    %22 = vector.broadcast %cst_10 : f32 to vector<16x16xf32>
    %23 = arith.select %20, %21, %22 : vector<16x16xi1>, vector<16x16xf32>
    %24 = arith.addf %13, %23 : vector<16x16xf32>
    %c-1_i32 = arith.constant -1 : i32
    %25 = vector.broadcast %c-1_i32 : i32 to vector<16x16xi32>
    %26 = arith.addi %11, %25 : vector<16x16xi32>
    %c0_i32_11 = arith.constant 0 : i32
    %c15_i32_12 = arith.constant 15 : i32
    %27 = vector.broadcast %c0_i32_11 : i32 to vector<16x16xi32>
    %28 = arith.maxsi %27, %26 : vector<16x16xi32>
    %29 = vector.broadcast %c15_i32_12 : i32 to vector<16x16xi32>
    %30 = arith.minsi %29, %28 : vector<16x16xi32>
    %31 = arith.cmpi eq, %12, %30 : vector<16x16xi32>
    %cst_13 = arith.constant 1.000000e+00 : f32
    %cst_14 = arith.constant 0.000000e+00 : f32
    %32 = vector.broadcast %cst_13 : f32 to vector<16x16xf32>
    %33 = vector.broadcast %cst_14 : f32 to vector<16x16xf32>
    %34 = arith.select %31, %32, %33 : vector<16x16xi1>, vector<16x16xf32>
    %35 = arith.addf %24, %34 : vector<16x16xf32>
    %c0_i32_15 = arith.constant 0 : i32
    %36 = vector.broadcast %c0_i32_15 : i32 to vector<16x16xi32>
    %37 = arith.addi %11, %36 : vector<16x16xi32>
    %c0_i32_16 = arith.constant 0 : i32
    %c15_i32_17 = arith.constant 15 : i32
    %38 = vector.broadcast %c0_i32_16 : i32 to vector<16x16xi32>
    %39 = arith.maxsi %38, %37 : vector<16x16xi32>
    %40 = vector.broadcast %c15_i32_17 : i32 to vector<16x16xi32>
    %41 = arith.minsi %40, %39 : vector<16x16xi32>
    %42 = arith.cmpi eq, %12, %41 : vector<16x16xi32>
    %cst_18 = arith.constant 1.000000e+00 : f32
    %cst_19 = arith.constant 0.000000e+00 : f32
    %43 = vector.broadcast %cst_18 : f32 to vector<16x16xf32>
    %44 = vector.broadcast %cst_19 : f32 to vector<16x16xf32>
    %45 = arith.select %42, %43, %44 : vector<16x16xi1>, vector<16x16xf32>
    %46 = arith.addf %35, %45 : vector<16x16xf32>
    %c1_i32 = arith.constant 1 : i32
    %47 = vector.broadcast %c1_i32 : i32 to vector<16x16xi32>
    %48 = arith.addi %11, %47 : vector<16x16xi32>
    %c0_i32_20 = arith.constant 0 : i32
    %c15_i32_21 = arith.constant 15 : i32
    %49 = vector.broadcast %c0_i32_20 : i32 to vector<16x16xi32>
    %50 = arith.maxsi %49, %48 : vector<16x16xi32>
    %51 = vector.broadcast %c15_i32_21 : i32 to vector<16x16xi32>
    %52 = arith.minsi %51, %50 : vector<16x16xi32>
    %53 = arith.cmpi eq, %12, %52 : vector<16x16xi32>
    %cst_22 = arith.constant 1.000000e+00 : f32
    %cst_23 = arith.constant 0.000000e+00 : f32
    %54 = vector.broadcast %cst_22 : f32 to vector<16x16xf32>
    %55 = vector.broadcast %cst_23 : f32 to vector<16x16xf32>
    %56 = arith.select %53, %54, %55 : vector<16x16xi1>, vector<16x16xf32>
    %57 = arith.addf %46, %56 : vector<16x16xf32>
    %c2_i32 = arith.constant 2 : i32
    %58 = vector.broadcast %c2_i32 : i32 to vector<16x16xi32>
    %59 = arith.addi %11, %58 : vector<16x16xi32>
    %c0_i32_24 = arith.constant 0 : i32
    %c15_i32_25 = arith.constant 15 : i32
    %60 = vector.broadcast %c0_i32_24 : i32 to vector<16x16xi32>
    %61 = arith.maxsi %60, %59 : vector<16x16xi32>
    %62 = vector.broadcast %c15_i32_25 : i32 to vector<16x16xi32>
    %63 = arith.minsi %62, %61 : vector<16x16xi32>
    %64 = arith.cmpi eq, %12, %63 : vector<16x16xi32>
    %cst_26 = arith.constant 1.000000e+00 : f32
    %cst_27 = arith.constant 0.000000e+00 : f32
    %65 = vector.broadcast %cst_26 : f32 to vector<16x16xf32>
    %66 = vector.broadcast %cst_27 : f32 to vector<16x16xf32>
    %67 = arith.select %64, %65, %66 : vector<16x16xi1>, vector<16x16xf32>
    %68 = arith.addf %57, %67 : vector<16x16xf32>
    %cst_28 = arith.constant 5.000000e+00 : f32
    %69 = vector.broadcast %cst_28 : f32 to vector<16x16xf32>
    %70 = arith.divf %68, %69 : vector<16x16xf32>
    %cst_29 = arith.constant dense<0.000000e+00> : vector<16x32xf32>
    %71 = tpu.matmul %70, %10, %cst_29 {dimension_numbers = #tpu.dot_dimension_numbers<[1], [0], [0], [1], [0, 0, 1, 1], [], []>} : vector<16x16xf32>, vector<16x32xf32>, vector<16x32xf32> -> vector<16x32xf32>
    %72 = arith.subf %10, %71 : vector<16x32xf32>
    %c0_30 = arith.constant 0 : index
    %c0_31 = arith.constant 0 : index
    %c0_32 = arith.constant 0 : index
    %73 = vector.load %arg4[%c0_30, %c0_31, %c0_32] : memref<1x16x32xf32, #tpu.memory_space<vmem>>, vector<1x16x32xf32>
    %74 = vector.shape_cast %73 : vector<1x16x32xf32> to vector<16x32xf32>
    %75 = vector.shape_cast %72 : vector<16x32xf32> to vector<1x16x32xf32>
    tpu.vector_store %arg4[%c0_30, %c0_31, %c0_32], %75 {strides = array<i32>} : memref<1x16x32xf32, #tpu.memory_space<vmem>>, vector<1x16x32xf32>,
    %c0_33 = arith.constant 0 : index
    %c0_34 = arith.constant 0 : index
    %c0_35 = arith.constant 0 : index
    %76 = vector.load %arg5[%c0_33, %c0_34, %c0_35] : memref<1x16x32xf32, #tpu.memory_space<vmem>>, vector<1x16x32xf32>
    %77 = vector.shape_cast %76 : vector<1x16x32xf32> to vector<16x32xf32>
    %78 = vector.shape_cast %71 : vector<16x32xf32> to vector<1x16x32xf32>
    tpu.vector_store %arg5[%c0_33, %c0_34, %c0_35], %78 {strides = array<i32>} : memref<1x16x32xf32, #tpu.memory_space<vmem>>, vector<1x16x32xf32>,
    return
  }
  func.func @transform_0(%arg0: i32) -> (i32, i32, i32) {
    %c0_i32 = arith.constant 0 : i32
    %c0_i32_0 = arith.constant 0 : i32
    %c0_i32_1 = arith.constant 0 : i32
    return %arg0, %c0_i32, %c0_i32_0 : i32, i32, i32
  }
  func.func @transform_1(%arg0: i32) -> (i32, i32) {
    %c0_i32 = arith.constant 0 : i32
    %c0_i32_0 = arith.constant 0 : i32
    %c0_i32_1 = arith.constant 0 : i32
    return %c0_i32, %c0_i32_0 : i32, i32
  }
  func.func @transform_2(%arg0: i32) -> (i32, i32) {
    %c0_i32 = arith.constant 0 : i32
    %c0_i32_0 = arith.constant 0 : i32
    %c0_i32_1 = arith.constant 0 : i32
    return %c0_i32, %c0_i32_0 : i32, i32
  }
  func.func @transform_3(%arg0: i32) -> (i32, i32, i32) {
    %c0_i32 = arith.constant 0 : i32
    %c0_i32_0 = arith.constant 0 : i32
    %c0_i32_1 = arith.constant 0 : i32
    return %arg0, %c0_i32, %c0_i32_0 : i32, i32, i32
  }
  func.func @transform_4(%arg0: i32) -> (i32, i32, i32) {
    %c0_i32 = arith.constant 0 : i32
    %c0_i32_0 = arith.constant 0 : i32
    %c0_i32_1 = arith.constant 0 : i32
    return %arg0, %c0_i32, %c0_i32_0 : i32, i32, i32
  }
}

module attributes {stable_mosaic.version = 11 : i64} {
  func.func @_my_ln_kernel(%arg0: i32, %arg1: memref<1x16x32xf32, #tpu.memory_space<vmem>>, %arg2: memref<1x32xf32, #tpu.memory_space<vmem>>, %arg3: memref<1x32xf32, #tpu.memory_space<vmem>>, %arg4: memref<1x16x32xf32, #tpu.memory_space<vmem>>) attributes {dimension_semantics = [#tpu.dimension_semantics<parallel>], iteration_bounds = array<i64: 2>, scalar_prefetch = 0 : i64, scratch_operands = 0 : i64, tpu.core_type = #tpu.core_type<tc>, window_params = [{transform_indices = @transform_0, window_bounds = array<i64: 1, 16, 32>}, {pipeline_mode = #tpu.pipeline_mode<synchronous>, transform_indices = @transform_1, window_bounds = array<i64: 1, 32>}, {pipeline_mode = #tpu.pipeline_mode<synchronous>, transform_indices = @transform_2, window_bounds = array<i64: 1, 32>}, {transform_indices = @transform_3, window_bounds = array<i64: 1, 16, 32>}]} {
    %c0 = arith.constant 0 : index
    %c0_0 = arith.constant 0 : index
    %c0_1 = arith.constant 0 : index
    %0 = vector.load %arg1[%c0, %c0_0, %c0_1] : memref<1x16x32xf32, #tpu.memory_space<vmem>>, vector<1x16x32xf32>
    %1 = vector.shape_cast %0 : vector<1x16x32xf32> to vector<16x32xf32>
    %c0_2 = arith.constant 0 : index
    %c0_3 = arith.constant 0 : index
    %2 = vector.load %arg2[%c0_2, %c0_3] : memref<1x32xf32, #tpu.memory_space<vmem>>, vector<1x32xf32>
    %c0_4 = arith.constant 0 : index
    %c0_5 = arith.constant 0 : index
    %3 = vector.load %arg3[%c0_4, %c0_5] : memref<1x32xf32, #tpu.memory_space<vmem>>, vector<1x32xf32>
    %cst = arith.constant dense<0.000000e+00> : vector<16xf32>
    %4 = vector.multi_reduction <add>, %1, %cst [1] : vector<16x32xf32> to vector<16xf32>
    %5 = vector.shape_cast %4 : vector<16xf32> to vector<16x1xf32>
    %cst_6 = arith.constant 3.200000e+01 : f32
    %6 = vector.broadcast %cst_6 : f32 to vector<16x1xf32>
    %7 = arith.divf %5, %6 : vector<16x1xf32>
    %8 = vector.broadcast %7 : vector<16x1xf32> to vector<16x32xf32>
    %9 = arith.subf %1, %8 : vector<16x32xf32>
    %10 = arith.mulf %9, %9 : vector<16x32xf32>
    %cst_7 = arith.constant dense<0.000000e+00> : vector<16xf32>
    %11 = vector.multi_reduction <add>, %10, %cst_7 [1] : vector<16x32xf32> to vector<16xf32>
    %12 = vector.shape_cast %11 : vector<16xf32> to vector<16x1xf32>
    %cst_8 = arith.constant 3.200000e+01 : f32
    %13 = vector.broadcast %cst_8 : f32 to vector<16x1xf32>
    %14 = arith.divf %12, %13 : vector<16x1xf32>
    %15 = vector.broadcast %7 : vector<16x1xf32> to vector<16x32xf32>
    %16 = arith.subf %1, %15 : vector<16x32xf32>
    %cst_9 = arith.constant 9.99999974E-6 : f32
    %17 = vector.broadcast %cst_9 : f32 to vector<16x1xf32>
    %18 = arith.addf %14, %17 : vector<16x1xf32>
    %19 = math.rsqrt %18 : vector<16x1xf32>
    %20 = vector.broadcast %19 : vector<16x1xf32> to vector<16x32xf32>
    %21 = arith.mulf %16, %20 : vector<16x32xf32>
    %22 = vector.broadcast %2 : vector<1x32xf32> to vector<16x32xf32>
    %23 = arith.mulf %21, %22 : vector<16x32xf32>
    %24 = vector.broadcast %3 : vector<1x32xf32> to vector<16x32xf32>
    %25 = arith.addf %23, %24 : vector<16x32xf32>
    %cst_10 = arith.constant dense<0.000000e+00> : vector<32xf32>
    %26 = vector.multi_reduction <add>, %25, %cst_10 [0] : vector<16x32xf32> to vector<32xf32>
    %27 = vector.shape_cast %26 : vector<32xf32> to vector<1x32xf32>
    %cst_11 = arith.constant 1.600000e+01 : f32
    %28 = vector.broadcast %cst_11 : f32 to vector<1x32xf32>
    %29 = arith.divf %27, %28 : vector<1x32xf32>
    %30 = vector.broadcast %29 : vector<1x32xf32> to vector<16x32xf32>
    %31 = arith.subf %25, %30 : vector<16x32xf32>
    %c0_12 = arith.constant 0 : index
    %c0_13 = arith.constant 0 : index
    %c0_14 = arith.constant 0 : index
    %32 = vector.load %arg4[%c0_12, %c0_13, %c0_14] : memref<1x16x32xf32, #tpu.memory_space<vmem>>, vector<1x16x32xf32>
    %33 = vector.shape_cast %32 : vector<1x16x32xf32> to vector<16x32xf32>
    %34 = vector.shape_cast %31 : vector<16x32xf32> to vector<1x16x32xf32>
    tpu.vector_store %arg4[%c0_12, %c0_13, %c0_14], %34 {strides = array<i32>} : memref<1x16x32xf32, #tpu.memory_space<vmem>>, vector<1x16x32xf32>,
    return
  }
  func.func @transform_0(%arg0: i32) -> (i32, i32, i32) {
    %c0_i32 = arith.constant 0 : i32
    %c0_i32_0 = arith.constant 0 : i32
    %c0_i32_1 = arith.constant 0 : i32
    return %arg0, %c0_i32, %c0_i32_0 : i32, i32, i32
  }
  func.func @transform_1(%arg0: i32) -> (i32, i32) {
    %c0_i32 = arith.constant 0 : i32
    %c0_i32_0 = arith.constant 0 : i32
    %c0_i32_1 = arith.constant 0 : i32
    return %c0_i32, %c0_i32_0 : i32, i32
  }
  func.func @transform_2(%arg0: i32) -> (i32, i32) {
    %c0_i32 = arith.constant 0 : i32
    %c0_i32_0 = arith.constant 0 : i32
    %c0_i32_1 = arith.constant 0 : i32
    return %c0_i32, %c0_i32_0 : i32, i32
  }
  func.func @transform_3(%arg0: i32) -> (i32, i32, i32) {
    %c0_i32 = arith.constant 0 : i32
    %c0_i32_0 = arith.constant 0 : i32
    %c0_i32_1 = arith.constant 0 : i32
    return %arg0, %c0_i32, %c0_i32_0 : i32, i32, i32
  }
}

module attributes {stable_mosaic.version = 11 : i64} {
  func.func @_linear_kernel(%arg0: i32, %arg1: i32, %arg2: i32, %arg3: memref<32x32xf32, #tpu.memory_space<vmem>>, %arg4: memref<32x64xbf16, #tpu.memory_space<vmem>>, %arg5: memref<1x64xf32, #tpu.memory_space<vmem>>, %arg6: memref<32x64xf32, #tpu.memory_space<vmem>>, %arg7: memref<32x64xf32, #tpu.memory_space<vmem>>) attributes {dimension_semantics = [#tpu.dimension_semantics<parallel>, #tpu.dimension_semantics<parallel>, #tpu.dimension_semantics<arbitrary>], iteration_bounds = array<i64: 1, 1, 1>, scalar_prefetch = 0 : i64, scratch_operands = 1 : i64, tpu.core_type = #tpu.core_type<tc>, window_params = [{transform_indices = @transform_0, window_bounds = array<i64: 32, 32>}, {transform_indices = @transform_1, window_bounds = array<i64: 32, 64>}, {transform_indices = @transform_2, window_bounds = array<i64: 1, 64>}, {transform_indices = @transform_3, window_bounds = array<i64: 32, 64>}]} {
    %c0_i32 = arith.constant 0 : i32
    %0 = arith.cmpi eq, %arg2, %c0_i32 : i32
    %1 = arith.extui %0 : i1 to i32
    %c0_i32_0 = arith.constant 0 : i32
    %2 = arith.cmpi ne, %1, %c0_i32_0 : i32
    scf.if %2 {
      %cst_10 = arith.constant 0.000000e+00 : f32
      %13 = vector.broadcast %cst_10 : f32 to vector<32x64xf32>
      %c0_11 = arith.constant 0 : index
      %c0_12 = arith.constant 0 : index
      %14 = vector.load %arg7[%c0_11, %c0_12] : memref<32x64xf32, #tpu.memory_space<vmem>>, vector<32x64xf32>
      tpu.vector_store %arg7[%c0_11, %c0_12], %13 {strides = array<i32>} : memref<32x64xf32, #tpu.memory_space<vmem>>, vector<32x64xf32>,
    } else {
    }
    %c0 = arith.constant 0 : index
    %c0_1 = arith.constant 0 : index
    %3 = vector.load %arg7[%c0, %c0_1] : memref<32x64xf32, #tpu.memory_space<vmem>>, vector<32x64xf32>
    %c0_2 = arith.constant 0 : index
    %c0_3 = arith.constant 0 : index
    %4 = vector.load %arg3[%c0_2, %c0_3] : memref<32x32xf32, #tpu.memory_space<vmem>>, vector<32x32xf32>
    %c0_4 = arith.constant 0 : index
    %c0_5 = arith.constant 0 : index
    %5 = vector.load %arg4[%c0_4, %c0_5] : memref<32x64xbf16, #tpu.memory_space<vmem>>, vector<32x64xbf16>
    %6 = arith.truncf %4 : vector<32x32xf32> to vector<32x32xbf16>
    %cst = arith.constant dense<0.000000e+00> : vector<32x64xf32>
    %7 = tpu.matmul %6, %5, %cst {dimension_numbers = #tpu.dot_dimension_numbers<[1], [0], [0], [1], [0, 0, 1, 1], [], []>} : vector<32x32xbf16>, vector<32x64xbf16>, vector<32x64xf32> -> vector<32x64xf32>
    %8 = arith.addf %3, %7 : vector<32x64xf32>
    %c0_6 = arith.constant 0 : index
    %c0_7 = arith.constant 0 : index
    %9 = vector.load %arg7[%c0_6, %c0_7] : memref<32x64xf32, #tpu.memory_space<vmem>>, vector<32x64xf32>
    tpu.vector_store %arg7[%c0_6, %c0_7], %8 {strides = array<i32>} : memref<32x64xf32, #tpu.memory_space<vmem>>, vector<32x64xf32>,
    %c0_i32_8 = arith.constant 0 : i32
    %10 = arith.cmpi eq, %arg2, %c0_i32_8 : i32
    %11 = arith.extui %10 : i1 to i32
    %c0_i32_9 = arith.constant 0 : i32
    %12 = arith.cmpi ne, %11, %c0_i32_9 : i32
    scf.if %12 {
      %c0_10 = arith.constant 0 : index
      %c0_11 = arith.constant 0 : index
      %13 = vector.load %arg7[%c0_10, %c0_11] : memref<32x64xf32, #tpu.memory_space<vmem>>, vector<32x64xf32>
      %c0_12 = arith.constant 0 : index
      %c0_13 = arith.constant 0 : index
      %14 = vector.load %arg5[%c0_12, %c0_13] : memref<1x64xf32, #tpu.memory_space<vmem>>, vector<1x64xf32>
      %15 = vector.broadcast %14 : vector<1x64xf32> to vector<32x64xf32>
      %16 = arith.addf %13, %15 : vector<32x64xf32>
      %c0_14 = arith.constant 0 : index
      %c0_15 = arith.constant 0 : index
      %17 = vector.load %arg6[%c0_14, %c0_15] : memref<32x64xf32, #tpu.memory_space<vmem>>, vector<32x64xf32>
      tpu.vector_store %arg6[%c0_14, %c0_15], %16 {strides = array<i32>} : memref<32x64xf32, #tpu.memory_space<vmem>>, vector<32x64xf32>,
    } else {
    }
    return
  }
  func.func @transform_0(%arg0: i32, %arg1: i32, %arg2: i32) -> (i32, i32) {
    %c0_i32 = arith.constant 0 : i32
    return %arg0, %arg2 : i32, i32
  }
  func.func @transform_1(%arg0: i32, %arg1: i32, %arg2: i32) -> (i32, i32) {
    %c0_i32 = arith.constant 0 : i32
    return %arg2, %arg1 : i32, i32
  }
  func.func @transform_2(%arg0: i32, %arg1: i32, %arg2: i32) -> (i32, i32) {
    %c0_i32 = arith.constant 0 : i32
    %c0_i32_0 = arith.constant 0 : i32
    return %c0_i32, %arg1 : i32, i32
  }
  func.func @transform_3(%arg0: i32, %arg1: i32, %arg2: i32) -> (i32, i32) {
    %c0_i32 = arith.constant 0 : i32
    return %arg0, %arg1 : i32, i32
  }
}

module attributes {stable_mosaic.version = 11 : i64} {
  func.func @_linear_kernel(%arg0: i32, %arg1: i32, %arg2: i32, %arg3: memref<16x32xf32, #tpu.memory_space<vmem>>, %arg4: memref<32x32xbf16, #tpu.memory_space<vmem>>, %arg5: memref<1x32xf32, #tpu.memory_space<vmem>>, %arg6: memref<16x32xf32, #tpu.memory_space<vmem>>, %arg7: memref<16x32xf32, #tpu.memory_space<vmem>>) attributes {dimension_semantics = [#tpu.dimension_semantics<parallel>, #tpu.dimension_semantics<parallel>, #tpu.dimension_semantics<arbitrary>], iteration_bounds = array<i64: 1, 1, 1>, scalar_prefetch = 0 : i64, scratch_operands = 1 : i64, tpu.core_type = #tpu.core_type<tc>, window_params = [{transform_indices = @transform_0, window_bounds = array<i64: 16, 32>}, {transform_indices = @transform_1, window_bounds = array<i64: 32, 32>}, {transform_indices = @transform_2, window_bounds = array<i64: 1, 32>}, {transform_indices = @transform_3, window_bounds = array<i64: 16, 32>}]} {
    %c0_i32 = arith.constant 0 : i32
    %0 = arith.cmpi eq, %arg2, %c0_i32 : i32
    %1 = arith.extui %0 : i1 to i32
    %c0_i32_0 = arith.constant 0 : i32
    %2 = arith.cmpi ne, %1, %c0_i32_0 : i32
    scf.if %2 {
      %cst_10 = arith.constant 0.000000e+00 : f32
      %13 = vector.broadcast %cst_10 : f32 to vector<16x32xf32>
      %c0_11 = arith.constant 0 : index
      %c0_12 = arith.constant 0 : index
      %14 = vector.load %arg7[%c0_11, %c0_12] : memref<16x32xf32, #tpu.memory_space<vmem>>, vector<16x32xf32>
      tpu.vector_store %arg7[%c0_11, %c0_12], %13 {strides = array<i32>} : memref<16x32xf32, #tpu.memory_space<vmem>>, vector<16x32xf32>,
    } else {
    }
    %c0 = arith.constant 0 : index
    %c0_1 = arith.constant 0 : index
    %3 = vector.load %arg7[%c0, %c0_1] : memref<16x32xf32, #tpu.memory_space<vmem>>, vector<16x32xf32>
    %c0_2 = arith.constant 0 : index
    %c0_3 = arith.constant 0 : index
    %4 = vector.load %arg3[%c0_2, %c0_3] : memref<16x32xf32, #tpu.memory_space<vmem>>, vector<16x32xf32>
    %c0_4 = arith.constant 0 : index
    %c0_5 = arith.constant 0 : index
    %5 = vector.load %arg4[%c0_4, %c0_5] : memref<32x32xbf16, #tpu.memory_space<vmem>>, vector<32x32xbf16>
    %6 = arith.truncf %4 : vector<16x32xf32> to vector<16x32xbf16>
    %cst = arith.constant dense<0.000000e+00> : vector<16x32xf32>
    %7 = tpu.matmul %6, %5, %cst {dimension_numbers = #tpu.dot_dimension_numbers<[1], [0], [0], [1], [0, 0, 1, 1], [], []>} : vector<16x32xbf16>, vector<32x32xbf16>, vector<16x32xf32> -> vector<16x32xf32>
    %8 = arith.addf %3, %7 : vector<16x32xf32>
    %c0_6 = arith.constant 0 : index
    %c0_7 = arith.constant 0 : index
    %9 = vector.load %arg7[%c0_6, %c0_7] : memref<16x32xf32, #tpu.memory_space<vmem>>, vector<16x32xf32>
    tpu.vector_store %arg7[%c0_6, %c0_7], %8 {strides = array<i32>} : memref<16x32xf32, #tpu.memory_space<vmem>>, vector<16x32xf32>,
    %c0_i32_8 = arith.constant 0 : i32
    %10 = arith.cmpi eq, %arg2, %c0_i32_8 : i32
    %11 = arith.extui %10 : i1 to i32
    %c0_i32_9 = arith.constant 0 : i32
    %12 = arith.cmpi ne, %11, %c0_i32_9 : i32
    scf.if %12 {
      %c0_10 = arith.constant 0 : index
      %c0_11 = arith.constant 0 : index
      %13 = vector.load %arg7[%c0_10, %c0_11] : memref<16x32xf32, #tpu.memory_space<vmem>>, vector<16x32xf32>
      %c0_12 = arith.constant 0 : index
      %c0_13 = arith.constant 0 : index
      %14 = vector.load %arg5[%c0_12, %c0_13] : memref<1x32xf32, #tpu.memory_space<vmem>>, vector<1x32xf32>
      %15 = vector.broadcast %14 : vector<1x32xf32> to vector<16x32xf32>
      %16 = arith.addf %13, %15 : vector<16x32xf32>
      %c0_14 = arith.constant 0 : index
      %c0_15 = arith.constant 0 : index
      %17 = vector.load %arg6[%c0_14, %c0_15] : memref<16x32xf32, #tpu.memory_space<vmem>>, vector<16x32xf32>
      tpu.vector_store %arg6[%c0_14, %c0_15], %16 {strides = array<i32>} : memref<16x32xf32, #tpu.memory_space<vmem>>, vector<16x32xf32>,
    } else {
    }
    return
  }
  func.func @transform_0(%arg0: i32, %arg1: i32, %arg2: i32) -> (i32, i32) {
    %c0_i32 = arith.constant 0 : i32
    return %arg0, %arg2 : i32, i32
  }
  func.func @transform_1(%arg0: i32, %arg1: i32, %arg2: i32) -> (i32, i32) {
    %c0_i32 = arith.constant 0 : i32
    return %arg2, %arg1 : i32, i32
  }
  func.func @transform_2(%arg0: i32, %arg1: i32, %arg2: i32) -> (i32, i32) {
    %c0_i32 = arith.constant 0 : i32
    %c0_i32_0 = arith.constant 0 : i32
    return %c0_i32, %arg1 : i32, i32
  }
  func.func @transform_3(%arg0: i32, %arg1: i32, %arg2: i32) -> (i32, i32) {
    %c0_i32 = arith.constant 0 : i32
    return %arg0, %arg1 : i32, i32
  }
}

module attributes {stable_mosaic.version = 11 : i64} {
  func.func @_linear_kernel(%arg0: i32, %arg1: i32, %arg2: i32, %arg3: memref<16x32xf32, #tpu.memory_space<vmem>>, %arg4: memref<32x64xbf16, #tpu.memory_space<vmem>>, %arg5: memref<1x64xf32, #tpu.memory_space<vmem>>, %arg6: memref<16x64xf32, #tpu.memory_space<vmem>>, %arg7: memref<16x64xf32, #tpu.memory_space<vmem>>) attributes {dimension_semantics = [#tpu.dimension_semantics<parallel>, #tpu.dimension_semantics<parallel>, #tpu.dimension_semantics<arbitrary>], iteration_bounds = array<i64: 1, 1, 1>, scalar_prefetch = 0 : i64, scratch_operands = 1 : i64, tpu.core_type = #tpu.core_type<tc>, window_params = [{transform_indices = @transform_0, window_bounds = array<i64: 16, 32>}, {transform_indices = @transform_1, window_bounds = array<i64: 32, 64>}, {transform_indices = @transform_2, window_bounds = array<i64: 1, 64>}, {transform_indices = @transform_3, window_bounds = array<i64: 16, 64>}]} {
    %c0_i32 = arith.constant 0 : i32
    %0 = arith.cmpi eq, %arg2, %c0_i32 : i32
    %1 = arith.extui %0 : i1 to i32
    %c0_i32_0 = arith.constant 0 : i32
    %2 = arith.cmpi ne, %1, %c0_i32_0 : i32
    scf.if %2 {
      %cst_10 = arith.constant 0.000000e+00 : f32
      %13 = vector.broadcast %cst_10 : f32 to vector<16x64xf32>
      %c0_11 = arith.constant 0 : index
      %c0_12 = arith.constant 0 : index
      %14 = vector.load %arg7[%c0_11, %c0_12] : memref<16x64xf32, #tpu.memory_space<vmem>>, vector<16x64xf32>
      tpu.vector_store %arg7[%c0_11, %c0_12], %13 {strides = array<i32>} : memref<16x64xf32, #tpu.memory_space<vmem>>, vector<16x64xf32>,
    } else {
    }
    %c0 = arith.constant 0 : index
    %c0_1 = arith.constant 0 : index
    %3 = vector.load %arg7[%c0, %c0_1] : memref<16x64xf32, #tpu.memory_space<vmem>>, vector<16x64xf32>
    %c0_2 = arith.constant 0 : index
    %c0_3 = arith.constant 0 : index
    %4 = vector.load %arg3[%c0_2, %c0_3] : memref<16x32xf32, #tpu.memory_space<vmem>>, vector<16x32xf32>
    %c0_4 = arith.constant 0 : index
    %c0_5 = arith.constant 0 : index
    %5 = vector.load %arg4[%c0_4, %c0_5] : memref<32x64xbf16, #tpu.memory_space<vmem>>, vector<32x64xbf16>
    %6 = arith.truncf %4 : vector<16x32xf32> to vector<16x32xbf16>
    %cst = arith.constant dense<0.000000e+00> : vector<16x64xf32>
    %7 = tpu.matmul %6, %5, %cst {dimension_numbers = #tpu.dot_dimension_numbers<[1], [0], [0], [1], [0, 0, 1, 1], [], []>} : vector<16x32xbf16>, vector<32x64xbf16>, vector<16x64xf32> -> vector<16x64xf32>
    %8 = arith.addf %3, %7 : vector<16x64xf32>
    %c0_6 = arith.constant 0 : index
    %c0_7 = arith.constant 0 : index
    %9 = vector.load %arg7[%c0_6, %c0_7] : memref<16x64xf32, #tpu.memory_space<vmem>>, vector<16x64xf32>
    tpu.vector_store %arg7[%c0_6, %c0_7], %8 {strides = array<i32>} : memref<16x64xf32, #tpu.memory_space<vmem>>, vector<16x64xf32>,
    %c0_i32_8 = arith.constant 0 : i32
    %10 = arith.cmpi eq, %arg2, %c0_i32_8 : i32
    %11 = arith.extui %10 : i1 to i32
    %c0_i32_9 = arith.constant 0 : i32
    %12 = arith.cmpi ne, %11, %c0_i32_9 : i32
    scf.if %12 {
      %c0_10 = arith.constant 0 : index
      %c0_11 = arith.constant 0 : index
      %13 = vector.load %arg7[%c0_10, %c0_11] : memref<16x64xf32, #tpu.memory_space<vmem>>, vector<16x64xf32>
      %c0_12 = arith.constant 0 : index
      %c0_13 = arith.constant 0 : index
      %14 = vector.load %arg5[%c0_12, %c0_13] : memref<1x64xf32, #tpu.memory_space<vmem>>, vector<1x64xf32>
      %15 = vector.broadcast %14 : vector<1x64xf32> to vector<16x64xf32>
      %16 = arith.addf %13, %15 : vector<16x64xf32>
      %c0_14 = arith.constant 0 : index
      %c0_15 = arith.constant 0 : index
      %17 = vector.load %arg6[%c0_14, %c0_15] : memref<16x64xf32, #tpu.memory_space<vmem>>, vector<16x64xf32>
      tpu.vector_store %arg6[%c0_14, %c0_15], %16 {strides = array<i32>} : memref<16x64xf32, #tpu.memory_space<vmem>>, vector<16x64xf32>,
    } else {
    }
    return
  }
  func.func @transform_0(%arg0: i32, %arg1: i32, %arg2: i32) -> (i32, i32) {
    %c0_i32 = arith.constant 0 : i32
    return %arg0, %arg2 : i32, i32
  }
  func.func @transform_1(%arg0: i32, %arg1: i32, %arg2: i32) -> (i32, i32) {
    %c0_i32 = arith.constant 0 : i32
    return %arg2, %arg1 : i32, i32
  }
  func.func @transform_2(%arg0: i32, %arg1: i32, %arg2: i32) -> (i32, i32) {
    %c0_i32 = arith.constant 0 : i32
    %c0_i32_0 = arith.constant 0 : i32
    return %c0_i32, %arg1 : i32, i32
  }
  func.func @transform_3(%arg0: i32, %arg1: i32, %arg2: i32) -> (i32, i32) {
    %c0_i32 = arith.constant 0 : i32
    return %arg0, %arg1 : i32, i32
  }
}

module attributes {stable_mosaic.version = 11 : i64} {
  func.func @_ffn_add_decomp_kernel(%arg0: i32, %arg1: memref<1x24x32xf32, #tpu.memory_space<vmem>>, %arg2: memref<32x64xbf16, #tpu.memory_space<vmem>>, %arg3: memref<64x32xbf16, #tpu.memory_space<vmem>>, %arg4: memref<1x24x32xf32, #tpu.memory_space<vmem>>, %arg5: memref<1x24x32xf32, #tpu.memory_space<vmem>>) attributes {dimension_semantics = [#tpu.dimension_semantics<parallel>], iteration_bounds = array<i64: 2>, scalar_prefetch = 0 : i64, scratch_operands = 0 : i64, tpu.core_type = #tpu.core_type<tc>, window_params = [{transform_indices = @transform_0, window_bounds = array<i64: 1, 24, 32>}, {pipeline_mode = #tpu.pipeline_mode<synchronous>, transform_indices = @transform_1, window_bounds = array<i64: 32, 64>}, {pipeline_mode = #tpu.pipeline_mode<synchronous>, transform_indices = @transform_2, window_bounds = array<i64: 64, 32>}, {transform_indices = @transform_3, window_bounds = array<i64: 1, 24, 32>}, {transform_indices = @transform_4, window_bounds = array<i64: 1, 24, 32>}]} {
    %c0 = arith.constant 0 : index
    %c0_0 = arith.constant 0 : index
    %c0_1 = arith.constant 0 : index
    %0 = vector.load %arg1[%c0, %c0_0, %c0_1] : memref<1x24x32xf32, #tpu.memory_space<vmem>>, vector<1x24x32xf32>
    %1 = vector.shape_cast %0 : vector<1x24x32xf32> to vector<24x32xf32>
    %c0_2 = arith.constant 0 : index
    %c0_3 = arith.constant 0 : index
    %2 = vector.load %arg2[%c0_2, %c0_3] : memref<32x64xbf16, #tpu.memory_space<vmem>>, vector<32x64xbf16>
    %3 = arith.truncf %1 : vector<24x32xf32> to vector<24x32xbf16>
    %cst = arith.constant dense<0.000000e+00> : vector<24x64xf32>
    %4 = tpu.matmul %3, %2, %cst {dimension_numbers = #tpu.dot_dimension_numbers<[1], [0], [0], [1], [0, 0, 1, 1], [], []>} : vector<24x32xbf16>, vector<32x64xbf16>, vector<24x64xf32> -> vector<24x64xf32>
    %cst_4 = arith.constant 0.000000e+00 : f32
    %5 = vector.broadcast %cst_4 : f32 to vector<24x64xf32>
    %6 = arith.maximumf %4, %5 : vector<24x64xf32>
    %c0_5 = arith.constant 0 : index
    %c0_6 = arith.constant 0 : index
    %7 = vector.load %arg3[%c0_5, %c0_6] : memref<64x32xbf16, #tpu.memory_space<vmem>>, vector<64x32xbf16>
    %8 = arith.truncf %6 : vector<24x64xf32> to vector<24x64xbf16>
    %cst_7 = arith.constant dense<0.000000e+00> : vector<24x32xf32>
    %9 = tpu.matmul %8, %7, %cst_7 {dimension_numbers = #tpu.dot_dimension_numbers<[1], [0], [0], [1], [0, 0, 1, 1], [], []>} : vector<24x64xbf16>, vector<64x32xbf16>, vector<24x32xf32> -> vector<24x32xf32>
    %10 = arith.addf %1, %9 : vector<24x32xf32>
    %11 = tpu.iota {dimensions = array<i32: 0>} : vector<24x24xi32>
    %12 = tpu.iota {dimensions = array<i32: 1>} : vector<24x24xi32>
    %cst_8 = arith.constant 0.000000e+00 : f32
    %13 = vector.broadcast %cst_8 : f32 to vector<24x24xf32>
    %c-2_i32 = arith.constant -2 : i32
    %14 = vector.broadcast %c-2_i32 : i32 to vector<24x24xi32>
    %15 = arith.addi %11, %14 : vector<24x24xi32>
    %c0_i32 = arith.constant 0 : i32
    %c23_i32 = arith.constant 23 : i32
    %16 = vector.broadcast %c0_i32 : i32 to vector<24x24xi32>
    %17 = arith.maxsi %16, %15 : vector<24x24xi32>
    %18 = vector.broadcast %c23_i32 : i32 to vector<24x24xi32>
    %19 = arith.minsi %18, %17 : vector<24x24xi32>
    %20 = arith.cmpi eq, %12, %19 : vector<24x24xi32>
    %cst_9 = arith.constant 1.000000e+00 : f32
    %cst_10 = arith.constant 0.000000e+00 : f32
    %21 = vector.broadcast %cst_9 : f32 to vector<24x24xf32>
    %22 = vector.broadcast %cst_10 : f32 to vector<24x24xf32>
    %23 = arith.select %20, %21, %22 : vector<24x24xi1>, vector<24x24xf32>
    %24 = arith.addf %13, %23 : vector<24x24xf32>
    %c-1_i32 = arith.constant -1 : i32
    %25 = vector.broadcast %c-1_i32 : i32 to vector<24x24xi32>
    %26 = arith.addi %11, %25 : vector<24x24xi32>
    %c0_i32_11 = arith.constant 0 : i32
    %c23_i32_12 = arith.constant 23 : i32
    %27 = vector.broadcast %c0_i32_11 : i32 to vector<24x24xi32>
    %28 = arith.maxsi %27, %26 : vector<24x24xi32>
    %29 = vector.broadcast %c23_i32_12 : i32 to vector<24x24xi32>
    %30 = arith.minsi %29, %28 : vector<24x24xi32>
    %31 = arith.cmpi eq, %12, %30 : vector<24x24xi32>
    %cst_13 = arith.constant 1.000000e+00 : f32
    %cst_14 = arith.constant 0.000000e+00 : f32
    %32 = vector.broadcast %cst_13 : f32 to vector<24x24xf32>
    %33 = vector.broadcast %cst_14 : f32 to vector<24x24xf32>
    %34 = arith.select %31, %32, %33 : vector<24x24xi1>, vector<24x24xf32>
    %35 = arith.addf %24, %34 : vector<24x24xf32>
    %c0_i32_15 = arith.constant 0 : i32
    %36 = vector.broadcast %c0_i32_15 : i32 to vector<24x24xi32>
    %37 = arith.addi %11, %36 : vector<24x24xi32>
    %c0_i32_16 = arith.constant 0 : i32
    %c23_i32_17 = arith.constant 23 : i32
    %38 = vector.broadcast %c0_i32_16 : i32 to vector<24x24xi32>
    %39 = arith.maxsi %38, %37 : vector<24x24xi32>
    %40 = vector.broadcast %c23_i32_17 : i32 to vector<24x24xi32>
    %41 = arith.minsi %40, %39 : vector<24x24xi32>
    %42 = arith.cmpi eq, %12, %41 : vector<24x24xi32>
    %cst_18 = arith.constant 1.000000e+00 : f32
    %cst_19 = arith.constant 0.000000e+00 : f32
    %43 = vector.broadcast %cst_18 : f32 to vector<24x24xf32>
    %44 = vector.broadcast %cst_19 : f32 to vector<24x24xf32>
    %45 = arith.select %42, %43, %44 : vector<24x24xi1>, vector<24x24xf32>
    %46 = arith.addf %35, %45 : vector<24x24xf32>
    %c1_i32 = arith.constant 1 : i32
    %47 = vector.broadcast %c1_i32 : i32 to vector<24x24xi32>
    %48 = arith.addi %11, %47 : vector<24x24xi32>
    %c0_i32_20 = arith.constant 0 : i32
    %c23_i32_21 = arith.constant 23 : i32
    %49 = vector.broadcast %c0_i32_20 : i32 to vector<24x24xi32>
    %50 = arith.maxsi %49, %48 : vector<24x24xi32>
    %51 = vector.broadcast %c23_i32_21 : i32 to vector<24x24xi32>
    %52 = arith.minsi %51, %50 : vector<24x24xi32>
    %53 = arith.cmpi eq, %12, %52 : vector<24x24xi32>
    %cst_22 = arith.constant 1.000000e+00 : f32
    %cst_23 = arith.constant 0.000000e+00 : f32
    %54 = vector.broadcast %cst_22 : f32 to vector<24x24xf32>
    %55 = vector.broadcast %cst_23 : f32 to vector<24x24xf32>
    %56 = arith.select %53, %54, %55 : vector<24x24xi1>, vector<24x24xf32>
    %57 = arith.addf %46, %56 : vector<24x24xf32>
    %c2_i32 = arith.constant 2 : i32
    %58 = vector.broadcast %c2_i32 : i32 to vector<24x24xi32>
    %59 = arith.addi %11, %58 : vector<24x24xi32>
    %c0_i32_24 = arith.constant 0 : i32
    %c23_i32_25 = arith.constant 23 : i32
    %60 = vector.broadcast %c0_i32_24 : i32 to vector<24x24xi32>
    %61 = arith.maxsi %60, %59 : vector<24x24xi32>
    %62 = vector.broadcast %c23_i32_25 : i32 to vector<24x24xi32>
    %63 = arith.minsi %62, %61 : vector<24x24xi32>
    %64 = arith.cmpi eq, %12, %63 : vector<24x24xi32>
    %cst_26 = arith.constant 1.000000e+00 : f32
    %cst_27 = arith.constant 0.000000e+00 : f32
    %65 = vector.broadcast %cst_26 : f32 to vector<24x24xf32>
    %66 = vector.broadcast %cst_27 : f32 to vector<24x24xf32>
    %67 = arith.select %64, %65, %66 : vector<24x24xi1>, vector<24x24xf32>
    %68 = arith.addf %57, %67 : vector<24x24xf32>
    %cst_28 = arith.constant 5.000000e+00 : f32
    %69 = vector.broadcast %cst_28 : f32 to vector<24x24xf32>
    %70 = arith.divf %68, %69 : vector<24x24xf32>
    %cst_29 = arith.constant dense<0.000000e+00> : vector<24x32xf32>
    %71 = tpu.matmul %70, %10, %cst_29 {dimension_numbers = #tpu.dot_dimension_numbers<[1], [0], [0], [1], [0, 0, 1, 1], [], []>} : vector<24x24xf32>, vector<24x32xf32>, vector<24x32xf32> -> vector<24x32xf32>
    %72 = arith.subf %10, %71 : vector<24x32xf32>
    %c0_30 = arith.constant 0 : index
    %c0_31 = arith.constant 0 : index
    %c0_32 = arith.constant 0 : index
    %73 = vector.load %arg4[%c0_30, %c0_31, %c0_32] : memref<1x24x32xf32, #tpu.memory_space<vmem>>, vector<1x24x32xf32>
    %74 = vector.shape_cast %73 : vector<1x24x32xf32> to vector<24x32xf32>
    %75 = vector.shape_cast %72 : vector<24x32xf32> to vector<1x24x32xf32>
    tpu.vector_store %arg4[%c0_30, %c0_31, %c0_32], %75 {strides = array<i32>} : memref<1x24x32xf32, #tpu.memory_space<vmem>>, vector<1x24x32xf32>,
    %c0_33 = arith.constant 0 : index
    %c0_34 = arith.constant 0 : index
    %c0_35 = arith.constant 0 : index
    %76 = vector.load %arg5[%c0_33, %c0_34, %c0_35] : memref<1x24x32xf32, #tpu.memory_space<vmem>>, vector<1x24x32xf32>
    %77 = vector.shape_cast %76 : vector<1x24x32xf32> to vector<24x32xf32>
    %78 = vector.shape_cast %71 : vector<24x32xf32> to vector<1x24x32xf32>
    tpu.vector_store %arg5[%c0_33, %c0_34, %c0_35], %78 {strides = array<i32>} : memref<1x24x32xf32, #tpu.memory_space<vmem>>, vector<1x24x32xf32>,
    return
  }
  func.func @transform_0(%arg0: i32) -> (i32, i32, i32) {
    %c0_i32 = arith.constant 0 : i32
    %c0_i32_0 = arith.constant 0 : i32
    %c0_i32_1 = arith.constant 0 : i32
    return %arg0, %c0_i32, %c0_i32_0 : i32, i32, i32
  }
  func.func @transform_1(%arg0: i32) -> (i32, i32) {
    %c0_i32 = arith.constant 0 : i32
    %c0_i32_0 = arith.constant 0 : i32
    %c0_i32_1 = arith.constant 0 : i32
    return %c0_i32, %c0_i32_0 : i32, i32
  }
  func.func @transform_2(%arg0: i32) -> (i32, i32) {
    %c0_i32 = arith.constant 0 : i32
    %c0_i32_0 = arith.constant 0 : i32
    %c0_i32_1 = arith.constant 0 : i32
    return %c0_i32, %c0_i32_0 : i32, i32
  }
  func.func @transform_3(%arg0: i32) -> (i32, i32, i32) {
    %c0_i32 = arith.constant 0 : i32
    %c0_i32_0 = arith.constant 0 : i32
    %c0_i32_1 = arith.constant 0 : i32
    return %arg0, %c0_i32, %c0_i32_0 : i32, i32, i32
  }
  func.func @transform_4(%arg0: i32) -> (i32, i32, i32) {
    %c0_i32 = arith.constant 0 : i32
    %c0_i32_0 = arith.constant 0 : i32
    %c0_i32_1 = arith.constant 0 : i32
    return %arg0, %c0_i32, %c0_i32_0 : i32, i32, i32
  }
}

module attributes {stable_mosaic.version = 11 : i64} {
  func.func @_decomp_kernel(%arg0: i32, %arg1: memref<1x24x32xf32, #tpu.memory_space<vmem>>, %arg2: memref<1x24x32xf32, #tpu.memory_space<vmem>>, %arg3: memref<1x24x32xf32, #tpu.memory_space<vmem>>) attributes {dimension_semantics = [#tpu.dimension_semantics<parallel>], iteration_bounds = array<i64: 2>, scalar_prefetch = 0 : i64, scratch_operands = 0 : i64, tpu.core_type = #tpu.core_type<tc>, window_params = [{transform_indices = @transform_0, window_bounds = array<i64: 1, 24, 32>}, {transform_indices = @transform_1, window_bounds = array<i64: 1, 24, 32>}, {transform_indices = @transform_2, window_bounds = array<i64: 1, 24, 32>}]} {
    %c0 = arith.constant 0 : index
    %c0_0 = arith.constant 0 : index
    %c0_1 = arith.constant 0 : index
    %0 = vector.load %arg1[%c0, %c0_0, %c0_1] : memref<1x24x32xf32, #tpu.memory_space<vmem>>, vector<1x24x32xf32>
    %1 = vector.shape_cast %0 : vector<1x24x32xf32> to vector<24x32xf32>
    %2 = tpu.iota {dimensions = array<i32: 0>} : vector<24x24xi32>
    %3 = tpu.iota {dimensions = array<i32: 1>} : vector<24x24xi32>
    %cst = arith.constant 0.000000e+00 : f32
    %4 = vector.broadcast %cst : f32 to vector<24x24xf32>
    %c-2_i32 = arith.constant -2 : i32
    %5 = vector.broadcast %c-2_i32 : i32 to vector<24x24xi32>
    %6 = arith.addi %2, %5 : vector<24x24xi32>
    %c0_i32 = arith.constant 0 : i32
    %c23_i32 = arith.constant 23 : i32
    %7 = vector.broadcast %c0_i32 : i32 to vector<24x24xi32>
    %8 = arith.maxsi %7, %6 : vector<24x24xi32>
    %9 = vector.broadcast %c23_i32 : i32 to vector<24x24xi32>
    %10 = arith.minsi %9, %8 : vector<24x24xi32>
    %11 = arith.cmpi eq, %3, %10 : vector<24x24xi32>
    %cst_2 = arith.constant 1.000000e+00 : f32
    %cst_3 = arith.constant 0.000000e+00 : f32
    %12 = vector.broadcast %cst_2 : f32 to vector<24x24xf32>
    %13 = vector.broadcast %cst_3 : f32 to vector<24x24xf32>
    %14 = arith.select %11, %12, %13 : vector<24x24xi1>, vector<24x24xf32>
    %15 = arith.addf %4, %14 : vector<24x24xf32>
    %c-1_i32 = arith.constant -1 : i32
    %16 = vector.broadcast %c-1_i32 : i32 to vector<24x24xi32>
    %17 = arith.addi %2, %16 : vector<24x24xi32>
    %c0_i32_4 = arith.constant 0 : i32
    %c23_i32_5 = arith.constant 23 : i32
    %18 = vector.broadcast %c0_i32_4 : i32 to vector<24x24xi32>
    %19 = arith.maxsi %18, %17 : vector<24x24xi32>
    %20 = vector.broadcast %c23_i32_5 : i32 to vector<24x24xi32>
    %21 = arith.minsi %20, %19 : vector<24x24xi32>
    %22 = arith.cmpi eq, %3, %21 : vector<24x24xi32>
    %cst_6 = arith.constant 1.000000e+00 : f32
    %cst_7 = arith.constant 0.000000e+00 : f32
    %23 = vector.broadcast %cst_6 : f32 to vector<24x24xf32>
    %24 = vector.broadcast %cst_7 : f32 to vector<24x24xf32>
    %25 = arith.select %22, %23, %24 : vector<24x24xi1>, vector<24x24xf32>
    %26 = arith.addf %15, %25 : vector<24x24xf32>
    %c0_i32_8 = arith.constant 0 : i32
    %27 = vector.broadcast %c0_i32_8 : i32 to vector<24x24xi32>
    %28 = arith.addi %2, %27 : vector<24x24xi32>
    %c0_i32_9 = arith.constant 0 : i32
    %c23_i32_10 = arith.constant 23 : i32
    %29 = vector.broadcast %c0_i32_9 : i32 to vector<24x24xi32>
    %30 = arith.maxsi %29, %28 : vector<24x24xi32>
    %31 = vector.broadcast %c23_i32_10 : i32 to vector<24x24xi32>
    %32 = arith.minsi %31, %30 : vector<24x24xi32>
    %33 = arith.cmpi eq, %3, %32 : vector<24x24xi32>
    %cst_11 = arith.constant 1.000000e+00 : f32
    %cst_12 = arith.constant 0.000000e+00 : f32
    %34 = vector.broadcast %cst_11 : f32 to vector<24x24xf32>
    %35 = vector.broadcast %cst_12 : f32 to vector<24x24xf32>
    %36 = arith.select %33, %34, %35 : vector<24x24xi1>, vector<24x24xf32>
    %37 = arith.addf %26, %36 : vector<24x24xf32>
    %c1_i32 = arith.constant 1 : i32
    %38 = vector.broadcast %c1_i32 : i32 to vector<24x24xi32>
    %39 = arith.addi %2, %38 : vector<24x24xi32>
    %c0_i32_13 = arith.constant 0 : i32
    %c23_i32_14 = arith.constant 23 : i32
    %40 = vector.broadcast %c0_i32_13 : i32 to vector<24x24xi32>
    %41 = arith.maxsi %40, %39 : vector<24x24xi32>
    %42 = vector.broadcast %c23_i32_14 : i32 to vector<24x24xi32>
    %43 = arith.minsi %42, %41 : vector<24x24xi32>
    %44 = arith.cmpi eq, %3, %43 : vector<24x24xi32>
    %cst_15 = arith.constant 1.000000e+00 : f32
    %cst_16 = arith.constant 0.000000e+00 : f32
    %45 = vector.broadcast %cst_15 : f32 to vector<24x24xf32>
    %46 = vector.broadcast %cst_16 : f32 to vector<24x24xf32>
    %47 = arith.select %44, %45, %46 : vector<24x24xi1>, vector<24x24xf32>
    %48 = arith.addf %37, %47 : vector<24x24xf32>
    %c2_i32 = arith.constant 2 : i32
    %49 = vector.broadcast %c2_i32 : i32 to vector<24x24xi32>
    %50 = arith.addi %2, %49 : vector<24x24xi32>
    %c0_i32_17 = arith.constant 0 : i32
    %c23_i32_18 = arith.constant 23 : i32
    %51 = vector.broadcast %c0_i32_17 : i32 to vector<24x24xi32>
    %52 = arith.maxsi %51, %50 : vector<24x24xi32>
    %53 = vector.broadcast %c23_i32_18 : i32 to vector<24x24xi32>
    %54 = arith.minsi %53, %52 : vector<24x24xi32>
    %55 = arith.cmpi eq, %3, %54 : vector<24x24xi32>
    %cst_19 = arith.constant 1.000000e+00 : f32
    %cst_20 = arith.constant 0.000000e+00 : f32
    %56 = vector.broadcast %cst_19 : f32 to vector<24x24xf32>
    %57 = vector.broadcast %cst_20 : f32 to vector<24x24xf32>
    %58 = arith.select %55, %56, %57 : vector<24x24xi1>, vector<24x24xf32>
    %59 = arith.addf %48, %58 : vector<24x24xf32>
    %cst_21 = arith.constant 5.000000e+00 : f32
    %60 = vector.broadcast %cst_21 : f32 to vector<24x24xf32>
    %61 = arith.divf %59, %60 : vector<24x24xf32>
    %cst_22 = arith.constant dense<0.000000e+00> : vector<24x32xf32>
    %62 = tpu.matmul %61, %1, %cst_22 {dimension_numbers = #tpu.dot_dimension_numbers<[1], [0], [0], [1], [0, 0, 1, 1], [], []>} : vector<24x24xf32>, vector<24x32xf32>, vector<24x32xf32> -> vector<24x32xf32>
    %63 = arith.subf %1, %62 : vector<24x32xf32>
    %c0_23 = arith.constant 0 : index
    %c0_24 = arith.constant 0 : index
    %c0_25 = arith.constant 0 : index
    %64 = vector.load %arg2[%c0_23, %c0_24, %c0_25] : memref<1x24x32xf32, #tpu.memory_space<vmem>>, vector<1x24x32xf32>
    %65 = vector.shape_cast %64 : vector<1x24x32xf32> to vector<24x32xf32>
    %66 = vector.shape_cast %63 : vector<24x32xf32> to vector<1x24x32xf32>
    tpu.vector_store %arg2[%c0_23, %c0_24, %c0_25], %66 {strides = array<i32>} : memref<1x24x32xf32, #tpu.memory_space<vmem>>, vector<1x24x32xf32>,
    %c0_26 = arith.constant 0 : index
    %c0_27 = arith.constant 0 : index
    %c0_28 = arith.constant 0 : index
    %67 = vector.load %arg3[%c0_26, %c0_27, %c0_28] : memref<1x24x32xf32, #tpu.memory_space<vmem>>, vector<1x24x32xf32>
    %68 = vector.shape_cast %67 : vector<1x24x32xf32> to vector<24x32xf32>
    %69 = vector.shape_cast %62 : vector<24x32xf32> to vector<1x24x32xf32>
    tpu.vector_store %arg3[%c0_26, %c0_27, %c0_28], %69 {strides = array<i32>} : memref<1x24x32xf32, #tpu.memory_space<vmem>>, vector<1x24x32xf32>,
    return
  }
  func.func @transform_0(%arg0: i32) -> (i32, i32, i32) {
    %c0_i32 = arith.constant 0 : i32
    %c0_i32_0 = arith.constant 0 : i32
    %c0_i32_1 = arith.constant 0 : i32
    return %arg0, %c0_i32, %c0_i32_0 : i32, i32, i32
  }
  func.func @transform_1(%arg0: i32) -> (i32, i32, i32) {
    %c0_i32 = arith.constant 0 : i32
    %c0_i32_0 = arith.constant 0 : i32
    %c0_i32_1 = arith.constant 0 : i32
    return %arg0, %c0_i32, %c0_i32_0 : i32, i32, i32
  }
  func.func @transform_2(%arg0: i32) -> (i32, i32, i32) {
    %c0_i32 = arith.constant 0 : i32
    %c0_i32_0 = arith.constant 0 : i32
    %c0_i32_1 = arith.constant 0 : i32
    return %arg0, %c0_i32, %c0_i32_0 : i32, i32, i32
  }
}

module attributes {stable_mosaic.version = 11 : i64} {
  func.func @_circconv_kernel(%arg0: i32, %arg1: memref<1x24x32xf32, #tpu.memory_space<vmem>>, %arg2: memref<32x4xbf16, #tpu.memory_space<vmem>>, %arg3: memref<32x4xbf16, #tpu.memory_space<vmem>>, %arg4: memref<32x4xbf16, #tpu.memory_space<vmem>>, %arg5: memref<1x24x4xf32, #tpu.memory_space<vmem>>) attributes {dimension_semantics = [#tpu.dimension_semantics<parallel>], iteration_bounds = array<i64: 2>, scalar_prefetch = 0 : i64, scratch_operands = 0 : i64, tpu.core_type = #tpu.core_type<tc>, window_params = [{transform_indices = @transform_0, window_bounds = array<i64: 1, 24, 32>}, {pipeline_mode = #tpu.pipeline_mode<synchronous>, transform_indices = @transform_1, window_bounds = array<i64: 32, 4>}, {pipeline_mode = #tpu.pipeline_mode<synchronous>, transform_indices = @transform_2, window_bounds = array<i64: 32, 4>}, {pipeline_mode = #tpu.pipeline_mode<synchronous>, transform_indices = @transform_3, window_bounds = array<i64: 32, 4>}, {transform_indices = @transform_4, window_bounds = array<i64: 1, 24, 4>}]} {
    %c0 = arith.constant 0 : index
    %c0_0 = arith.constant 0 : index
    %c0_1 = arith.constant 0 : index
    %0 = vector.load %arg1[%c0, %c0_0, %c0_1] : memref<1x24x32xf32, #tpu.memory_space<vmem>>, vector<1x24x32xf32>
    %1 = vector.shape_cast %0 : vector<1x24x32xf32> to vector<24x32xf32>
    %2 = tpu.iota {dimensions = array<i32: 0>} : vector<24x24xi32>
    %3 = tpu.iota {dimensions = array<i32: 1>} : vector<24x24xi32>
    %c-1_i32 = arith.constant -1 : i32
    %4 = vector.broadcast %c-1_i32 : i32 to vector<24x24xi32>
    %5 = arith.addi %2, %4 : vector<24x24xi32>
    %c24_i32 = arith.constant 24 : i32
    %6 = vector.broadcast %c24_i32 : i32 to vector<24x24xi32>
    %7 = arith.addi %5, %6 : vector<24x24xi32>
    %c24_i32_2 = arith.constant 24 : i32
    %c0_i32 = arith.constant 0 : i32
    %8 = arith.cmpi eq, %c24_i32_2, %c0_i32 : i32
    %c1_i32 = arith.constant 1 : i32
    %9 = arith.select %8, %c1_i32, %c24_i32_2 : i32
    %10 = vector.broadcast %9 : i32 to vector<24x24xi32>
    %11 = arith.remsi %7, %10 : vector<24x24xi32>
    %c0_i32_3 = arith.constant 0 : i32
    %12 = vector.broadcast %c0_i32_3 : i32 to vector<24x24xi32>
    %13 = arith.cmpi ne, %11, %12 : vector<24x24xi32>
    %c0_i32_4 = arith.constant 0 : i32
    %14 = vector.broadcast %c0_i32_4 : i32 to vector<24x24xi32>
    %15 = arith.cmpi slt, %11, %14 : vector<24x24xi32>
    %c0_i32_5 = arith.constant 0 : i32
    %16 = arith.cmpi slt, %9, %c0_i32_5 : i32
    %17 = vector.broadcast %16 : i1 to vector<24x24xi1>
    %18 = vector.broadcast %17 : vector<24x24xi1> to vector<24x24xi1>
    %19 = arith.xori %15, %18 : vector<24x24xi1>
    %20 = arith.andi %19, %13 : vector<24x24xi1>
    %21 = vector.broadcast %9 : i32 to vector<24x24xi32>
    %22 = arith.addi %11, %21 : vector<24x24xi32>
    %23 = arith.select %20, %22, %11 : vector<24x24xi1>, vector<24x24xi32>
    %24 = arith.cmpi eq, %3, %23 : vector<24x24xi32>
    %cst = arith.constant 1.000000e+00 : f32
    %cst_6 = arith.constant 0.000000e+00 : f32
    %25 = vector.broadcast %cst : f32 to vector<24x24xf32>
    %26 = vector.broadcast %cst_6 : f32 to vector<24x24xf32>
    %27 = arith.select %24, %25, %26 : vector<24x24xi1>, vector<24x24xf32>
    %cst_7 = arith.constant dense<0.000000e+00> : vector<24x32xf32>
    %28 = tpu.matmul %27, %1, %cst_7 {dimension_numbers = #tpu.dot_dimension_numbers<[1], [0], [0], [1], [0, 0, 1, 1], [], []>} : vector<24x24xf32>, vector<24x32xf32>, vector<24x32xf32> -> vector<24x32xf32>
    %29 = tpu.iota {dimensions = array<i32: 0>} : vector<24x24xi32>
    %30 = tpu.iota {dimensions = array<i32: 1>} : vector<24x24xi32>
    %c1_i32_8 = arith.constant 1 : i32
    %31 = vector.broadcast %c1_i32_8 : i32 to vector<24x24xi32>
    %32 = arith.addi %29, %31 : vector<24x24xi32>
    %c24_i32_9 = arith.constant 24 : i32
    %33 = vector.broadcast %c24_i32_9 : i32 to vector<24x24xi32>
    %34 = arith.addi %32, %33 : vector<24x24xi32>
    %c24_i32_10 = arith.constant 24 : i32
    %c0_i32_11 = arith.constant 0 : i32
    %35 = arith.cmpi eq, %c24_i32_10, %c0_i32_11 : i32
    %c1_i32_12 = arith.constant 1 : i32
    %36 = arith.select %35, %c1_i32_12, %c24_i32_10 : i32
    %37 = vector.broadcast %36 : i32 to vector<24x24xi32>
    %38 = arith.remsi %34, %37 : vector<24x24xi32>
    %c0_i32_13 = arith.constant 0 : i32
    %39 = vector.broadcast %c0_i32_13 : i32 to vector<24x24xi32>
    %40 = arith.cmpi ne, %38, %39 : vector<24x24xi32>
    %c0_i32_14 = arith.constant 0 : i32
    %41 = vector.broadcast %c0_i32_14 : i32 to vector<24x24xi32>
    %42 = arith.cmpi slt, %38, %41 : vector<24x24xi32>
    %c0_i32_15 = arith.constant 0 : i32
    %43 = arith.cmpi slt, %36, %c0_i32_15 : i32
    %44 = vector.broadcast %43 : i1 to vector<24x24xi1>
    %45 = vector.broadcast %44 : vector<24x24xi1> to vector<24x24xi1>
    %46 = arith.xori %42, %45 : vector<24x24xi1>
    %47 = arith.andi %46, %40 : vector<24x24xi1>
    %48 = vector.broadcast %36 : i32 to vector<24x24xi32>
    %49 = arith.addi %38, %48 : vector<24x24xi32>
    %50 = arith.select %47, %49, %38 : vector<24x24xi1>, vector<24x24xi32>
    %51 = arith.cmpi eq, %30, %50 : vector<24x24xi32>
    %cst_16 = arith.constant 1.000000e+00 : f32
    %cst_17 = arith.constant 0.000000e+00 : f32
    %52 = vector.broadcast %cst_16 : f32 to vector<24x24xf32>
    %53 = vector.broadcast %cst_17 : f32 to vector<24x24xf32>
    %54 = arith.select %51, %52, %53 : vector<24x24xi1>, vector<24x24xf32>
    %cst_18 = arith.constant dense<0.000000e+00> : vector<24x32xf32>
    %55 = tpu.matmul %54, %1, %cst_18 {dimension_numbers = #tpu.dot_dimension_numbers<[1], [0], [0], [1], [0, 0, 1, 1], [], []>} : vector<24x24xf32>, vector<24x32xf32>, vector<24x32xf32> -> vector<24x32xf32>
    %c0_19 = arith.constant 0 : index
    %c0_20 = arith.constant 0 : index
    %56 = vector.load %arg2[%c0_19, %c0_20] : memref<32x4xbf16, #tpu.memory_space<vmem>>, vector<32x4xbf16>
    %57 = arith.truncf %28 : vector<24x32xf32> to vector<24x32xbf16>
    %cst_21 = arith.constant dense<0.000000e+00> : vector<24x4xf32>
    %58 = tpu.matmul %57, %56, %cst_21 {dimension_numbers = #tpu.dot_dimension_numbers<[1], [0], [0], [1], [0, 0, 1, 1], [], []>} : vector<24x32xbf16>, vector<32x4xbf16>, vector<24x4xf32> -> vector<24x4xf32>
    %c0_22 = arith.constant 0 : index
    %c0_23 = arith.constant 0 : index
    %59 = vector.load %arg3[%c0_22, %c0_23] : memref<32x4xbf16, #tpu.memory_space<vmem>>, vector<32x4xbf16>
    %60 = arith.truncf %1 : vector<24x32xf32> to vector<24x32xbf16>
    %cst_24 = arith.constant dense<0.000000e+00> : vector<24x4xf32>
    %61 = tpu.matmul %60, %59, %cst_24 {dimension_numbers = #tpu.dot_dimension_numbers<[1], [0], [0], [1], [0, 0, 1, 1], [], []>} : vector<24x32xbf16>, vector<32x4xbf16>, vector<24x4xf32> -> vector<24x4xf32>
    %62 = arith.addf %58, %61 : vector<24x4xf32>
    %c0_25 = arith.constant 0 : index
    %c0_26 = arith.constant 0 : index
    %63 = vector.load %arg4[%c0_25, %c0_26] : memref<32x4xbf16, #tpu.memory_space<vmem>>, vector<32x4xbf16>
    %64 = arith.truncf %55 : vector<24x32xf32> to vector<24x32xbf16>
    %cst_27 = arith.constant dense<0.000000e+00> : vector<24x4xf32>
    %65 = tpu.matmul %64, %63, %cst_27 {dimension_numbers = #tpu.dot_dimension_numbers<[1], [0], [0], [1], [0, 0, 1, 1], [], []>} : vector<24x32xbf16>, vector<32x4xbf16>, vector<24x4xf32> -> vector<24x4xf32>
    %66 = arith.addf %62, %65 : vector<24x4xf32>
    %c0_28 = arith.constant 0 : index
    %c0_29 = arith.constant 0 : index
    %c0_30 = arith.constant 0 : index
    %67 = vector.load %arg5[%c0_28, %c0_29, %c0_30] : memref<1x24x4xf32, #tpu.memory_space<vmem>>, vector<1x24x4xf32>
    %68 = vector.shape_cast %67 : vector<1x24x4xf32> to vector<24x4xf32>
    %69 = vector.shape_cast %66 : vector<24x4xf32> to vector<1x24x4xf32>
    tpu.vector_store %arg5[%c0_28, %c0_29, %c0_30], %69 {strides = array<i32>} : memref<1x24x4xf32, #tpu.memory_space<vmem>>, vector<1x24x4xf32>,
    return
  }
  func.func @transform_0(%arg0: i32) -> (i32, i32, i32) {
    %c0_i32 = arith.constant 0 : i32
    %c0_i32_0 = arith.constant 0 : i32
    %c0_i32_1 = arith.constant 0 : i32
    return %arg0, %c0_i32, %c0_i32_0 : i32, i32, i32
  }
  func.func @transform_1(%arg0: i32) -> (i32, i32) {
    %c0_i32 = arith.constant 0 : i32
    %c0_i32_0 = arith.constant 0 : i32
    %c0_i32_1 = arith.constant 0 : i32
    return %c0_i32, %c0_i32_0 : i32, i32
  }
  func.func @transform_2(%arg0: i32) -> (i32, i32) {
    %c0_i32 = arith.constant 0 : i32
    %c0_i32_0 = arith.constant 0 : i32
    %c0_i32_1 = arith.constant 0 : i32
    return %c0_i32, %c0_i32_0 : i32, i32
  }
  func.func @transform_3(%arg0: i32) -> (i32, i32) {
    %c0_i32 = arith.constant 0 : i32
    %c0_i32_0 = arith.constant 0 : i32
    %c0_i32_1 = arith.constant 0 : i32
    return %c0_i32, %c0_i32_0 : i32, i32
  }
  func.func @transform_4(%arg0: i32) -> (i32, i32, i32) {
    %c0_i32 = arith.constant 0 : i32
    %c0_i32_0 = arith.constant 0 : i32
    %c0_i32_1 = arith.constant 0 : i32
    return %arg0, %c0_i32, %c0_i32_0 : i32, i32, i32
  }
}

module attributes {stable_mosaic.version = 11 : i64} {
  func.func @_my_ln_kernel(%arg0: i32, %arg1: memref<1x24x32xf32, #tpu.memory_space<vmem>>, %arg2: memref<1x32xf32, #tpu.memory_space<vmem>>, %arg3: memref<1x32xf32, #tpu.memory_space<vmem>>, %arg4: memref<1x24x32xf32, #tpu.memory_space<vmem>>) attributes {dimension_semantics = [#tpu.dimension_semantics<parallel>], iteration_bounds = array<i64: 2>, scalar_prefetch = 0 : i64, scratch_operands = 0 : i64, tpu.core_type = #tpu.core_type<tc>, window_params = [{transform_indices = @transform_0, window_bounds = array<i64: 1, 24, 32>}, {pipeline_mode = #tpu.pipeline_mode<synchronous>, transform_indices = @transform_1, window_bounds = array<i64: 1, 32>}, {pipeline_mode = #tpu.pipeline_mode<synchronous>, transform_indices = @transform_2, window_bounds = array<i64: 1, 32>}, {transform_indices = @transform_3, window_bounds = array<i64: 1, 24, 32>}]} {
    %c0 = arith.constant 0 : index
    %c0_0 = arith.constant 0 : index
    %c0_1 = arith.constant 0 : index
    %0 = vector.load %arg1[%c0, %c0_0, %c0_1] : memref<1x24x32xf32, #tpu.memory_space<vmem>>, vector<1x24x32xf32>
    %1 = vector.shape_cast %0 : vector<1x24x32xf32> to vector<24x32xf32>
    %c0_2 = arith.constant 0 : index
    %c0_3 = arith.constant 0 : index
    %2 = vector.load %arg2[%c0_2, %c0_3] : memref<1x32xf32, #tpu.memory_space<vmem>>, vector<1x32xf32>
    %c0_4 = arith.constant 0 : index
    %c0_5 = arith.constant 0 : index
    %3 = vector.load %arg3[%c0_4, %c0_5] : memref<1x32xf32, #tpu.memory_space<vmem>>, vector<1x32xf32>
    %cst = arith.constant dense<0.000000e+00> : vector<24xf32>
    %4 = vector.multi_reduction <add>, %1, %cst [1] : vector<24x32xf32> to vector<24xf32>
    %5 = vector.shape_cast %4 : vector<24xf32> to vector<24x1xf32>
    %cst_6 = arith.constant 3.200000e+01 : f32
    %6 = vector.broadcast %cst_6 : f32 to vector<24x1xf32>
    %7 = arith.divf %5, %6 : vector<24x1xf32>
    %8 = vector.broadcast %7 : vector<24x1xf32> to vector<24x32xf32>
    %9 = arith.subf %1, %8 : vector<24x32xf32>
    %10 = arith.mulf %9, %9 : vector<24x32xf32>
    %cst_7 = arith.constant dense<0.000000e+00> : vector<24xf32>
    %11 = vector.multi_reduction <add>, %10, %cst_7 [1] : vector<24x32xf32> to vector<24xf32>
    %12 = vector.shape_cast %11 : vector<24xf32> to vector<24x1xf32>
    %cst_8 = arith.constant 3.200000e+01 : f32
    %13 = vector.broadcast %cst_8 : f32 to vector<24x1xf32>
    %14 = arith.divf %12, %13 : vector<24x1xf32>
    %15 = vector.broadcast %7 : vector<24x1xf32> to vector<24x32xf32>
    %16 = arith.subf %1, %15 : vector<24x32xf32>
    %cst_9 = arith.constant 9.99999974E-6 : f32
    %17 = vector.broadcast %cst_9 : f32 to vector<24x1xf32>
    %18 = arith.addf %14, %17 : vector<24x1xf32>
    %19 = math.rsqrt %18 : vector<24x1xf32>
    %20 = vector.broadcast %19 : vector<24x1xf32> to vector<24x32xf32>
    %21 = arith.mulf %16, %20 : vector<24x32xf32>
    %22 = vector.broadcast %2 : vector<1x32xf32> to vector<24x32xf32>
    %23 = arith.mulf %21, %22 : vector<24x32xf32>
    %24 = vector.broadcast %3 : vector<1x32xf32> to vector<24x32xf32>
    %25 = arith.addf %23, %24 : vector<24x32xf32>
    %cst_10 = arith.constant dense<0.000000e+00> : vector<32xf32>
    %26 = vector.multi_reduction <add>, %25, %cst_10 [0] : vector<24x32xf32> to vector<32xf32>
    %27 = vector.shape_cast %26 : vector<32xf32> to vector<1x32xf32>
    %cst_11 = arith.constant 2.400000e+01 : f32
    %28 = vector.broadcast %cst_11 : f32 to vector<1x32xf32>
    %29 = arith.divf %27, %28 : vector<1x32xf32>
    %30 = vector.broadcast %29 : vector<1x32xf32> to vector<24x32xf32>
    %31 = arith.subf %25, %30 : vector<24x32xf32>
    %c0_12 = arith.constant 0 : index
    %c0_13 = arith.constant 0 : index
    %c0_14 = arith.constant 0 : index
    %32 = vector.load %arg4[%c0_12, %c0_13, %c0_14] : memref<1x24x32xf32, #tpu.memory_space<vmem>>, vector<1x24x32xf32>
    %33 = vector.shape_cast %32 : vector<1x24x32xf32> to vector<24x32xf32>
    %34 = vector.shape_cast %31 : vector<24x32xf32> to vector<1x24x32xf32>
    tpu.vector_store %arg4[%c0_12, %c0_13, %c0_14], %34 {strides = array<i32>} : memref<1x24x32xf32, #tpu.memory_space<vmem>>, vector<1x24x32xf32>,
    return
  }
  func.func @transform_0(%arg0: i32) -> (i32, i32, i32) {
    %c0_i32 = arith.constant 0 : i32
    %c0_i32_0 = arith.constant 0 : i32
    %c0_i32_1 = arith.constant 0 : i32
    return %arg0, %c0_i32, %c0_i32_0 : i32, i32, i32
  }
  func.func @transform_1(%arg0: i32) -> (i32, i32) {
    %c0_i32 = arith.constant 0 : i32
    %c0_i32_0 = arith.constant 0 : i32
    %c0_i32_1 = arith.constant 0 : i32
    return %c0_i32, %c0_i32_0 : i32, i32
  }
  func.func @transform_2(%arg0: i32) -> (i32, i32) {
    %c0_i32 = arith.constant 0 : i32
    %c0_i32_0 = arith.constant 0 : i32
    %c0_i32_1 = arith.constant 0 : i32
    return %c0_i32, %c0_i32_0 : i32, i32
  }
  func.func @transform_3(%arg0: i32) -> (i32, i32, i32) {
    %c0_i32 = arith.constant 0 : i32
    %c0_i32_0 = arith.constant 0 : i32
    %c0_i32_1 = arith.constant 0 : i32
    return %arg0, %c0_i32, %c0_i32_0 : i32, i32, i32
  }
}

module attributes {stable_mosaic.version = 11 : i64} {
  func.func @_linear_kernel(%arg0: i32, %arg1: i32, %arg2: i32, %arg3: memref<48x32xf32, #tpu.memory_space<vmem>>, %arg4: memref<32x4xbf16, #tpu.memory_space<vmem>>, %arg5: memref<1x4xf32, #tpu.memory_space<vmem>>, %arg6: memref<48x4xf32, #tpu.memory_space<vmem>>, %arg7: memref<48x4xf32, #tpu.memory_space<vmem>>) attributes {dimension_semantics = [#tpu.dimension_semantics<parallel>, #tpu.dimension_semantics<parallel>, #tpu.dimension_semantics<arbitrary>], iteration_bounds = array<i64: 1, 1, 1>, scalar_prefetch = 0 : i64, scratch_operands = 1 : i64, tpu.core_type = #tpu.core_type<tc>, window_params = [{transform_indices = @transform_0, window_bounds = array<i64: 48, 32>}, {transform_indices = @transform_1, window_bounds = array<i64: 32, 4>}, {transform_indices = @transform_2, window_bounds = array<i64: 1, 4>}, {transform_indices = @transform_3, window_bounds = array<i64: 48, 4>}]} {
    %c0_i32 = arith.constant 0 : i32
    %0 = arith.cmpi eq, %arg2, %c0_i32 : i32
    %1 = arith.extui %0 : i1 to i32
    %c0_i32_0 = arith.constant 0 : i32
    %2 = arith.cmpi ne, %1, %c0_i32_0 : i32
    scf.if %2 {
      %cst_10 = arith.constant 0.000000e+00 : f32
      %13 = vector.broadcast %cst_10 : f32 to vector<48x4xf32>
      %c0_11 = arith.constant 0 : index
      %c0_12 = arith.constant 0 : index
      %14 = vector.load %arg7[%c0_11, %c0_12] : memref<48x4xf32, #tpu.memory_space<vmem>>, vector<48x4xf32>
      tpu.vector_store %arg7[%c0_11, %c0_12], %13 {strides = array<i32>} : memref<48x4xf32, #tpu.memory_space<vmem>>, vector<48x4xf32>,
    } else {
    }
    %c0 = arith.constant 0 : index
    %c0_1 = arith.constant 0 : index
    %3 = vector.load %arg7[%c0, %c0_1] : memref<48x4xf32, #tpu.memory_space<vmem>>, vector<48x4xf32>
    %c0_2 = arith.constant 0 : index
    %c0_3 = arith.constant 0 : index
    %4 = vector.load %arg3[%c0_2, %c0_3] : memref<48x32xf32, #tpu.memory_space<vmem>>, vector<48x32xf32>
    %c0_4 = arith.constant 0 : index
    %c0_5 = arith.constant 0 : index
    %5 = vector.load %arg4[%c0_4, %c0_5] : memref<32x4xbf16, #tpu.memory_space<vmem>>, vector<32x4xbf16>
    %6 = arith.truncf %4 : vector<48x32xf32> to vector<48x32xbf16>
    %cst = arith.constant dense<0.000000e+00> : vector<48x4xf32>
    %7 = tpu.matmul %6, %5, %cst {dimension_numbers = #tpu.dot_dimension_numbers<[1], [0], [0], [1], [0, 0, 1, 1], [], []>} : vector<48x32xbf16>, vector<32x4xbf16>, vector<48x4xf32> -> vector<48x4xf32>
    %8 = arith.addf %3, %7 : vector<48x4xf32>
    %c0_6 = arith.constant 0 : index
    %c0_7 = arith.constant 0 : index
    %9 = vector.load %arg7[%c0_6, %c0_7] : memref<48x4xf32, #tpu.memory_space<vmem>>, vector<48x4xf32>
    tpu.vector_store %arg7[%c0_6, %c0_7], %8 {strides = array<i32>} : memref<48x4xf32, #tpu.memory_space<vmem>>, vector<48x4xf32>,
    %c0_i32_8 = arith.constant 0 : i32
    %10 = arith.cmpi eq, %arg2, %c0_i32_8 : i32
    %11 = arith.extui %10 : i1 to i32
    %c0_i32_9 = arith.constant 0 : i32
    %12 = arith.cmpi ne, %11, %c0_i32_9 : i32
    scf.if %12 {
      %c0_10 = arith.constant 0 : index
      %c0_11 = arith.constant 0 : index
      %13 = vector.load %arg7[%c0_10, %c0_11] : memref<48x4xf32, #tpu.memory_space<vmem>>, vector<48x4xf32>
      %c0_12 = arith.constant 0 : index
      %c0_13 = arith.constant 0 : index
      %14 = vector.load %arg5[%c0_12, %c0_13] : memref<1x4xf32, #tpu.memory_space<vmem>>, vector<1x4xf32>
      %15 = vector.broadcast %14 : vector<1x4xf32> to vector<48x4xf32>
      %16 = arith.addf %13, %15 : vector<48x4xf32>
      %c0_14 = arith.constant 0 : index
      %c0_15 = arith.constant 0 : index
      %17 = vector.load %arg6[%c0_14, %c0_15] : memref<48x4xf32, #tpu.memory_space<vmem>>, vector<48x4xf32>
      tpu.vector_store %arg6[%c0_14, %c0_15], %16 {strides = array<i32>} : memref<48x4xf32, #tpu.memory_space<vmem>>, vector<48x4xf32>,
    } else {
    }
    return
  }
  func.func @transform_0(%arg0: i32, %arg1: i32, %arg2: i32) -> (i32, i32) {
    %c0_i32 = arith.constant 0 : i32
    return %arg0, %arg2 : i32, i32
  }
  func.func @transform_1(%arg0: i32, %arg1: i32, %arg2: i32) -> (i32, i32) {
    %c0_i32 = arith.constant 0 : i32
    return %arg2, %arg1 : i32, i32
  }
  func.func @transform_2(%arg0: i32, %arg1: i32, %arg2: i32) -> (i32, i32) {
    %c0_i32 = arith.constant 0 : i32
    %c0_i32_0 = arith.constant 0 : i32
    return %c0_i32, %arg1 : i32, i32
  }
  func.func @transform_3(%arg0: i32, %arg1: i32, %arg2: i32) -> (i32, i32) {
    %c0_i32 = arith.constant 0 : i32
    return %arg0, %arg1 : i32, i32
  }
}

</mosaic_0001>

<bundles_post_ra>
// kernel: _lambda_.32
= control target key start
LH: loop header
LB: loop body
LE: loop exit
PB: predicated region body
PF: predicated region fallthrough
CT: control target
= control target key end

     0   :  { %vm19_vm0 = vcmask 785408   ;;  %v134_v0 = vmov 0.0   ;;  %vm135_vm1 = vmmov 0   ;;  %vm44_vm2 = vcmask 261120   ;;  %s183_s1 = inlined_call_operand.vmem [shape: bf16[32,96], index: 1, kind: input, shape index: {}]   ;;  %s184_s0 = inlined_call_operand.vmem [shape: f32[12,32], index: 0, kind: input, shape index: {}]   ;;  %s185_s2 = inlined_call_operand.vmem [shape: f32[1,96], index: 2, kind: input, shape index: {}]   ;;  %s186_s3 = inlined_call_operand.vmem [shape: f32[12,96], index: 3, kind: output, shape index: {}]  }
   0x1   :  { %122 = vmatprep.subr.bf16.mxu0 %v134_v0  ;;  %v132_v1 = vld [vmem:[%s183_s1] sm:$0xff]   ;;  %126 = vmatprep.mubr.msk.bf16.mxu0 %vm135_vm1, %v134_v0  ;;  %20 = vst.msk [vmem:[#allocation2] sm:$0xff] %vm19_vm0, %v134_v0  ;;  %v133_v2 = vld [vmem:[%s183_s1 + $0x8] sm:$0xff]   ;;  %vm21_vm3 = vcmask 781312  }
   0x2   :  { %123 = vmatpush3.bf16.msra.mxu0 %v132_v1  ;;  %v25_v3 = vld [vmem:[%s184_s0] sm:$0xff]  ;;  %v26_v4 = vld [vmem:[%s184_s0 + $0x8] sm:$0xf]  ;;  %22 = vst.msk [vmem:[#allocation2 + $0x8] sm:$0xf] %vm21_vm3, %v134_v0 }
   0x3   :  { %124 = vmatprep.subr.bf16.mxu0 %v134_v0  ;;  %v31_v5 = vpack.c.bf16 %v26_v4, %v25_v3  ;;  %v118_v14 = vld [vmem:[%s185_s2] ss:$0 sm:$0xff] }
   0x6   :  { %125 = vmatpush3.bf16.msra.mxu0 %v133_v2 }
   0x8   :  { %v23_v6 = vld [vmem:[#allocation2] sm:$0xff] }
   0x9   :  { %127 = vmatmul.mubr.msk.bf16.vlgmr.msra.gmra.mrb[0].mxu0 %vm44_vm2, %v31_v5  ;;  %v24_v8 = vld [vmem:[#allocation2 + $0x8] sm:$0xf] }
  0xdc   :  { %v82_v7 = vpop.f32.mrb[0].mxu0 }
  0xdd   :  { %v89_v9 = vadd.f32 %v82_v7, %v23_v6  ;;  %v128_v10 = vpop.f32.mrb[1].mxu0 }
  0xde   :  { %v85_v11 = vpop.f32.mrb[2].mxu0 }
  0xdf   :  { %92 = vst.msk [vmem:[#allocation2] sm:$0xff] %vm19_vm0, %v89_v9  ;;  %v90_v12 = vadd.f32 %v85_v11, %v24_v8  ;;  %v129_v13 = vpop.f32.mrb[3].mxu0 }
  0xe1   :  { %94 = vst.msk [vmem:[#allocation2 + $0x8] sm:$0xf] %vm21_vm3, %v90_v12 }
  0xe6   :  { %v98_v15 = vld [vmem:[#allocation2] sm:$0xff] }
  0xe7   :  { %v107_v16 = vadd.f32 %v118_v14, %v98_v15 }
  0xe8   :  { %v99_v17 = vld [vmem:[#allocation2 + $0x8] sm:$0xf] }
  0xe9   :  { %109 = vst.msk [vmem:[%s186_s3] sm:$0xff] %vm19_vm0, %v107_v16  ;;  %v108_v18 = vadd.f32 %v118_v14, %v99_v17 }
  0xeb   :  { %110 = vst.msk [vmem:[%s186_s3 + $0x8] sm:$0xf] %vm21_vm3, %v108_v18 }

// kernel: _lambda_.31
= control target key start
LH: loop header
LB: loop body
LE: loop exit
PB: predicated region body
PF: predicated region fallthrough
CT: control target
= control target key end

     0   :  { %vm19_vm0 = vcmask 261120   ;;  %vm21_vm1 = vcmask 257024   ;;  %v121_v0 = vmov 0.0   ;;  %vm122_vm2 = vmmov 0   ;;  %s167_s1 = inlined_call_operand.vmem [shape: bf16[16,32], index: 1, kind: input, shape index: {}]   ;;  %s168_s0 = inlined_call_operand.vmem [shape: f32[12,16], index: 0, kind: input, shape index: {}]   ;;  %s169_s2 = inlined_call_operand.vmem [shape: f32[1,32], index: 2, kind: input, shape index: {}]   ;;  %s170_s3 = inlined_call_operand.vmem [shape: f32[12,32], index: 3, kind: output, shape index: {}]  }
   0x1   :  { %20 = vst.msk [vmem:[#allocation2] sm:$0xff] %vm19_vm0, %v121_v0  ;;  %112 = vmatprep.subr.bf16.mxu0 %v121_v0  ;;  %v120_v1 = vld [vmem:[%s167_s1] sm:$0xff]   ;;  %114 = vmatprep.mubr.msk.bf16.mxu0 %vm122_vm2, %v121_v0  ;;  %v26_v3 = vld [vmem:[%s168_s0 + $0x8] sm:$0xf]  ;;  %vm36_vm3 = vcmask 130048  }
   0x2   :  { %22 = vst.msk [vmem:[#allocation2 + $0x8] sm:$0xf] %vm21_vm1, %v121_v0  ;;  %v25_v2 = vld [vmem:[%s168_s0] sm:$0xff]  ;;  %113 = vmatpush3.bf16.msra.mxu0 %v120_v1 }
   0x3   :  { %v29_v4 = vpack.c.bf16 %v26_v3, %v25_v2  ;;  %v109_v13 = vld [vmem:[%s169_s2] ss:$0 sm:$0xff] }
   0x5   :  { %115 = vmatmul.mubr.msk.bf16.vlgmr.msra.gmra.mrb[0].mxu0 %vm36_vm3, %v29_v4 }
   0x8   :  { %v23_v5 = vld [vmem:[#allocation2] sm:$0xff] }
   0x9   :  { %v24_v7 = vld [vmem:[#allocation2 + $0x8] sm:$0xf] }
  0xd8   :  { %v74_v6 = vpop.f32.mrb[0].mxu0 }
  0xd9   :  { %v81_v8 = vadd.f32 %v74_v6, %v23_v5  ;;  %v116_v9 = vpop.f32.mrb[1].mxu0 }
  0xda   :  { %v77_v10 = vpop.f32.mrb[2].mxu0 }
  0xdb   :  { %84 = vst.msk [vmem:[#allocation2] sm:$0xff] %vm19_vm0, %v81_v8  ;;  %v82_v11 = vadd.f32 %v77_v10, %v24_v7  ;;  %v117_v12 = vpop.f32.mrb[3].mxu0 }
  0xdd   :  { %86 = vst.msk [vmem:[#allocation2 + $0x8] sm:$0xf] %vm21_vm1, %v82_v11 }
  0xe2   :  { %v90_v14 = vld [vmem:[#allocation2] sm:$0xff] }
  0xe3   :  { %v99_v15 = vadd.f32 %v109_v13, %v90_v14 }
  0xe4   :  { %v91_v16 = vld [vmem:[#allocation2 + $0x8] sm:$0xf] }
  0xe5   :  { %101 = vst.msk [vmem:[%s170_s3] sm:$0xff] %vm19_vm0, %v99_v15  ;;  %v100_v17 = vadd.f32 %v109_v13, %v91_v16 }
  0xe7   :  { %102 = vst.msk [vmem:[%s170_s3 + $0x8] sm:$0xf] %vm21_vm1, %v100_v17 }

// kernel: _lambda_.33
= control target key start
LH: loop header
LB: loop body
LE: loop exit
PB: predicated region body
PF: predicated region fallthrough
CT: control target
= control target key end

     0   :  { %s960_s15 = smov 0   ;;  %s1048_s0 = inlined_call_operand.vmem [shape: f32[2,4,6,8], index: 0, kind: input, shape index: {}]   ;;  %s1049_s1 = inlined_call_operand.vmem [shape: f32[2,4,6,8], index: 1, kind: input, shape index: {}]   ;;  %s1050_s2 = inlined_call_operand.vmem [shape: f32[2,4,6,8], index: 2, kind: input, shape index: {}]   ;;  %s1051_s3 = inlined_call_operand.vmem [shape: f32[2,1,6], index: 3, kind: input, shape index: {}]   ;;  %s1052_s4 = inlined_call_operand.vmem [shape: f32[2,4,6,8], index: 4, kind: output, shape index: {}]  }
   0x1 LB: > { %s806_s16 = sadd.s32 4294967295, %s930_s15   ;;  %p810_p0 = scmp.ge.s32.totalorder %s930_s15, 1  ;;  %s930_s15 = sphi %s960_s15, %s14_s15  }
   0x2   : > { %p190_p1 = scmp.lt.s32.totalorder %s930_s15, 3 }
   0x4   : > { %p191_p2 = pnand %p810_p0, %p190_p1 }
   0x5   : > { %p229_p3 = scmp.lt.s32.totalorder (!%p191_p2), %s806_s16, 1  ;;  %v932_v0 = vmov (!%p191_p2), 0.0   ;;  %vm933_vm0 = vmmov (!%p191_p2), 0   ;;  %vm278_vm1 = vcmask (!%p191_p2), 64512   ;;  %v469_v21 = vlaneseq (!%p191_p2) }
   0x6   : > { %194 = sbr.rel (%p191_p2) target bundleno = 785 (0x311), region = 36  ;;  %849 = vmatprep.subr.bf16.mxu0 (!%p191_p2), %v932_v0  ;;  %855 = vmatprep.subr.bf16.mxu1 (!%p191_p2), %v932_v0  ;;  %v934_v25 = vmov (!%p191_p2), 0   ;;  %vm478_vm4 = vcmask (!%p191_p2), 46080   ;;  %vm531_vm5 = vcmask (!%p191_p2), 1042432   ;;  %vm527_vm6 = vcmask (!%p191_p2), 48128  }
   0x7   : > { %851 = vmatprep.mubr.msk.bf16.mxu0 (!%p191_p2), %vm933_vm0, %v932_v0  ;;  %857 = vmatprep.mubr.msk.bf16.mxu1 (!%p191_p2), %vm933_vm0, %v932_v0  ;;  %v470_v23 = vshrl.u32 (!%p191_p2), %v469_v21, 7  ;;  %vm713_vm7 = vcmask (!%p191_p2), 62464  }
   0x9   : > { %v471_v24 = vsub.s32 (!%p191_p2), 0, %v470_v23 }
   0xd   : > { %s1054_s16 = smov (!%p229_p3, %s806_s16), 1 }
   0xe   : > { %s977_s17 = sshll.u32 %s1054_s16, 5  ;;  %s246_s26 = scalar_lea.vmem %s1051_s3, %s1054_s16 }
   0xf   : > { %s238_s20 = scalar_lea.vmem %s1049_s1, %s977_s17  ;;  %s233_s23 = scalar_lea.vmem %s1048_s0, %s977_s17  ;;  %v277_v22 = vld [vmem:[%s246_s26] sm:$0x1] }
  0x10   : > { %v261_v1 = vld [vmem:[%s238_s20] sm:$0x3f]  ;;  %v262_v2 = vld [vmem:[%s238_s20 + $0x8] sm:$0x3f]  ;;  %v263_v5 = vld [vmem:[%s238_s20 + $0x10] sm:$0x3f]  ;;  %s243_s29 = scalar_lea.vmem %s1050_s2, %s977_s17  ;;  %s251_s6 = scalar_lea.vmem %s1052_s4, %s977_s17 }
  0x11   : > { %v265_v3 = vpack.c.bf16 %v261_v1, %v261_v1  ;;  %v266_v4 = vpack.c.bf16 %v262_v2, %v262_v2  ;;  %v264_v6 = vld [vmem:[%s238_s20 + $0x18] sm:$0x3f]  ;;  %v253_v9 = vld [vmem:[%s233_s23] sm:$0x3f]  ;;  %v254_v10 = vld [vmem:[%s233_s23 + $0x8] sm:$0x3f]  ;;  %v267_v11 = vpack.c.bf16 %v263_v5, %v263_v5 }
  0x12   : > { %v268_v12 = vpack.c.bf16 %v264_v6, %v264_v6  ;;  %v257_v13 = vpack.c.bf16 %v253_v9, %v253_v9  ;;  %v258_v14 = vpack.c.bf16 %v254_v10, %v254_v10  ;;  %v255_v17 = vld [vmem:[%s233_s23 + $0x10] sm:$0x3f]  ;;  %v256_v18 = vld [vmem:[%s233_s23 + $0x18] sm:$0x3f]  ;;  %vm467_vm2 = vcmp.gt.f32.partialorder %v277_v22, 0.0 }
  0x13   : > { %v283_v7 = vsel %vm278_vm1, %v265_v3, 0  ;;  %v329_v8 = vsel %vm278_vm1, %v266_v4, 0  ;;  %v375_v15 = vsel %vm278_vm1, %v267_v11, 0  ;;  %v259_v19 = vpack.c.bf16 %v255_v17, %v255_v17  ;;  %v272_v22 = vld [vmem:[%s243_s29 + $0x18] sm:$0x3f] }
  0x14   : > { %850 = vmatpush3.bf16.xpose.msra.mxu0 %v283_v7  ;;  %856 = vmatpush3.bf16.xpose.msra.mxu1 %v329_v8  ;;  %v421_v16 = vsel %vm278_vm1, %v268_v12, 0  ;;  %v260_v20 = vpack.c.bf16 %v256_v18, %v256_v18  ;;  %v468_v26 = vsel %vm467_vm2, 1, %v934_v25  ;;  %v276_v23 = vpack.c.bf16 %v272_v22, %v272_v22 }
  0x15   : > { %861 = vmatprep.subr.bf16.mxu0 %v932_v0  ;;  %867 = vmatprep.subr.bf16.mxu1 %v932_v0  ;;  %v472_v27 = vrot.slane %v468_v26, %v471_v24 }
  0x16   : > { %v671_v24 = vsel %vm531_vm5, %v276_v23, 0 }
  0x17   : > { %vm473_vm3 = vcmp.eq.s32.totalorder %v472_v27, 1 }
  0x1b   : > { %852 = vmatmul.mubr.msk.bf16.vlgmr.msra.gmra.mrb[0].mxu0 %vm278_vm1, %v257_v13  ;;  %858 = vmatmul.mubr.msk.bf16.vlgmr.msra.gmra.mrb[0].mxu1 %vm278_vm1, %v258_v14  ;;  %v269_v13 = vld [vmem:[%s243_s29] sm:$0x3f] }
  0x1c   : > { %862 = vmatpush3.bf16.xpose.msra.mxu0 %v375_v15  ;;  %868 = vmatpush3.bf16.xpose.msra.mxu1 %v421_v16  ;;  %v273_v14 = vpack.c.bf16 %v269_v13, %v269_v13  ;;  %v270_v16 = vld [vmem:[%s243_s29 + $0x8] sm:$0x3f] }
  0x1d   : > { %863 = vmatprep.mubr.msk.bf16.mxu0 %vm933_vm0, %v932_v0  ;;  %869 = vmatprep.mubr.msk.bf16.mxu1 %vm933_vm0, %v932_v0  ;;  %v274_v17 = vpack.c.bf16 %v270_v16, %v270_v16 }
  0x1e   : > { %873 = vmatprep.subr.bf16.mxu0 %v932_v0  ;;  %879 = vmatprep.subr.bf16.mxu1 %v932_v0  ;;  %v533_v15 = vsel %vm531_vm5, %v273_v14, 0 }
  0x1f   : > { %v579_v18 = vsel %vm531_vm5, %v274_v17, 0 }
  0x23   : > { %864 = vmatmul.mubr.msk.bf16.vlgmr.msra.gmra.mrb[4].mxu0 %vm278_vm1, %v259_v19  ;;  %870 = vmatmul.mubr.msk.bf16.vlgmr.msra.gmra.mrb[4].mxu1 %vm278_vm1, %v260_v20  ;;  %v271_v19 = vld [vmem:[%s243_s29 + $0x10] sm:$0x3f] }
  0x24   : > { %875 = vmatprep.mubr.msk.bf16.mxu0 %vm933_vm0, %v932_v0  ;;  %881 = vmatprep.mubr.msk.bf16.mxu1 %vm933_vm0, %v932_v0  ;;  %v275_v20 = vpack.c.bf16 %v271_v19, %v271_v19 }
  0x25   : > { %874 = vmatpush3.bf16.msra.mxu0 %v533_v15  ;;  %880 = vmatpush3.bf16.msra.mxu1 %v579_v18 }
  0x26   : > { %885 = vmatprep.subr.bf16.mxu0 %v932_v0  ;;  %891 = vmatprep.subr.bf16.mxu1 %v932_v0  ;;  %v625_v21 = vsel %vm531_vm5, %v275_v20, 0 }
  0xee   : > { %v319_v28 = vpop.f32.mrb[0].mxu0  ;;  %v365_v29 = vpop.f32.mrb[0].mxu1 }
  0xef   : > { %v463_v30 = vmul.f32 0.35355338, %v319_v28  ;;  %v853_v31 = vpop.f32.mrb[1].mxu0  ;;  %v464_v32 = vmul.f32 0.35355338, %v365_v29  ;;  %v859_v33 = vpop.f32.mrb[1].mxu1 }
  0xf0   : > { %v322_v34 = vpop.f32.mrb[2].mxu0  ;;  %v368_v35 = vpop.f32.mrb[2].mxu1 }
  0xf1   : > { %v854_v36 = vpop.f32.mrb[3].mxu0  ;;  %v860_v37 = vpop.f32.mrb[3].mxu1  ;;  %v474_v38 = vsel %vm473_vm3, %v463_v30, -1e+09  ;;  %v475_v39 = vsel %vm473_vm3, %v464_v32, -1e+09 }
  0xf2   : > { %v479_v40 = vsel %vm478_vm4, %v474_v38, -inf  ;;  %v482_v41 = vsel %vm478_vm4, %v475_v39, -inf }
  0xf3   : > { %480 = vmax.xlane.f32.xlu0 %v479_v40 }
  0xf6   : > { %v411_v42 = vpop.f32.mrb[4].mxu0  ;;  %v457_v43 = vpop.f32.mrb[4].mxu1 }
  0xf7   : > { %v465_v44 = vmul.f32 0.35355338, %v411_v42  ;;  %483 = vmax.xlane.f32.xlu0 %v482_v41  ;;  %v865_v45 = vpop.f32.mrb[5].mxu0  ;;  %v466_v46 = vmul.f32 0.35355338, %v457_v43  ;;  %v871_v47 = vpop.f32.mrb[5].mxu1 }
  0xf8   : > { %v414_v48 = vpop.f32.mrb[6].mxu0  ;;  %v460_v49 = vpop.f32.mrb[6].mxu1 }
  0xf9   : > { %v866_v50 = vpop.f32.mrb[7].mxu0  ;;  %v872_v51 = vpop.f32.mrb[7].mxu1  ;;  %v476_v52 = vsel %vm473_vm3, %v465_v44, -1e+09  ;;  %v477_v53 = vsel %vm473_vm3, %v466_v46, -1e+09 }
  0xfa   : > { %v485_v54 = vsel %vm478_vm4, %v476_v52, -inf  ;;  %v488_v55 = vsel %vm478_vm4, %v477_v53, -inf }
  0xfb   : > { %486 = vmax.xlane.f32.xlu1 %v485_v54 }
  0xff   : > { %489 = vmax.xlane.f32.xlu1 %v488_v55 }
 0x180   : > { %v481_v56 = vpop.xlane.xlu0 %480 }
 0x181   : > { %v491_v57 = vsub.f32 %v474_v38, %v481_v56 }
 0x183   : > { %v495_v58 = vmul.f32 1.442695, %v491_v57 }
 0x184   : > { %v484_v59 = vpop.xlane.xlu0 %483 }
 0x185   : > { %908 = vpow2.f32 %v495_v58  ;;  %v492_v60 = vsub.f32 %v475_v39, %v484_v59 }
 0x187   : > { %v497_v61 = vmul.f32 1.442695, %v492_v60 }
 0x188   : > { %v487_v62 = vpop.xlane.xlu1 %486 }
 0x189   : > { %910 = vpow2.f32 %v497_v61  ;;  %v493_v63 = vsub.f32 %v476_v52, %v487_v62 }
 0x18b   : > { %v499_v1 = vmul.f32 1.442695, %v493_v63 }
 0x18c   : > { %v490_v2 = vpop.xlane.xlu1 %489 }
 0x18d   : > { %912 = vpow2.f32 %v499_v1  ;;  %v494_v3 = vsub.f32 %v477_v53, %v490_v2 }
 0x18f   : > { %v909_v4 = vpop.eup %908  ;;  %v501_v5 = vmul.f32 1.442695, %v494_v3 }
 0x190   : > { %v503_v6 = vsel %vm478_vm4, %v909_v4, 0.0 }
 0x191   : > { %914 = vpow2.f32 %v501_v5  ;;  %504 = vadd.xlane.f32.xlu0 %v503_v6 }
 0x193   : > { %v911_v7 = vpop.eup %910 }
 0x194   : > { %v506_v8 = vsel %vm478_vm4, %v911_v7, 0.0 }
 0x195   : > { %507 = vadd.xlane.f32.xlu1 %v506_v8 }
 0x197   : > { %v913_v9 = vpop.eup %912 }
 0x198   : > { %v509_v10 = vsel %vm478_vm4, %v913_v9, 0.0 }
 0x199   : > { %510 = vadd.xlane.f32.xlu0 %v509_v10 }
 0x19b   : > { %v915_v11 = vpop.eup %914 }
 0x19c   : > { %v512_v12 = vsel %vm478_vm4, %v915_v11, 0.0 }
 0x19d   : > { %513 = vadd.xlane.f32.xlu1 %v512_v12 }
 0x21e   : > { %v505_v25 = vpop.xlane.xlu0 %504 }
 0x21f   : > { %916 = vrcp.f32 %v505_v25 }
 0x222   : > { %v508_v26 = vpop.xlane.xlu1 %507 }
 0x223   : > { %918 = vrcp.f32 %v508_v26 }
 0x226   : > { %v511_v27 = vpop.xlane.xlu0 %510 }
 0x227   : > { %920 = vrcp.f32 %v511_v27 }
 0x229   : > { %v917_v28 = vpop.eup %916 }
 0x22a   : > { %v519_v29 = vmul.f32 %v917_v28, %v909_v4  ;;  %v514_v30 = vpop.xlane.xlu1 %513 }
 0x22b   : > { %922 = vrcp.f32 %v514_v30 }
 0x22c   : > { %v523_v31 = vpack.c.bf16 %v519_v29, %v519_v29 }
 0x22d   : > { %v919_v32 = vpop.eup %918 }
 0x22e   : > { %v520_v33 = vmul.f32 %v919_v32, %v911_v7  ;;  %876 = vmatmul.mubr.msk.bf16.vlgmr.msra.gmra.mrb[8].mxu0 %vm527_vm6, %v523_v31 }
 0x22f   : > { %886 = vmatpush3.bf16.msra.mxu0 %v625_v21  ;;  %887 = vmatprep.mubr.msk.bf16.mxu0 %vm933_vm0, %v932_v0 }
 0x230   : > { %v524_v34 = vpack.c.bf16 %v520_v33, %v520_v33 }
 0x231   : > { %v921_v35 = vpop.eup %920 }
 0x232   : > { %v521_v36 = vmul.f32 %v921_v35, %v913_v9  ;;  %882 = vmatmul.mubr.msk.bf16.vlgmr.msra.gmra.mrb[8].mxu1 %vm527_vm6, %v524_v34 }
 0x233   : > { %892 = vmatpush3.bf16.msra.mxu1 %v671_v24  ;;  %893 = vmatprep.mubr.msk.bf16.mxu1 %vm933_vm0, %v932_v0 }
 0x234   : > { %v525_v37 = vpack.c.bf16 %v521_v36, %v521_v36 }
 0x235   : > { %v923_v38 = vpop.eup %922 }
 0x236   : > { %v522_v39 = vmul.f32 %v923_v38, %v915_v11  ;;  %888 = vmatmul.mubr.msk.bf16.vlgmr.msra.gmra.mrb[12].mxu0 %vm527_vm6, %v525_v37 }
 0x238   : > { %v526_v40 = vpack.c.bf16 %v522_v39, %v522_v39 }
 0x23a   : > { %894 = vmatmul.mubr.msk.bf16.vlgmr.msra.gmra.mrb[12].mxu1 %vm527_vm6, %v526_v40 }
 0x301   : > { %v569_v41 = vpop.f32.mrb[8].mxu0 }
 0x302   : > { %714 = vst.msk [vmem:[%s251_s6] sm:$0x3f] %vm713_vm7, %v569_v41  ;;  %v877_v42 = vpop.f32.mrb[9].mxu0 }
 0x303   : > { %v572_v43 = vpop.f32.mrb[10].mxu0 }
 0x304   : > { %v878_v44 = vpop.f32.mrb[11].mxu0 }
 0x305   : > { %v615_v0 = vpop.f32.mrb[8].mxu1 }
 0x306   : > { %715 = vst.msk [vmem:[%s251_s6 + $0x8] sm:$0x3f] %vm713_vm7, %v615_v0  ;;  %v883_v45 = vpop.f32.mrb[9].mxu1 }
 0x307   : > { %v618_v46 = vpop.f32.mrb[10].mxu1 }
 0x308   : > { %v884_v47 = vpop.f32.mrb[11].mxu1 }
 0x309   : > { %v661_v48 = vpop.f32.mrb[12].mxu0 }
 0x30a   : > { %716 = vst.msk [vmem:[%s251_s6 + $0x10] sm:$0x3f] %vm713_vm7, %v661_v48  ;;  %v889_v49 = vpop.f32.mrb[13].mxu0 }
 0x30b   : > { %v664_v50 = vpop.f32.mrb[14].mxu0 }
 0x30c   : > { %v890_v51 = vpop.f32.mrb[15].mxu0 }
 0x30d   : > { %v707_v52 = vpop.f32.mrb[12].mxu1 }
 0x30e   : > { %717 = vst.msk [vmem:[%s251_s6 + $0x18] sm:$0x3f] %vm713_vm7, %v707_v52  ;;  %v895_v53 = vpop.f32.mrb[13].mxu1 }
 0x30f   : > { %v710_v54 = vpop.f32.mrb[14].mxu1 }
 0x310   : > { %v896_v55 = vpop.f32.mrb[15].mxu1 }
 0x311 PF: > { %s14_s15 = sadd.s32 1, %s930_s15  }
 0x312   : > { %p11_p4 = scmp.ge.s32.totalorder %s14_s15, 4  }
 0x314   :  { %13 = sbr.rel (!%p11_p4) target bundleno = 1 (0x1), region = 75 }

// kernel: _lambda_.34
= control target key start
LH: loop header
LB: loop body
LE: loop exit
PB: predicated region body
PF: predicated region fallthrough
CT: control target
= control target key end

     0   :  { %s519_s21 = smov 0   ;;  %s562_s0 = inlined_call_operand.vmem [shape: f32[2,6,32], index: 0, kind: input, shape index: {}]   ;;  %s563_s1 = inlined_call_operand.vmem [shape: bf16[32,32], index: 1, kind: input, shape index: {}]   ;;  %s564_s2 = inlined_call_operand.vmem [shape: f32[1,32], index: 2, kind: input, shape index: {}]   ;;  %s565_s3 = inlined_call_operand.vmem [shape: f32[2,6,32], index: 3, kind: input, shape index: {}]   ;;  %s566_s4 = inlined_call_operand.vmem [shape: f32[1,32], index: 4, kind: input, shape index: {}]   ;;  %s567_s5 = inlined_call_operand.vmem [shape: f32[1,32], index: 5, kind: input, shape index: {}]   ;;  %s568_s6 = inlined_call_operand.vmem [shape: f32[2,6,32], index: 6, kind: output, shape index: {}]  }
   0x1 LB: > { %s433_s22 = sadd.s32 4294967295, %s480_s21   ;;  %p437_p0 = scmp.ge.s32.totalorder %s480_s21, 1  ;;  %s480_s21 = sphi %s519_s21, %s16_s21  }
   0x2   : > { %p220_p1 = scmp.lt.s32.totalorder %s480_s21, 3 }
   0x4   : > { %p221_p2 = pnand %p437_p0, %p220_p1 }
   0x5   : > { %v470_v0 = vld [vmem:[%s563_s1] sm:$0xff] (!%p221_p2)   ;;  %v482_v1 = vmov (!%p221_p2), 0.0   ;;  %v471_v2 = vld [vmem:[%s563_s1 + $0x8] sm:$0xff] (!%p221_p2)   ;;  %vm483_vm0 = vmmov (!%p221_p2), 0   ;;  %p252_p3 = scmp.lt.s32.totalorder (!%p221_p2), %s433_s22, 1  ;;  %vm290_vm1 = vcmask (!%p221_p2), 261120  }
   0x6   : > { %224 = sbr.rel (%p221_p2) target bundleno = 549 (0x225), region = 44  ;;  %452 = vmatprep.subr.bf16.mxu0 (!%p221_p2), %v482_v1  ;;  %456 = vmatprep.mubr.msk.bf16.mxu0 (!%p221_p2), %vm483_vm0, %v482_v1  ;;  %v441_v5 = vld [vmem:[%s564_s2] ss:$0 sm:$0xff] (!%p221_p2)  ;;  %vm338_vm2 = vcmask (!%p221_p2), 259072  }
   0x7   : > { %453 = vmatpush3.bf16.msra.mxu0 (!%p221_p2), %v470_v0  ;;  %v445_v23 = vld [vmem:[%s566_s4] ss:$0 sm:$0xff] (!%p221_p2) }
   0x8   : > { %454 = vmatprep.subr.bf16.mxu0 (!%p221_p2), %v482_v1  ;;  %v446_v25 = vld [vmem:[%s567_s5] ss:$0 sm:$0xff] (!%p221_p2) }
   0xb   : > { %455 = vmatpush3.bf16.msra.mxu0 (!%p221_p2), %v471_v2 }
   0xd   : > { %s570_s22 = smov (!%p252_p3, %s433_s22), 1 }
   0xe   : > { %s533_s27 = sshll.u32 %s570_s22, 3 }
   0xf   : > { %s255_s30 = scalar_lea.vmem %s562_s0, %s533_s27  ;;  %s259_s9 = scalar_lea.vmem %s565_s3, %s533_s27 }
  0x10   : > { %v265_v3 = vld [vmem:[%s255_s30] sm:$0x3f]  ;;  %s263_s18 = scalar_lea.vmem %s568_s6, %s533_s27 }
  0x11   : > { %v270_v4 = vpack.c.bf16 %v265_v3, %v265_v3  ;;  %v334_v7 = vld [vmem:[%s259_s9] sm:$0x3f] }
  0x13   : > { %457 = vmatmul.mubr.msk.bf16.vlgmr.msra.gmra.mrb[0].mxu0 %vm290_vm1, %v270_v4 }
  0xe6   : > { %v328_v6 = vpop.f32.mrb[0].mxu0 }
  0xe7   : > { %v329_v8 = vadd.f32 %v441_v5, %v328_v6  ;;  %v458_v9 = vpop.f32.mrb[1].mxu0 }
  0xe8   : > { %v331_v10 = vpop.f32.mrb[2].mxu0 }
  0xe9   : > { %v459_v11 = vpop.f32.mrb[3].mxu0  ;;  %v335_v12 = vadd.f32 %v334_v7, %v329_v8 }
  0xeb   : > { %v339_v13 = vsel %vm338_vm2, %v335_v12, 0.0 }
  0xec   : > { %340 = vadd.xlane.f32.xlu0 %v339_v13 }
 0x179   : > { %v341_v14 = vpop.xlane.xlu0 %340 }
 0x17a   : > { %v343_v15 = vmul.f32 0.03125, %v341_v14 }
 0x17c   : > { %v344_v16 = vsub.f32 %v335_v12, %v343_v15 }
 0x17e   : > { %v345_v17 = vmul.f32 %v344_v16, %v344_v16 }
 0x180   : > { %v346_v18 = vsel %vm338_vm2, %v345_v17, 0.0 }
 0x181   : > { %347 = vadd.xlane.f32.xlu0 %v346_v18 }
 0x20e   : > { %v348_v19 = vpop.xlane.xlu0 %347 }
 0x20f   : > { %v349_v20 = vmul.f32 0.03125, %v348_v19 }
 0x211   : > { %v350_v21 = vadd.f32 1e-05, %v349_v20 }
 0x213   : > { %472 = vrsqrt.f32 %v350_v21 }
 0x21d   : > { %v473_v22 = vpop.eup %472 }
 0x21e   : > { %v352_v24 = vmul.f32 %v473_v22, %v344_v16 }
 0x220   : > { %v359_v26 = vmul.f32 %v445_v23, %v352_v24 }
 0x222   : > { %v366_v27 = vadd.f32 %v446_v25, %v359_v26 }
 0x224   : > { %367 = vst.msk [vmem:[%s263_s18] sm:$0x3f] %vm338_vm2, %v366_v27 }
 0x225 PF: > { %s16_s21 = sadd.s32 1, %s480_s21  }
 0x226   : > { %p13_p4 = scmp.ge.s32.totalorder %s16_s21, 4  }
 0x228   :  { %15 = sbr.rel (!%p13_p4) target bundleno = 1 (0x1), region = 77 }

// kernel: _lambda_.35
= control target key start
LH: loop header
LB: loop body
LE: loop exit
PB: predicated region body
PF: predicated region fallthrough
CT: control target
= control target key end

     0   :  { %s679_s24 = smov 0   ;;  %s748_s0 = inlined_call_operand.vmem [shape: f32[2,6,32], index: 0, kind: input, shape index: {}]   ;;  %s749_s1 = inlined_call_operand.vmem [shape: bf16[32,128], index: 1, kind: input, shape index: {}]   ;;  %s750_s2 = inlined_call_operand.vmem [shape: f32[1,128], index: 2, kind: input, shape index: {}]   ;;  %s751_s3 = inlined_call_operand.vmem [shape: bf16[128,32], index: 3, kind: input, shape index: {}]   ;;  %s752_s4 = inlined_call_operand.vmem [shape: f32[1,32], index: 4, kind: input, shape index: {}]   ;;  %s753_s5 = inlined_call_operand.vmem [shape: f32[1,32], index: 5, kind: input, shape index: {}]   ;;  %s754_s6 = inlined_call_operand.vmem [shape: f32[1,32], index: 6, kind: input, shape index: {}]   ;;  %s755_s7 = inlined_call_operand.vmem [shape: f32[2,6,32], index: 7, kind: output, shape index: {}]  }
   0x1 LB: > { %s543_s25 = sadd.s32 4294967295, %s635_s24   ;;  %p547_p0 = scmp.ge.s32.totalorder %s635_s24, 1  ;;  %s635_s24 = sphi %s679_s24, %s17_s24  }
   0x2   : > { %p236_p1 = scmp.lt.s32.totalorder %s635_s24, 3 }
   0x4   : > { %p237_p2 = pnand %p547_p0, %p236_p1 }
   0x5   : > { %v617_v0 = vld [vmem:[%s749_s1] sm:$0xff] (!%p237_p2)   ;;  %v637_v1 = vmov (!%p237_p2), 0.0   ;;  %v618_v2 = vld [vmem:[%s749_s1 + $0x8] sm:$0xff] (!%p237_p2)   ;;  %vm638_vm0 = vmmov (!%p237_p2), 0   ;;  %p266_p3 = scmp.lt.s32.totalorder (!%p237_p2), %s543_s25, 1  ;;  %vm300_vm1 = vcmask (!%p237_p2), 261120  }
   0x6   : > { %240 = sbr.rel (%p237_p2) target bundleno = 767 (0x2ff), region = 48  ;;  %579 = vmatprep.subr.bf16.mxu0 (!%p237_p2), %v637_v1  ;;  %587 = vmatprep.subr.bf16.mxu1 (!%p237_p2), %v637_v1  ;;  %v619_v3 = vld [vmem:[%s751_s3] sm:$0xff] (!%p237_p2)   ;;  %v620_v4 = vld [vmem:[%s751_s3 + $0x8] sm:$0xff] (!%p237_p2)   ;;  %v621_v6 = vld [vmem:[%s751_s3 + $0x10] sm:$0xff] (!%p237_p2)   ;;  %vm460_vm2 = vcmask (!%p237_p2), 259072  }
   0x7   : > { %580 = vmatpush3.bf16.msra.mxu0 (!%p237_p2), %v617_v0  ;;  %583 = vmatprep.mubr.msk.bf16.mxu0 (!%p237_p2), %vm638_vm0, %v637_v1  ;;  %v622_v8 = vld [vmem:[%s751_s3 + $0x18] sm:$0xff] (!%p237_p2)   ;;  %v623_v9 = vld [vmem:[%s751_s3 + $0x20] sm:$0xff] (!%p237_p2)   ;;  %v624_v10 = vld [vmem:[%s751_s3 + $0x28] sm:$0xff] (!%p237_p2)  }
   0x8   : > { %581 = vmatprep.subr.bf16.mxu0 (!%p237_p2), %v637_v1  ;;  %603 = vmatprep.mubr.msk.bf16.mxu1 (!%p237_p2), %vm638_vm0, %v637_v1  ;;  %v625_v11 = vld [vmem:[%s751_s3 + $0x30] sm:$0xff] (!%p237_p2)   ;;  %v626_v12 = vld [vmem:[%s751_s3 + $0x38] sm:$0xff] (!%p237_p2)   ;;  %v550_v13 = vld [vmem:[%s750_s2] ss:$0 sm:$0xff] (!%p237_p2) }
   0x9   : > { %588 = vmatpush3.bf16.msra.mxu1 (!%p237_p2), %v619_v3  ;;  %v554_v21 = vld [vmem:[%s752_s4] ss:$0 sm:$0xff] (!%p237_p2) }
   0xa   : > { %589 = vmatprep.subr.bf16.mxu1 (!%p237_p2), %v637_v1  ;;  %v563_v38 = vld [vmem:[%s753_s5] ss:$0 sm:$0xff] (!%p237_p2) }
   0xb   : > { %582 = vmatpush3.bf16.msra.mxu0 (!%p237_p2), %v618_v2  ;;  %v564_v40 = vld [vmem:[%s754_s6] ss:$0 sm:$0xff] (!%p237_p2) }
   0xd   : > { %s757_s25 = smov (!%p266_p3, %s543_s25), 1  ;;  %590 = vmatpush3.bf16.msra.mxu1 %v620_v4 }
   0xe   : > { %s548_s11 = sshll.u32 %s757_s25, 3  ;;  %591 = vmatprep.subr.bf16.mxu1 %v637_v1 }
   0xf   : > { %s269_s14 = scalar_lea.vmem %s748_s0, %s548_s11  ;;  %s273_s17 = scalar_lea.vmem %s755_s7, %s548_s11 }
  0x10   : > { %v275_v5 = vld [vmem:[%s269_s14] sm:$0x3f] }
  0x11   : > { %v280_v7 = vpack.c.bf16 %v275_v5, %v275_v5  ;;  %592 = vmatpush3.bf16.msra.mxu1 %v621_v6 }
  0x12   : > { %593 = vmatprep.subr.bf16.mxu1 %v637_v1 }
  0x13   : > { %584 = vmatmul.mubr.msk.bf16.vlgmr.msra.gmra.mrb[0].mxu0 %vm300_vm1, %v280_v7 }
  0x15   : > { %594 = vmatpush3.bf16.msra.mxu1 %v622_v8 }
  0x16   : > { %595 = vmatprep.subr.bf16.mxu1 %v637_v1 }
  0x19   : > { %596 = vmatpush3.bf16.msra.mxu1 %v623_v9 }
  0x1a   : > { %597 = vmatprep.subr.bf16.mxu1 %v637_v1 }
  0x1d   : > { %598 = vmatpush3.bf16.msra.mxu1 %v624_v10 }
  0x1e   : > { %599 = vmatprep.subr.bf16.mxu1 %v637_v1 }
  0x21   : > { %600 = vmatpush3.bf16.msra.mxu1 %v625_v11 }
  0x22   : > { %601 = vmatprep.subr.bf16.mxu1 %v637_v1 }
  0x25   : > { %602 = vmatpush3.bf16.msra.mxu1 %v626_v12 }
  0xe6   : > { %v338_v14 = vpop.f32.mrb[0].mxu0 }
  0xe7   : > { %v339_v15 = vadd.f32 %v550_v13, %v338_v14  ;;  %v585_v16 = vpop.f32.mrb[1].mxu0 }
  0xe8   : > { %v341_v17 = vpop.f32.mrb[2].mxu0 }
  0xe9   : > { %v344_v18 = vmax.f32 %v339_v15, 0.0  ;;  %v586_v19 = vpop.f32.mrb[3].mxu0 }
  0xeb   : > { %v361_v20 = vpack.c.bf16 %v344_v18, %v344_v18 }
  0xed   : > { %604 = vmatmul.mubr.bf16.vlgmr.msra.gmra.mrb[0].mxu1 %v361_v20 }
 0x1c0   : > { %v451_v22 = vpop.f32.mrb[0].mxu1 }
 0x1c1   : > { %v452_v23 = vadd.f32 %v554_v21, %v451_v22  ;;  %v605_v24 = vpop.f32.mrb[1].mxu1 }
 0x1c2   : > { %v454_v25 = vpop.f32.mrb[2].mxu1 }
 0x1c3   : > { %v606_v26 = vpop.f32.mrb[3].mxu1  ;;  %v457_v27 = vadd.f32 %v452_v23, %v275_v5 }
 0x1c5   : > { %v461_v28 = vsel %vm460_vm2, %v457_v27, 0.0 }
 0x1c6   : > { %462 = vadd.xlane.f32.xlu0 %v461_v28 }
 0x253   : > { %v463_v29 = vpop.xlane.xlu0 %462 }
 0x254   : > { %v465_v30 = vmul.f32 0.03125, %v463_v29 }
 0x256   : > { %v466_v31 = vsub.f32 %v457_v27, %v465_v30 }
 0x258   : > { %v467_v32 = vmul.f32 %v466_v31, %v466_v31 }
 0x25a   : > { %v468_v33 = vsel %vm460_vm2, %v467_v32, 0.0 }
 0x25b   : > { %469 = vadd.xlane.f32.xlu0 %v468_v33 }
 0x2e8   : > { %v470_v34 = vpop.xlane.xlu0 %469 }
 0x2e9   : > { %v471_v35 = vmul.f32 0.03125, %v470_v34 }
 0x2eb   : > { %v472_v36 = vadd.f32 1e-05, %v471_v35 }
 0x2ed   : > { %627 = vrsqrt.f32 %v472_v36 }
 0x2f7   : > { %v628_v37 = vpop.eup %627 }
 0x2f8   : > { %v474_v39 = vmul.f32 %v628_v37, %v466_v31 }
 0x2fa   : > { %v481_v41 = vmul.f32 %v563_v38, %v474_v39 }
 0x2fc   : > { %v488_v42 = vadd.f32 %v564_v40, %v481_v41 }
 0x2fe   : > { %489 = vst.msk [vmem:[%s273_s17] sm:$0x3f] %vm460_vm2, %v488_v42 }
 0x2ff PF: > { %s17_s24 = sadd.s32 1, %s635_s24  }
 0x300   : > { %p14_p4 = scmp.ge.s32.totalorder %s17_s24, 4  }
 0x302   :  { %16 = sbr.rel (!%p14_p4) target bundleno = 1 (0x1), region = 78 }

// kernel: _lambda_.29
= control target key start
LH: loop header
LB: loop body
LE: loop exit
PB: predicated region body
PF: predicated region fallthrough
CT: control target
= control target key end

     0   :  { %s488_s9 = smov 0   ;;  %s517_s0 = inlined_call_operand.vmem [shape: f32[2,16,4], index: 0, kind: input, shape index: {}]   ;;  %s518_s1 = inlined_call_operand.vmem [shape: f32[2,16,4], index: 1, kind: output, shape index: {0}]   ;;  %s519_s2 = inlined_call_operand.vmem [shape: f32[2,16,4], index: 2, kind: output, shape index: {1}]  }
   0x1 LB: > { %s422_s10 = sadd.s32 4294967295, %s470_s9   ;;  %p426_p0 = scmp.ge.s32.totalorder %s470_s9, 1  ;;  %s470_s9 = sphi %s488_s9, %s13_s9  }
   0x2   : > { %p115_p1 = scmp.lt.s32.totalorder %s470_s9, 3 }
   0x4   : > { %p116_p2 = pnand %p426_p0, %p115_p1 }
   0x5   : > { %p142_p3 = scmp.lt.s32.totalorder (!%p116_p2), %s422_s10, 1  ;;  %v159_v0 = vlaneseq (!%p116_p2)  ;;  %v472_v14 = vmov (!%p116_p2), 0.0  }
   0x6   : > { %119 = sbr.rel (%p116_p2) target bundleno = 244 (0xf4), region = 24 }
   0x7   : > { %v160_v1 = vshrl.u32 (!%p116_p2), %v159_v0, 7  ;;  %v163_v2 = vand.u32 (!%p116_p2), 127, %v159_v0 }
   0x9   : > { %v164_v3 = vadd.s32 (!%p116_p2), 4294967294, %v160_v1  ;;  %v180_v4 = vadd.s32 (!%p116_p2), 4294967295, %v160_v1  ;;  %vm196_vm0 = vcmp.gt.s32.totalorder (!%p116_p2), %v160_v1, 0  ;;  %v210_v5 = vadd.s32 (!%p116_p2), 1, %v160_v1 }
   0xa   : > { %v197_v6 = vsel (!%p116_p2), %vm196_vm0, %v160_v1, 0  ;;  %v226_v7 = vadd.s32 (!%p116_p2), 2, %v160_v1  ;;  %v161_v8 = vadd.s32 (!%p116_p2), 8, %v160_v1  ;;  %vm245_vm0 = vcmask (!%p116_p2), 130048  }
   0xb   : > { %vm166_vm1 = vcmp.gt.s32.totalorder (!%p116_p2), %v164_v3, 0  ;;  %vm182_vm2 = vcmp.gt.s32.totalorder (!%p116_p2), %v180_v4, 0  ;;  %vm204_vm3 = vcmp.eq.s32.totalorder (!%p116_p2), %v163_v2, %v197_v6  ;;  %vm220_vm4 = vcmp.eq.s32.totalorder (!%p116_p2), %v163_v2, %v210_v5 }
   0xc   : > { %v167_v12 = vsel (!%p116_p2), %vm166_vm1, %v164_v3, 0  ;;  %v183_v13 = vsel (!%p116_p2), %vm182_vm2, %v180_v4, 0  ;;  %v206_v15 = vsel (!%p116_p2), %vm204_vm3, 1.0, %v472_v14  ;;  %vm236_vm7 = vcmp.eq.s32.totalorder (!%p116_p2), %v163_v2, %v226_v7 }
   0xd   : > { %s521_s10 = smov (!%p142_p3, %s422_s10), 1  ;;  %vm174_vm5 = vcmp.eq.s32.totalorder %v163_v2, %v167_v12  ;;  %vm190_vm6 = vcmp.eq.s32.totalorder %v163_v2, %v183_v13  ;;  %v222_v18 = vsel %vm220_vm4, 1.0, %v472_v14  ;;  %v165_v19 = vadd.s32 4294967294, %v161_v8 }
   0xe   : > { %s496_s11 = sshll.u32 %s521_s10, 4  ;;  %v176_v16 = vsel %vm174_vm5, 1.0, %v472_v14  ;;  %v192_v17 = vsel %vm190_vm6, 1.0, %v472_v14  ;;  %v181_v21 = vadd.s32 4294967295, %v161_v8  ;;  %vm202_vm8 = vcmp.lt.s32.totalorder %v161_v8, 15 }
   0xf   : > { %s146_s14 = scalar_lea.vmem %s517_s0, %s496_s11  ;;  %v194_v20 = vadd.f32 %v192_v17, %v176_v16  ;;  %v211_v22 = vadd.s32 1, %v161_v8  ;;  %v238_v23 = vsel %vm236_vm7, 1.0, %v472_v14  ;;  %vm175_vm9 = vcmp.eq.s32.totalorder %v163_v2, %v165_v19  ;;  %s156_s17 = scalar_lea.vmem %s519_s2, %s496_s11 }
  0x10   : > { %v502_v9 = vld [vmem:[%s146_s14] sm:$0xff]  ;;  %v158_v10 = vld [vmem:[%s146_s14 + $0x8] sm:$0xff]  ;;  %v203_v24 = vsel %vm202_vm8, %v161_v8, 15  ;;  %v227_v25 = vadd.s32 2, %v161_v8  ;;  %v177_v27 = vsel %vm175_vm9, 1.0, %v472_v14  ;;  %vm191_vm10 = vcmp.eq.s32.totalorder %v163_v2, %v181_v21  ;;  %s151_s20 = scalar_lea.vmem %s518_s1, %s496_s11 }
  0x11   : > { %v451_v11 = vpack.c.bf16 %v158_v10, %v502_v9  ;;  %v208_v26 = vadd.f32 %v206_v15, %v194_v20  ;;  %vm205_vm11 = vcmp.eq.s32.totalorder %v163_v2, %v203_v24  ;;  %v193_v28 = vsel %vm191_vm10, 1.0, %v472_v14 }
  0x12   : > { %v207_v29 = vsel %vm205_vm11, 1.0, %v472_v14  ;;  %vm218_vm12 = vcmp.lt.s32.totalorder %v211_v22, 15  ;;  %vm234_vm13 = vcmp.lt.s32.totalorder %v227_v25, 15  ;;  %v195_v31 = vadd.f32 %v193_v28, %v177_v27 }
  0x13   : > { %452 = vmatprep.subr.bf16.mxu0 %v451_v11  ;;  %v224_v30 = vadd.f32 %v222_v18, %v208_v26  ;;  %v219_v32 = vsel %vm218_vm12, %v211_v22, 15  ;;  %v235_v33 = vsel %vm234_vm13, %v227_v25, 15  ;;  %vm329_vm1 = vcmask 31744  }
  0x14   : > { %454 = vmatpush3.bf16.msra.mxu0 %v451_v11  ;;  %vm221_vm14 = vcmp.eq.s32.totalorder %v163_v2, %v219_v32  ;;  %vm237_vm15 = vcmp.eq.s32.totalorder %v163_v2, %v235_v33  ;;  %v209_v35 = vadd.f32 %v207_v29, %v195_v31 }
  0x15   : > { %v240_v34 = vadd.f32 %v238_v23, %v224_v30  ;;  %v223_v36 = vsel %vm221_vm14, 1.0, %v472_v14  ;;  %v239_v37 = vsel %vm237_vm15, 1.0, %v472_v14 }
  0x16   : > { %v225_v39 = vadd.f32 %v223_v36, %v209_v35 }
  0x17   : > { %v243_v38 = vmul.f32 0.2, %v240_v34 }
  0x18   : > { %v241_v40 = vadd.f32 %v239_v37, %v225_v39 }
  0x19   : > { %448 = vmatprep.mubr.msk.f32.mxu0 %vm245_vm0, %v243_v38 }
  0x1a   : > { %v244_v41 = vmul.f32 0.2, %v241_v40 }
  0x1c   : > { %449 = vmatmul.mubr.msk.f32.vlgmr.msra.gmra.mrb[0].mxu0 %vm245_vm0, %v244_v41 }
  0xef   : > { %v450_v42 = vpop.f32.mrb[0].mxu0 }
  0xf0   : > { %v328_v43 = vsub.f32 %v158_v10, %v450_v42  ;;  %333 = vst.msk [vmem:[%s156_s17 + $0x8] sm:$0xff] %vm329_vm1, %v450_v42  ;;  %v318_v44 = vpop.f32.mrb[1].mxu0 }
  0xf1   : > { %v327_v45 = vsub.f32 %v502_v9, %v318_v44  ;;  %332 = vst.msk [vmem:[%s156_s17] sm:$0xff] %vm329_vm1, %v318_v44 }
  0xf2   : > { %331 = vst.msk [vmem:[%s151_s20 + $0x8] sm:$0xff] %vm329_vm1, %v328_v43 }
  0xf3   : > { %330 = vst.msk [vmem:[%s151_s20] sm:$0xff] %vm329_vm1, %v327_v45 }
  0xf4 PF: > { %s13_s9 = sadd.s32 1, %s470_s9  }
  0xf5   : > { %p10_p4 = scmp.ge.s32.totalorder %s13_s9, 4  }
  0xf7   :  { %12 = sbr.rel (!%p10_p4) target bundleno = 1 (0x1), region = 66 }

// kernel: _lambda_.40
= control target key start
LH: loop header
LB: loop body
LE: loop exit
PB: predicated region body
PF: predicated region fallthrough
CT: control target
= control target key end

     0   :  { %vm19_vm0 = vcmask 785408   ;;  %v204_v0 = vmov 0.0   ;;  %vm205_vm1 = vmmov 0   ;;  %vm57_vm2 = vcmask 261120   ;;  %s292_s1 = inlined_call_operand.vmem [shape: bf16[32,96], index: 1, kind: input, shape index: {}]   ;;  %s293_s0 = inlined_call_operand.vmem [shape: f32[48,32], index: 0, kind: input, shape index: {}]   ;;  %s294_s2 = inlined_call_operand.vmem [shape: f32[1,96], index: 2, kind: input, shape index: {}]   ;;  %s295_s3 = inlined_call_operand.vmem [shape: f32[48,96], index: 3, kind: output, shape index: {}]  }
   0x1   :  { %196 = vmatprep.subr.bf16.mxu1 %v204_v0  ;;  %v202_v1 = vld [vmem:[%s292_s1] sm:$0xff]   ;;  %180 = vmatprep.subr.bf16.mxu0 %v204_v0  ;;  %22 = vst.msk [vmem:[#allocation2 + $0x10] sm:$0xff] %vm19_vm0, %v204_v0  ;;  %20 = vst.msk [vmem:[#allocation2] sm:$0xff] %vm19_vm0, %v204_v0  ;;  %v203_v2 = vld [vmem:[%s292_s1 + $0x8] sm:$0xff]  }
   0x2   :  { %21 = vst.msk [vmem:[#allocation2 + $0x8] sm:$0xff] %vm19_vm0, %v204_v0  ;;  %23 = vst.msk [vmem:[#allocation2 + $0x18] sm:$0xff] %vm19_vm0, %v204_v0  ;;  %188 = vmatprep.mubr.msk.bf16.mxu1 %vm205_vm1, %v204_v0  ;;  %184 = vmatprep.mubr.msk.bf16.mxu0 %vm205_vm1, %v204_v0  ;;  %v34_v3 = vld [vmem:[%s293_s0 + $0x10] sm:$0xff]  ;;  %v35_v4 = vld [vmem:[%s293_s0 + $0x18] sm:$0xff] }
   0x3   :  { %24 = vst.msk [vmem:[#allocation2 + $0x20] sm:$0xff] %vm19_vm0, %v204_v0  ;;  %25 = vst.msk [vmem:[#allocation2 + $0x28] sm:$0xff] %vm19_vm0, %v204_v0  ;;  %198 = vmatpush3.bf16.msra.mxu1 %v202_v1  ;;  %181 = vmatpush3.bf16.msra.mxu0 %v202_v1  ;;  %v32_v5 = vld [vmem:[%s293_s0] sm:$0xff]  ;;  %v33_v6 = vld [vmem:[%s293_s0 + $0x8] sm:$0xff]  ;;  %v43_v7 = vpack.c.bf16 %v35_v4, %v34_v3 }
   0x4   :  { %197 = vmatprep.subr.bf16.mxu1 %v204_v0  ;;  %182 = vmatprep.subr.bf16.mxu0 %v204_v0  ;;  %v42_v8 = vpack.c.bf16 %v33_v6, %v32_v5  ;;  %v36_v9 = vld [vmem:[%s293_s0 + $0x20] sm:$0xff]  ;;  %v37_v10 = vld [vmem:[%s293_s0 + $0x28] sm:$0xff] }
   0x5   :  { %v44_v11 = vpack.c.bf16 %v37_v10, %v36_v9  ;;  %v174_v29 = vld [vmem:[%s294_s2] ss:$0 sm:$0xff] }
   0x7   :  { %199 = vmatpush3.bf16.msra.mxu1 %v203_v2  ;;  %183 = vmatpush3.bf16.msra.mxu0 %v203_v2 }
   0x8   :  { %v28_v12 = vld [vmem:[#allocation2 + $0x10] sm:$0xff]  ;;  %v26_v13 = vld [vmem:[#allocation2] sm:$0xff] }
   0x9   :  { %v29_v15 = vld [vmem:[#allocation2 + $0x18] sm:$0xff]  ;;  %v27_v17 = vld [vmem:[#allocation2 + $0x8] sm:$0xff] }
   0xa   :  { %189 = vmatmul.mubr.msk.bf16.vlgmr.msra.gmra.mrb[0].mxu1 %vm57_vm2, %v43_v7  ;;  %185 = vmatmul.mubr.msk.bf16.vlgmr.msra.gmra.mrb[0].mxu0 %vm57_vm2, %v42_v8  ;;  %v30_v28 = vld [vmem:[#allocation2 + $0x20] sm:$0xff]  ;;  %v31_v31 = vld [vmem:[#allocation2 + $0x28] sm:$0xff] }
   0xb   :  { %192 = vmatprep.mubr.msk.bf16.mxu1 %vm205_vm1, %v204_v0 }
  0x12   :  { %193 = vmatmul.mubr.msk.bf16.gmra.mrb[4].mxu1 %vm57_vm2, %v44_v11 }
  0xdd   :  { %v109_v14 = vpop.f32.mrb[0].mxu1  ;;  %v101_v16 = vpop.f32.mrb[0].mxu0 }
  0xde   :  { %v126_v18 = vadd.f32 %v109_v14, %v28_v12  ;;  %v190_v19 = vpop.f32.mrb[1].mxu1  ;;  %v124_v20 = vadd.f32 %v101_v16, %v26_v13  ;;  %v186_v21 = vpop.f32.mrb[1].mxu0 }
  0xdf   :  { %v112_v22 = vpop.f32.mrb[2].mxu1  ;;  %v104_v23 = vpop.f32.mrb[2].mxu0 }
  0xe0   :  { %133 = vst.msk [vmem:[#allocation2 + $0x10] sm:$0xff] %vm19_vm0, %v126_v18  ;;  %v127_v24 = vadd.f32 %v112_v22, %v29_v15  ;;  %v191_v25 = vpop.f32.mrb[3].mxu1  ;;  %131 = vst.msk [vmem:[#allocation2] sm:$0xff] %vm19_vm0, %v124_v20  ;;  %v125_v26 = vadd.f32 %v104_v23, %v27_v17  ;;  %v187_v27 = vpop.f32.mrb[3].mxu0 }
  0xe2   :  { %134 = vst.msk [vmem:[#allocation2 + $0x18] sm:$0xff] %vm19_vm0, %v127_v24  ;;  %132 = vst.msk [vmem:[#allocation2 + $0x8] sm:$0xff] %vm19_vm0, %v125_v26 }
  0xe5   :  { %v117_v30 = vpop.f32.mrb[4].mxu1 }
  0xe6   :  { %v128_v32 = vadd.f32 %v117_v30, %v30_v28  ;;  %v194_v33 = vpop.f32.mrb[5].mxu1 }
  0xe7   :  { %v142_v34 = vld [vmem:[#allocation2 + $0x10] sm:$0xff]  ;;  %v140_v35 = vld [vmem:[#allocation2] sm:$0xff]  ;;  %v120_v36 = vpop.f32.mrb[6].mxu1 }
  0xe8   :  { %v155_v37 = vadd.f32 %v174_v29, %v142_v34  ;;  %v153_v38 = vadd.f32 %v174_v29, %v140_v35  ;;  %135 = vst.msk [vmem:[#allocation2 + $0x20] sm:$0xff] %vm19_vm0, %v128_v32  ;;  %v129_v39 = vadd.f32 %v120_v36, %v31_v31  ;;  %v195_v40 = vpop.f32.mrb[7].mxu1 }
  0xe9   :  { %v143_v41 = vld [vmem:[#allocation2 + $0x18] sm:$0xff]  ;;  %v141_v42 = vld [vmem:[#allocation2 + $0x8] sm:$0xff] }
  0xea   :  { %161 = vst.msk [vmem:[%s295_s3 + $0x10] sm:$0xff] %vm19_vm0, %v155_v37  ;;  %v156_v43 = vadd.f32 %v174_v29, %v143_v41  ;;  %159 = vst.msk [vmem:[%s295_s3] sm:$0xff] %vm19_vm0, %v153_v38  ;;  %v154_v44 = vadd.f32 %v174_v29, %v141_v42 }
  0xeb   :  { %136 = vst.msk [vmem:[#allocation2 + $0x28] sm:$0xff] %vm19_vm0, %v129_v39 }
  0xec   :  { %162 = vst.msk [vmem:[%s295_s3 + $0x18] sm:$0xff] %vm19_vm0, %v156_v43  ;;  %160 = vst.msk [vmem:[%s295_s3 + $0x8] sm:$0xff] %vm19_vm0, %v154_v44 }
  0xef   :  { %v144_v45 = vld [vmem:[#allocation2 + $0x20] sm:$0xff] }
  0xf0   :  { %v157_v46 = vadd.f32 %v174_v29, %v144_v45 }
  0xf2   :  { %v145_v47 = vld [vmem:[#allocation2 + $0x28] sm:$0xff]  ;;  %163 = vst.msk [vmem:[%s295_s3 + $0x20] sm:$0xff] %vm19_vm0, %v157_v46 }
  0xf3   :  { %v158_v48 = vadd.f32 %v174_v29, %v145_v47 }
  0xf5   :  { %164 = vst.msk [vmem:[%s295_s3 + $0x28] sm:$0xff] %vm19_vm0, %v158_v48 }

// kernel: _lambda_.30
= control target key start
LH: loop header
LB: loop body
LE: loop exit
PB: predicated region body
PF: predicated region fallthrough
CT: control target
= control target key end

     0   :  { %s1097_s21 = smov 0   ;;  %s1231_s0 = inlined_call_operand.vmem [shape: f32[2,24,4], index: 0, kind: input, shape index: {}, may-alias: {0,1}]   ;;  %s1232_s1 = inlined_call_operand.vmem [shape: f32[2,24,4], index: 1, kind: input, shape index: {}, may-alias: {0,1}]   ;;  %s1233_s2 = inlined_call_operand.vmem [shape: bf16[4,32], index: 2, kind: input, shape index: {}]   ;;  %s1234_s3 = inlined_call_operand.vmem [shape: bf16[4,32], index: 3, kind: input, shape index: {}]   ;;  %s1235_s4 = inlined_call_operand.vmem [shape: bf16[4,32], index: 4, kind: input, shape index: {}]   ;;  %s1236_s5 = inlined_call_operand.vmem [shape: bf16[4,32], index: 5, kind: input, shape index: {}]   ;;  %s1237_s6 = inlined_call_operand.vmem [shape: f32[2,24,32], index: 6, kind: output, shape index: {}]  }
   0x1 LB: > { %s903_s22 = sadd.s32 4294967295, %s1057_s21   ;;  %p907_p0 = scmp.ge.s32.totalorder %s1057_s21, 1  ;;  %s1057_s21 = sphi %s1097_s21, %s16_s21  }
   0x2   : > { %p222_p1 = scmp.lt.s32.totalorder %s1057_s21, 3 }
   0x4   : > { %p223_p2 = pnand %p907_p0, %p222_p1 }
   0x5   : > { %p257_p3 = scmp.lt.s32.totalorder (!%p223_p2), %s903_s22, 1  ;;  %v276_v0 = vlaneseq (!%p223_p2)  ;;  %v584_v1 = vld [vmem:[%s1234_s3] sm:$0x3] (!%p223_p2)  ;;  %v1059_v2 = vmov (!%p223_p2), 0.0|0.0   ;;  %vm1060_vm0 = vmmov (!%p223_p2), 0   ;;  %v1061_v3 = vmov (!%p223_p2), 0.0  }
   0x6   : > { %226 = sbr.rel (%p223_p2) target bundleno = 489 (0x1e9), region = 44  ;;  %1005 = vmatprep.subr.bf16.mxu1 (!%p223_p2), %v1059_v2  ;;  %957 = vmatprep.mubr.msk.f32.mxu1 (!%p223_p2), %vm1060_vm0, %v1061_v3  ;;  %vm594_vm1 = vcmask (!%p223_p2), 1041408   ;;  %v581_v4 = vld [vmem:[%s1233_s2] sm:$0x3] (!%p223_p2)  ;;  %vm587_vm2 = vcmask (!%p223_p2), 31744   ;;  %vm342_vm3 = vcmask (!%p223_p2), 195584  }
   0x7   : > { %v277_v5 = vshrl.u32 (!%p223_p2), %v276_v0, 7  ;;  %1023 = vmatprep.subr.msk.bf16.mxu0 (!%p223_p2), %vm594_vm1, %v584_v1  ;;  %v596_v6 = vsel (!%p223_p2), %vm594_vm1, %v584_v1, 0  ;;  %v653_v20 = vsel (!%p223_p2), %vm594_vm1, %v581_v4, 0  ;;  %v1162_v45 = vand.u32 (!%p223_p2), 127, %v276_v0 }
   0x8   : > { %982 = vmatpush3.bf16.msra.mxu0 (!%p223_p2), %v596_v6 }
   0x9   : > { %v282_v7 = vadd.s32 (!%p223_p2), 4294967295, %v277_v5  ;;  %v278_v8 = vadd.s32 (!%p223_p2), 8, %v277_v5  ;;  %v279_v9 = vadd.s32 (!%p223_p2), 16, %v277_v5  ;;  %v432_v10 = vadd.s32 (!%p223_p2), 1, %v277_v5  ;;  %1024 = vmatprep.subr.msk.bf16.mxu0 (!%p223_p2), %vm594_vm1, %v581_v4 }
   0xb   : > { %v285_v11 = vadd.s32 (!%p223_p2), 24, %v282_v7  ;;  %v283_v12 = vadd.s32 (!%p223_p2), 4294967295, %v278_v8  ;;  %v284_v13 = vadd.s32 (!%p223_p2), 4294967295, %v279_v9  ;;  %v435_v14 = vadd.s32 (!%p223_p2), 24, %v432_v10 }
   0xc   : > { %v433_v18 = vadd.s32 (!%p223_p2), 1, %v278_v8  ;;  %v434_v19 = vadd.s32 (!%p223_p2), 1, %v279_v9 }
   0xd   : > { %s1241_s22 = smov (!%p257_p3, %s903_s22), 1  ;;  %v1130_v23 = vmul.u32.u64.low 2863311531, %v285_v11  ;;  %v1131_v24 = vmul.u32.u64.high 2863311531, %v285_v11, %v1130_v23  ;;  %v286_v25 = vadd.s32 24, %v283_v12  ;;  %v287_v26 = vadd.s32 24, %v284_v13 }
   0xe   : > { %s1116_s27 = smul.u32 24, %s1241_s22  ;;  %v1133_v27 = vmul.u32.u64.low 2863311531, %v435_v14  ;;  %v1134_v28 = vmul.u32.u64.high 2863311531, %v435_v14, %v1133_v27  ;;  %v436_v29 = vadd.s32 24, %v433_v18  ;;  %v1137_v30 = vadd.s32 24, %v434_v19 }
   0xf   : > { %v1142_v31 = vmul.u32.u64.low 2863311531, %v286_v25  ;;  %v1143_v32 = vmul.u32.u64.high 2863311531, %v286_v25, %v1142_v31  ;;  %v1145_v33 = vmul.u32.u64.low 2863311531, %v287_v26  ;;  %v1146_v34 = vmul.u32.u64.high 2863311531, %v287_v26, %v1145_v33  ;;  %v769_v23 = vld [vmem:[%s1236_s5] sm:$0x3] }
  0x10   : > { %s261_s30 = scalar_lea.vmem %s1231_s0, %s1116_s27  ;;  %v294_v35 = vshrl.u32 %v1131_v24, 4  ;;  %v1150_v36 = vmul.u32.u64.low 2863311531, %v436_v29  ;;  %v1151_v37 = vmul.u32.u64.high 2863311531, %v436_v29, %v1150_v36  ;;  %v444_v38 = vshrl.u32 %v1134_v28, 4  ;;  %s266_s13 = scalar_lea.vmem %s1232_s1, %s1116_s27 }
  0x11   : > { %v273_v15 = vld [vmem:[%s261_s30] sm:$0xff]  ;;  %v274_v16 = vld [vmem:[%s261_s30 + $0x8] sm:$0xff]  ;;  %v1123_v17 = vld [vmem:[%s261_s30 + $0x10] sm:$0xff]  ;;  %v1155_v39 = vmul.u32.u64.low 2863311531, %v1137_v30  ;;  %v1156_v40 = vmul.u32.u64.high 2863311531, %v1137_v30, %v1155_v39  ;;  %v305_v42 = vshrl.u32 %v1143_v32, 4  ;;  %s271_s16 = scalar_lea.vmem %s1237_s6, %s1116_s27 }
  0x12   : > { %v1126_v21 = vpack.c.bf16 %v274_v16, %v273_v15  ;;  %v586_v22 = vpack.c.bf16 %v1123_v17, %v1123_v17  ;;  %v295_v41 = vmul.u32 24, %v294_v35  ;;  %v316_v43 = vshrl.u32 %v1146_v34, 4  ;;  %v768_v36 = vld [vmem:[%s266_s13 + $0x10] sm:$0xff] }
  0x13   : > { %v445_v44 = vmul.u32 24, %v444_v38  ;;  %v455_v47 = vshrl.u32 %v1151_v37, 4  ;;  %v306_v48 = vmul.u32 24, %v305_v42  ;;  %v466_v51 = vshrl.u32 %v1156_v40, 4 }
  0x14   : > { %1007 = vmatpush3.bf16.msra.mxu1 %v1126_v21  ;;  %983 = vmatprep.mubr.msk.bf16.mxu0 %vm587_vm2, %v1126_v21  ;;  %v296_v46 = vsub.s32 %v285_v11, %v295_v41  ;;  %v317_v49 = vmul.u32 24, %v316_v43  ;;  %v779_v35 = vsel %vm594_vm1, %v769_v23, 0  ;;  %v771_v37 = vpack.c.bf16 %v768_v36, %v768_v36 }
  0x15   : > { %955 = vmatprep.subr.mxu1 %v1061_v3  ;;  %984 = vmatmul.mubr.msk.bf16.vlgmr.msra.gmra.mrb[0].mxu0 %vm587_vm2, %v586_v22  ;;  %v446_v50 = vsub.s32 %v435_v14, %v445_v44  ;;  %v456_v53 = vmul.u32 24, %v455_v47  ;;  %v307_v54 = vsub.s32 %v286_v25, %v306_v48  ;;  %v467_v59 = vmul.u32 24, %v466_v51  ;;  %v703_v14 = vld [vmem:[%s1235_s4] sm:$0x3] }
  0x16   : > { %988 = vmatpush3.bf16.msra.mxu0 %v653_v20  ;;  %vm321_vm4 = vcmp.ne.s32.totalorder %v296_v46, 0  ;;  %vm324_vm5 = vcmp.lt.s32.totalorder %v296_v46, 0  ;;  %v330_v52 = vadd.s32 24, %v296_v46  ;;  %v318_v55 = vsub.s32 %v287_v26, %v317_v49 }
  0x17   : > { %vm327_vm6 = vmand %vm324_vm5, %vm321_vm4  ;;  %vm471_vm7 = vcmp.ne.s32.totalorder %v446_v50, 0  ;;  %vm474_vm8 = vcmp.lt.s32.totalorder %v446_v50, 0  ;;  %v480_v57 = vadd.s32 24, %v446_v50  ;;  %v457_v58 = vsub.s32 %v436_v29, %v456_v53  ;;  %1025 = vmatprep.subr.msk.bf16.mxu0 %vm594_vm1, %v703_v14  ;;  %v766_v29 = vld [vmem:[%s266_s13] sm:$0xff] }
  0x18   : > { %956 = vmatpush3.msra.mxu1 %v1123_v17  ;;  %v333_v56 = vsel %vm327_vm6, %v330_v52, %v296_v46  ;;  %vm322_vm10 = vcmp.ne.s32.totalorder %v307_v54, 0  ;;  %vm325_vm11 = vcmp.lt.s32.totalorder %v307_v54, 0  ;;  %v331_v60 = vadd.s32 24, %v307_v54  ;;  %vm1167_vm12 = vmand %vm474_vm8, %vm471_vm7 }
  0x19   : > { %1008 = vmatprep.subr.bf16.mxu1 %v1059_v2  ;;  %vm336_vm9 = vcmp.eq.s32.totalorder %v1162_v45, %v333_v56  ;;  %vm328_vm13 = vmand %vm325_vm11, %vm322_vm10  ;;  %vm323_vm14 = vcmp.ne.s32.totalorder %v318_v55, 0  ;;  %vm326_vm15 = vcmp.lt.s32.totalorder %v318_v55, 0  ;;  %v332_v63 = vadd.s32 24, %v318_v55 }
  0x1a   : > { %v339_v62 = vsel %vm336_vm9, 1.0, %v1061_v3  ;;  %v334_v0 = vsel %vm328_vm13, %v331_v60, %v307_v54  ;;  %vm329_vm4 = vmand %vm326_vm15, %vm323_vm14  ;;  %vm472_vm6 = vcmp.ne.s32.totalorder %v457_v58, 0  ;;  %vm475_vm7 = vcmp.lt.s32.totalorder %v457_v58, 0 }
  0x1b   : > { %958 = vmatmul.mubr.msk.f32.vlgmr.msra.gmra.mrb[0].mxu1 %vm342_vm3, %v339_v62  ;;  %vm337_vm5 = vcmp.eq.s32.totalorder %v1162_v45, %v334_v0  ;;  %v335_v1 = vsel %vm329_vm4, %v332_v63, %v318_v55  ;;  %v468_v4 = vsub.s32 %v1137_v30, %v467_v59  ;;  %v483_v5 = vsel %vm1167_vm12, %v480_v57, %v446_v50  ;;  %vm478_vm9 = vmand %vm475_vm7, %vm472_vm6  ;;  %v767_v30 = vld [vmem:[%s266_s13 + $0x8] sm:$0xff] }
  0x1c   : > { %1010 = vmatpush3.bf16.msra.mxu1 %v1126_v21  ;;  %960 = vmatprep.mubr.msk.f32.mxu1 %vm1060_vm0, %v1061_v3  ;;  %v340_v2 = vsel %vm337_vm5, 1.0, %v1061_v3  ;;  %vm338_vm8 = vcmp.eq.s32.totalorder %v1162_v45, %v335_v1  ;;  %v481_v6 = vadd.s32 24, %v457_v58  ;;  %vm486_vm13 = vcmp.eq.s32.totalorder %v1162_v45, %v483_v5 }
  0x1d   : > { %970 = vmatprep.subr.mxu1 %v1061_v3  ;;  %v341_v7 = vsel %vm338_vm8, 1.0, %v1061_v3  ;;  %vm473_vm10 = vcmp.ne.s32.totalorder %v468_v4, 0  ;;  %vm476_vm11 = vcmp.lt.s32.totalorder %v468_v4, 0  ;;  %v482_v9 = vadd.s32 24, %v468_v4 }
  0x1e   : > { %v484_v8 = vsel %vm478_vm9, %v481_v6, %v457_v58  ;;  %vm479_vm12 = vmand %vm476_vm11, %vm473_vm10  ;;  %v489_v10 = vsel %vm486_vm13, 1.0, %v1061_v3  ;;  %v770_v32 = vpack.c.bf16 %v767_v30, %v766_v29 }
  0x1f   : > { %961 = vmatmul.mubr.msk.f32.gmra.mrb[2].mxu1 %vm342_vm3, %v340_v2  ;;  %vm487_vm14 = vcmp.eq.s32.totalorder %v1162_v45, %v484_v8  ;;  %v485_v11 = vsel %vm479_vm12, %v482_v9, %v468_v4 }
  0x20   : > { %971 = vmatpush3.msra.mxu1 %v1123_v17  ;;  %963 = vmatprep.mubr.msk.f32.mxu1 %vm1060_vm0, %v1061_v3  ;;  %v490_v12 = vsel %vm487_vm14, 1.0, %v1061_v3  ;;  %vm488_vm15 = vcmp.eq.s32.totalorder %v1162_v45, %v485_v11 }
  0x21   : > { %v491_v13 = vsel %vm488_vm15, 1.0, %v1061_v3 }
  0x23   : > { %964 = vmatmul.mubr.msk.f32.gmra.mrb[4].mxu1 %vm342_vm3, %v341_v7 }
  0x24   : > { %972 = vmatprep.mubr.msk.f32.mxu1 %vm1060_vm0, %v1061_v3 }
  0x27   : > { %973 = vmatmul.mubr.msk.f32.vlgmr.msra.gmra.mrb[6].mxu1 %vm342_vm3, %v489_v10 }
  0x28   : > { %975 = vmatprep.mubr.msk.f32.mxu1 %vm1060_vm0, %v1061_v3 }
  0x2b   : > { %976 = vmatmul.mubr.msk.f32.gmra.mrb[8].mxu1 %vm342_vm3, %v490_v12 }
  0x2c   : > { %978 = vmatprep.mubr.msk.f32.mxu1 %vm1060_vm0, %v1061_v3  ;;  %v713_v3 = vsel %vm594_vm1, %v703_v14, 0  ;;  %vm832_vm0 = vcmask 261120  }
  0x2f   : > { %979 = vmatmul.mubr.msk.f32.gmra.mrb[10].mxu1 %vm342_vm3, %v491_v13 }
  0xee   : > { %v418_v15 = vpop.f32.mrb[0].mxu1 }
  0xef   : > { %v959_v16 = vpop.f32.mrb[1].mxu1 }
  0xf2   : > { %v423_v17 = vpop.f32.mrb[2].mxu1 }
  0xf3   : > { %v582_v18 = vpack.c.bf16 %v423_v17, %v418_v15  ;;  %v962_v19 = vpop.f32.mrb[3].mxu1 }
  0xf5   : > { %989 = vmatprep.mubr.msk.bf16.mxu0 %vm587_vm2, %v582_v18 }
  0xf6   : > { %v428_v20 = vpop.f32.mrb[4].mxu1 }
  0xf7   : > { %v583_v21 = vpack.c.bf16 %v428_v20, %v428_v20  ;;  %v965_v22 = vpop.f32.mrb[5].mxu1 }
  0xf9   : > { %990 = vmatmul.mubr.msk.bf16.vlgmr.msra.gmra.mrb[0].mxu0 %vm587_vm2, %v583_v21 }
  0xfa   : > { %994 = vmatpush3.bf16.msra.mxu0 %v713_v3  ;;  %v567_v24 = vpop.f32.mrb[6].mxu1 }
  0xfb   : > { %v974_v25 = vpop.f32.mrb[7].mxu1  ;;  %1026 = vmatprep.subr.msk.bf16.mxu0 %vm594_vm1, %v769_v23 }
  0xfe   : > { %v572_v26 = vpop.f32.mrb[8].mxu1 }
  0xff   : > { %v704_v27 = vpack.c.bf16 %v572_v26, %v567_v24  ;;  %v977_v28 = vpop.f32.mrb[9].mxu1 }
 0x101   : > { %995 = vmatprep.mubr.msk.bf16.mxu0 %vm587_vm2, %v704_v27 }
 0x102   : > { %v577_v31 = vpop.f32.mrb[10].mxu1 }
 0x103   : > { %v705_v33 = vpack.c.bf16 %v577_v31, %v577_v31  ;;  %v980_v34 = vpop.f32.mrb[11].mxu1 }
 0x105   : > { %996 = vmatmul.mubr.msk.bf16.vlgmr.msra.gmra.mrb[0].mxu0 %vm587_vm2, %v705_v33 }
 0x106   : > { %1000 = vmatpush3.bf16.msra.mxu0 %v779_v35  ;;  %1001 = vmatprep.mubr.msk.bf16.mxu0 %vm587_vm2, %v770_v32 }
 0x111   : > { %1002 = vmatmul.mubr.msk.bf16.vlgmr.msra.gmra.mrb[0].mxu0 %vm587_vm2, %v771_v37 }
 0x1e4   : > { %v1003_v38 = vpop.f32.mrb[0].mxu0 }
 0x1e5   : > { %835 = vst.msk [vmem:[%s271_s16 + $0x10] sm:$0xff] %vm832_vm0, %v1003_v38  ;;  %v815_v39 = vpop.f32.mrb[1].mxu0 }
 0x1e6   : > { %833 = vst.msk [vmem:[%s271_s16] sm:$0xff] %vm832_vm0, %v815_v39  ;;  %v1004_v40 = vpop.f32.mrb[2].mxu0 }
 0x1e7   : > { %v818_v41 = vpop.f32.mrb[3].mxu0 }
 0x1e8   : > { %834 = vst.msk [vmem:[%s271_s16 + $0x8] sm:$0xff] %vm832_vm0, %v818_v41 }
 0x1e9 PF: > { %s16_s21 = sadd.s32 1, %s1057_s21  }
 0x1ea   : > { %p13_p4 = scmp.ge.s32.totalorder %s16_s21, 4  }
 0x1ec   :  { %15 = sbr.rel (!%p13_p4) target bundleno = 1 (0x1), region = 77 }

// kernel: reverse.9
= control target key start
LH: loop header
LB: loop body
LE: loop exit
PB: predicated region body
PF: predicated region fallthrough
CT: control target
= control target key end

     0   :  { %v2_v0 = vlaneseq  ;;  %s238_s0 = inlined_call_operand.vmem [shape: f32[2,4,8,11], index: 0, kind: input, shape index: {}]   ;;  %s239_s1 = inlined_call_operand.vmem [shape: f32[2,4,8,11], index: 1, kind: output, shape index: {}]  }
   0x1   :  { %v50_v2 = vld [vmem:[%s238_s0 + $0x10] sm:$0xff]  ;;  %v46_v3 = vld [vmem:[%s238_s0] sm:$0xff]  ;;  %v52_v4 = vld [vmem:[%s238_s0 + $0x18] sm:$0xff] }
   0x2   :  { %v3_v1 = vsub.s32 10, %v2_v0  ;;  %v48_v5 = vld [vmem:[%s238_s0 + $0x8] sm:$0xff]  ;;  %v54_v7 = vld [vmem:[%s238_s0 + $0x20] sm:$0xff]  ;;  %v60_v8 = vld [vmem:[%s238_s0 + $0x38] sm:$0xff] }
   0x3   :  { %v56_v6 = vld [vmem:[%s238_s0 + $0x28] sm:$0xff]  ;;  %v58_v9 = vld [vmem:[%s238_s0 + $0x30] sm:$0xff] }
   0x4   :  { %4 = vset.pattern.permute.xlu0 %v3_v1  ;;  %179 = vset.pattern.permute.xlu1 %v3_v1 }
   0x5   :  { %78 = vperm.xlu1 %179, %v50_v2   ;;  %66 = vperm.xlu0 %4, %v46_v3  }
   0x9   :  { %84 = vperm.xlu1 %179, %v52_v4   ;;  %72 = vperm.xlu0 %4, %v48_v5  }
   0xd   :  { %96 = vperm.xlu1 %179, %v56_v6   ;;  %90 = vperm.xlu0 %4, %v54_v7  }
  0x11   :  { %108 = vperm.xlu1 %179, %v60_v8   ;;  %102 = vperm.xlu0 %4, %v58_v9  }
  0x84   :  { %v79_v10 = vpop.permute.xlu1 %78  ;;  %v67_v11 = vpop.permute.xlu0 %66 }
  0x85   :  { %157 = vst [vmem:[%s239_s1 + $0x10] sm:$0xff] %v79_v10  ;;  %153 = vst [vmem:[%s239_s1] sm:$0xff] %v67_v11 }
  0x88   :  { %v85_v12 = vpop.permute.xlu1 %84  ;;  %v73_v13 = vpop.permute.xlu0 %72 }
  0x89   :  { %159 = vst [vmem:[%s239_s1 + $0x18] sm:$0xff] %v85_v12  ;;  %155 = vst [vmem:[%s239_s1 + $0x8] sm:$0xff] %v73_v13 }
  0x8c   :  { %v97_v14 = vpop.permute.xlu1 %96  ;;  %v91_v15 = vpop.permute.xlu0 %90 }
  0x8d   :  { %163 = vst [vmem:[%s239_s1 + $0x28] sm:$0xff] %v97_v14  ;;  %161 = vst [vmem:[%s239_s1 + $0x20] sm:$0xff] %v91_v15 }
  0x90   :  { %v109_v16 = vpop.permute.xlu1 %108  ;;  %v103_v17 = vpop.permute.xlu0 %102 }
  0x91   :  { %167 = vst [vmem:[%s239_s1 + $0x38] sm:$0xff] %v109_v16  ;;  %165 = vst [vmem:[%s239_s1 + $0x30] sm:$0xff] %v103_v17 }

// kernel: _lambda_.41
= control target key start
LH: loop header
LB: loop body
LE: loop exit
PB: predicated region body
PF: predicated region fallthrough
CT: control target
= control target key end

     0   :  { %s784_s18 = smov 0   ;;  %s876_s0 = inlined_call_operand.vmem [shape: f32[2,24,32], index: 0, kind: input, shape index: {}]   ;;  %s877_s1 = inlined_call_operand.vmem [shape: bf16[32,32], index: 1, kind: input, shape index: {}]   ;;  %s878_s2 = inlined_call_operand.vmem [shape: f32[1,32], index: 2, kind: input, shape index: {}]   ;;  %s879_s3 = inlined_call_operand.vmem [shape: f32[2,24,32], index: 3, kind: input, shape index: {}]   ;;  %s880_s4 = inlined_call_operand.vmem [shape: f32[2,24,32], index: 4, kind: output, shape index: {0}]   ;;  %s881_s5 = inlined_call_operand.vmem [shape: f32[2,24,32], index: 5, kind: output, shape index: {1}]  }
   0x1 LB: > { %s674_s19 = sadd.s32 4294967295, %s749_s18   ;;  %p678_p0 = scmp.ge.s32.totalorder %s749_s18, 1  ;;  %s749_s18 = sphi %s784_s18, %s16_s18  }
   0x2   : > { %p200_p1 = scmp.lt.s32.totalorder %s749_s18, 3 }
   0x4   : > { %p201_p2 = pnand %p678_p0, %p200_p1 }
   0x5   : > { %v741_v0 = vld [vmem:[%s877_s1] sm:$0xff] (!%p201_p2)   ;;  %p238_p3 = scmp.lt.s32.totalorder (!%p201_p2), %s674_s19, 1  ;;  %v742_v1 = vld [vmem:[%s877_s1 + $0x8] sm:$0xff] (!%p201_p2)   ;;  %vm287_vm0 = vcmask (!%p201_p2), 261120   ;;  %v751_v7 = vmov (!%p201_p2), 0.0|0.0   ;;  %vm752_vm1 = vmmov (!%p201_p2), 0   ;;  %v348_v9 = vlaneseq (!%p201_p2) }
   0x6   : > { %204 = sbr.rel (%p201_p2) target bundleno = 470 (0x1d6), region = 36  ;;  %703 = vmatprep.subr.bf16.mxu0 (!%p201_p2), %v741_v0  ;;  %726 = vmatprep.subr.bf16.mxu1 (!%p201_p2), %v751_v7  ;;  %v753_v8 = vmov (!%p201_p2), 0.0   ;;  %v683_v34 = vld [vmem:[%s878_s2] ss:$0 sm:$0xff] (!%p201_p2) }
   0x7   : > { %704 = vmatpush3.bf16.msra.mxu0 (!%p201_p2), %v741_v0  ;;  %717 = vmatprep.mubr.msk.f32.mxu1 (!%p201_p2), %vm752_vm1, %v753_v8  ;;  %v349_v10 = vshrl.u32 (!%p201_p2), %v348_v9, 7  ;;  %v808_v13 = vand.u32 (!%p201_p2), 127, %v348_v9 }
   0x8   : > { %705 = vmatprep.subr.bf16.mxu0 (!%p201_p2), %v742_v1 }
   0x9   : > { %v354_v11 = vadd.s32 (!%p201_p2), 4294967294, %v349_v10  ;;  %v378_v12 = vadd.s32 (!%p201_p2), 4294967295, %v349_v10  ;;  %v350_v16 = vadd.s32 (!%p201_p2), 8, %v349_v10  ;;  %vm402_vm4 = vcmp.gt.s32.totalorder (!%p201_p2), %v349_v10, 0 }
   0xa   : > { %v403_v17 = vsel (!%p201_p2), %vm402_vm4, %v349_v10, 0  ;;  %v351_v20 = vadd.s32 (!%p201_p2), 16, %v349_v10  ;;  %v423_v23 = vadd.s32 (!%p201_p2), 1, %v349_v10  ;;  %v447_v29 = vadd.s32 (!%p201_p2), 2, %v349_v10 }
   0xb   : > { %706 = vmatpush3.bf16.msra.mxu0 (!%p201_p2), %v742_v1  ;;  %vm357_vm2 = vcmp.gt.s32.totalorder (!%p201_p2), %v354_v11, 0  ;;  %vm381_vm3 = vcmp.gt.s32.totalorder (!%p201_p2), %v378_v12, 0  ;;  %v355_v18 = vadd.s32 (!%p201_p2), 4294967294, %v350_v16  ;;  %v379_v19 = vadd.s32 (!%p201_p2), 4294967295, %v350_v16 }
   0xc   : > { %v358_v14 = vsel (!%p201_p2), %vm357_vm2, %v354_v11, 0  ;;  %v382_v15 = vsel (!%p201_p2), %vm381_vm3, %v378_v12, 0  ;;  %vm414_vm7 = vcmp.eq.s32.totalorder (!%p201_p2), %v808_v13, %v403_v17  ;;  %v356_v24 = vadd.s32 (!%p201_p2), 4294967294, %v351_v20 }
   0xd   : > { %s883_s19 = smov (!%p238_p3, %s674_s19), 1  ;;  %vm369_vm5 = vcmp.eq.s32.totalorder %v808_v13, %v358_v14  ;;  %vm393_vm6 = vcmp.eq.s32.totalorder %v808_v13, %v382_v15  ;;  %vm370_vm8 = vcmp.eq.s32.totalorder %v808_v13, %v355_v18  ;;  %vm394_vm9 = vcmp.eq.s32.totalorder %v808_v13, %v379_v19 }
   0xe   : > { %s798_s24 = smul.u32 24, %s883_s19  ;;  %v372_v21 = vsel %vm369_vm5, 1.0, %v753_v8  ;;  %v396_v22 = vsel %vm393_vm6, 1.0, %v753_v8  ;;  %v380_v25 = vadd.s32 4294967295, %v351_v20  ;;  %v417_v27 = vsel %vm414_vm7, 1.0, %v753_v8 }
   0xf   : > { %v399_v26 = vadd.f32 %v396_v22, %v372_v21  ;;  %vm412_vm10 = vcmp.lt.s32.totalorder %v351_v20, 23  ;;  %v425_v28 = vadd.s32 1, %v351_v20  ;;  %vm438_vm11 = vcmp.eq.s32.totalorder %v808_v13, %v423_v23 }
  0x10   : > { %s242_s27 = scalar_lea.vmem %s876_s0, %s798_s24  ;;  %v373_v30 = vsel %vm370_vm8, 1.0, %v753_v8  ;;  %v397_v31 = vsel %vm394_vm9, 1.0, %v753_v8  ;;  %vm415_vm12 = vcmp.eq.s32.totalorder %v808_v13, %v350_v16  ;;  %v424_v32 = vadd.s32 1, %v350_v16  ;;  %s831_s7 = scalar_lea.vmem %s879_s3, %s798_s24 }
  0x11   : > { %v259_v2 = vld [vmem:[%s242_s27] sm:$0xff]  ;;  %v260_v3 = vld [vmem:[%s242_s27 + $0x8] sm:$0xff]  ;;  %v261_v4 = vld [vmem:[%s242_s27 + $0x10] sm:$0xff]  ;;  %vm371_vm13 = vcmp.eq.s32.totalorder %v808_v13, %v356_v24  ;;  %vm395_vm14 = vcmp.eq.s32.totalorder %v808_v13, %v380_v25  ;;  %v413_v33 = vsel %vm412_vm10, %v351_v20, 23  ;;  %v420_v35 = vadd.f32 %v417_v27, %v399_v26  ;;  %s257_s10 = scalar_lea.vmem %s881_s5, %s798_s24  ;;  %s252_s13 = scalar_lea.vmem %s880_s4, %s798_s24 }
  0x12   : > { %v266_v5 = vpack.c.bf16 %v260_v3, %v259_v2  ;;  %v267_v6 = vpack.c.bf16 %v261_v4, %v261_v4  ;;  %v400_v36 = vadd.f32 %v397_v31, %v373_v30  ;;  %vm436_vm15 = vcmp.lt.s32.totalorder %v425_v28, 23  ;;  %v342_v48 = vld [vmem:[%s831_s7] sm:$0xff]  ;;  %v343_v50 = vld [vmem:[%s831_s7 + $0x8] sm:$0xff]  ;;  %v344_v4 = vld [vmem:[%s831_s7 + $0x10] sm:$0xff] }
  0x13   : > { %v449_v37 = vadd.s32 2, %v351_v20  ;;  %v441_v39 = vsel %vm438_vm11, 1.0, %v753_v8  ;;  %v418_v40 = vsel %vm415_vm12, 1.0, %v753_v8  ;;  %v374_v41 = vsel %vm371_vm13, 1.0, %v753_v8 }
  0x14   : > { %707 = vmatprep.mubr.msk.bf16.mxu0 %vm287_vm0, %v266_v5  ;;  %v398_v42 = vsel %vm395_vm14, 1.0, %v753_v8  ;;  %vm462_vm2 = vcmp.eq.s32.totalorder %v808_v13, %v447_v29  ;;  %vm439_vm3 = vcmp.eq.s32.totalorder %v808_v13, %v424_v32  ;;  %v448_v44 = vadd.s32 2, %v350_v16 }
  0x15   : > { %708 = vmatmul.mubr.msk.bf16.vlgmr.msra.gmra.mrb[0].mxu0 %vm287_vm0, %v267_v6  ;;  %vm416_vm4 = vcmp.eq.s32.totalorder %v808_v13, %v413_v33  ;;  %v437_v47 = vsel %vm436_vm15, %v425_v28, 23  ;;  %v444_v51 = vadd.f32 %v441_v39, %v420_v35  ;;  %v421_v52 = vadd.f32 %v418_v40, %v400_v36 }
  0x16   : > { %v401_v53 = vadd.f32 %v398_v42, %v374_v41  ;;  %vm460_vm5 = vcmp.lt.s32.totalorder %v449_v37, 23  ;;  %v465_v55 = vsel %vm462_vm2, 1.0, %v753_v8  ;;  %v442_v56 = vsel %vm439_vm3, 1.0, %v753_v8 }
  0x17   : > { %v419_v57 = vsel %vm416_vm4, 1.0, %v753_v8  ;;  %vm463_vm6 = vcmp.eq.s32.totalorder %v808_v13, %v448_v44  ;;  %vm440_vm7 = vcmp.eq.s32.totalorder %v808_v13, %v437_v47  ;;  %v461_v60 = vsel %vm460_vm5, %v449_v37, 23 }
  0x18   : > { %v468_v61 = vadd.f32 %v465_v55, %v444_v51  ;;  %v445_v62 = vadd.f32 %v442_v56, %v421_v52  ;;  %v422_v63 = vadd.f32 %v419_v57, %v401_v53  ;;  %v466_v2 = vsel %vm463_vm6, 1.0, %v753_v8 }
  0x19   : > { %v443_v3 = vsel %vm440_vm7, 1.0, %v753_v8  ;;  %vm464_vm8 = vcmp.eq.s32.totalorder %v808_v13, %v461_v60  ;;  %vm475_vm9 = vcmask 195584  }
  0x1a   : > { %v472_v5 = vmul.f32 0.2, %v468_v61  ;;  %v469_v6 = vadd.f32 %v466_v2, %v445_v62  ;;  %v446_v7 = vadd.f32 %v443_v3, %v422_v63  ;;  %v467_v10 = vsel %vm464_vm8, 1.0, %v753_v8 }
  0x1c   : > { %v473_v11 = vmul.f32 0.2, %v469_v6  ;;  %v470_v12 = vadd.f32 %v467_v10, %v446_v7 }
  0x1e   : > { %v474_v13 = vmul.f32 0.2, %v470_v12 }
  0xe8   : > { %v709_v38 = vpop.f32.mrb[0].mxu0 }
  0xe9   : > { %v328_v43 = vpop.f32.mrb[1].mxu0  ;;  %v337_v0 = vadd.f32 %v709_v38, %v683_v34 }
  0xea   : > { %v329_v45 = vadd.f32 %v683_v34, %v328_v43  ;;  %v710_v46 = vpop.f32.mrb[2].mxu0 }
  0xeb   : > { %v331_v49 = vpop.f32.mrb[3].mxu0  ;;  %v347_v9 = vadd.f32 %v344_v4, %v337_v0 }
  0xec   : > { %v332_v54 = vadd.f32 %v683_v34, %v331_v49  ;;  %v345_v58 = vadd.f32 %v342_v48, %v329_v45 }
  0xee   : > { %v346_v59 = vadd.f32 %v343_v50, %v332_v54 }
  0xf0   : > { %v727_v1 = vpack.c.bf16 %v346_v59, %v345_v58 }
  0xf2   : > { %728 = vmatpush3.bf16.msra.mxu1 %v727_v1 }
  0xf3   : > { %715 = vmatprep.subr.mxu1 %v753_v8 }
  0xf6   : > { %716 = vmatpush3.msra.mxu1 %v347_v9 }
  0xf7   : > { %718 = vmatmul.mubr.msk.f32.vlgmr.msra.gmra.mrb[0].mxu1 %vm475_vm9, %v472_v5 }
  0xf8   : > { %720 = vmatprep.mubr.msk.f32.mxu1 %vm752_vm1, %v753_v8 }
  0xfb   : > { %721 = vmatmul.mubr.msk.f32.gmra.mrb[2].mxu1 %vm475_vm9, %v473_v11 }
  0xfc   : > { %723 = vmatprep.mubr.msk.f32.mxu1 %vm752_vm1, %v753_v8 }
  0xff   : > { %724 = vmatmul.mubr.msk.f32.gmra.mrb[4].mxu1 %vm475_vm9, %v474_v13 }
 0x1ca   : > { %v551_v14 = vpop.f32.mrb[0].mxu1 }
 0x1cb   : > { %v565_v15 = vsub.f32 %v345_v58, %v551_v14  ;;  %571 = vst.msk [vmem:[%s257_s10] sm:$0xff] %vm287_vm0, %v551_v14  ;;  %v719_v16 = vpop.f32.mrb[1].mxu1 }
 0x1cd   : > { %568 = vst.msk [vmem:[%s252_s13] sm:$0xff] %vm287_vm0, %v565_v15 }
 0x1ce   : > { %v556_v17 = vpop.f32.mrb[2].mxu1 }
 0x1cf   : > { %v566_v18 = vsub.f32 %v346_v59, %v556_v17  ;;  %572 = vst.msk [vmem:[%s257_s10 + $0x8] sm:$0xff] %vm287_vm0, %v556_v17  ;;  %v722_v8 = vpop.f32.mrb[3].mxu1 }
 0x1d1   : > { %569 = vst.msk [vmem:[%s252_s13 + $0x8] sm:$0xff] %vm287_vm0, %v566_v18 }
 0x1d2   : > { %v561_v19 = vpop.f32.mrb[4].mxu1 }
 0x1d3   : > { %v567_v20 = vsub.f32 %v347_v9, %v561_v19  ;;  %573 = vst.msk [vmem:[%s257_s10 + $0x10] sm:$0xff] %vm287_vm0, %v561_v19  ;;  %v725_v21 = vpop.f32.mrb[5].mxu1 }
 0x1d5   : > { %570 = vst.msk [vmem:[%s252_s13 + $0x10] sm:$0xff] %vm287_vm0, %v567_v20 }
 0x1d6 PF: > { %s16_s18 = sadd.s32 1, %s749_s18  }
 0x1d7   : > { %p13_p4 = scmp.ge.s32.totalorder %s16_s18, 4  }
 0x1d9   :  { %15 = sbr.rel (!%p13_p4) target bundleno = 1 (0x1), region = 81 }

// kernel: _lambda_.42
= control target key start
LH: loop header
LB: loop body
LE: loop exit
PB: predicated region body
PF: predicated region fallthrough
CT: control target
= control target key end

     0   :  { %vm19_vm0 = vcmask 261120   ;;  %v203_v0 = vmov 0.0   ;;  %vm204_vm1 = vmmov 0   ;;  %s294_s1 = inlined_call_operand.vmem [shape: bf16[32,32], index: 1, kind: input, shape index: {}]   ;;  %s295_s0 = inlined_call_operand.vmem [shape: f32[48,32], index: 0, kind: input, shape index: {}]   ;;  %s296_s2 = inlined_call_operand.vmem [shape: f32[1,32], index: 2, kind: input, shape index: {}]   ;;  %s297_s3 = inlined_call_operand.vmem [shape: f32[48,32], index: 3, kind: output, shape index: {}]  }
   0x1   :  { %195 = vmatprep.subr.bf16.mxu1 %v203_v0  ;;  %v201_v1 = vld [vmem:[%s294_s1] sm:$0xff]   ;;  %179 = vmatprep.subr.bf16.mxu0 %v203_v0  ;;  %20 = vst.msk [vmem:[#allocation2] sm:$0xff] %vm19_vm0, %v203_v0  ;;  %21 = vst.msk [vmem:[#allocation2 + $0x8] sm:$0xff] %vm19_vm0, %v203_v0  ;;  %v202_v2 = vld [vmem:[%s294_s1 + $0x8] sm:$0xff]  }
   0x2   :  { %22 = vst.msk [vmem:[#allocation2 + $0x10] sm:$0xff] %vm19_vm0, %v203_v0  ;;  %23 = vst.msk [vmem:[#allocation2 + $0x18] sm:$0xff] %vm19_vm0, %v203_v0  ;;  %187 = vmatprep.mubr.msk.bf16.mxu1 %vm204_vm1, %v203_v0  ;;  %183 = vmatprep.mubr.msk.bf16.mxu0 %vm204_vm1, %v203_v0  ;;  %v34_v3 = vld [vmem:[%s295_s0 + $0x10] sm:$0xff]  ;;  %v35_v4 = vld [vmem:[%s295_s0 + $0x18] sm:$0xff] }
   0x3   :  { %24 = vst.msk [vmem:[#allocation2 + $0x20] sm:$0xff] %vm19_vm0, %v203_v0  ;;  %25 = vst.msk [vmem:[#allocation2 + $0x28] sm:$0xff] %vm19_vm0, %v203_v0  ;;  %197 = vmatpush3.bf16.msra.mxu1 %v201_v1  ;;  %180 = vmatpush3.bf16.msra.mxu0 %v201_v1  ;;  %v32_v5 = vld [vmem:[%s295_s0] sm:$0xff]  ;;  %v33_v6 = vld [vmem:[%s295_s0 + $0x8] sm:$0xff]  ;;  %v43_v7 = vpack.c.bf16 %v35_v4, %v34_v3 }
   0x4   :  { %196 = vmatprep.subr.bf16.mxu1 %v203_v0  ;;  %181 = vmatprep.subr.bf16.mxu0 %v203_v0  ;;  %v42_v8 = vpack.c.bf16 %v33_v6, %v32_v5  ;;  %v36_v9 = vld [vmem:[%s295_s0 + $0x20] sm:$0xff]  ;;  %v37_v10 = vld [vmem:[%s295_s0 + $0x28] sm:$0xff] }
   0x5   :  { %v44_v11 = vpack.c.bf16 %v37_v10, %v36_v9  ;;  %v173_v29 = vld [vmem:[%s296_s2] ss:$0 sm:$0xff] }
   0x7   :  { %198 = vmatpush3.bf16.msra.mxu1 %v202_v2  ;;  %182 = vmatpush3.bf16.msra.mxu0 %v202_v2 }
   0x8   :  { %v26_v13 = vld [vmem:[#allocation2] sm:$0xff]  ;;  %v27_v17 = vld [vmem:[#allocation2 + $0x8] sm:$0xff] }
   0x9   :  { %v28_v12 = vld [vmem:[#allocation2 + $0x10] sm:$0xff]  ;;  %v29_v15 = vld [vmem:[#allocation2 + $0x18] sm:$0xff] }
   0xa   :  { %188 = vmatmul.mubr.msk.bf16.vlgmr.msra.gmra.mrb[0].mxu1 %vm19_vm0, %v43_v7  ;;  %184 = vmatmul.mubr.msk.bf16.vlgmr.msra.gmra.mrb[0].mxu0 %vm19_vm0, %v42_v8  ;;  %v30_v28 = vld [vmem:[#allocation2 + $0x20] sm:$0xff]  ;;  %v31_v31 = vld [vmem:[#allocation2 + $0x28] sm:$0xff] }
   0xb   :  { %191 = vmatprep.mubr.msk.bf16.mxu1 %vm204_vm1, %v203_v0 }
  0x12   :  { %192 = vmatmul.mubr.msk.bf16.gmra.mrb[4].mxu1 %vm19_vm0, %v44_v11 }
  0xdd   :  { %v109_v14 = vpop.f32.mrb[0].mxu1  ;;  %v101_v16 = vpop.f32.mrb[0].mxu0 }
  0xde   :  { %v126_v18 = vadd.f32 %v109_v14, %v28_v12  ;;  %v189_v19 = vpop.f32.mrb[1].mxu1  ;;  %v124_v20 = vadd.f32 %v101_v16, %v26_v13  ;;  %v185_v21 = vpop.f32.mrb[1].mxu0 }
  0xdf   :  { %v112_v22 = vpop.f32.mrb[2].mxu1  ;;  %v104_v23 = vpop.f32.mrb[2].mxu0 }
  0xe0   :  { %132 = vst.msk [vmem:[#allocation2 + $0x10] sm:$0xff] %vm19_vm0, %v126_v18  ;;  %v127_v24 = vadd.f32 %v112_v22, %v29_v15  ;;  %v190_v25 = vpop.f32.mrb[3].mxu1  ;;  %130 = vst.msk [vmem:[#allocation2] sm:$0xff] %vm19_vm0, %v124_v20  ;;  %v125_v26 = vadd.f32 %v104_v23, %v27_v17  ;;  %v186_v27 = vpop.f32.mrb[3].mxu0 }
  0xe2   :  { %133 = vst.msk [vmem:[#allocation2 + $0x18] sm:$0xff] %vm19_vm0, %v127_v24  ;;  %131 = vst.msk [vmem:[#allocation2 + $0x8] sm:$0xff] %vm19_vm0, %v125_v26 }
  0xe5   :  { %v117_v30 = vpop.f32.mrb[4].mxu1 }
  0xe6   :  { %v128_v32 = vadd.f32 %v117_v30, %v30_v28  ;;  %v193_v33 = vpop.f32.mrb[5].mxu1 }
  0xe7   :  { %v141_v34 = vld [vmem:[#allocation2 + $0x10] sm:$0xff]  ;;  %v139_v35 = vld [vmem:[#allocation2] sm:$0xff]  ;;  %v120_v36 = vpop.f32.mrb[6].mxu1 }
  0xe8   :  { %v154_v37 = vadd.f32 %v173_v29, %v141_v34  ;;  %v152_v38 = vadd.f32 %v173_v29, %v139_v35  ;;  %134 = vst.msk [vmem:[#allocation2 + $0x20] sm:$0xff] %vm19_vm0, %v128_v32  ;;  %v129_v39 = vadd.f32 %v120_v36, %v31_v31  ;;  %v194_v40 = vpop.f32.mrb[7].mxu1 }
  0xe9   :  { %v142_v41 = vld [vmem:[#allocation2 + $0x18] sm:$0xff]  ;;  %v140_v42 = vld [vmem:[#allocation2 + $0x8] sm:$0xff] }
  0xea   :  { %160 = vst.msk [vmem:[%s297_s3 + $0x10] sm:$0xff] %vm19_vm0, %v154_v37  ;;  %v155_v43 = vadd.f32 %v173_v29, %v142_v41  ;;  %158 = vst.msk [vmem:[%s297_s3] sm:$0xff] %vm19_vm0, %v152_v38  ;;  %v153_v44 = vadd.f32 %v173_v29, %v140_v42 }
  0xeb   :  { %135 = vst.msk [vmem:[#allocation2 + $0x28] sm:$0xff] %vm19_vm0, %v129_v39 }
  0xec   :  { %161 = vst.msk [vmem:[%s297_s3 + $0x18] sm:$0xff] %vm19_vm0, %v155_v43  ;;  %159 = vst.msk [vmem:[%s297_s3 + $0x8] sm:$0xff] %vm19_vm0, %v153_v44 }
  0xef   :  { %v143_v45 = vld [vmem:[#allocation2 + $0x20] sm:$0xff] }
  0xf0   :  { %v156_v46 = vadd.f32 %v173_v29, %v143_v45 }
  0xf2   :  { %v144_v47 = vld [vmem:[#allocation2 + $0x28] sm:$0xff]  ;;  %162 = vst.msk [vmem:[%s297_s3 + $0x20] sm:$0xff] %vm19_vm0, %v156_v46 }
  0xf3   :  { %v157_v48 = vadd.f32 %v173_v29, %v144_v47 }
  0xf5   :  { %163 = vst.msk [vmem:[%s297_s3 + $0x28] sm:$0xff] %vm19_vm0, %v157_v48 }

// kernel: _lambda_.44
= control target key start
LH: loop header
LB: loop body
LE: loop exit
PB: predicated region body
PF: predicated region fallthrough
CT: control target
= control target key end

     0   :  { %vm19_vm0 = vcmask 785408   ;;  %v161_v1 = vmov 0.0   ;;  %vm50_vm1 = vcmask 261120   ;;  %s227_s1 = inlined_call_operand.vmem [shape: bf16[32,96], index: 1, kind: input, shape index: {}]   ;;  %s228_s0 = inlined_call_operand.vmem [shape: f32[32,32], index: 0, kind: input, shape index: {}]   ;;  %s229_s2 = inlined_call_operand.vmem [shape: f32[1,96], index: 2, kind: input, shape index: {}]   ;;  %s230_s3 = inlined_call_operand.vmem [shape: f32[32,96], index: 3, kind: output, shape index: {}]  }
   0x1   :  { %v159_v0 = vld [vmem:[%s227_s1] sm:$0xff]   ;;  %22 = vst.msk [vmem:[#allocation2 + $0x10] sm:$0xff] %vm19_vm0, %v161_v1  ;;  %20 = vst.msk [vmem:[#allocation2] sm:$0xff] %vm19_vm0, %v161_v1  ;;  %v160_v2 = vld [vmem:[%s227_s1 + $0x8] sm:$0xff]  }
   0x2   :  { %21 = vst.msk [vmem:[#allocation2 + $0x8] sm:$0xff] %vm19_vm0, %v161_v1  ;;  %23 = vst.msk [vmem:[#allocation2 + $0x18] sm:$0xff] %vm19_vm0, %v161_v1  ;;  %150 = vmatprep.subr.bf16.mxu0 %v159_v0  ;;  %v28_v3 = vld [vmem:[%s228_s0] sm:$0xff]  ;;  %v29_v4 = vld [vmem:[%s228_s0 + $0x8] sm:$0xff] }
   0x3   :  { %151 = vmatpush3.bf16.msra.mxu0 %v159_v0  ;;  %v36_v5 = vpack.c.bf16 %v29_v4, %v28_v3  ;;  %v30_v6 = vld [vmem:[%s228_s0 + $0x10] sm:$0xff]  ;;  %v31_v7 = vld [vmem:[%s228_s0 + $0x18] sm:$0xff]  ;;  %v145_v21 = vld [vmem:[%s229_s2] ss:$0 sm:$0xff] }
   0x4   :  { %152 = vmatprep.subr.bf16.mxu0 %v160_v2  ;;  %v37_v8 = vpack.c.bf16 %v31_v7, %v30_v6 }
   0x5   :  { %154 = vmatprep.mubr.msk.bf16.mxu0 %vm50_vm1, %v36_v5 }
   0x7   :  { %153 = vmatpush3.bf16.msra.mxu0 %v160_v2 }
   0x8   :  { %v26_v9 = vld [vmem:[#allocation2 + $0x10] sm:$0xff]  ;;  %v24_v10 = vld [vmem:[#allocation2] sm:$0xff] }
   0x9   :  { %v27_v12 = vld [vmem:[#allocation2 + $0x18] sm:$0xff]  ;;  %v25_v15 = vld [vmem:[#allocation2 + $0x8] sm:$0xff] }
   0xa   :  { %155 = vmatmul.mubr.msk.bf16.vlgmr.msra.gmra.mrb[0].mxu0 %vm50_vm1, %v37_v8 }
  0xdd   :  { %v156_v11 = vpop.f32.mrb[0].mxu0 }
  0xde   :  { %v108_v13 = vadd.f32 %v156_v11, %v26_v9  ;;  %v91_v14 = vpop.f32.mrb[1].mxu0 }
  0xdf   :  { %v106_v16 = vadd.f32 %v91_v14, %v24_v10  ;;  %v157_v17 = vpop.f32.mrb[2].mxu0 }
  0xe0   :  { %113 = vst.msk [vmem:[#allocation2 + $0x10] sm:$0xff] %vm19_vm0, %v108_v13  ;;  %v109_v18 = vadd.f32 %v157_v17, %v27_v12  ;;  %v94_v19 = vpop.f32.mrb[3].mxu0 }
  0xe1   :  { %111 = vst.msk [vmem:[#allocation2] sm:$0xff] %vm19_vm0, %v106_v16  ;;  %v107_v20 = vadd.f32 %v94_v19, %v25_v15 }
  0xe2   :  { %114 = vst.msk [vmem:[#allocation2 + $0x18] sm:$0xff] %vm19_vm0, %v109_v18 }
  0xe3   :  { %112 = vst.msk [vmem:[#allocation2 + $0x8] sm:$0xff] %vm19_vm0, %v107_v20 }
  0xe7   :  { %v120_v22 = vld [vmem:[#allocation2 + $0x10] sm:$0xff] }
  0xe8   :  { %v131_v23 = vadd.f32 %v145_v21, %v120_v22  ;;  %v118_v24 = vld [vmem:[#allocation2] sm:$0xff] }
  0xe9   :  { %v129_v25 = vadd.f32 %v145_v21, %v118_v24  ;;  %v121_v26 = vld [vmem:[#allocation2 + $0x18] sm:$0xff] }
  0xea   :  { %135 = vst.msk [vmem:[%s230_s3 + $0x10] sm:$0xff] %vm19_vm0, %v131_v23  ;;  %v132_v27 = vadd.f32 %v145_v21, %v121_v26  ;;  %v119_v28 = vld [vmem:[#allocation2 + $0x8] sm:$0xff] }
  0xeb   :  { %133 = vst.msk [vmem:[%s230_s3] sm:$0xff] %vm19_vm0, %v129_v25  ;;  %v130_v29 = vadd.f32 %v145_v21, %v119_v28 }
  0xec   :  { %136 = vst.msk [vmem:[%s230_s3 + $0x18] sm:$0xff] %vm19_vm0, %v132_v27 }
  0xed   :  { %134 = vst.msk [vmem:[%s230_s3 + $0x8] sm:$0xff] %vm19_vm0, %v130_v29 }

// kernel: _lambda_.43
= control target key start
LH: loop header
LB: loop body
LE: loop exit
PB: predicated region body
PF: predicated region fallthrough
CT: control target
= control target key end

     0   :  { %s932_s21 = smov 0   ;;  %s985_s0 = inlined_call_operand.vmem [shape: f32[2,16,4], index: 0, kind: input, shape index: {}, may-alias: {0,1}]   ;;  %s986_s1 = inlined_call_operand.vmem [shape: f32[2,16,4], index: 1, kind: input, shape index: {}, may-alias: {0,1}]   ;;  %s987_s2 = inlined_call_operand.vmem [shape: bf16[4,32], index: 2, kind: input, shape index: {}]   ;;  %s988_s3 = inlined_call_operand.vmem [shape: bf16[4,32], index: 3, kind: input, shape index: {}]   ;;  %s989_s4 = inlined_call_operand.vmem [shape: bf16[4,32], index: 4, kind: input, shape index: {}]   ;;  %s990_s5 = inlined_call_operand.vmem [shape: bf16[4,32], index: 5, kind: input, shape index: {}]   ;;  %s991_s6 = inlined_call_operand.vmem [shape: f32[2,16,32], index: 6, kind: output, shape index: {}]  }
   0x1 LB: > { %s781_s22 = sadd.s32 4294967295, %s893_s21   ;;  %p785_p0 = scmp.ge.s32.totalorder %s893_s21, 1  ;;  %s893_s21 = sphi %s932_s21, %s16_s21  }
   0x2   : > { %p222_p1 = scmp.lt.s32.totalorder %s893_s21, 3 }
   0x4   : > { %p223_p2 = pnand %p785_p0, %p222_p1 }
   0x5   : > { %p257_p3 = scmp.lt.s32.totalorder (!%p223_p2), %s781_s22, 1  ;;  %v275_v0 = vlaneseq (!%p223_p2)  ;;  %vm312_vm0 = vcmask (!%p223_p2), 130048   ;;  %v895_v19 = vmov (!%p223_p2), 0.0   ;;  %v509_v24 = vld [vmem:[%s988_s3] sm:$0x3] (!%p223_p2)  ;;  %vm515_vm8 = vcmask (!%p223_p2), 1041408  }
   0x6   : > { %226 = sbr.rel (%p223_p2) target bundleno = 467 (0x1d3), region = 44  ;;  %v517_v28 = vsel (!%p223_p2), %vm515_vm8, %v509_v24, 0  ;;  %vm896_vm12 = vmmov (!%p223_p2), 0   ;;  %vm511_vm13 = vcmask (!%p223_p2), 31744   ;;  %v607_v30 = vld [vmem:[%s989_s4] sm:$0x3] (!%p223_p2) }
   0x7   : > { %v276_v1 = vshrl.u32 (!%p223_p2), %v275_v0, 7  ;;  %v279_v5 = vand.u32 (!%p223_p2), 127, %v275_v0  ;;  %v507_v31 = vld [vmem:[%s987_s2] sm:$0x3] (!%p223_p2)  ;;  %v613_v32 = vsel (!%p223_p2), %vm515_vm8, %v607_v30, 0  ;;  %vm711_vm14 = vcmask (!%p223_p2), 261120  }
   0x8   : > { %v564_v33 = vsel (!%p223_p2), %vm515_vm8, %v507_v31, 0  ;;  %v660_v35 = vld [vmem:[%s990_s5] sm:$0x3] (!%p223_p2) }
   0x9   : > { %v277_v2 = vadd.s32 (!%p223_p2), 8, %v276_v1  ;;  %v280_v3 = vadd.s32 (!%p223_p2), 4294967295, %v276_v1  ;;  %v394_v4 = vadd.s32 (!%p223_p2), 1, %v276_v1  ;;  %v666_v41 = vsel (!%p223_p2), %vm515_vm8, %v660_v35, 0 }
   0xb   : > { %v282_v8 = vadd.s32 (!%p223_p2), 16, %v280_v3  ;;  %v396_v9 = vadd.s32 (!%p223_p2), 16, %v394_v4  ;;  %v281_v10 = vadd.s32 (!%p223_p2), 4294967295, %v277_v2  ;;  %v395_v11 = vadd.s32 (!%p223_p2), 1, %v277_v2 }
   0xd   : > { %s993_s22 = smov (!%p257_p3, %s781_s22), 1  ;;  %v288_v13 = vand.u32 15, %v282_v8  ;;  %v402_v14 = vand.u32 15, %v396_v9  ;;  %v283_v15 = vadd.s32 16, %v281_v10  ;;  %v397_v16 = vadd.s32 16, %v395_v11 }
   0xe   : > { %s940_s23 = sshll.u32 %s993_s22, 4 }
   0xf   : > { %s261_s26 = scalar_lea.vmem %s985_s0, %s940_s23  ;;  %vm308_vm1 = vcmp.eq.s32.totalorder %v279_v5, %v288_v13  ;;  %vm422_vm2 = vcmp.eq.s32.totalorder %v279_v5, %v402_v14  ;;  %v295_v17 = vand.u32 15, %v283_v15  ;;  %v409_v18 = vand.u32 15, %v397_v16  ;;  %s266_s13 = scalar_lea.vmem %s986_s1, %s940_s23 }
  0x10   : > { %v273_v6 = vld [vmem:[%s261_s26] sm:$0xff]  ;;  %v274_v7 = vld [vmem:[%s261_s26 + $0x8] sm:$0xff]  ;;  %v310_v20 = vsel %vm308_vm1, 1.0, %v895_v19  ;;  %v424_v21 = vsel %vm422_vm2, 1.0, %v895_v19  ;;  %s271_s16 = scalar_lea.vmem %s991_s6, %s940_s23 }
  0x11   : > { %v859_v12 = vpack.c.bf16 %v274_v7, %v273_v6  ;;  %825 = vmatprep.mubr.msk.f32.mxu0 %vm312_vm0, %v310_v20  ;;  %832 = vmatprep.mubr.msk.f32.mxu1 %vm312_vm0, %v424_v21  ;;  %vm299_vm3 = vcmp.ne.s32.totalorder %v295_v17, 0  ;;  %vm301_vm4 = vcmp.lt.s32.totalorder %v295_v17, 0  ;;  %v305_v22 = vadd.s32 16, %v295_v17  ;;  %v658_v42 = vld [vmem:[%s266_s13] sm:$0xff]  ;;  %v659_v43 = vld [vmem:[%s266_s13 + $0x8] sm:$0xff] }
  0x12   : > { %vm413_vm5 = vcmp.ne.s32.totalorder %v409_v18, 0  ;;  %vm303_vm6 = vmand %vm301_vm4, %vm299_vm3  ;;  %vm415_vm7 = vcmp.lt.s32.totalorder %v409_v18, 0  ;;  %v419_v23 = vadd.s32 16, %v409_v18  ;;  %v661_v44 = vpack.c.bf16 %v659_v43, %v658_v42 }
  0x13   : > { %860 = vmatprep.subr.bf16.mxu0 %v859_v12  ;;  %864 = vmatprep.subr.bf16.mxu1 %v859_v12  ;;  %v307_v25 = vsel %vm303_vm6, %v305_v22, %v295_v17  ;;  %vm417_vm9 = vmand %vm415_vm7, %vm413_vm5 }
  0x14   : > { %862 = vmatpush3.bf16.msra.mxu0 %v859_v12  ;;  %866 = vmatpush3.bf16.msra.mxu1 %v859_v12  ;;  %vm309_vm10 = vcmp.eq.s32.totalorder %v279_v5, %v307_v25  ;;  %v421_v26 = vsel %vm417_vm9, %v419_v23, %v409_v18 }
  0x15   : > { %835 = vmatprep.subr.bf16.mxu1 %v895_v19  ;;  %847 = vmatprep.subr.bf16.mxu0 %v895_v19  ;;  %v311_v27 = vsel %vm309_vm10, 1.0, %v895_v19  ;;  %vm423_vm11 = vcmp.eq.s32.totalorder %v279_v5, %v421_v26 }
  0x16   : > { %v425_v29 = vsel %vm423_vm11, 1.0, %v895_v19 }
  0x17   : > { %826 = vmatmul.mubr.msk.f32.vlgmr.msra.gmra.mrb[0].mxu0 %vm312_vm0, %v311_v27  ;;  %833 = vmatmul.mubr.msk.f32.vlgmr.msra.gmra.mrb[0].mxu1 %vm312_vm0, %v425_v29 }
  0x18   : > { %849 = vmatprep.mubr.msk.bf16.mxu0 %vm896_vm12, %v895_v19  ;;  %836 = vmatpush3.bf16.msra.mxu1 %v517_v28 }
  0x19   : > { %837 = vmatprep.mubr.msk.bf16.mxu1 %vm896_vm12, %v895_v19  ;;  %841 = vmatprep.subr.bf16.mxu1 %v895_v19 }
  0x1a   : > { %848 = vmatpush3.bf16.msra.mxu0 %v613_v32 }
  0x1b   : > { %838 = vmatmul.mubr.msk.bf16.vlgmr.msra.gmra.mrb[4].mxu1 %vm511_vm13, %v859_v12  ;;  %853 = vmatprep.subr.bf16.mxu0 %v895_v19 }
  0x1c   : > { %843 = vmatprep.mubr.msk.bf16.mxu1 %vm896_vm12, %v895_v19  ;;  %842 = vmatpush3.bf16.msra.mxu1 %v564_v33 }
  0xea   : > { %v827_v34 = vpop.f32.mrb[0].mxu0  ;;  %v834_v36 = vpop.f32.mrb[0].mxu1 }
  0xeb   : > { %v385_v37 = vpop.f32.mrb[1].mxu0  ;;  %v498_v39 = vpop.f32.mrb[1].mxu1 }
  0xec   : > { %v508_v38 = vpack.c.bf16 %v827_v34, %v385_v37  ;;  %v608_v40 = vpack.c.bf16 %v834_v36, %v498_v39 }
  0xee   : > { %844 = vmatmul.mubr.msk.bf16.vlgmr.msra.gmra.mrb[4].mxu1 %vm511_vm13, %v508_v38  ;;  %850 = vmatmul.mubr.msk.bf16.vlgmr.msra.gmra.mrb[4].mxu0 %vm511_vm13, %v608_v40 }
  0xef   : > { %854 = vmatpush3.bf16.msra.mxu0 %v666_v41  ;;  %855 = vmatprep.mubr.msk.bf16.mxu0 %vm896_vm12, %v895_v19 }
  0xfa   : > { %856 = vmatmul.mubr.msk.bf16.vlgmr.msra.gmra.mrb[4].mxu0 %vm511_vm13, %v661_v44 }
 0x1c1   : > { %v600_v45 = vpop.f32.mrb[4].mxu1 }
 0x1c2   : > { %v845_v46 = vpop.f32.mrb[5].mxu1 }
 0x1c3   : > { %v603_v47 = vpop.f32.mrb[6].mxu1 }
 0x1c4   : > { %v846_v48 = vpop.f32.mrb[7].mxu1 }
 0x1cd   : > { %v702_v49 = vpop.f32.mrb[4].mxu0 }
 0x1ce   : > { %v867_v50 = vadd.f32 %v702_v49, %v600_v45  ;;  %v857_v51 = vpop.f32.mrb[5].mxu0 }
 0x1cf   : > { %v705_v52 = vpop.f32.mrb[6].mxu0 }
 0x1d0   : > { %712 = vst.msk [vmem:[%s271_s16] sm:$0xff] %vm711_vm14, %v867_v50  ;;  %v868_v53 = vadd.f32 %v705_v52, %v603_v47  ;;  %v858_v54 = vpop.f32.mrb[7].mxu0 }
 0x1d2   : > { %713 = vst.msk [vmem:[%s271_s16 + $0x8] sm:$0xff] %vm711_vm14, %v868_v53 }
 0x1d3 PF: > { %s16_s21 = sadd.s32 1, %s893_s21  }
 0x1d4   : > { %p13_p4 = scmp.ge.s32.totalorder %s16_s21, 4  }
 0x1d6   :  { %15 = sbr.rel (!%p13_p4) target bundleno = 1 (0x1), region = 77 }

// kernel: reverse.2
= control target key start
LH: loop header
LB: loop body
LE: loop exit
PB: predicated region body
PF: predicated region fallthrough
CT: control target
= control target key end

     0   :  { %v2_v0 = vlaneseq  ;;  %s238_s0 = inlined_call_operand.vmem [shape: f32[2,4,8,7], index: 0, kind: input, shape index: {}]   ;;  %s239_s1 = inlined_call_operand.vmem [shape: f32[2,4,8,7], index: 1, kind: output, shape index: {}]  }
   0x1   :  { %v50_v2 = vld [vmem:[%s238_s0 + $0x10] sm:$0xff]  ;;  %v46_v3 = vld [vmem:[%s238_s0] sm:$0xff]  ;;  %v52_v4 = vld [vmem:[%s238_s0 + $0x18] sm:$0xff] }
   0x2   :  { %v3_v1 = vsub.s32 6, %v2_v0  ;;  %v48_v5 = vld [vmem:[%s238_s0 + $0x8] sm:$0xff]  ;;  %v54_v7 = vld [vmem:[%s238_s0 + $0x20] sm:$0xff]  ;;  %v60_v8 = vld [vmem:[%s238_s0 + $0x38] sm:$0xff] }
   0x3   :  { %v56_v6 = vld [vmem:[%s238_s0 + $0x28] sm:$0xff]  ;;  %v58_v9 = vld [vmem:[%s238_s0 + $0x30] sm:$0xff] }
   0x4   :  { %4 = vset.pattern.permute.xlu0 %v3_v1  ;;  %179 = vset.pattern.permute.xlu1 %v3_v1 }
   0x5   :  { %78 = vperm.xlu1 %179, %v50_v2   ;;  %66 = vperm.xlu0 %4, %v46_v3  }
   0x9   :  { %84 = vperm.xlu1 %179, %v52_v4   ;;  %72 = vperm.xlu0 %4, %v48_v5  }
   0xd   :  { %96 = vperm.xlu1 %179, %v56_v6   ;;  %90 = vperm.xlu0 %4, %v54_v7  }
  0x11   :  { %108 = vperm.xlu1 %179, %v60_v8   ;;  %102 = vperm.xlu0 %4, %v58_v9  }
  0x84   :  { %v79_v10 = vpop.permute.xlu1 %78  ;;  %v67_v11 = vpop.permute.xlu0 %66 }
  0x85   :  { %157 = vst [vmem:[%s239_s1 + $0x10] sm:$0xff] %v79_v10  ;;  %153 = vst [vmem:[%s239_s1] sm:$0xff] %v67_v11 }
  0x88   :  { %v85_v12 = vpop.permute.xlu1 %84  ;;  %v73_v13 = vpop.permute.xlu0 %72 }
  0x89   :  { %159 = vst [vmem:[%s239_s1 + $0x18] sm:$0xff] %v85_v12  ;;  %155 = vst [vmem:[%s239_s1 + $0x8] sm:$0xff] %v73_v13 }
  0x8c   :  { %v97_v14 = vpop.permute.xlu1 %96  ;;  %v91_v15 = vpop.permute.xlu0 %90 }
  0x8d   :  { %163 = vst [vmem:[%s239_s1 + $0x28] sm:$0xff] %v97_v14  ;;  %161 = vst [vmem:[%s239_s1 + $0x20] sm:$0xff] %v91_v15 }
  0x90   :  { %v109_v16 = vpop.permute.xlu1 %108  ;;  %v103_v17 = vpop.permute.xlu0 %102 }
  0x91   :  { %167 = vst [vmem:[%s239_s1 + $0x38] sm:$0xff] %v109_v16  ;;  %165 = vst [vmem:[%s239_s1 + $0x30] sm:$0xff] %v103_v17 }

// kernel: _lambda_.47
= control target key start
LH: loop header
LB: loop body
LE: loop exit
PB: predicated region body
PF: predicated region fallthrough
CT: control target
= control target key end

     0   :  { %s344_s12 = smov 0   ;;  %s382_s0 = inlined_call_operand.vmem [shape: f32[2,16,32], index: 0, kind: input, shape index: {}]   ;;  %s383_s1 = inlined_call_operand.vmem [shape: f32[1,32], index: 1, kind: input, shape index: {}]   ;;  %s384_s2 = inlined_call_operand.vmem [shape: f32[1,32], index: 2, kind: input, shape index: {}]   ;;  %s385_s3 = inlined_call_operand.vmem [shape: f32[2,16,32], index: 3, kind: output, shape index: {}]  }
   0x1 LB: > { %s289_s13 = sadd.s32 4294967295, %s322_s12   ;;  %p293_p0 = scmp.ge.s32.totalorder %s322_s12, 1  ;;  %s322_s12 = sphi %s344_s12, %s13_s12  }
   0x2   : > { %p137_p1 = scmp.lt.s32.totalorder %s322_s12, 3 }
   0x4   : > { %p138_p2 = pnand %p293_p0, %p137_p1 }
   0x5   : > { %p161_p3 = scmp.lt.s32.totalorder (!%p138_p2), %s289_s13, 1  ;;  %vm175_vm0 = vcmask (!%p138_p2), 261120   ;;  %v298_v21 = vld [vmem:[%s383_s1] ss:$0 sm:$0xff] (!%p138_p2) }
   0x6   : > { %141 = sbr.rel (%p138_p2) target bundleno = 354 (0x162), region = 32  ;;  %v299_v25 = vld [vmem:[%s384_s2] ss:$0 sm:$0xff] (!%p138_p2) }
   0xd   : > { %s387_s13 = smov (!%p161_p3, %s289_s13), 1 }
   0xe   : > { %s302_s14 = sshll.u32 %s387_s13, 4 }
   0xf   : > { %s165_s17 = scalar_lea.vmem %s382_s0, %s302_s14  ;;  %s170_s24 = scalar_lea.vmem %s385_s3, %s302_s14 }
  0x10   : > { %v171_v0 = vld [vmem:[%s165_s17] sm:$0xff]  ;;  %v172_v1 = vld [vmem:[%s165_s17 + $0x8] sm:$0xff] }
  0x11   : > { %v176_v2 = vsel %vm175_vm0, %v171_v0, 0.0  ;;  %v179_v3 = vsel %vm175_vm0, %v172_v1, 0.0 }
  0x12   : > { %177 = vadd.xlane.f32.xlu0 %v176_v2 }
  0x16   : > { %180 = vadd.xlane.f32.xlu0 %v179_v3 }
  0x9f   : > { %v178_v4 = vpop.xlane.xlu0 %177 }
  0xa0   : > { %v183_v5 = vmul.f32 0.03125, %v178_v4 }
  0xa2   : > { %v185_v6 = vsub.f32 %v171_v0, %v183_v5 }
  0xa3   : > { %v181_v7 = vpop.xlane.xlu0 %180 }
  0xa4   : > { %v184_v8 = vmul.f32 0.03125, %v181_v7  ;;  %v187_v9 = vmul.f32 %v185_v6, %v185_v6 }
  0xa6   : > { %v186_v10 = vsub.f32 %v172_v1, %v184_v8  ;;  %v189_v11 = vsel %vm175_vm0, %v187_v9, 0.0 }
  0xa7   : > { %190 = vadd.xlane.f32.xlu1 %v189_v11 }
  0xa8   : > { %v188_v12 = vmul.f32 %v186_v10, %v186_v10 }
  0xaa   : > { %v192_v13 = vsel %vm175_vm0, %v188_v12, 0.0 }
  0xab   : > { %193 = vadd.xlane.f32.xlu1 %v192_v13 }
 0x134   : > { %v191_v14 = vpop.xlane.xlu1 %190 }
 0x135   : > { %v195_v15 = vmul.f32 0.03125, %v191_v14 }
 0x137   : > { %v197_v16 = vadd.f32 1e-05, %v195_v15 }
 0x138   : > { %v194_v17 = vpop.xlane.xlu1 %193 }
 0x139   : > { %312 = vrsqrt.f32 %v197_v16  ;;  %v196_v18 = vmul.f32 0.03125, %v194_v17 }
 0x13b   : > { %v198_v19 = vadd.f32 1e-05, %v196_v18 }
 0x13d   : > { %314 = vrsqrt.f32 %v198_v19 }
 0x143   : > { %v313_v20 = vpop.eup %312 }
 0x144   : > { %v201_v22 = vmul.f32 %v313_v20, %v185_v6 }
 0x146   : > { %v209_v23 = vmul.f32 %v298_v21, %v201_v22 }
 0x147   : > { %v315_v24 = vpop.eup %314 }
 0x148   : > { %v202_v26 = vmul.f32 %v315_v24, %v186_v10  ;;  %v217_v27 = vadd.f32 %v299_v25, %v209_v23 }
 0x14a   : > { %v210_v28 = vmul.f32 %v298_v21, %v202_v26  ;;  %v219_v30 = vsel %vm175_vm0, %v217_v27, 0.0 }
 0x14c   : > { %v218_v29 = vadd.f32 %v299_v25, %v210_v28 }
 0x14e   : > { %v220_v31 = vsel %vm175_vm0, %v218_v29, 0.0 }
 0x14f   : > { %v221_v32 = vadd.f32 %v220_v31, %v219_v30 }
 0x151   : > { %v222_v33 = vrot.slane %v221_v32, 4 }
 0x153   : > { %v223_v34 = vadd.f32 %v222_v33, %v221_v32 }
 0x155   : > { %v224_v35 = vrot.slane %v223_v34, 2 }
 0x157   : > { %v225_v36 = vadd.f32 %v224_v35, %v223_v34 }
 0x159   : > { %v226_v37 = vrot.slane %v225_v36, 1 }
 0x15b   : > { %v227_v38 = vadd.f32 %v226_v37, %v225_v36 }
 0x15d   : > { %v229_v39 = vmul.f32 0.0625, %v227_v38 }
 0x15f   : > { %v230_v40 = vsub.f32 %v217_v27, %v229_v39  ;;  %v231_v41 = vsub.f32 %v218_v29, %v229_v39 }
 0x161   : > { %232 = vst.msk [vmem:[%s170_s24] sm:$0xff] %vm175_vm0, %v230_v40  ;;  %233 = vst.msk [vmem:[%s170_s24 + $0x8] sm:$0xff] %vm175_vm0, %v231_v41 }
 0x162 PF: > { %s13_s12 = sadd.s32 1, %s322_s12  }
 0x163   : > { %p10_p4 = scmp.ge.s32.totalorder %s13_s12, 4  }
 0x165   :  { %12 = sbr.rel (!%p10_p4) target bundleno = 1 (0x1), region = 62 }

// kernel: _lambda_.45
= control target key start
LH: loop header
LB: loop body
LE: loop exit
PB: predicated region body
PF: predicated region fallthrough
CT: control target
= control target key end

     0   :  { %11 = vsyncpa [#allocation3], 0  ;;  %s970_s0 = inlined_call_operand.vmem [shape: f32[2,16,32], index: 0, kind: input, shape index: {}]   ;;  %s971_s1 = inlined_call_operand.vmem [shape: bf16[32,32], index: 1, kind: input, shape index: {}]   ;;  %s972_s2 = inlined_call_operand.vmem [shape: f32[1,32], index: 2, kind: input, shape index: {}]   ;;  %s973_s3 = inlined_call_operand.vmem [shape: f32[2,16,32], index: 3, kind: input, shape index: {}]   ;;  %s974_s4 = inlined_call_operand.vmem [shape: f32[2,16,32], index: 4, kind: output, shape index: {0}]   ;;  %s975_s5 = inlined_call_operand.hbm [shape: f32[2,16,32], index: 5, kind: output, shape index: {1}]  }
   0x1   :  { %13 = vsyncpa [#allocation3 + $0x1], 0  ;;  %s823_s18 = smov 0   ;;  %s825_s19 = smov 0  }
   0x2   :  { %s827_s20 = smov 0   ;;  %s829_s21 = smov 0  }
   0x3 LB: > { %s844_s22 = sadd.s32 4294967295, %s786_s21   ;;  %s627_s23 = sadd.s32 4294967294, %s786_s21   ;;  %s786_s21 = sphi %s829_s21, %s981_s21   ;;  %s782_s20 = sphi %s827_s20, %s980_s20   ;;  %s778_s19 = sphi %s825_s19, %s979_s19   ;;  %s774_s18 = sphi %s823_s18, %s978_s18  }
   0x4   : > { %s848_s24 = sadd.s32 1, %s786_s21   ;;  %s146_s25 = sadd.s32 1, %s782_s20 }
   0x5   : > { %s143_s26 = ssub.s32 %s786_s21, %s848_s24  ;;  %p156_p0 = scmp.ne.s32.totalorder %s782_s20, %s778_s19 }
   0x6   : > { %p144_p1 = scmp.eq.s32.totalorder %s143_s26, 0  ;;  %p157_p2 = scmp.eq.s32.totalorder %s844_s22, 1 }
   0x7   : > { %p162_p3 = scmp.ne.s32.totalorder %s778_s19, %s774_s18  ;;  %p163_p4 = scmp.eq.s32.totalorder %s627_s23, 1 }
   0x8   : > { %s859_s27 = scalar_select %p144_p1, %s782_s20, %s146_s25  }
   0x9   : > { %p861_p5 = por %p157_p2, %p156_p0  ;;  %p865_p6 = por %p163_p4, %p162_p3 }
   0xa   : > { %p630_p7 = scmp.ge.s32.totalorder %s786_s21, 1  ;;  %p203_p8 = scmp.lt.s32.totalorder %s786_s21, 3 }
   0xc   : > { %p204_p9 = pnand %p630_p7, %p203_p8 }
   0xd   : > { %v722_v0 = vld [vmem:[%s971_s1] sm:$0xff] (!%p204_p9)   ;;  %v788_v1 = vmov (!%p204_p9), 0.0   ;;  %v723_v2 = vld [vmem:[%s971_s1 + $0x8] sm:$0xff] (!%p204_p9)   ;;  %vm789_vm0 = vmmov (!%p204_p9), 0   ;;  %p241_p10 = scmp.lt.s32.totalorder (!%p204_p9), %s844_s22, 1  ;;  %vm283_vm1 = vcmask (!%p204_p9), 261120   ;;  %v332_v6 = vlaneseq (!%p204_p9) }
   0xe   : > { %207 = sbr.rel (%p204_p9) target bundleno = 481 (0x1e1), region = 36  ;;  %660 = vmatprep.subr.bf16.mxu0 (!%p204_p9), %v788_v1  ;;  %664 = vmatprep.mubr.msk.bf16.mxu0 (!%p204_p9), %vm789_vm0, %v788_v1  ;;  %v638_v43 = vld [vmem:[%s972_s2] ss:$0 sm:$0xff] (!%p204_p9)  ;;  %s238_s25 = sand.u32 (!%p204_p9), 1, %s778_s19  }
   0xf   : > { %661 = vmatpush3.bf16.msra.mxu0 (!%p204_p9), %v722_v0  ;;  %v333_v7 = vshrl.u32 (!%p204_p9), %v332_v6, 7  ;;  %v336_v11 = vand.u32 (!%p204_p9), 127, %v332_v6  ;;  %s631_s26 = sshll.u32 (!%p204_p9), %s238_s25, 4  ;;  %s652_s7 = sshll.u32 (!%p204_p9), %s844_s22, 8 }
  0x10   : > { %662 = vmatprep.subr.bf16.mxu0 (!%p204_p9), %v788_v1  ;;  %s240_s30 = scalar_lea.vmem (!%p204_p9), [#allocation2], %s631_s26  ;;  %s921_s14 = scalar_lea.hbm (!%p204_p9), %s975_s5, %s652_s7 }
  0x11   : > { %v337_v8 = vadd.s32 (!%p204_p9), 4294967294, %v333_v7  ;;  %v353_v9 = vadd.s32 (!%p204_p9), 4294967295, %v333_v7  ;;  %v334_v10 = vadd.s32 (!%p204_p9), 8, %v333_v7  ;;  %vm369_vm6 = vcmp.gt.s32.totalorder (!%p204_p9), %v333_v7, 0  ;;  %s528_s6 = sshll.u32 (!%p204_p9), %s240_s30, 4  ;;  %s790_s15 = smov (!%p204_p9), [#allocation2]   ;;  %s916_s6 = int_to_ptr.vmem [resolvable:$true] %s528_s6 }
  0x12   : > { %v370_v18 = vsel (!%p204_p9), %vm369_vm6, %v333_v7, 0  ;;  %v383_v20 = vadd.s32 (!%p204_p9), 1, %v333_v7  ;;  %v399_v25 = vadd.s32 (!%p204_p9), 2, %v333_v7  ;;  %s728_s16 = sshll.u32 (!%p204_p9), %s790_s15, 4  ;;  %s729_s16 = int_to_ptr.vmem [resolvable:$false] %s728_s16 }
  0x13   : > { %663 = vmatpush3.bf16.msra.mxu0 (!%p204_p9), %v723_v2  ;;  %vm339_vm2 = vcmp.gt.s32.totalorder (!%p204_p9), %v337_v8, 0  ;;  %vm355_vm3 = vcmp.gt.s32.totalorder (!%p204_p9), %v353_v9, 0  ;;  %v338_v14 = vadd.s32 (!%p204_p9), 4294967294, %v334_v10  ;;  %v354_v15 = vadd.s32 (!%p204_p9), 4294967295, %v334_v10  ;;  %s730_s17 = scalar_lea.vmem (!%p204_p9), %s729_s16, 512  ;;  %p731_p0 = scmp.lt.s32.totalorder (!%p204_p9), %s916_s6, %s729_s16 }
  0x14   : > { %v340_v12 = vsel (!%p204_p9), %vm339_vm2, %v337_v8, 0  ;;  %v356_v13 = vsel (!%p204_p9), %vm355_vm3, %v353_v9, 0  ;;  %vm377_vm8 = vcmp.eq.s32.totalorder (!%p204_p9), %v336_v11, %v370_v18  ;;  %vm375_vm10 = vcmp.lt.s32.totalorder (!%p204_p9), %v334_v10, 15 }
  0x15   : > { %s242_s9 = scalar_select %p241_p10, %s844_s22, 1  ;;  %vm347_vm4 = vcmp.eq.s32.totalorder %v336_v11, %v340_v12  ;;  %vm363_vm5 = vcmp.eq.s32.totalorder %v336_v11, %v356_v13  ;;  %vm348_vm7 = vcmp.eq.s32.totalorder %v336_v11, %v338_v14  ;;  %v379_v22 = vsel %vm377_vm8, 1.0, %v788_v1 }
  0x16   : > { %v349_v16 = vsel %vm347_vm4, 1.0, %v788_v1  ;;  %v365_v17 = vsel %vm363_vm5, 1.0, %v788_v1  ;;  %v350_v21 = vsel %vm348_vm7, 1.0, %v788_v1  ;;  %vm364_vm9 = vcmp.eq.s32.totalorder %v336_v11, %v354_v15  ;;  %s927_s22 = scalar_lea.sflag [#allocation3], %s238_s25 }
  0x17   : > { %s882_s10 = sshll.u32 %s242_s9, 4  ;;  %v367_v19 = vadd.f32 %v365_v17, %v349_v16  ;;  %v384_v23 = vadd.s32 1, %v334_v10  ;;  %vm393_vm11 = vcmp.eq.s32.totalorder %v336_v11, %v383_v20  ;;  %v366_v26 = vsel %vm364_vm9, 1.0, %v788_v1 }
  0x18   : > { %s245_s13 = scalar_lea.vmem %s970_s0, %s882_s10  ;;  %v395_v27 = vsel %vm393_vm11, 1.0, %v788_v1  ;;  %v368_v28 = vadd.f32 %v366_v26, %v350_v21  ;;  %v376_v29 = vsel %vm375_vm10, %v334_v10, 15  ;;  %vm409_vm13 = vcmp.eq.s32.totalorder %v336_v11, %v399_v25  ;;  %s250_s23 = scalar_lea.vmem %s973_s3, %s882_s10 }
  0x19   : > { %v257_v3 = vld [vmem:[%s245_s13] sm:$0xff]  ;;  %v258_v4 = vld [vmem:[%s245_s13 + $0x8] sm:$0xff]  ;;  %v381_v24 = vadd.f32 %v379_v22, %v367_v19  ;;  %vm391_vm12 = vcmp.lt.s32.totalorder %v384_v23, 15  ;;  %vm378_vm14 = vcmp.eq.s32.totalorder %v336_v11, %v376_v29  ;;  %v411_v32 = vsel %vm409_vm13, 1.0, %v788_v1  ;;  %s914_s11 = scalar_lea.vmem %s974_s4, %s882_s10  ;;  %s724_s10 = scalar_lea.vmem %s916_s6, 256 }
  0x1a   : > { %v263_v5 = vpack.c.bf16 %v258_v4, %v257_v3  ;;  %v392_v31 = vsel %vm391_vm12, %v384_v23, 15  ;;  %v380_v33 = vsel %vm378_vm14, 1.0, %v788_v1  ;;  %v400_v34 = vadd.s32 2, %v334_v10  ;;  %v328_v47 = vld [vmem:[%s250_s23] sm:$0xff]  ;;  %v329_v49 = vld [vmem:[%s250_s23 + $0x8] sm:$0xff]  ;;  %p725_p11 = scmp.ne.s32.totalorder %s916_s6, %s724_s10  ;;  %p732_p1 = scmp.lt.s32.totalorder %s730_s17, %s724_s10 }
  0x1b   : > { %v397_v30 = vadd.f32 %v395_v27, %v381_v24  ;;  %vm394_vm15 = vcmp.eq.s32.totalorder %v336_v11, %v392_v31  ;;  %v382_v36 = vadd.f32 %v380_v33, %v368_v28  ;;  %vm418_vm2 = vcmask 130048  }
  0x1c   : > { %665 = vmatmul.mubr.msk.bf16.vlgmr.msra.gmra.mrb[0].mxu0 %vm283_vm1, %v263_v5  ;;  %v396_v37 = vsel %vm394_vm15, 1.0, %v788_v1  ;;  %vm407_vm0 = vcmp.lt.s32.totalorder %v400_v34, 15  ;;  %p726_p12 = pnand %p725_p11, %p861_p5  ;;  %p733_p2 = por %p732_p1, %p731_p0 }
  0x1d   : > { %v413_v35 = vadd.f32 %v411_v32, %v397_v30  ;;  %v398_v39 = vadd.f32 %v396_v37, %v382_v36  ;;  %v408_v40 = vsel %vm407_vm0, %v400_v34, 15 }
  0x1e   : > { %vm410_vm3 = vcmp.eq.s32.totalorder %v336_v11, %v408_v40  ;;  %p727_p13 = pneg %p726_p12 }
  0x1f   : > { %v416_v38 = vmul.f32 0.2, %v413_v35  ;;  %v412_v41 = vsel %vm410_vm3, 1.0, %v788_v1 }
  0x20   : > { %v414_v42 = vadd.f32 %v412_v41, %v398_v39  ;;  %p734_p3 = pnand %p733_p2, %p727_p13 }
  0x21   : > { %672 = vmatprep.mubr.msk.f32.mxu1 %vm418_vm2, %v416_v38 }
  0x22   : > { %v417_v55 = vmul.f32 0.2, %v414_v42 }
  0xef   : > { %v321_v44 = vpop.f32.mrb[0].mxu0 }
  0xf0   : > { %v322_v45 = vadd.f32 %v638_v43, %v321_v44  ;;  %v666_v46 = vpop.f32.mrb[1].mxu0 }
  0xf1   : > { %v324_v48 = vpop.f32.mrb[2].mxu0 }
  0xf2   : > { %v325_v50 = vadd.f32 %v638_v43, %v324_v48  ;;  %v667_v51 = vpop.f32.mrb[3].mxu0  ;;  %v330_v52 = vadd.f32 %v328_v47, %v322_v45 }
  0xf4   : > { %v331_v53 = vadd.f32 %v329_v49, %v325_v50 }
  0xf6   : > { %v675_v54 = vpack.c.bf16 %v331_v53, %v330_v52 }
  0xf8   : > { %676 = vmatprep.subr.bf16.mxu1 %v675_v54 }
  0xf9   : > { %678 = vmatpush3.bf16.msra.mxu1 %v675_v54 }
  0xfc   : > { %673 = vmatmul.mubr.msk.f32.vlgmr.msra.gmra.mrb[0].mxu1 %vm418_vm2, %v417_v55 }
 0x1cf   : > { %v674_v56 = vpop.f32.mrb[0].mxu1 }
 0x1d0   : > { %v501_v57 = vsub.f32 %v331_v53, %v674_v56  ;;  %505 = vst.msk [vmem:[%s240_s30 + $0x8] sm:$0xff] %vm283_vm1, %v674_v56  ;;  %v491_v58 = vpop.f32.mrb[1].mxu1 }
 0x1d1   : > { %v500_v59 = vsub.f32 %v330_v52, %v491_v58  ;;  %504 = vst.msk [vmem:[%s240_s30] sm:$0xff] %vm283_vm1, %v491_v58 }
 0x1d2   : > { %503 = vst.msk [vmem:[%s914_s11 + $0x8] sm:$0xff] %vm283_vm1, %v501_v57 }
 0x1d3   : > { %737 = shalt.err (!%p734_p3)
}
 0x1d4   : > { %s738_s23 = scalar_lea.hbm %s921_s14, 256  ;;  %s742_s30 = scalar_lea.hbm %s975_s5, 512 }
 0x1d5   : > { %p739_p4 = scmp.ne.s32.totalorder %s921_s14, %s738_s23  ;;  %p743_p9 = scmp.lt.u32.totalorder %s921_s14, %s975_s5 }
 0x1d6   : > { %p744_p10 = scmp.lt.u32.totalorder %s742_s30, %s738_s23  ;;  %p746_p12 = scmp.lt.u32.totalorder %s738_s23, %s921_s14 }
 0x1d7   : > { %p740_p7 = pnand %p739_p4, %p861_p5 }
 0x1d8   : > { %p745_p11 = por %p744_p10, %p743_p9 }
 0x1d9   : > { %p741_p8 = pneg %p740_p7 }
 0x1da   : > { %p747_p13 = por %p746_p12, %p745_p11 }
 0x1dc   : > { %p748_p0 = pnand %p747_p13, %p741_p8 }
 0x1de   : > { %751 = shalt.err (!%p748_p0)
}
 0x1df   : > { %s791_s9 = smov 128   ;;  %s792_s12 = smov 8   ;;  %502 = vst.msk [vmem:[%s914_s11] sm:$0xff] %vm283_vm1, %v500_v59 }
 0x1e0   : > { %679 = dma.vmem_to_hbm [thread:$0]  (%p861_p5), %s916_s6, 256, %s921_s14, %s927_s22, %s791_s9, %s791_s9, %s792_s12  }
 0x1e1 PF: > { %p685_p1 = scmp.ge.s32.totalorder %s786_s21, 2  ;;  %s551_s13 = sand.u32 1, %s774_s18  }
 0x1e2   : > { %s552_s10 = scalar_lea.sflag [#allocation3], %s551_s13 }
 0x1e3   : > { %p682_p2 = pnand %p685_p1, %p865_p6 }
 0x1e5   : > { %769 = dma.done.wait (!%p682_p2), %s552_s10, 256  }
 0x1e6   : > { %771 = vsyncadd (!%p682_p2), %s552_s10, 4294967040  ;;  %p16_p3 = scmp.ge.s32.totalorder %s848_s24, 4   ;;  %s978_s18 = smov %s778_s19 }
 0x1e7   : > { %s979_s19 = smov %s782_s20  ;;  %s980_s20 = smov %s859_s27 }
 0x1e8   : > { %s981_s21 = smov %s848_s24  ;;  %18 = sbr.rel (!%p16_p3) target bundleno = 3 (0x3), region = 86 }
 0x1ef   :  { %557 = vsyncpa [#allocation3], 1 }
 0x1f0   :  { %559 = vsyncpa [#allocation3 + $0x1], 1 }

// kernel: _lambda_.46
= control target key start
LH: loop header
LB: loop body
LE: loop exit
PB: predicated region body
PF: predicated region fallthrough
CT: control target
= control target key end

     0   :  { %10 = vsyncpa [#allocation3], 0  ;;  %s1020_s0 = inlined_call_operand.vmem [shape: f32[2,16,32], index: 0, kind: input, shape index: {}]   ;;  %s1021_s1 = inlined_call_operand.vmem [shape: bf16[32,64], index: 1, kind: input, shape index: {}]   ;;  %s1022_s2 = inlined_call_operand.vmem [shape: bf16[64,32], index: 2, kind: input, shape index: {}]   ;;  %s1023_s3 = inlined_call_operand.vmem [shape: f32[2,16,32], index: 3, kind: output, shape index: {0}]   ;;  %s1024_s4 = inlined_call_operand.hbm [shape: f32[2,16,32], index: 4, kind: output, shape index: {1}]  }
   0x1   :  { %12 = vsyncpa [#allocation3 + $0x1], 0  ;;  %s852_s15 = smov 0   ;;  %s854_s16 = smov 0  }
   0x2   :  { %s856_s17 = smov 0   ;;  %s858_s18 = smov 0  }
   0x3 LB: > { %s873_s19 = sadd.s32 4294967295, %s820_s18   ;;  %s639_s20 = sadd.s32 4294967294, %s820_s18   ;;  %s820_s18 = sphi %s858_s18, %s1030_s18   ;;  %s816_s17 = sphi %s856_s17, %s1029_s17   ;;  %s812_s16 = sphi %s854_s16, %s1028_s16   ;;  %s808_s15 = sphi %s852_s15, %s1027_s15  }
   0x4   : > { %s877_s21 = sadd.s32 1, %s820_s18   ;;  %s119_s22 = sadd.s32 1, %s816_s17 }
   0x5   : > { %s116_s23 = ssub.s32 %s820_s18, %s877_s21  ;;  %p129_p0 = scmp.ne.s32.totalorder %s816_s17, %s812_s16 }
   0x6   : > { %p117_p1 = scmp.eq.s32.totalorder %s116_s23, 0  ;;  %p130_p2 = scmp.eq.s32.totalorder %s873_s19, 1 }
   0x7   : > { %p135_p3 = scmp.ne.s32.totalorder %s812_s16, %s808_s15  ;;  %p136_p4 = scmp.eq.s32.totalorder %s639_s20, 1 }
   0x8   : > { %s888_s24 = scalar_select %p117_p1, %s816_s17, %s119_s22  }
   0x9   : > { %p890_p5 = por %p130_p2, %p129_p0  ;;  %p894_p6 = por %p136_p4, %p135_p3 }
   0xa   : > { %p642_p7 = scmp.ge.s32.totalorder %s820_s18, 1  ;;  %p168_p8 = scmp.lt.s32.totalorder %s820_s18, 3 }
   0xc   : > { %p169_p9 = pnand %p642_p7, %p168_p8 }
   0xd   : > { %v752_v0 = vld [vmem:[%s1021_s1] sm:$0xff] (!%p169_p9)   ;;  %v822_v1 = vmov (!%p169_p9), 0.0   ;;  %v753_v2 = vld [vmem:[%s1021_s1 + $0x8] sm:$0xff] (!%p169_p9)   ;;  %vm823_vm0 = vmmov (!%p169_p9), 0   ;;  %p199_p10 = scmp.lt.s32.totalorder (!%p169_p9), %s873_s19, 1  ;;  %vm229_vm1 = vcmask (!%p169_p9), 261120   ;;  %v356_v17 = vlaneseq (!%p169_p9) }
   0xe   : > { %172 = sbr.rel (%p169_p9) target bundleno = 697 (0x2b9), region = 32  ;;  %678 = vmatprep.subr.bf16.mxu0 (!%p169_p9), %v822_v1  ;;  %686 = vmatprep.subr.bf16.mxu1 (!%p169_p9), %v822_v1  ;;  %v754_v3 = vld [vmem:[%s1022_s2] sm:$0xff] (!%p169_p9)   ;;  %v755_v4 = vld [vmem:[%s1022_s2 + $0x8] sm:$0xff] (!%p169_p9)   ;;  %v756_v8 = vld [vmem:[%s1022_s2 + $0x10] sm:$0xff] (!%p169_p9)   ;;  %vm309_vm2 = vcmask (!%p169_p9), 523264   ;;  %s196_s27 = sand.u32 (!%p169_p9), 1, %s812_s16  }
   0xf   : > { %679 = vmatpush3.bf16.msra.mxu0 (!%p169_p9), %v752_v0  ;;  %682 = vmatprep.mubr.msk.bf16.mxu0 (!%p169_p9), %vm823_vm0, %v822_v1  ;;  %v757_v9 = vld [vmem:[%s1022_s2 + $0x18] sm:$0xff] (!%p169_p9)   ;;  %v357_v18 = vshrl.u32 (!%p169_p9), %v356_v17, 7  ;;  %v360_v22 = vand.u32 (!%p169_p9), 127, %v356_v17  ;;  %s643_s28 = sshll.u32 (!%p169_p9), %s196_s27, 4  ;;  %s665_s5 = sshll.u32 (!%p169_p9), %s873_s19, 8 }
  0x10   : > { %680 = vmatprep.subr.bf16.mxu0 (!%p169_p9), %v822_v1  ;;  %694 = vmatprep.mubr.msk.bf16.mxu1 (!%p169_p9), %vm823_vm0, %v822_v1  ;;  %s198_s29 = scalar_lea.vmem (!%p169_p9), [#allocation2], %s643_s28 }
  0x11   : > { %687 = vmatpush3.bf16.msra.mxu1 (!%p169_p9), %v754_v3  ;;  %v361_v19 = vadd.s32 (!%p169_p9), 4294967294, %v357_v18  ;;  %v377_v20 = vadd.s32 (!%p169_p9), 4294967295, %v357_v18  ;;  %v358_v21 = vadd.s32 (!%p169_p9), 8, %v357_v18  ;;  %vm393_vm7 = vcmp.gt.s32.totalorder (!%p169_p9), %v357_v18, 0  ;;  %s552_s30 = sshll.u32 (!%p169_p9), %s198_s29, 4  ;;  %s966_s30 = int_to_ptr.vmem [resolvable:$true] %s552_s30 }
  0x12   : > { %688 = vmatprep.subr.bf16.mxu1 (!%p169_p9), %v822_v1  ;;  %v394_v29 = vsel (!%p169_p9), %vm393_vm7, %v357_v18, 0  ;;  %v407_v31 = vadd.s32 (!%p169_p9), 1, %v357_v18  ;;  %v423_v36 = vadd.s32 (!%p169_p9), 2, %v357_v18 }
  0x13   : > { %681 = vmatpush3.bf16.msra.mxu0 (!%p169_p9), %v753_v2  ;;  %vm363_vm3 = vcmp.gt.s32.totalorder (!%p169_p9), %v361_v19, 0  ;;  %vm379_vm4 = vcmp.gt.s32.totalorder (!%p169_p9), %v377_v20, 0  ;;  %v362_v25 = vadd.s32 (!%p169_p9), 4294967294, %v358_v21  ;;  %v378_v26 = vadd.s32 (!%p169_p9), 4294967295, %v358_v21 }
  0x14   : > { %v364_v23 = vsel (!%p169_p9), %vm363_vm3, %v361_v19, 0  ;;  %v380_v24 = vsel (!%p169_p9), %vm379_vm4, %v377_v20, 0  ;;  %vm401_vm9 = vcmp.eq.s32.totalorder (!%p169_p9), %v360_v22, %v394_v29  ;;  %vm399_vm11 = vcmp.lt.s32.totalorder (!%p169_p9), %v358_v21, 15 }
  0x15   : > { %s916_s7 = scalar_select %p199_p10, %s873_s19, 1  ;;  %689 = vmatpush3.bf16.msra.mxu1 %v755_v4  ;;  %vm371_vm5 = vcmp.eq.s32.totalorder %v360_v22, %v364_v23  ;;  %vm387_vm6 = vcmp.eq.s32.totalorder %v360_v22, %v380_v24  ;;  %vm372_vm8 = vcmp.eq.s32.totalorder %v360_v22, %v362_v25  ;;  %v403_v33 = vsel %vm401_vm9, 1.0, %v822_v1 }
  0x16   : > { %690 = vmatprep.subr.bf16.mxu1 %v822_v1  ;;  %v373_v27 = vsel %vm371_vm5, 1.0, %v822_v1  ;;  %v389_v28 = vsel %vm387_vm6, 1.0, %v822_v1  ;;  %v374_v32 = vsel %vm372_vm8, 1.0, %v822_v1  ;;  %vm388_vm10 = vcmp.eq.s32.totalorder %v360_v22, %v378_v26  ;;  %s977_s19 = scalar_lea.sflag [#allocation3], %s196_s27 }
  0x17   : > { %s663_s10 = sshll.u32 %s916_s7, 4  ;;  %v391_v30 = vadd.f32 %v389_v28, %v373_v27  ;;  %v408_v34 = vadd.s32 1, %v358_v21  ;;  %vm417_vm12 = vcmp.eq.s32.totalorder %v360_v22, %v407_v31  ;;  %v390_v37 = vsel %vm388_vm10, 1.0, %v822_v1  ;;  %s758_s7 = scalar_lea.vmem %s966_s30, 256 }
  0x18   : > { %s203_s13 = scalar_lea.vmem %s1020_s0, %s663_s10  ;;  %v419_v38 = vsel %vm417_vm12, 1.0, %v822_v1  ;;  %v392_v39 = vadd.f32 %v390_v37, %v374_v32  ;;  %v400_v40 = vsel %vm399_vm11, %v358_v21, 15  ;;  %vm433_vm14 = vcmp.eq.s32.totalorder %v360_v22, %v423_v36  ;;  %s964_s9 = scalar_lea.vmem %s1023_s3, %s663_s10 }
  0x19   : > { %v928_v5 = vld [vmem:[%s203_s13] sm:$0xff]  ;;  %v930_v6 = vld [vmem:[%s203_s13 + $0x8] sm:$0xff]  ;;  %691 = vmatpush3.bf16.msra.mxu1 %v756_v8  ;;  %v405_v35 = vadd.f32 %v403_v33, %v391_v30  ;;  %vm415_vm13 = vcmp.lt.s32.totalorder %v408_v34, 15  ;;  %vm402_vm15 = vcmp.eq.s32.totalorder %v360_v22, %v400_v40  ;;  %v435_v43 = vsel %vm433_vm14, 1.0, %v822_v1  ;;  %s971_s13 = scalar_lea.hbm %s1024_s4, %s665_s5  ;;  %p759_p11 = scmp.ne.s32.totalorder %s966_s30, %s758_s7 }
  0x1a   : > { %v216_v7 = vpack.c.bf16 %v930_v6, %v928_v5  ;;  %692 = vmatprep.subr.bf16.mxu1 %v822_v1  ;;  %v416_v42 = vsel %vm415_vm13, %v408_v34, 15  ;;  %v404_v44 = vsel %vm402_vm15, 1.0, %v822_v1  ;;  %v424_v45 = vadd.s32 2, %v358_v21  ;;  %s824_s10 = smov [#allocation2]  }
  0x1b   : > { %v421_v41 = vadd.f32 %v419_v38, %v405_v35  ;;  %vm418_vm0 = vcmp.eq.s32.totalorder %v360_v22, %v416_v42  ;;  %v406_v47 = vadd.f32 %v404_v44, %v392_v39  ;;  %vm442_vm3 = vcmask 130048   ;;  %p760_p12 = pnand %p759_p11, %p890_p5  ;;  %s762_s14 = sshll.u32 %s824_s10, 4  ;;  %s763_s14 = int_to_ptr.vmem [resolvable:$false] %s762_s14 }
  0x1c   : > { %683 = vmatmul.mubr.msk.bf16.vlgmr.msra.gmra.mrb[0].mxu0 %vm229_vm1, %v216_v7  ;;  %v420_v48 = vsel %vm418_vm0, 1.0, %v822_v1  ;;  %s764_s20 = scalar_lea.vmem %s763_s14, 512  ;;  %p765_p0 = scmp.lt.s32.totalorder %s966_s30, %s763_s14 }
  0x1d   : > { %693 = vmatpush3.bf16.msra.mxu1 %v757_v9  ;;  %v437_v46 = vadd.f32 %v435_v43, %v421_v41  ;;  %v422_v50 = vadd.f32 %v420_v48, %v406_v47  ;;  %p761_p13 = pneg %p760_p12  ;;  %p766_p1 = scmp.lt.s32.totalorder %s764_s20, %s758_s7 }
  0x1f   : > { %v440_v49 = vmul.f32 0.2, %v437_v46  ;;  %p767_p2 = por %p766_p1, %p765_p0 }
  0x21   : > { %702 = vmatprep.mubr.msk.f32.mxu0 %vm442_vm3, %v440_v49  ;;  %p768_p3 = pnand %p767_p2, %p761_p13 }
  0xef   : > { %v267_v10 = vpop.f32.mrb[0].mxu0 }
  0xf0   : > { %v684_v11 = vpop.f32.mrb[1].mxu0  ;;  %v274_v13 = vmax.f32 %v267_v10, 0.0 }
  0xf1   : > { %v270_v12 = vpop.f32.mrb[2].mxu0 }
  0xf2   : > { %v275_v14 = vmax.f32 %v270_v12, 0.0  ;;  %v685_v15 = vpop.f32.mrb[3].mxu0 }
  0xf4   : > { %v284_v16 = vpack.c.bf16 %v275_v14, %v274_v13 }
  0xf6   : > { %695 = vmatmul.mubr.msk.bf16.vlgmr.msra.gmra.mrb[0].mxu1 %vm309_vm2, %v284_v16  ;;  %vm431_vm2 = vcmp.lt.s32.totalorder %v424_v45, 15 }
  0xf7   : > { %v432_v51 = vsel %vm431_vm2, %v424_v45, 15 }
  0xf8   : > { %vm434_vm4 = vcmp.eq.s32.totalorder %v360_v22, %v432_v51 }
  0xf9   : > { %v436_v52 = vsel %vm434_vm4, 1.0, %v822_v1 }
  0xfa   : > { %v438_v53 = vadd.f32 %v436_v52, %v422_v50 }
  0xfc   : > { %v441_v61 = vmul.f32 0.2, %v438_v53 }
 0x1c9   : > { %v347_v54 = vpop.f32.mrb[0].mxu1 }
 0x1ca   : > { %v696_v55 = vpop.f32.mrb[1].mxu1  ;;  %v354_v57 = vadd.f32 %v347_v54, %v928_v5 }
 0x1cb   : > { %v350_v56 = vpop.f32.mrb[2].mxu1 }
 0x1cc   : > { %v355_v58 = vadd.f32 %v350_v56, %v930_v6  ;;  %v697_v59 = vpop.f32.mrb[3].mxu1 }
 0x1ce   : > { %v705_v60 = vpack.c.bf16 %v355_v58, %v354_v57 }
 0x1d0   : > { %706 = vmatprep.subr.bf16.mxu0 %v705_v60 }
 0x1d1   : > { %708 = vmatpush3.bf16.msra.mxu0 %v705_v60 }
 0x1d4   : > { %703 = vmatmul.mubr.msk.f32.vlgmr.msra.gmra.mrb[4].mxu0 %vm442_vm3, %v441_v61 }
 0x2a7   : > { %v704_v62 = vpop.f32.mrb[4].mxu0 }
 0x2a8   : > { %v525_v63 = vsub.f32 %v355_v58, %v704_v62  ;;  %529 = vst.msk [vmem:[%s198_s29 + $0x8] sm:$0xff] %vm229_vm1, %v704_v62  ;;  %v515_v0 = vpop.f32.mrb[5].mxu0 }
 0x2a9   : > { %v524_v1 = vsub.f32 %v354_v57, %v515_v0  ;;  %528 = vst.msk [vmem:[%s198_s29] sm:$0xff] %vm229_vm1, %v515_v0 }
 0x2aa   : > { %527 = vst.msk [vmem:[%s964_s9 + $0x8] sm:$0xff] %vm229_vm1, %v525_v63 }
 0x2ab   : > { %771 = shalt.err (!%p768_p3)
}
 0x2ac   : > { %s772_s22 = scalar_lea.hbm %s971_s13, 256  ;;  %s776_s28 = scalar_lea.hbm %s1024_s4, 512 }
 0x2ad   : > { %p773_p4 = scmp.ne.s32.totalorder %s971_s13, %s772_s22  ;;  %p777_p9 = scmp.lt.u32.totalorder %s971_s13, %s1024_s4 }
 0x2ae   : > { %p778_p10 = scmp.lt.u32.totalorder %s776_s28, %s772_s22  ;;  %p780_p12 = scmp.lt.u32.totalorder %s772_s22, %s971_s13 }
 0x2af   : > { %p774_p7 = pnand %p773_p4, %p890_p5 }
 0x2b0   : > { %p779_p11 = por %p778_p10, %p777_p9 }
 0x2b1   : > { %p775_p8 = pneg %p774_p7 }
 0x2b2   : > { %p781_p13 = por %p780_p12, %p779_p11 }
 0x2b4   : > { %p782_p0 = pnand %p781_p13, %p775_p8 }
 0x2b6   : > { %785 = shalt.err (!%p782_p0)
}
 0x2b7   : > { %s825_s6 = smov 128   ;;  %s826_s8 = smov 8   ;;  %526 = vst.msk [vmem:[%s964_s9] sm:$0xff] %vm229_vm1, %v524_v1 }
 0x2b8   : > { %709 = dma.vmem_to_hbm [thread:$0]  (%p890_p5), %s966_s30, 256, %s971_s13, %s977_s19, %s825_s6, %s825_s6, %s826_s8  }
 0x2b9 PF: > { %p715_p1 = scmp.ge.s32.totalorder %s820_s18, 2  ;;  %s575_s11 = sand.u32 1, %s808_s15  }
 0x2ba   : > { %s576_s12 = scalar_lea.sflag [#allocation3], %s575_s11 }
 0x2bb   : > { %p712_p2 = pnand %p715_p1, %p894_p6 }
 0x2bd   : > { %803 = dma.done.wait (!%p712_p2), %s576_s12, 256  }
 0x2be   : > { %805 = vsyncadd (!%p712_p2), %s576_s12, 4294967040  ;;  %p15_p3 = scmp.ge.s32.totalorder %s877_s21, 4   ;;  %s1027_s15 = smov %s812_s16 }
 0x2bf   : > { %s1028_s16 = smov %s816_s17  ;;  %s1029_s17 = smov %s888_s24 }
 0x2c0   : > { %s1030_s18 = smov %s877_s21  ;;  %17 = sbr.rel (!%p15_p3) target bundleno = 3 (0x3), region = 79 }
 0x2c7   :  { %581 = vsyncpa [#allocation3], 1 }
 0x2c8   :  { %583 = vsyncpa [#allocation3 + $0x1], 1 }

// kernel: _lambda_.48
= control target key start
LH: loop header
LB: loop body
LE: loop exit
PB: predicated region body
PF: predicated region fallthrough
CT: control target
= control target key end

     0   :  { %vm19_vm0 = vcmask 523264   ;;  %v161_v1 = vmov 0.0   ;;  %vm50_vm1 = vcmask 261120   ;;  %s227_s1 = inlined_call_operand.vmem [shape: bf16[32,64], index: 1, kind: input, shape index: {}]   ;;  %s228_s0 = inlined_call_operand.vmem [shape: f32[32,32], index: 0, kind: input, shape index: {}]   ;;  %s229_s2 = inlined_call_operand.vmem [shape: f32[1,64], index: 2, kind: input, shape index: {}]   ;;  %s230_s3 = inlined_call_operand.vmem [shape: f32[32,64], index: 3, kind: output, shape index: {}]  }
   0x1   :  { %v159_v0 = vld [vmem:[%s227_s1] sm:$0xff]   ;;  %22 = vst.msk [vmem:[#allocation2 + $0x10] sm:$0xff] %vm19_vm0, %v161_v1  ;;  %20 = vst.msk [vmem:[#allocation2] sm:$0xff] %vm19_vm0, %v161_v1  ;;  %v160_v2 = vld [vmem:[%s227_s1 + $0x8] sm:$0xff]  }
   0x2   :  { %21 = vst.msk [vmem:[#allocation2 + $0x8] sm:$0xff] %vm19_vm0, %v161_v1  ;;  %23 = vst.msk [vmem:[#allocation2 + $0x18] sm:$0xff] %vm19_vm0, %v161_v1  ;;  %150 = vmatprep.subr.bf16.mxu0 %v159_v0  ;;  %v28_v3 = vld [vmem:[%s228_s0] sm:$0xff]  ;;  %v29_v4 = vld [vmem:[%s228_s0 + $0x8] sm:$0xff] }
   0x3   :  { %151 = vmatpush3.bf16.msra.mxu0 %v159_v0  ;;  %v36_v5 = vpack.c.bf16 %v29_v4, %v28_v3  ;;  %v30_v6 = vld [vmem:[%s228_s0 + $0x10] sm:$0xff]  ;;  %v31_v7 = vld [vmem:[%s228_s0 + $0x18] sm:$0xff]  ;;  %v145_v21 = vld [vmem:[%s229_s2] ss:$0 sm:$0xff] }
   0x4   :  { %152 = vmatprep.subr.bf16.mxu0 %v160_v2  ;;  %v37_v8 = vpack.c.bf16 %v31_v7, %v30_v6 }
   0x5   :  { %154 = vmatprep.mubr.msk.bf16.mxu0 %vm50_vm1, %v36_v5 }
   0x7   :  { %153 = vmatpush3.bf16.msra.mxu0 %v160_v2 }
   0x8   :  { %v26_v9 = vld [vmem:[#allocation2 + $0x10] sm:$0xff]  ;;  %v24_v10 = vld [vmem:[#allocation2] sm:$0xff] }
   0x9   :  { %v27_v12 = vld [vmem:[#allocation2 + $0x18] sm:$0xff]  ;;  %v25_v15 = vld [vmem:[#allocation2 + $0x8] sm:$0xff] }
   0xa   :  { %155 = vmatmul.mubr.msk.bf16.vlgmr.msra.gmra.mrb[0].mxu0 %vm50_vm1, %v37_v8 }
  0xdd   :  { %v156_v11 = vpop.f32.mrb[0].mxu0 }
  0xde   :  { %v108_v13 = vadd.f32 %v156_v11, %v26_v9  ;;  %v91_v14 = vpop.f32.mrb[1].mxu0 }
  0xdf   :  { %v106_v16 = vadd.f32 %v91_v14, %v24_v10  ;;  %v157_v17 = vpop.f32.mrb[2].mxu0 }
  0xe0   :  { %113 = vst.msk [vmem:[#allocation2 + $0x10] sm:$0xff] %vm19_vm0, %v108_v13  ;;  %v109_v18 = vadd.f32 %v157_v17, %v27_v12  ;;  %v94_v19 = vpop.f32.mrb[3].mxu0 }
  0xe1   :  { %111 = vst.msk [vmem:[#allocation2] sm:$0xff] %vm19_vm0, %v106_v16  ;;  %v107_v20 = vadd.f32 %v94_v19, %v25_v15 }
  0xe2   :  { %114 = vst.msk [vmem:[#allocation2 + $0x18] sm:$0xff] %vm19_vm0, %v109_v18 }
  0xe3   :  { %112 = vst.msk [vmem:[#allocation2 + $0x8] sm:$0xff] %vm19_vm0, %v107_v20 }
  0xe7   :  { %v120_v22 = vld [vmem:[#allocation2 + $0x10] sm:$0xff] }
  0xe8   :  { %v131_v23 = vadd.f32 %v145_v21, %v120_v22  ;;  %v118_v24 = vld [vmem:[#allocation2] sm:$0xff] }
  0xe9   :  { %v129_v25 = vadd.f32 %v145_v21, %v118_v24  ;;  %v121_v26 = vld [vmem:[#allocation2 + $0x18] sm:$0xff] }
  0xea   :  { %135 = vst.msk [vmem:[%s230_s3 + $0x10] sm:$0xff] %vm19_vm0, %v131_v23  ;;  %v132_v27 = vadd.f32 %v145_v21, %v121_v26  ;;  %v119_v28 = vld [vmem:[#allocation2 + $0x8] sm:$0xff] }
  0xeb   :  { %133 = vst.msk [vmem:[%s230_s3] sm:$0xff] %vm19_vm0, %v129_v25  ;;  %v130_v29 = vadd.f32 %v145_v21, %v119_v28 }
  0xec   :  { %136 = vst.msk [vmem:[%s230_s3 + $0x18] sm:$0xff] %vm19_vm0, %v132_v27 }
  0xed   :  { %134 = vst.msk [vmem:[%s230_s3 + $0x8] sm:$0xff] %vm19_vm0, %v130_v29 }

// kernel: _lambda_.50
= control target key start
LH: loop header
LB: loop body
LE: loop exit
PB: predicated region body
PF: predicated region fallthrough
CT: control target
= control target key end

     0   :  { %vm19_vm0 = vcmask 261120   ;;  %v131_v0 = vmov 0.0   ;;  %vm132_vm1 = vmmov 0   ;;  %s181_s1 = inlined_call_operand.vmem [shape: bf16[32,32], index: 1, kind: input, shape index: {}]   ;;  %s182_s0 = inlined_call_operand.vmem [shape: f32[16,32], index: 0, kind: input, shape index: {}]   ;;  %s183_s2 = inlined_call_operand.vmem [shape: f32[1,32], index: 2, kind: input, shape index: {}]   ;;  %s184_s3 = inlined_call_operand.vmem [shape: f32[16,32], index: 3, kind: output, shape index: {}]  }
   0x1   :  { %119 = vmatprep.subr.bf16.mxu0 %v131_v0  ;;  %v129_v1 = vld [vmem:[%s181_s1] sm:$0xff]   ;;  %123 = vmatprep.mubr.msk.bf16.mxu0 %vm132_vm1, %v131_v0  ;;  %20 = vst.msk [vmem:[#allocation2] sm:$0xff] %vm19_vm0, %v131_v0  ;;  %21 = vst.msk [vmem:[#allocation2 + $0x8] sm:$0xff] %vm19_vm0, %v131_v0  ;;  %v130_v2 = vld [vmem:[%s181_s1 + $0x8] sm:$0xff]  }
   0x2   :  { %120 = vmatpush3.bf16.msra.mxu0 %v129_v1  ;;  %v24_v3 = vld [vmem:[%s182_s0] sm:$0xff]  ;;  %v25_v4 = vld [vmem:[%s182_s0 + $0x8] sm:$0xff] }
   0x3   :  { %121 = vmatprep.subr.bf16.mxu0 %v131_v0  ;;  %v30_v5 = vpack.c.bf16 %v25_v4, %v24_v3  ;;  %v115_v14 = vld [vmem:[%s183_s2] ss:$0 sm:$0xff] }
   0x6   :  { %122 = vmatpush3.bf16.msra.mxu0 %v130_v2 }
   0x8   :  { %v22_v6 = vld [vmem:[#allocation2] sm:$0xff]  ;;  %v23_v8 = vld [vmem:[#allocation2 + $0x8] sm:$0xff] }
   0x9   :  { %124 = vmatmul.mubr.msk.bf16.vlgmr.msra.gmra.mrb[0].mxu0 %vm19_vm0, %v30_v5 }
  0xdc   :  { %v81_v7 = vpop.f32.mrb[0].mxu0 }
  0xdd   :  { %v88_v9 = vadd.f32 %v81_v7, %v22_v6  ;;  %v125_v10 = vpop.f32.mrb[1].mxu0 }
  0xde   :  { %v84_v11 = vpop.f32.mrb[2].mxu0 }
  0xdf   :  { %90 = vst.msk [vmem:[#allocation2] sm:$0xff] %vm19_vm0, %v88_v9  ;;  %v89_v12 = vadd.f32 %v84_v11, %v23_v8  ;;  %v126_v13 = vpop.f32.mrb[3].mxu0 }
  0xe1   :  { %91 = vst.msk [vmem:[#allocation2 + $0x8] sm:$0xff] %vm19_vm0, %v89_v12 }
  0xe6   :  { %v95_v15 = vld [vmem:[#allocation2] sm:$0xff] }
  0xe7   :  { %v104_v16 = vadd.f32 %v115_v14, %v95_v15 }
  0xe8   :  { %v96_v17 = vld [vmem:[#allocation2 + $0x8] sm:$0xff] }
  0xe9   :  { %106 = vst.msk [vmem:[%s184_s3] sm:$0xff] %vm19_vm0, %v104_v16  ;;  %v105_v18 = vadd.f32 %v115_v14, %v96_v17 }
  0xeb   :  { %107 = vst.msk [vmem:[%s184_s3 + $0x8] sm:$0xff] %vm19_vm0, %v105_v18 }

// kernel: reverse.5
= control target key start
LH: loop header
LB: loop body
LE: loop exit
PB: predicated region body
PF: predicated region fallthrough
CT: control target
= control target key end

     0   :  { %v79_v8 = vld [vmem:[#allocation1 + $0x38] sm:$0xf]  ;;  %v89_v9 = vld [vmem:[#allocation1 + $0x30] sm:$0xf]  ;;  %v99_v10 = vld [vmem:[#allocation1 + $0x28] sm:$0xf]  ;;  %v156_v12 = vlaneseq  ;;  %s487_s0 = inlined_call_operand.vmem [shape: f32[2,4,8,3], index: 0, kind: input, shape index: {}]   ;;  %s488_s1 = inlined_call_operand.vmem [shape: f32[2,4,8,3], index: 1, kind: output, shape index: {}]  }
   0x1   :  { %v18_v0 = vld [vmem:[%s487_s0] sm:$0xf]  ;;  %v20_v1 = vld [vmem:[%s487_s0 + $0x4] sm:$0xf]  ;;  %v22_v2 = vld [vmem:[%s487_s0 + $0x8] sm:$0xf] }
   0x2   :  { %19 = vst [vmem:[#allocation1 + $0x4] sm:$0xf] %v18_v0  ;;  %21 = vst [vmem:[#allocation1 + $0xc] sm:$0xf] %v20_v1  ;;  %v24_v3 = vld [vmem:[%s487_s0 + $0xc] sm:$0xf] }
   0x3   :  { %23 = vst [vmem:[#allocation1 + $0x14] sm:$0xf] %v22_v2  ;;  %v26_v4 = vld [vmem:[%s487_s0 + $0x10] sm:$0xf]  ;;  %v28_v5 = vld [vmem:[%s487_s0 + $0x14] sm:$0xf] }
   0x4   :  { %25 = vst [vmem:[#allocation1 + $0x1c] sm:$0xf] %v24_v3  ;;  %27 = vst [vmem:[#allocation1 + $0x24] sm:$0xf] %v26_v4  ;;  %v30_v6 = vld [vmem:[%s487_s0 + $0x18] sm:$0xf] }
   0x5   :  { %29 = vst [vmem:[#allocation1 + $0x2c] sm:$0xf] %v28_v5  ;;  %v32_v7 = vld [vmem:[%s487_s0 + $0x1c] sm:$0xf]  ;;  %31 = vst [vmem:[#allocation1 + $0x34] sm:$0xf] %v30_v6 }
   0x6   :  { %33 = vst [vmem:[#allocation1 + $0x3c] sm:$0xf] %v32_v7  ;;  %81 = vst [vmem:[#allocation0 + $0x70] sm:$0xf] %v79_v8  ;;  %v109_v11 = vld [vmem:[#allocation1 + $0x20] sm:$0xf] }
   0x7   :  { %91 = vst [vmem:[#allocation0 + $0x60] sm:$0xf] %v89_v9  ;;  %101 = vst [vmem:[#allocation0 + $0x50] sm:$0xf] %v99_v10  ;;  %v119_v13 = vld [vmem:[#allocation1 + $0x18] sm:$0xf] }
   0x8   :  { %111 = vst [vmem:[#allocation0 + $0x40] sm:$0xf] %v109_v11  ;;  %v129_v14 = vld [vmem:[#allocation1 + $0x10] sm:$0xf]  ;;  %v139_v15 = vld [vmem:[#allocation1 + $0x8] sm:$0xf] }
   0x9   :  { %121 = vst [vmem:[#allocation0 + $0x30] sm:$0xf] %v119_v13  ;;  %131 = vst [vmem:[#allocation0 + $0x20] sm:$0xf] %v129_v14  ;;  %v146_v16 = vld [vmem:[#allocation1] sm:$0xf] }
   0xa   :  { %141 = vst [vmem:[#allocation0 + $0x10] sm:$0xf] %v139_v15  ;;  %147 = vst [vmem:[#allocation0] sm:$0xf] %v146_v16  ;;  %v456_v17 = vshrl.u32 %v156_v12, 7 }
   0xb   :  { %v124_v18 = vld [vmem:[#allocation1 + $0x14] sm:$0xf]  ;;  %v134_v19 = vld [vmem:[#allocation1 + $0xc] sm:$0xf]  ;;  %v143_v20 = vld [vmem:[#allocation1 + $0x4] sm:$0xf] }
   0xc   :  { %v94_v21 = vld [vmem:[#allocation1 + $0x2c] sm:$0xf]  ;;  %v104_v22 = vld [vmem:[#allocation1 + $0x24] sm:$0xf]  ;;  %v114_v23 = vld [vmem:[#allocation1 + $0x1c] sm:$0xf] }
   0xd   :  { %126 = vst [vmem:[#allocation0 + $0x28] sm:$0xf] %v124_v18  ;;  %136 = vst [vmem:[#allocation0 + $0x18] sm:$0xf] %v134_v19  ;;  %v74_v24 = vld [vmem:[#allocation1 + $0x3c] sm:$0xf] }
   0xe   :  { %145 = vst [vmem:[#allocation0 + $0x8] sm:$0xf] %v143_v20  ;;  %v84_v25 = vld [vmem:[#allocation1 + $0x34] sm:$0xf]  ;;  %96 = vst [vmem:[#allocation0 + $0x58] sm:$0xf] %v94_v21 }
   0xf   :  { %106 = vst [vmem:[#allocation0 + $0x48] sm:$0xf] %v104_v22  ;;  %116 = vst [vmem:[#allocation0 + $0x38] sm:$0xf] %v114_v23  ;;  %v247_v26 = vld [vmem:[#allocation0 + $0x77] ss:$-1 sm:$0xff] }
  0x10   :  { %76 = vst [vmem:[#allocation0 + $0x78] sm:$0xf] %v74_v24  ;;  %86 = vst [vmem:[#allocation0 + $0x68] sm:$0xf] %v84_v25  ;;  %v205_v27 = vld [vmem:[#allocation0 + $0x47] ss:$-1 sm:$0xff] }
  0x11   :  { %v219_v28 = vld [vmem:[#allocation0 + $0x57] ss:$-1 sm:$0xff]  ;;  %v233_v29 = vld [vmem:[#allocation0 + $0x67] ss:$-1 sm:$0xff]  ;;  %v206_v37 = vrot.slane %v205_v27, 5  ;;  %v248_v41 = vrot.slane %v247_v26, 5 }
  0x12   :  { %v163_v30 = vld [vmem:[#allocation0 + $0x17] ss:$-1 sm:$0xff]  ;;  %v177_v31 = vld [vmem:[#allocation0 + $0x27] ss:$-1 sm:$0xff]  ;;  %v220_v39 = vrot.slane %v219_v28, 5  ;;  %v234_v40 = vrot.slane %v233_v29, 5 }
  0x13   :  { %v191_v32 = vld [vmem:[#allocation0 + $0x37] ss:$-1 sm:$0xff]  ;;  %v149_v33 = vld [vmem:[#allocation0 + $0x7] ss:$-1 sm:$0xff]  ;;  %v164_v34 = vrot.slane %v163_v30, 5  ;;  %v178_v35 = vrot.slane %v177_v31, 5 }
  0x14   :  { %v192_v36 = vrot.slane %v191_v32, 5  ;;  %v150_v38 = vrot.slane %v149_v33, 5  ;;  %vm158_vm0 = vcmp.lt.s32.totalorder %v456_v17, 3  ;;  %207 = vst [vmem:[#allocation2 + $0x20] sm:$0xff] %v206_v37  ;;  %v168_v43 = vld [vmem:[#allocation0 + $0x1f] ss:$-1 sm:$0xff] }
  0x15   :  { %165 = vst [vmem:[#allocation2 + $0x8] sm:$0xff] %v164_v34  ;;  %179 = vst [vmem:[#allocation2 + $0x10] sm:$0xff] %v178_v35  ;;  %v154_v42 = vld [vmem:[#allocation0 + $0xf] ss:$-1 sm:$0xff]  ;;  %v169_v46 = vrot.slane %v168_v43, 5 }
  0x16   :  { %193 = vst [vmem:[#allocation2 + $0x18] sm:$0xff] %v192_v36  ;;  %151 = vst [vmem:[#allocation2] sm:$0xff] %v150_v38  ;;  %v182_v44 = vld [vmem:[#allocation0 + $0x2f] ss:$-1 sm:$0xff]  ;;  %v155_v45 = vrot.slane %v154_v42, 5 }
  0x17   :  { %221 = vst [vmem:[#allocation2 + $0x28] sm:$0xff] %v220_v39  ;;  %235 = vst [vmem:[#allocation2 + $0x30] sm:$0xff] %v234_v40  ;;  %v183_v47 = vrot.slane %v182_v44, 5  ;;  %v196_v48 = vld [vmem:[#allocation0 + $0x3f] ss:$-1 sm:$0xff] }
  0x18   :  { %249 = vst [vmem:[#allocation2 + $0x38] sm:$0xff] %v248_v41  ;;  %v197_v49 = vrot.slane %v196_v48, 5  ;;  %v210_v50 = vld [vmem:[#allocation0 + $0x4f] ss:$-1 sm:$0xff]  ;;  %v224_v51 = vld [vmem:[#allocation0 + $0x5f] ss:$-1 sm:$0xff] }
  0x19   :  { %159 = vst.msk [vmem:[#allocation2] sm:$0xff] %vm158_vm0, %v155_v45  ;;  %173 = vst.msk [vmem:[#allocation2 + $0x8] sm:$0xff] %vm158_vm0, %v169_v46  ;;  %v211_v52 = vrot.slane %v210_v50, 5  ;;  %v225_v53 = vrot.slane %v224_v51, 5  ;;  %v238_v54 = vld [vmem:[#allocation0 + $0x6f] ss:$-1 sm:$0xff] }
  0x1a   :  { %187 = vst.msk [vmem:[#allocation2 + $0x10] sm:$0xff] %vm158_vm0, %v183_v47  ;;  %v252_v55 = vld [vmem:[#allocation0 + $0x7f] ss:$-1 sm:$0xff]  ;;  %201 = vst.msk [vmem:[#allocation2 + $0x18] sm:$0xff] %vm158_vm0, %v197_v49  ;;  %v239_v56 = vrot.slane %v238_v54, 5 }
  0x1b   :  { %v253_v57 = vrot.slane %v252_v55, 5  ;;  %215 = vst.msk [vmem:[#allocation2 + $0x20] sm:$0xff] %vm158_vm0, %v211_v52  ;;  %229 = vst.msk [vmem:[#allocation2 + $0x28] sm:$0xff] %vm158_vm0, %v225_v53 }
  0x1c   :  { %243 = vst.msk [vmem:[#allocation2 + $0x30] sm:$0xff] %vm158_vm0, %v239_v56 }
  0x1d   :  { %257 = vst.msk [vmem:[#allocation2 + $0x38] sm:$0xff] %vm158_vm0, %v253_v57 }
  0x20   :  { %v261_v58 = vld [vmem:[#allocation2] sm:$0xf]  ;;  %v265_v59 = vld [vmem:[#allocation2 + $0x8] sm:$0xf] }
  0x21   :  { %v270_v60 = vld [vmem:[#allocation2 + $0x10] sm:$0xf]  ;;  %263 = vst [vmem:[#allocation3] sm:$0xf] %v261_v58  ;;  %268 = vst [vmem:[#allocation3 + $0x4] sm:$0xf] %v265_v59 }
  0x22   :  { %274 = vst [vmem:[#allocation3 + $0x8] sm:$0xf] %v270_v60  ;;  %v276_v61 = vld [vmem:[#allocation2 + $0x18] sm:$0xf]  ;;  %v282_v62 = vld [vmem:[#allocation2 + $0x20] sm:$0xf] }
  0x23   :  { %280 = vst [vmem:[#allocation3 + $0xc] sm:$0xf] %v276_v61  ;;  %v288_v63 = vld [vmem:[#allocation2 + $0x28] sm:$0xf]  ;;  %286 = vst [vmem:[#allocation3 + $0x10] sm:$0xf] %v282_v62 }
  0x24   :  { %292 = vst [vmem:[#allocation3 + $0x14] sm:$0xf] %v288_v63  ;;  %v294_v0 = vld [vmem:[#allocation2 + $0x30] sm:$0xf]  ;;  %v300_v1 = vld [vmem:[#allocation2 + $0x38] sm:$0xf] }
  0x25   :  { %298 = vst [vmem:[#allocation3 + $0x18] sm:$0xf] %v294_v0  ;;  %304 = vst [vmem:[#allocation3 + $0x1c] sm:$0xf] %v300_v1 }
  0x28   :  { %v320_v2 = vld [vmem:[#allocation3] sm:$0xff]  }
  0x29   :  { %321 = vst [vmem:[%s488_s1] sm:$0xff] %v320_v2  }
  0x2a   :  { %v324_v3 = vld [vmem:[#allocation3 + $0x8] sm:$0xff]  }
  0x2b   :  { %325 = vst [vmem:[%s488_s1 + $0x8] sm:$0xff] %v324_v3   ;;  %v328_v4 = vld [vmem:[#allocation3 + $0x10] sm:$0xff]  }
  0x2c   :  { %329 = vst [vmem:[%s488_s1 + $0x10] sm:$0xff] %v328_v4   ;;  %v332_v5 = vld [vmem:[#allocation3 + $0x18] sm:$0xff]  }
  0x2d   :  { %333 = vst [vmem:[%s488_s1 + $0x18] sm:$0xff] %v332_v5  }

// kernel: _lambda_.51
= control target key start
LH: loop header
LB: loop body
LE: loop exit
PB: predicated region body
PF: predicated region fallthrough
CT: control target
= control target key end

     0   :  { %vm19_vm0 = vcmask 523264   ;;  %v132_v0 = vmov 0.0   ;;  %vm133_vm1 = vmmov 0   ;;  %vm43_vm2 = vcmask 261120   ;;  %s181_s1 = inlined_call_operand.vmem [shape: bf16[32,64], index: 1, kind: input, shape index: {}]   ;;  %s182_s0 = inlined_call_operand.vmem [shape: f32[16,32], index: 0, kind: input, shape index: {}]   ;;  %s183_s2 = inlined_call_operand.vmem [shape: f32[1,64], index: 2, kind: input, shape index: {}]   ;;  %s184_s3 = inlined_call_operand.vmem [shape: f32[16,64], index: 3, kind: output, shape index: {}]  }
   0x1   :  { %120 = vmatprep.subr.bf16.mxu0 %v132_v0  ;;  %v130_v1 = vld [vmem:[%s181_s1] sm:$0xff]   ;;  %124 = vmatprep.mubr.msk.bf16.mxu0 %vm133_vm1, %v132_v0  ;;  %20 = vst.msk [vmem:[#allocation2] sm:$0xff] %vm19_vm0, %v132_v0  ;;  %21 = vst.msk [vmem:[#allocation2 + $0x8] sm:$0xff] %vm19_vm0, %v132_v0  ;;  %v131_v2 = vld [vmem:[%s181_s1 + $0x8] sm:$0xff]  }
   0x2   :  { %121 = vmatpush3.bf16.msra.mxu0 %v130_v1  ;;  %v24_v3 = vld [vmem:[%s182_s0] sm:$0xff]  ;;  %v25_v4 = vld [vmem:[%s182_s0 + $0x8] sm:$0xff] }
   0x3   :  { %122 = vmatprep.subr.bf16.mxu0 %v132_v0  ;;  %v30_v5 = vpack.c.bf16 %v25_v4, %v24_v3  ;;  %v116_v14 = vld [vmem:[%s183_s2] ss:$0 sm:$0xff] }
   0x6   :  { %123 = vmatpush3.bf16.msra.mxu0 %v131_v2 }
   0x8   :  { %v22_v6 = vld [vmem:[#allocation2] sm:$0xff]  ;;  %v23_v8 = vld [vmem:[#allocation2 + $0x8] sm:$0xff] }
   0x9   :  { %125 = vmatmul.mubr.msk.bf16.vlgmr.msra.gmra.mrb[0].mxu0 %vm43_vm2, %v30_v5 }
  0xdc   :  { %v81_v7 = vpop.f32.mrb[0].mxu0 }
  0xdd   :  { %v88_v9 = vadd.f32 %v81_v7, %v22_v6  ;;  %v126_v10 = vpop.f32.mrb[1].mxu0 }
  0xde   :  { %v84_v11 = vpop.f32.mrb[2].mxu0 }
  0xdf   :  { %91 = vst.msk [vmem:[#allocation2] sm:$0xff] %vm19_vm0, %v88_v9  ;;  %v89_v12 = vadd.f32 %v84_v11, %v23_v8  ;;  %v127_v13 = vpop.f32.mrb[3].mxu0 }
  0xe1   :  { %92 = vst.msk [vmem:[#allocation2 + $0x8] sm:$0xff] %vm19_vm0, %v89_v12 }
  0xe6   :  { %v96_v15 = vld [vmem:[#allocation2] sm:$0xff] }
  0xe7   :  { %v105_v16 = vadd.f32 %v116_v14, %v96_v15 }
  0xe8   :  { %v97_v17 = vld [vmem:[#allocation2 + $0x8] sm:$0xff] }
  0xe9   :  { %107 = vst.msk [vmem:[%s184_s3] sm:$0xff] %vm19_vm0, %v105_v16  ;;  %v106_v18 = vadd.f32 %v116_v14, %v97_v17 }
  0xeb   :  { %108 = vst.msk [vmem:[%s184_s3 + $0x8] sm:$0xff] %vm19_vm0, %v106_v18 }

// kernel: _lambda_.54
= control target key start
LH: loop header
LB: loop body
LE: loop exit
PB: predicated region body
PF: predicated region fallthrough
CT: control target
= control target key end

     0   :  { %s828_s15 = smov 0   ;;  %s931_s0 = inlined_call_operand.vmem [shape: f32[2,24,32], index: 0, kind: input, shape index: {}]   ;;  %s932_s1 = inlined_call_operand.vmem [shape: bf16[32,64], index: 1, kind: input, shape index: {}]   ;;  %s933_s2 = inlined_call_operand.vmem [shape: bf16[64,32], index: 2, kind: input, shape index: {}]   ;;  %s934_s3 = inlined_call_operand.vmem [shape: f32[2,24,32], index: 3, kind: output, shape index: {0}]   ;;  %s935_s4 = inlined_call_operand.vmem [shape: f32[2,24,32], index: 4, kind: output, shape index: {1}]  }
   0x1 LB: > { %s697_s16 = sadd.s32 4294967295, %s798_s15   ;;  %p701_p0 = scmp.ge.s32.totalorder %s798_s15, 1  ;;  %s798_s15 = sphi %s828_s15, %s15_s15  }
   0x2   : > { %p165_p1 = scmp.lt.s32.totalorder %s798_s15, 3 }
   0x4   : > { %p166_p2 = pnand %p701_p0, %p165_p1 }
   0x5   : > { %v786_v0 = vld [vmem:[%s932_s1] sm:$0xff] (!%p166_p2)   ;;  %p196_p3 = scmp.lt.s32.totalorder (!%p166_p2), %s697_s16, 1  ;;  %v787_v1 = vld [vmem:[%s932_s1 + $0x8] sm:$0xff] (!%p166_p2)   ;;  %vm233_vm0 = vcmask (!%p166_p2), 261120   ;;  %v790_v9 = vld [vmem:[%s933_s2 + $0x10] sm:$0xff] (!%p166_p2)   ;;  %vm325_vm1 = vcmask (!%p166_p2), 523264   ;;  %v383_v22 = vlaneseq (!%p166_p2) }
   0x6   : > { %169 = sbr.rel (%p166_p2) target bundleno = 688 (0x2b0), region = 32  ;;  %736 = vmatprep.subr.bf16.mxu0 (!%p166_p2), %v786_v0  ;;  %v788_v2 = vld [vmem:[%s933_s2] sm:$0xff] (!%p166_p2)   ;;  %v789_v3 = vld [vmem:[%s933_s2 + $0x8] sm:$0xff] (!%p166_p2)   ;;  %v791_v10 = vld [vmem:[%s933_s2 + $0x18] sm:$0xff] (!%p166_p2)   ;;  %v800_v20 = vmov (!%p166_p2), 0.0|0.0   ;;  %vm801_vm2 = vmmov (!%p166_p2), 0  }
   0x7   : > { %737 = vmatpush3.bf16.msra.mxu0 (!%p166_p2), %v786_v0  ;;  %744 = vmatprep.subr.bf16.mxu1 (!%p166_p2), %v788_v2  ;;  %v802_v21 = vmov (!%p166_p2), 0.0   ;;  %v384_v23 = vshrl.u32 (!%p166_p2), %v383_v22, 7  ;;  %v874_v26 = vand.u32 (!%p166_p2), 127, %v383_v22 }
   0x8   : > { %738 = vmatprep.subr.bf16.mxu0 (!%p166_p2), %v787_v1  ;;  %745 = vmatpush3.bf16.msra.mxu1 (!%p166_p2), %v788_v2 }
   0x9   : > { %746 = vmatprep.subr.bf16.mxu1 (!%p166_p2), %v789_v3  ;;  %v389_v24 = vadd.s32 (!%p166_p2), 4294967294, %v384_v23  ;;  %v413_v25 = vadd.s32 (!%p166_p2), 4294967295, %v384_v23  ;;  %v385_v29 = vadd.s32 (!%p166_p2), 8, %v384_v23  ;;  %vm437_vm5 = vcmp.gt.s32.totalorder (!%p166_p2), %v384_v23, 0 }
   0xa   : > { %v438_v30 = vsel (!%p166_p2), %vm437_vm5, %v384_v23, 0  ;;  %v386_v33 = vadd.s32 (!%p166_p2), 16, %v384_v23  ;;  %v458_v36 = vadd.s32 (!%p166_p2), 1, %v384_v23  ;;  %v482_v42 = vadd.s32 (!%p166_p2), 2, %v384_v23 }
   0xb   : > { %739 = vmatpush3.bf16.msra.mxu0 (!%p166_p2), %v787_v1  ;;  %vm392_vm3 = vcmp.gt.s32.totalorder (!%p166_p2), %v389_v24, 0  ;;  %vm416_vm4 = vcmp.gt.s32.totalorder (!%p166_p2), %v413_v25, 0  ;;  %v390_v31 = vadd.s32 (!%p166_p2), 4294967294, %v385_v29  ;;  %v414_v32 = vadd.s32 (!%p166_p2), 4294967295, %v385_v29 }
   0xc   : > { %747 = vmatpush3.bf16.msra.mxu1 (!%p166_p2), %v789_v3  ;;  %771 = vmatprep.subr.bf16.mxu0 (!%p166_p2), %v800_v20  ;;  %v393_v27 = vsel (!%p166_p2), %vm392_vm3, %v389_v24, 0  ;;  %v417_v28 = vsel (!%p166_p2), %vm416_vm4, %v413_v25, 0  ;;  %vm449_vm8 = vcmp.eq.s32.totalorder (!%p166_p2), %v874_v26, %v438_v30  ;;  %v391_v37 = vadd.s32 (!%p166_p2), 4294967294, %v386_v33 }
   0xd   : > { %s937_s16 = smov (!%p196_p3, %s697_s16), 1  ;;  %748 = vmatprep.subr.bf16.mxu1 %v790_v9  ;;  %vm404_vm6 = vcmp.eq.s32.totalorder %v874_v26, %v393_v27  ;;  %vm428_vm7 = vcmp.eq.s32.totalorder %v874_v26, %v417_v28  ;;  %vm405_vm9 = vcmp.eq.s32.totalorder %v874_v26, %v390_v31  ;;  %vm429_vm10 = vcmp.eq.s32.totalorder %v874_v26, %v414_v32 }
   0xe   : > { %s848_s25 = smul.u32 24, %s937_s16  ;;  %v407_v34 = vsel %vm404_vm6, 1.0, %v802_v21  ;;  %v431_v35 = vsel %vm428_vm7, 1.0, %v802_v21  ;;  %v415_v38 = vadd.s32 4294967295, %v386_v33  ;;  %v452_v40 = vsel %vm449_vm8, 1.0, %v802_v21 }
   0xf   : > { %v434_v39 = vadd.f32 %v431_v35, %v407_v34  ;;  %vm447_vm11 = vcmp.lt.s32.totalorder %v386_v33, 23  ;;  %v460_v41 = vadd.s32 1, %v386_v33  ;;  %vm473_vm12 = vcmp.eq.s32.totalorder %v874_v26, %v458_v36 }
  0x10   : > { %s200_s28 = scalar_lea.vmem %s931_s0, %s848_s25  ;;  %749 = vmatpush3.bf16.msra.mxu1 %v790_v9  ;;  %v408_v43 = vsel %vm405_vm9, 1.0, %v802_v21  ;;  %v432_v44 = vsel %vm429_vm10, 1.0, %v802_v21  ;;  %vm450_vm13 = vcmp.eq.s32.totalorder %v874_v26, %v385_v29  ;;  %v459_v45 = vadd.s32 1, %v385_v29  ;;  %s210_s9 = scalar_lea.vmem %s935_s4, %s848_s25 }
  0x11   : > { %v854_v4 = vld [vmem:[%s200_s28] sm:$0xff]  ;;  %v856_v5 = vld [vmem:[%s200_s28 + $0x8] sm:$0xff]  ;;  %v858_v6 = vld [vmem:[%s200_s28 + $0x10] sm:$0xff]  ;;  %750 = vmatprep.subr.bf16.mxu1 %v791_v10  ;;  %vm406_vm14 = vcmp.eq.s32.totalorder %v874_v26, %v391_v37  ;;  %vm430_vm15 = vcmp.eq.s32.totalorder %v874_v26, %v415_v38  ;;  %v448_v46 = vsel %vm447_vm11, %v386_v33, 23  ;;  %v455_v47 = vadd.f32 %v452_v40, %v434_v39  ;;  %s205_s12 = scalar_lea.vmem %s934_s3, %s848_s25 }
  0x12   : > { %v219_v7 = vpack.c.bf16 %v856_v5, %v854_v4  ;;  %v220_v8 = vpack.c.bf16 %v858_v6, %v858_v6  ;;  %v435_v48 = vadd.f32 %v432_v44, %v408_v43  ;;  %v484_v49 = vadd.s32 2, %v386_v33 }
  0x13   : > { %v476_v50 = vsel %vm473_vm12, 1.0, %v802_v21  ;;  %v453_v51 = vsel %vm450_vm13, 1.0, %v802_v21  ;;  %v409_v52 = vsel %vm406_vm14, 1.0, %v802_v21  ;;  %v433_v53 = vsel %vm430_vm15, 1.0, %v802_v21 }
  0x14   : > { %740 = vmatprep.mubr.msk.bf16.mxu0 %vm233_vm0, %v219_v7  ;;  %751 = vmatpush3.bf16.msra.mxu1 %v791_v10  ;;  %vm497_vm3 = vcmp.eq.s32.totalorder %v874_v26, %v482_v42  ;;  %vm474_vm4 = vcmp.eq.s32.totalorder %v874_v26, %v459_v45  ;;  %v483_v54 = vadd.s32 2, %v385_v29  ;;  %vm451_vm5 = vcmp.eq.s32.totalorder %v874_v26, %v448_v46 }
  0x15   : > { %741 = vmatmul.mubr.msk.bf16.vlgmr.msra.gmra.mrb[0].mxu0 %vm233_vm0, %v220_v8  ;;  %v479_v58 = vadd.f32 %v476_v50, %v455_v47  ;;  %v456_v59 = vadd.f32 %v453_v51, %v435_v48  ;;  %v436_v60 = vadd.f32 %v433_v53, %v409_v52  ;;  %vm495_vm6 = vcmp.lt.s32.totalorder %v484_v49, 23 }
  0x16   : > { %762 = vmatprep.mubr.msk.f32.mxu0 %vm801_vm2, %v802_v21  ;;  %v500_v62 = vsel %vm497_vm3, 1.0, %v802_v21  ;;  %v477_v63 = vsel %vm474_vm4, 1.0, %v802_v21  ;;  %v454_v0 = vsel %vm451_vm5, 1.0, %v802_v21  ;;  %vm498_vm7 = vcmp.eq.s32.totalorder %v874_v26, %v483_v54 }
  0x17   : > { %v496_v7 = vsel %vm495_vm6, %v484_v49, 23  ;;  %v503_v8 = vadd.f32 %v500_v62, %v479_v58  ;;  %v480_v9 = vadd.f32 %v477_v63, %v456_v59  ;;  %v457_v10 = vadd.f32 %v454_v0, %v436_v60 }
  0x18   : > { %vm499_vm9 = vcmp.eq.s32.totalorder %v874_v26, %v496_v7  ;;  %vm510_vm10 = vcmask 195584  }
  0xe8   : > { %v742_v11 = vpop.f32.mrb[0].mxu0 }
  0xe9   : > { %v274_v12 = vpop.f32.mrb[1].mxu0  ;;  %v290_v14 = vmax.f32 %v742_v11, 0.0 }
  0xea   : > { %v743_v13 = vpop.f32.mrb[2].mxu0  ;;  %v288_v16 = vmax.f32 %v274_v12, 0.0  ;;  %v501_v12 = vsel %vm498_vm7, 1.0, %v802_v21 }
  0xeb   : > { %v277_v15 = vpop.f32.mrb[3].mxu0  ;;  %v300_v19 = vpack.c.bf16 %v290_v14, %v290_v14  ;;  %v507_v14 = vmul.f32 0.2, %v503_v8 }
  0xec   : > { %v289_v17 = vmax.f32 %v277_v15, 0.0 }
  0xee   : > { %v299_v18 = vpack.c.bf16 %v289_v17, %v288_v16  ;;  %v502_v16 = vsel %vm499_vm9, 1.0, %v802_v21 }
  0xf0   : > { %752 = vmatprep.mubr.msk.bf16.mxu1 %vm325_vm1, %v299_v18 }
  0xf1   : > { %753 = vmatmul.mubr.msk.bf16.vlgmr.msra.gmra.mrb[0].mxu1 %vm325_vm1, %v300_v19  ;;  %vm471_vm1 = vcmp.lt.s32.totalorder %v460_v41, 23 }
  0xf2   : > { %v472_v56 = vsel %vm471_vm1, %v460_v41, 23 }
  0xf3   : > { %vm475_vm8 = vcmp.eq.s32.totalorder %v874_v26, %v472_v56 }
  0xf4   : > { %v478_v13 = vsel %vm475_vm8, 1.0, %v802_v21 }
  0xf5   : > { %v481_v15 = vadd.f32 %v478_v13, %v457_v10 }
  0xf7   : > { %v505_v18 = vadd.f32 %v502_v16, %v481_v15 }
  0xf9   : > { %v509_v19 = vmul.f32 0.2, %v505_v18 }
 0x1c4   : > { %v754_v55 = vpop.f32.mrb[0].mxu1 }
 0x1c5   : > { %v366_v57 = vpop.f32.mrb[1].mxu1 }
 0x1c6   : > { %v755_v61 = vpop.f32.mrb[2].mxu1  ;;  %v380_v2 = vadd.f32 %v366_v57, %v854_v4  ;;  %v504_v4 = vadd.f32 %v501_v12, %v480_v9 }
 0x1c7   : > { %v369_v1 = vpop.f32.mrb[3].mxu1 }
 0x1c8   : > { %v381_v3 = vadd.f32 %v369_v1, %v856_v5  ;;  %v382_v5 = vadd.f32 %v754_v55, %v858_v6  ;;  %v508_v17 = vmul.f32 0.2, %v504_v4 }
 0x1ca   : > { %v772_v11 = vpack.c.bf16 %v381_v3, %v380_v2 }
 0x1cc   : > { %773 = vmatpush3.bf16.msra.mxu0 %v772_v11 }
 0x1cd   : > { %760 = vmatprep.subr.mxu0 %v802_v21 }
 0x1d0   : > { %761 = vmatpush3.msra.mxu0 %v382_v5 }
 0x1d1   : > { %763 = vmatmul.mubr.msk.f32.vlgmr.msra.gmra.mrb[4].mxu0 %vm510_vm10, %v507_v14 }
 0x1d2   : > { %765 = vmatprep.mubr.msk.f32.mxu0 %vm801_vm2, %v802_v21 }
 0x1d5   : > { %766 = vmatmul.mubr.msk.f32.gmra.mrb[6].mxu0 %vm510_vm10, %v508_v17 }
 0x1d6   : > { %768 = vmatprep.mubr.msk.f32.mxu0 %vm801_vm2, %v802_v21 }
 0x1d9   : > { %769 = vmatmul.mubr.msk.f32.gmra.mrb[8].mxu0 %vm510_vm10, %v509_v19 }
 0x2a4   : > { %v586_v6 = vpop.f32.mrb[4].mxu0 }
 0x2a5   : > { %v600_v20 = vsub.f32 %v380_v2, %v586_v6  ;;  %606 = vst.msk [vmem:[%s210_s9] sm:$0xff] %vm233_vm0, %v586_v6  ;;  %v764_v22 = vpop.f32.mrb[5].mxu0 }
 0x2a7   : > { %603 = vst.msk [vmem:[%s205_s12] sm:$0xff] %vm233_vm0, %v600_v20 }
 0x2a8   : > { %v591_v23 = vpop.f32.mrb[6].mxu0 }
 0x2a9   : > { %v601_v24 = vsub.f32 %v381_v3, %v591_v23  ;;  %607 = vst.msk [vmem:[%s210_s9 + $0x8] sm:$0xff] %vm233_vm0, %v591_v23  ;;  %v767_v21 = vpop.f32.mrb[7].mxu0 }
 0x2ab   : > { %604 = vst.msk [vmem:[%s205_s12 + $0x8] sm:$0xff] %vm233_vm0, %v601_v24 }
 0x2ac   : > { %v596_v25 = vpop.f32.mrb[8].mxu0 }
 0x2ad   : > { %v602_v26 = vsub.f32 %v382_v5, %v596_v25  ;;  %608 = vst.msk [vmem:[%s210_s9 + $0x10] sm:$0xff] %vm233_vm0, %v596_v25  ;;  %v770_v27 = vpop.f32.mrb[9].mxu0 }
 0x2af   : > { %605 = vst.msk [vmem:[%s205_s12 + $0x10] sm:$0xff] %vm233_vm0, %v602_v26 }
 0x2b0 PF: > { %s15_s15 = sadd.s32 1, %s798_s15  }
 0x2b1   : > { %p12_p4 = scmp.ge.s32.totalorder %s15_s15, 4  }
 0x2b3   :  { %14 = sbr.rel (!%p12_p4) target bundleno = 1 (0x1), region = 74 }

// kernel: _lambda_.53
= control target key start
LH: loop header
LB: loop body
LE: loop exit
PB: predicated region body
PF: predicated region fallthrough
CT: control target
= control target key end

     0   :  { %s554_s9 = smov 0   ;;  %s643_s0 = inlined_call_operand.vmem [shape: f32[2,24,32], index: 0, kind: input, shape index: {}]   ;;  %s644_s1 = inlined_call_operand.vmem [shape: f32[2,24,32], index: 1, kind: output, shape index: {0}]   ;;  %s645_s2 = inlined_call_operand.vmem [shape: f32[2,24,32], index: 2, kind: output, shape index: {1}]  }
   0x1 LB: > { %s475_s10 = sadd.s32 4294967295, %s534_s9   ;;  %p479_p0 = scmp.ge.s32.totalorder %s534_s9, 1  ;;  %s534_s9 = sphi %s554_s9, %s13_s9  }
   0x2   : > { %p115_p1 = scmp.lt.s32.totalorder %s534_s9, 3 }
   0x4   : > { %p116_p2 = pnand %p479_p0, %p115_p1 }
   0x5   : > { %p142_p3 = scmp.lt.s32.totalorder (!%p116_p2), %s475_s10, 1  ;;  %v160_v0 = vlaneseq (!%p116_p2)  ;;  %v536_v1 = vmov (!%p116_p2), 0.0|0.0   ;;  %vm537_vm0 = vmmov (!%p116_p2), 0   ;;  %v538_v2 = vmov (!%p116_p2), 0.0  }
   0x6   : > { %119 = sbr.rel (%p116_p2) target bundleno = 247 (0xf7), region = 24  ;;  %512 = vmatprep.subr.bf16.mxu1 (!%p116_p2), %v536_v1  ;;  %509 = vmatprep.subr.bf16.mxu0 (!%p116_p2), %v536_v1  ;;  %vm287_vm9 = vcmask (!%p116_p2), 195584  }
   0x7   : > { %503 = vmatprep.mubr.msk.f32.mxu1 (!%p116_p2), %vm537_vm0, %v538_v2  ;;  %v161_v3 = vshrl.u32 (!%p116_p2), %v160_v0, 7  ;;  %500 = vmatprep.mubr.msk.f32.mxu0 (!%p116_p2), %vm537_vm0, %v538_v2  ;;  %v566_v4 = vand.u32 (!%p116_p2), 127, %v160_v0 }
   0x9   : > { %v162_v5 = vadd.s32 (!%p116_p2), 8, %v161_v3  ;;  %v166_v6 = vadd.s32 (!%p116_p2), 4294967294, %v161_v3  ;;  %v190_v7 = vadd.s32 (!%p116_p2), 4294967295, %v161_v3  ;;  %vm214_vm1 = vcmp.gt.s32.totalorder (!%p116_p2), %v161_v3, 0 }
   0xa   : > { %v215_v8 = vsel (!%p116_p2), %vm214_vm1, %v161_v3, 0  ;;  %v235_v9 = vadd.s32 (!%p116_p2), 1, %v161_v3  ;;  %v259_v10 = vadd.s32 (!%p116_p2), 2, %v161_v3  ;;  %v163_v11 = vadd.s32 (!%p116_p2), 16, %v161_v3 }
   0xb   : > { %v167_v12 = vadd.s32 (!%p116_p2), 4294967294, %v162_v5  ;;  %v191_v13 = vadd.s32 (!%p116_p2), 4294967295, %v162_v5  ;;  %vm227_vm2 = vcmp.eq.s32.totalorder (!%p116_p2), %v566_v4, %v162_v5  ;;  %v236_v14 = vadd.s32 (!%p116_p2), 1, %v162_v5 }
   0xc   : > { %v230_v17 = vsel (!%p116_p2), %vm227_vm2, 1.0, %v538_v2  ;;  %v260_v18 = vadd.s32 (!%p116_p2), 2, %v162_v5  ;;  %vm169_vm3 = vcmp.gt.s32.totalorder (!%p116_p2), %v166_v6, 0  ;;  %vm226_vm4 = vcmp.eq.s32.totalorder (!%p116_p2), %v566_v4, %v215_v8 }
   0xd   : > { %s647_s10 = smov (!%p142_p3, %s475_s10), 1  ;;  %vm182_vm5 = vcmp.eq.s32.totalorder %v566_v4, %v167_v12  ;;  %vm206_vm6 = vcmp.eq.s32.totalorder %v566_v4, %v191_v13  ;;  %vm251_vm7 = vcmp.eq.s32.totalorder %v566_v4, %v236_v14  ;;  %v170_v25 = vsel %vm169_vm3, %v166_v6, 0 }
   0xe   : > { %s568_s11 = smul.u32 24, %s647_s10  ;;  %v185_v20 = vsel %vm182_vm5, 1.0, %v538_v2  ;;  %v209_v21 = vsel %vm206_vm6, 1.0, %v538_v2  ;;  %v254_v22 = vsel %vm251_vm7, 1.0, %v538_v2  ;;  %vm275_vm8 = vcmp.eq.s32.totalorder %v566_v4, %v260_v18 }
   0xf   : > { %v212_v23 = vadd.f32 %v209_v21, %v185_v20  ;;  %v278_v24 = vsel %vm275_vm8, 1.0, %v538_v2  ;;  %vm193_vm10 = vcmp.gt.s32.totalorder %v190_v7, 0  ;;  %vm181_vm11 = vcmp.eq.s32.totalorder %v566_v4, %v170_v25 }
  0x10   : > { %s146_s14 = scalar_lea.vmem %s643_s0, %s568_s11  ;;  %v194_v27 = vsel %vm193_vm10, %v190_v7, 0  ;;  %v229_v28 = vsel %vm226_vm4, 1.0, %v538_v2  ;;  %vm250_vm12 = vcmp.eq.s32.totalorder %v566_v4, %v235_v9  ;;  %v184_v30 = vsel %vm181_vm11, 1.0, %v538_v2  ;;  %s156_s17 = scalar_lea.vmem %s645_s2, %s568_s11 }
  0x11   : > { %v575_v15 = vld [vmem:[%s146_s14] sm:$0xff]  ;;  %v577_v16 = vld [vmem:[%s146_s14 + $0x8] sm:$0xff]  ;;  %v592_v26 = vld [vmem:[%s146_s14 + $0x10] sm:$0xff]  ;;  %v233_v29 = vadd.f32 %v230_v17, %v212_v23  ;;  %vm205_vm13 = vcmp.eq.s32.totalorder %v566_v4, %v194_v27  ;;  %v253_v31 = vsel %vm250_vm12, 1.0, %v538_v2  ;;  %vm274_vm14 = vcmp.eq.s32.totalorder %v566_v4, %v259_v10  ;;  %s151_s20 = scalar_lea.vmem %s644_s1, %s568_s11 }
  0x12   : > { %v510_v19 = vpack.c.bf16 %v577_v16, %v575_v15  ;;  %v208_v32 = vsel %vm205_vm13, 1.0, %v538_v2  ;;  %v168_v33 = vadd.s32 4294967294, %v163_v11  ;;  %v192_v34 = vadd.s32 4294967295, %v163_v11 }
  0x13   : > { %v257_v35 = vadd.f32 %v254_v22, %v233_v29  ;;  %v211_v36 = vadd.f32 %v208_v32, %v184_v30  ;;  %v277_v37 = vsel %vm274_vm14, 1.0, %v538_v2  ;;  %vm224_vm15 = vcmp.lt.s32.totalorder %v163_v11, 23 }
  0x14   : > { %514 = vmatpush3.bf16.msra.mxu1 %v510_v19  ;;  %511 = vmatpush3.bf16.msra.mxu0 %v510_v19  ;;  %vm183_vm1 = vcmp.eq.s32.totalorder %v566_v4, %v168_v33  ;;  %vm207_vm2 = vcmp.eq.s32.totalorder %v566_v4, %v192_v34  ;;  %v225_v38 = vsel %vm224_vm15, %v163_v11, 23  ;;  %v237_v39 = vadd.s32 1, %v163_v11 }
  0x15   : > { %513 = vmatprep.subr.mxu1 %v538_v2  ;;  %498 = vmatprep.subr.mxu0 %v538_v2  ;;  %v281_v40 = vadd.f32 %v278_v24, %v257_v35  ;;  %v232_v41 = vadd.f32 %v229_v28, %v211_v36  ;;  %v186_v42 = vsel %vm183_vm1, 1.0, %v538_v2  ;;  %v210_v43 = vsel %vm207_vm2, 1.0, %v538_v2 }
  0x16   : > { %v213_v44 = vadd.f32 %v210_v43, %v186_v42  ;;  %vm228_vm3 = vcmp.eq.s32.totalorder %v566_v4, %v225_v38  ;;  %vm248_vm4 = vcmp.lt.s32.totalorder %v237_v39, 23  ;;  %v261_v45 = vadd.s32 2, %v163_v11 }
  0x17   : > { %v285_v46 = vmul.f32 0.2, %v281_v40  ;;  %v256_v47 = vadd.f32 %v253_v31, %v232_v41  ;;  %v231_v48 = vsel %vm228_vm3, 1.0, %v538_v2  ;;  %v249_v49 = vsel %vm248_vm4, %v237_v39, 23 }
  0x18   : > { %515 = vmatpush3.msra.mxu1 %v592_v26  ;;  %499 = vmatpush3.msra.mxu0 %v592_v26  ;;  %v234_v50 = vadd.f32 %v231_v48, %v213_v44  ;;  %vm252_vm5 = vcmp.eq.s32.totalorder %v566_v4, %v249_v49  ;;  %vm272_vm6 = vcmp.lt.s32.totalorder %v261_v45, 23  ;;  %vm380_vm8 = vcmask 261120  }
  0x19   : > { %504 = vmatmul.mubr.msk.f32.vlgmr.msra.gmra.mrb[0].mxu1 %vm287_vm9, %v285_v46  ;;  %v280_v51 = vadd.f32 %v277_v37, %v256_v47  ;;  %v255_v52 = vsel %vm252_vm5, 1.0, %v538_v2  ;;  %v273_v53 = vsel %vm272_vm6, %v261_v45, 23 }
  0x1a   : > { %506 = vmatprep.mubr.msk.f32.mxu1 %vm537_vm0, %v538_v2  ;;  %v258_v54 = vadd.f32 %v255_v52, %v234_v50  ;;  %vm276_vm7 = vcmp.eq.s32.totalorder %v566_v4, %v273_v53 }
  0x1b   : > { %v284_v55 = vmul.f32 0.2, %v280_v51  ;;  %v279_v56 = vsel %vm276_vm7, 1.0, %v538_v2 }
  0x1c   : > { %v282_v57 = vadd.f32 %v279_v56, %v258_v54 }
  0x1d   : > { %501 = vmatmul.mubr.msk.f32.vlgmr.msra.gmra.mrb[0].mxu0 %vm287_vm9, %v284_v55 }
  0x1e   : > { %v286_v58 = vmul.f32 0.2, %v282_v57 }
  0x20   : > { %507 = vmatmul.mubr.msk.f32.gmra.mrb[2].mxu1 %vm287_vm9, %v286_v58 }
  0xec   : > { %v368_v59 = vpop.f32.mrb[0].mxu1 }
  0xed   : > { %v378_v60 = vsub.f32 %v577_v16, %v368_v59  ;;  %385 = vst.msk [vmem:[%s156_s17 + $0x8] sm:$0xff] %vm380_vm8, %v368_v59  ;;  %v505_v61 = vpop.f32.mrb[1].mxu1 }
  0xef   : > { %382 = vst.msk [vmem:[%s151_s20 + $0x8] sm:$0xff] %vm380_vm8, %v378_v60 }
  0xf0   : > { %v363_v62 = vpop.f32.mrb[0].mxu0 }
  0xf1   : > { %v377_v63 = vsub.f32 %v575_v15, %v363_v62  ;;  %384 = vst.msk [vmem:[%s156_s17] sm:$0xff] %vm380_vm8, %v363_v62  ;;  %v502_v0 = vpop.f32.mrb[1].mxu0 }
  0xf3   : > { %381 = vst.msk [vmem:[%s151_s20] sm:$0xff] %vm380_vm8, %v377_v63  ;;  %v373_v1 = vpop.f32.mrb[2].mxu1 }
  0xf4   : > { %v379_v2 = vsub.f32 %v592_v26, %v373_v1  ;;  %386 = vst.msk [vmem:[%s156_s17 + $0x10] sm:$0xff] %vm380_vm8, %v373_v1  ;;  %v508_v3 = vpop.f32.mrb[3].mxu1 }
  0xf6   : > { %383 = vst.msk [vmem:[%s151_s20 + $0x10] sm:$0xff] %vm380_vm8, %v379_v2 }
  0xf7 PF: > { %s13_s9 = sadd.s32 1, %s534_s9  }
  0xf8   : > { %p10_p4 = scmp.ge.s32.totalorder %s13_s9, 4  }
  0xfa   :  { %12 = sbr.rel (!%p10_p4) target bundleno = 1 (0x1), region = 66 }

// kernel: _lambda_.55
= control target key start
LH: loop header
LB: loop body
LE: loop exit
PB: predicated region body
PF: predicated region fallthrough
CT: control target
= control target key end

     0   :  { %s971_s15 = smov 0   ;;  %s1100_s0 = inlined_call_operand.vmem [shape: f32[2,24,32], index: 0, kind: input, shape index: {}]   ;;  %s1101_s1 = inlined_call_operand.vmem [shape: bf16[32,4], index: 1, kind: input, shape index: {}]   ;;  %s1102_s2 = inlined_call_operand.vmem [shape: bf16[32,4], index: 2, kind: input, shape index: {}]   ;;  %s1103_s3 = inlined_call_operand.vmem [shape: bf16[32,4], index: 3, kind: input, shape index: {}]   ;;  %s1104_s4 = inlined_call_operand.vmem [shape: f32[2,24,4], index: 4, kind: output, shape index: {}]  }
   0x1 LB: > { %s786_s16 = sadd.s32 4294967295, %s941_s15   ;;  %p790_p0 = scmp.ge.s32.totalorder %s941_s15, 1  ;;  %s941_s15 = sphi %s971_s15, %s14_s15  }
   0x2   : > { %p162_p1 = scmp.lt.s32.totalorder %s941_s15, 3 }
   0x4   : > { %p163_p2 = pnand %p790_p0, %p162_p1 }
   0x5   : > { %p188_p3 = scmp.lt.s32.totalorder (!%p163_p2), %s786_s16, 1  ;;  %v202_v0 = vlaneseq (!%p163_p2)  ;;  %v943_v1 = vmov (!%p163_p2), 0.0|0.0   ;;  %vm944_vm0 = vmmov (!%p163_p2), 0   ;;  %v945_v2 = vmov (!%p163_p2), 0.0   ;;  %v929_v3 = vld [vmem:[%s1102_s2] sm:$0xff] (!%p163_p2)   ;;  %v930_v5 = vld [vmem:[%s1102_s2 + $0x8] sm:$0xff] (!%p163_p2)  }
   0x6   : > { %166 = sbr.rel (%p163_p2) target bundleno = 477 (0x1dd), region = 36  ;;  %891 = vmatprep.subr.bf16.mxu1 (!%p163_p2), %v943_v1  ;;  %843 = vmatprep.mubr.msk.f32.mxu1 (!%p163_p2), %vm944_vm0, %v945_v2  ;;  %v931_v10 = vld [vmem:[%s1101_s1] sm:$0xff] (!%p163_p2)   ;;  %vm531_vm1 = vcmask (!%p163_p2), 261120   ;;  %vm268_vm2 = vcmask (!%p163_p2), 195584  }
   0x7   : > { %v203_v4 = vshrl.u32 (!%p163_p2), %v202_v0, 7  ;;  %867 = vmatprep.subr.bf16.mxu0 (!%p163_p2), %v929_v3  ;;  %v1037_v44 = vand.u32 (!%p163_p2), 127, %v202_v0 }
   0x8   : > { %868 = vmatpush3.bf16.msra.mxu0 (!%p163_p2), %v929_v3 }
   0x9   : > { %v208_v6 = vadd.s32 (!%p163_p2), 4294967295, %v203_v4  ;;  %v204_v7 = vadd.s32 (!%p163_p2), 8, %v203_v4  ;;  %v205_v8 = vadd.s32 (!%p163_p2), 16, %v203_v4  ;;  %v358_v9 = vadd.s32 (!%p163_p2), 1, %v203_v4  ;;  %869 = vmatprep.subr.bf16.mxu0 (!%p163_p2), %v930_v5 }
   0xb   : > { %v211_v11 = vadd.s32 (!%p163_p2), 24, %v208_v6  ;;  %v209_v12 = vadd.s32 (!%p163_p2), 4294967295, %v204_v7  ;;  %v210_v13 = vadd.s32 (!%p163_p2), 4294967295, %v205_v8  ;;  %v361_v14 = vadd.s32 (!%p163_p2), 24, %v358_v9 }
   0xc   : > { %v359_v18 = vadd.s32 (!%p163_p2), 1, %v204_v7  ;;  %v360_v19 = vadd.s32 (!%p163_p2), 1, %v205_v8  ;;  %870 = vmatpush3.bf16.msra.mxu0 (!%p163_p2), %v930_v5 }
   0xd   : > { %s1108_s16 = smov (!%p188_p3, %s786_s16), 1  ;;  %v1005_v22 = vmul.u32.u64.low 2863311531, %v211_v11  ;;  %v1006_v23 = vmul.u32.u64.high 2863311531, %v211_v11, %v1005_v22  ;;  %v212_v24 = vadd.s32 24, %v209_v12  ;;  %v213_v25 = vadd.s32 24, %v210_v13  ;;  %875 = vmatprep.subr.bf16.mxu0 %v931_v10  ;;  %v932_v13 = vld [vmem:[%s1101_s1 + $0x8] sm:$0xff]  }
   0xe   : > { %s905_s21 = smul.u32 24, %s1108_s16  ;;  %v1008_v26 = vmul.u32.u64.low 2863311531, %v361_v14  ;;  %v1009_v27 = vmul.u32.u64.high 2863311531, %v361_v14, %v1008_v26  ;;  %v362_v28 = vadd.s32 24, %v359_v18  ;;  %v1012_v29 = vadd.s32 24, %v360_v19  ;;  %v934_v22 = vld [vmem:[%s1103_s3 + $0x8] sm:$0xff]  }
   0xf   : > { %v1017_v30 = vmul.u32.u64.low 2863311531, %v212_v24  ;;  %v1018_v31 = vmul.u32.u64.high 2863311531, %v212_v24, %v1017_v30  ;;  %v1020_v32 = vmul.u32.u64.low 2863311531, %v213_v25  ;;  %v1021_v33 = vmul.u32.u64.high 2863311531, %v213_v25, %v1020_v32 }
  0x10   : > { %s192_s26 = scalar_lea.vmem %s1100_s0, %s905_s21  ;;  %v220_v34 = vshrl.u32 %v1006_v23, 4  ;;  %v1025_v35 = vmul.u32.u64.low 2863311531, %v362_v28  ;;  %v1026_v36 = vmul.u32.u64.high 2863311531, %v362_v28, %v1025_v35  ;;  %v370_v37 = vshrl.u32 %v1009_v27, 4  ;;  %s197_s9 = scalar_lea.vmem %s1104_s4, %s905_s21 }
  0x11   : > { %v199_v15 = vld [vmem:[%s192_s26] sm:$0xff]  ;;  %v200_v16 = vld [vmem:[%s192_s26 + $0x8] sm:$0xff]  ;;  %v999_v17 = vld [vmem:[%s192_s26 + $0x10] sm:$0xff]  ;;  %v1030_v38 = vmul.u32.u64.low 2863311531, %v1012_v29  ;;  %v1031_v39 = vmul.u32.u64.high 2863311531, %v1012_v29, %v1030_v38  ;;  %v231_v41 = vshrl.u32 %v1018_v31, 4 }
  0x12   : > { %v1001_v20 = vpack.c.bf16 %v200_v16, %v199_v15  ;;  %v518_v21 = vpack.c.bf16 %v999_v17, %v999_v17  ;;  %v221_v40 = vmul.u32 24, %v220_v34  ;;  %v242_v42 = vshrl.u32 %v1021_v33, 4 }
  0x13   : > { %v371_v43 = vmul.u32 24, %v370_v37  ;;  %v381_v46 = vshrl.u32 %v1026_v36, 4  ;;  %v232_v47 = vmul.u32 24, %v231_v41  ;;  %v392_v50 = vshrl.u32 %v1031_v39, 4 }
  0x14   : > { %893 = vmatpush3.bf16.msra.mxu1 %v1001_v20  ;;  %871 = vmatprep.mubr.msk.bf16.mxu0 %vm531_vm1, %v1001_v20  ;;  %v222_v45 = vsub.s32 %v211_v11, %v221_v40  ;;  %v243_v48 = vmul.u32 24, %v242_v42 }
  0x15   : > { %841 = vmatprep.subr.mxu1 %v945_v2  ;;  %872 = vmatmul.mubr.msk.bf16.vlgmr.msra.gmra.mrb[0].mxu0 %vm531_vm1, %v518_v21  ;;  %v372_v49 = vsub.s32 %v361_v14, %v371_v43  ;;  %v382_v52 = vmul.u32 24, %v381_v46  ;;  %v233_v53 = vsub.s32 %v212_v24, %v232_v47  ;;  %v393_v58 = vmul.u32 24, %v392_v50  ;;  %v933_v14 = vld [vmem:[%s1103_s3] sm:$0xff]  }
  0x16   : > { %876 = vmatpush3.bf16.msra.mxu0 %v931_v10  ;;  %vm247_vm3 = vcmp.ne.s32.totalorder %v222_v45, 0  ;;  %vm250_vm4 = vcmp.lt.s32.totalorder %v222_v45, 0  ;;  %v256_v51 = vadd.s32 24, %v222_v45  ;;  %v244_v54 = vsub.s32 %v213_v25, %v243_v48 }
  0x17   : > { %vm253_vm5 = vmand %vm250_vm4, %vm247_vm3  ;;  %vm397_vm6 = vcmp.ne.s32.totalorder %v372_v49, 0  ;;  %vm400_vm7 = vcmp.lt.s32.totalorder %v372_v49, 0  ;;  %v406_v56 = vadd.s32 24, %v372_v49  ;;  %v383_v57 = vsub.s32 %v362_v28, %v382_v52  ;;  %877 = vmatprep.subr.bf16.mxu0 %v932_v13 }
  0x18   : > { %842 = vmatpush3.msra.mxu1 %v999_v17  ;;  %v259_v55 = vsel %vm253_vm5, %v256_v51, %v222_v45  ;;  %vm248_vm9 = vcmp.ne.s32.totalorder %v233_v53, 0  ;;  %vm251_vm10 = vcmp.lt.s32.totalorder %v233_v53, 0  ;;  %v257_v59 = vadd.s32 24, %v233_v53  ;;  %vm1042_vm11 = vmand %vm400_vm7, %vm397_vm6 }
  0x19   : > { %894 = vmatprep.subr.bf16.mxu1 %v943_v1  ;;  %vm262_vm8 = vcmp.eq.s32.totalorder %v1037_v44, %v259_v55  ;;  %vm254_vm12 = vmand %vm251_vm10, %vm248_vm9  ;;  %vm249_vm13 = vcmp.ne.s32.totalorder %v244_v54, 0  ;;  %vm252_vm14 = vcmp.lt.s32.totalorder %v244_v54, 0  ;;  %v258_v62 = vadd.s32 24, %v244_v54 }
  0x1a   : > { %v265_v61 = vsel %vm262_vm8, 1.0, %v945_v2  ;;  %v260_v63 = vsel %vm254_vm12, %v257_v59, %v233_v53  ;;  %vm255_vm15 = vmand %vm252_vm14, %vm249_vm13  ;;  %vm398_vm4 = vcmp.ne.s32.totalorder %v383_v57, 0  ;;  %vm401_vm5 = vcmp.lt.s32.totalorder %v383_v57, 0  ;;  %878 = vmatpush3.bf16.msra.mxu0 %v932_v13 }
  0x1b   : > { %844 = vmatmul.mubr.msk.f32.vlgmr.msra.gmra.mrb[0].mxu1 %vm268_vm2, %v265_v61  ;;  %vm263_vm3 = vcmp.eq.s32.totalorder %v1037_v44, %v260_v63  ;;  %v261_v0 = vsel %vm255_vm15, %v258_v62, %v244_v54  ;;  %v394_v3 = vsub.s32 %v1012_v29, %v393_v58  ;;  %v409_v4 = vsel %vm1042_vm11, %v406_v56, %v372_v49  ;;  %vm404_vm7 = vmand %vm401_vm5, %vm398_vm4 }
  0x1c   : > { %896 = vmatpush3.bf16.msra.mxu1 %v1001_v20  ;;  %846 = vmatprep.mubr.msk.f32.mxu1 %vm944_vm0, %v945_v2  ;;  %v266_v1 = vsel %vm263_vm3, 1.0, %v945_v2  ;;  %vm264_vm6 = vcmp.eq.s32.totalorder %v1037_v44, %v261_v0  ;;  %v407_v5 = vadd.s32 24, %v383_v57  ;;  %vm412_vm10 = vcmp.eq.s32.totalorder %v1037_v44, %v409_v4 }
  0x1d   : > { %856 = vmatprep.subr.mxu1 %v945_v2  ;;  %v267_v6 = vsel %vm264_vm6, 1.0, %v945_v2  ;;  %vm399_vm8 = vcmp.ne.s32.totalorder %v394_v3, 0  ;;  %vm402_vm9 = vcmp.lt.s32.totalorder %v394_v3, 0  ;;  %v408_v8 = vadd.s32 24, %v394_v3  ;;  %883 = vmatprep.subr.bf16.mxu0 %v933_v14 }
  0x1e   : > { %v410_v7 = vsel %vm404_vm7, %v407_v5, %v383_v57  ;;  %vm405_vm11 = vmand %vm402_vm9, %vm399_vm8  ;;  %v415_v9 = vsel %vm412_vm10, 1.0, %v945_v2 }
  0x1f   : > { %847 = vmatmul.mubr.msk.f32.gmra.mrb[2].mxu1 %vm268_vm2, %v266_v1  ;;  %vm413_vm12 = vcmp.eq.s32.totalorder %v1037_v44, %v410_v7  ;;  %v411_v10 = vsel %vm405_vm11, %v408_v8, %v394_v3 }
  0x20   : > { %857 = vmatpush3.msra.mxu1 %v999_v17  ;;  %849 = vmatprep.mubr.msk.f32.mxu1 %vm944_vm0, %v945_v2  ;;  %v416_v11 = vsel %vm413_vm12, 1.0, %v945_v2  ;;  %vm414_vm13 = vcmp.eq.s32.totalorder %v1037_v44, %v411_v10 }
  0x21   : > { %v417_v12 = vsel %vm414_vm13, 1.0, %v945_v2 }
  0x23   : > { %850 = vmatmul.mubr.msk.f32.gmra.mrb[4].mxu1 %vm268_vm2, %v267_v6 }
  0x24   : > { %858 = vmatprep.mubr.msk.f32.mxu1 %vm944_vm0, %v945_v2 }
  0x27   : > { %859 = vmatmul.mubr.msk.f32.vlgmr.msra.gmra.mrb[6].mxu1 %vm268_vm2, %v415_v9 }
  0x28   : > { %861 = vmatprep.mubr.msk.f32.mxu1 %vm944_vm0, %v945_v2 }
  0x2b   : > { %862 = vmatmul.mubr.msk.f32.gmra.mrb[8].mxu1 %vm268_vm2, %v416_v11 }
  0x2c   : > { %864 = vmatprep.mubr.msk.f32.mxu1 %vm944_vm0, %v945_v2  ;;  %vm727_vm0 = vcmask 31744  }
  0x2f   : > { %865 = vmatmul.mubr.msk.f32.gmra.mrb[10].mxu1 %vm268_vm2, %v417_v12 }
  0xee   : > { %v344_v15 = vpop.f32.mrb[0].mxu1 }
  0xef   : > { %v845_v16 = vpop.f32.mrb[1].mxu1 }
  0xf2   : > { %v349_v17 = vpop.f32.mrb[2].mxu1 }
  0xf3   : > { %v511_v18 = vpack.c.bf16 %v349_v17, %v344_v15  ;;  %v848_v19 = vpop.f32.mrb[3].mxu1 }
  0xf5   : > { %879 = vmatprep.mubr.msk.bf16.mxu0 %vm531_vm1, %v511_v18 }
  0xf6   : > { %v354_v2 = vpop.f32.mrb[4].mxu1 }
  0xf7   : > { %v512_v20 = vpack.c.bf16 %v354_v2, %v354_v2  ;;  %v851_v21 = vpop.f32.mrb[5].mxu1 }
  0xf9   : > { %880 = vmatmul.mubr.msk.bf16.vlgmr.msra.gmra.mrb[0].mxu0 %vm531_vm1, %v512_v20 }
  0xfa   : > { %884 = vmatpush3.bf16.msra.mxu0 %v933_v14  ;;  %v493_v23 = vpop.f32.mrb[6].mxu1 }
  0xfb   : > { %v860_v24 = vpop.f32.mrb[7].mxu1  ;;  %885 = vmatprep.subr.bf16.mxu0 %v934_v22 }
  0xfe   : > { %v498_v25 = vpop.f32.mrb[8].mxu1  ;;  %886 = vmatpush3.bf16.msra.mxu0 %v934_v22 }
  0xff   : > { %v656_v26 = vpack.c.bf16 %v498_v25, %v493_v23  ;;  %v863_v27 = vpop.f32.mrb[9].mxu1 }
 0x101   : > { %887 = vmatprep.mubr.msk.bf16.mxu0 %vm531_vm1, %v656_v26 }
 0x102   : > { %v503_v28 = vpop.f32.mrb[10].mxu1 }
 0x103   : > { %v657_v29 = vpack.c.bf16 %v503_v28, %v503_v28  ;;  %v866_v30 = vpop.f32.mrb[11].mxu1 }
 0x105   : > { %888 = vmatmul.mubr.msk.bf16.vlgmr.msra.gmra.mrb[0].mxu0 %vm531_vm1, %v657_v29 }
 0x1d8   : > { %v889_v31 = vpop.f32.mrb[0].mxu0 }
 0x1d9   : > { %730 = vst.msk [vmem:[%s197_s9 + $0x10] sm:$0xff] %vm727_vm0, %v889_v31  ;;  %v710_v32 = vpop.f32.mrb[1].mxu0 }
 0x1da   : > { %728 = vst.msk [vmem:[%s197_s9] sm:$0xff] %vm727_vm0, %v710_v32  ;;  %v890_v33 = vpop.f32.mrb[2].mxu0 }
 0x1db   : > { %v713_v34 = vpop.f32.mrb[3].mxu0 }
 0x1dc   : > { %729 = vst.msk [vmem:[%s197_s9 + $0x8] sm:$0xff] %vm727_vm0, %v713_v34 }
 0x1dd PF: > { %s14_s15 = sadd.s32 1, %s941_s15  }
 0x1de   : > { %p11_p4 = scmp.ge.s32.totalorder %s14_s15, 4  }
 0x1e0   :  { %13 = sbr.rel (!%p11_p4) target bundleno = 1 (0x1), region = 66 }

// kernel: _lambda_.56
= control target key start
LH: loop header
LB: loop body
LE: loop exit
PB: predicated region body
PF: predicated region fallthrough
CT: control target
= control target key end

     0   :  { %s363_s12 = smov 0   ;;  %s405_s0 = inlined_call_operand.vmem [shape: f32[2,24,32], index: 0, kind: input, shape index: {}]   ;;  %s406_s1 = inlined_call_operand.vmem [shape: f32[1,32], index: 1, kind: input, shape index: {}]   ;;  %s407_s2 = inlined_call_operand.vmem [shape: f32[1,32], index: 2, kind: input, shape index: {}]   ;;  %s408_s3 = inlined_call_operand.vmem [shape: f32[2,24,32], index: 3, kind: output, shape index: {}]  }
   0x1 LB: > { %s309_s13 = sadd.s32 4294967295, %s341_s12   ;;  %p313_p0 = scmp.ge.s32.totalorder %s341_s12, 1  ;;  %s341_s12 = sphi %s363_s12, %s13_s12  }
   0x2   : > { %p137_p1 = scmp.lt.s32.totalorder %s341_s12, 3 }
   0x4   : > { %p138_p2 = pnand %p313_p0, %p137_p1 }
   0x5   : > { %p161_p3 = scmp.lt.s32.totalorder (!%p138_p2), %s309_s13, 1  ;;  %vm176_vm0 = vcmask (!%p138_p2), 261120   ;;  %v316_v31 = vld [vmem:[%s406_s1] ss:$0 sm:$0xff] (!%p138_p2) }
   0x6   : > { %141 = sbr.rel (%p138_p2) target bundleno = 359 (0x167), region = 32  ;;  %v317_v36 = vld [vmem:[%s407_s2] ss:$0 sm:$0xff] (!%p138_p2) }
   0xd   : > { %s410_s13 = smov (!%p161_p3, %s309_s13), 1 }
   0xe   : > { %s320_s14 = smul.u32 24, %s410_s13 }
  0x10   : > { %s165_s17 = scalar_lea.vmem %s405_s0, %s320_s14  ;;  %s170_s24 = scalar_lea.vmem %s408_s3, %s320_s14 }
  0x11   : > { %v171_v0 = vld [vmem:[%s165_s17] sm:$0xff]  ;;  %v173_v1 = vld [vmem:[%s165_s17 + $0x10] sm:$0xff]  ;;  %v172_v2 = vld [vmem:[%s165_s17 + $0x8] sm:$0xff] }
  0x12   : > { %v177_v3 = vsel %vm176_vm0, %v171_v0, 0.0  ;;  %v183_v4 = vsel %vm176_vm0, %v173_v1, 0.0  ;;  %v180_v5 = vsel %vm176_vm0, %v172_v2, 0.0 }
  0x13   : > { %178 = vadd.xlane.f32.xlu0 %v177_v3  ;;  %184 = vadd.xlane.f32.xlu1 %v183_v4 }
  0x17   : > { %181 = vadd.xlane.f32.xlu0 %v180_v5 }
  0xa0   : > { %v179_v6 = vpop.xlane.xlu0 %178  ;;  %v185_v7 = vpop.xlane.xlu1 %184 }
  0xa1   : > { %v187_v8 = vmul.f32 0.03125, %v179_v6  ;;  %v189_v9 = vmul.f32 0.03125, %v185_v7 }
  0xa3   : > { %v190_v10 = vsub.f32 %v171_v0, %v187_v8  ;;  %v192_v11 = vsub.f32 %v173_v1, %v189_v9 }
  0xa4   : > { %v182_v12 = vpop.xlane.xlu0 %181 }
  0xa5   : > { %v188_v13 = vmul.f32 0.03125, %v182_v12  ;;  %v193_v14 = vmul.f32 %v190_v10, %v190_v10  ;;  %v195_v15 = vmul.f32 %v192_v11, %v192_v11 }
  0xa7   : > { %v191_v16 = vsub.f32 %v172_v2, %v188_v13  ;;  %v196_v17 = vsel %vm176_vm0, %v193_v14, 0.0  ;;  %v202_v18 = vsel %vm176_vm0, %v195_v15, 0.0 }
  0xa8   : > { %197 = vadd.xlane.f32.xlu1 %v196_v17 }
  0xa9   : > { %v194_v19 = vmul.f32 %v191_v16, %v191_v16 }
  0xab   : > { %v199_v20 = vsel %vm176_vm0, %v194_v19, 0.0 }
  0xac   : > { %203 = vadd.xlane.f32.xlu1 %v202_v18  ;;  %200 = vadd.xlane.f32.xlu0 %v199_v20 }
 0x135   : > { %v198_v21 = vpop.xlane.xlu1 %197 }
 0x136   : > { %v205_v22 = vmul.f32 0.03125, %v198_v21 }
 0x138   : > { %v208_v23 = vadd.f32 1e-05, %v205_v22 }
 0x139   : > { %v204_v24 = vpop.xlane.xlu1 %203  ;;  %v201_v25 = vpop.xlane.xlu0 %200 }
 0x13a   : > { %329 = vrsqrt.f32 %v208_v23  ;;  %v207_v26 = vmul.f32 0.03125, %v204_v24  ;;  %v206_v27 = vmul.f32 0.03125, %v201_v25 }
 0x13c   : > { %v210_v28 = vadd.f32 1e-05, %v207_v26  ;;  %v209_v29 = vadd.f32 1e-05, %v206_v27 }
 0x13e   : > { %331 = vrsqrt.f32 %v210_v28 }
 0x13f   : > { %333 = vrsqrt.f32 %v209_v29 }
 0x144   : > { %v330_v30 = vpop.eup %329 }
 0x145   : > { %v214_v32 = vmul.f32 %v330_v30, %v190_v10 }
 0x147   : > { %v223_v34 = vmul.f32 %v316_v31, %v214_v32 }
 0x148   : > { %v332_v33 = vpop.eup %331 }
 0x149   : > { %v334_v35 = vpop.eup %333  ;;  %v216_v37 = vmul.f32 %v332_v33, %v192_v11  ;;  %v232_v40 = vadd.f32 %v317_v36, %v223_v34 }
 0x14a   : > { %v215_v38 = vmul.f32 %v334_v35, %v191_v16 }
 0x14b   : > { %v225_v39 = vmul.f32 %v316_v31, %v216_v37  ;;  %v235_v44 = vsel %vm176_vm0, %v232_v40, 0.0 }
 0x14c   : > { %v224_v41 = vmul.f32 %v316_v31, %v215_v38 }
 0x14d   : > { %v234_v42 = vadd.f32 %v317_v36, %v225_v39 }
 0x14e   : > { %v233_v43 = vadd.f32 %v317_v36, %v224_v41 }
 0x14f   : > { %v238_v47 = vsel %vm176_vm0, %v234_v42, 0.0 }
 0x150   : > { %v236_v45 = vsel %vm176_vm0, %v233_v43, 0.0 }
 0x151   : > { %v237_v46 = vadd.f32 %v236_v45, %v235_v44 }
 0x153   : > { %v239_v48 = vadd.f32 %v238_v47, %v237_v46 }
 0x155   : > { %v240_v49 = vrot.slane %v239_v48, 4 }
 0x157   : > { %v241_v50 = vadd.f32 %v240_v49, %v239_v48 }
 0x159   : > { %v242_v51 = vrot.slane %v241_v50, 2 }
 0x15b   : > { %v243_v52 = vadd.f32 %v242_v51, %v241_v50 }
 0x15d   : > { %v244_v53 = vrot.slane %v243_v52, 1 }
 0x15f   : > { %v245_v54 = vadd.f32 %v244_v53, %v243_v52 }
 0x161   : > { %v247_v55 = vmul.f32 0.041666668, %v245_v54 }
 0x163   : > { %v248_v56 = vsub.f32 %v232_v40, %v247_v55  ;;  %v249_v57 = vsub.f32 %v233_v43, %v247_v55  ;;  %v250_v58 = vsub.f32 %v234_v42, %v247_v55 }
 0x165   : > { %251 = vst.msk [vmem:[%s170_s24] sm:$0xff] %vm176_vm0, %v248_v56  ;;  %252 = vst.msk [vmem:[%s170_s24 + $0x8] sm:$0xff] %vm176_vm0, %v249_v57 }
 0x166   : > { %253 = vst.msk [vmem:[%s170_s24 + $0x10] sm:$0xff] %vm176_vm0, %v250_v58 }
 0x167 PF: > { %s13_s12 = sadd.s32 1, %s341_s12  }
 0x168   : > { %p10_p4 = scmp.ge.s32.totalorder %s13_s12, 4  }
 0x16a   :  { %12 = sbr.rel (!%p10_p4) target bundleno = 1 (0x1), region = 62 }

// kernel: _lambda_.57
= control target key start
LH: loop header
LB: loop body
LE: loop exit
PB: predicated region body
PF: predicated region fallthrough
CT: control target
= control target key end

     0   :  { %vm19_vm0 = vcmask 31744   ;;  %v204_v0 = vmov 0.0   ;;  %vm205_vm1 = vmmov 0   ;;  %vm57_vm2 = vcmask 261120   ;;  %s292_s1 = inlined_call_operand.vmem [shape: bf16[32,4], index: 1, kind: input, shape index: {}]   ;;  %s293_s0 = inlined_call_operand.vmem [shape: f32[48,32], index: 0, kind: input, shape index: {}]   ;;  %s294_s2 = inlined_call_operand.vmem [shape: f32[1,4], index: 2, kind: input, shape index: {}]   ;;  %s295_s3 = inlined_call_operand.vmem [shape: f32[48,4], index: 3, kind: output, shape index: {}]  }
   0x1   :  { %196 = vmatprep.subr.bf16.mxu1 %v204_v0  ;;  %v202_v1 = vld [vmem:[%s292_s1] sm:$0xff]   ;;  %180 = vmatprep.subr.bf16.mxu0 %v204_v0  ;;  %22 = vst.msk [vmem:[#allocation2 + $0x10] sm:$0xff] %vm19_vm0, %v204_v0  ;;  %20 = vst.msk [vmem:[#allocation2] sm:$0xff] %vm19_vm0, %v204_v0  ;;  %v203_v2 = vld [vmem:[%s292_s1 + $0x8] sm:$0xff]  }
   0x2   :  { %21 = vst.msk [vmem:[#allocation2 + $0x8] sm:$0xff] %vm19_vm0, %v204_v0  ;;  %23 = vst.msk [vmem:[#allocation2 + $0x18] sm:$0xff] %vm19_vm0, %v204_v0  ;;  %188 = vmatprep.mubr.msk.bf16.mxu1 %vm205_vm1, %v204_v0  ;;  %184 = vmatprep.mubr.msk.bf16.mxu0 %vm205_vm1, %v204_v0  ;;  %v34_v3 = vld [vmem:[%s293_s0 + $0x10] sm:$0xff]  ;;  %v35_v4 = vld [vmem:[%s293_s0 + $0x18] sm:$0xff] }
   0x3   :  { %24 = vst.msk [vmem:[#allocation2 + $0x20] sm:$0xff] %vm19_vm0, %v204_v0  ;;  %25 = vst.msk [vmem:[#allocation2 + $0x28] sm:$0xff] %vm19_vm0, %v204_v0  ;;  %198 = vmatpush3.bf16.msra.mxu1 %v202_v1  ;;  %181 = vmatpush3.bf16.msra.mxu0 %v202_v1  ;;  %v32_v5 = vld [vmem:[%s293_s0] sm:$0xff]  ;;  %v33_v6 = vld [vmem:[%s293_s0 + $0x8] sm:$0xff]  ;;  %v43_v7 = vpack.c.bf16 %v35_v4, %v34_v3 }
   0x4   :  { %197 = vmatprep.subr.bf16.mxu1 %v204_v0  ;;  %182 = vmatprep.subr.bf16.mxu0 %v204_v0  ;;  %v42_v8 = vpack.c.bf16 %v33_v6, %v32_v5  ;;  %v36_v9 = vld [vmem:[%s293_s0 + $0x20] sm:$0xff]  ;;  %v37_v10 = vld [vmem:[%s293_s0 + $0x28] sm:$0xff] }
   0x5   :  { %v44_v11 = vpack.c.bf16 %v37_v10, %v36_v9  ;;  %v174_v29 = vld [vmem:[%s294_s2] ss:$0 sm:$0xff] }
   0x7   :  { %199 = vmatpush3.bf16.msra.mxu1 %v203_v2  ;;  %183 = vmatpush3.bf16.msra.mxu0 %v203_v2 }
   0x8   :  { %v28_v12 = vld [vmem:[#allocation2 + $0x10] sm:$0xff]  ;;  %v26_v13 = vld [vmem:[#allocation2] sm:$0xff] }
   0x9   :  { %v29_v15 = vld [vmem:[#allocation2 + $0x18] sm:$0xff]  ;;  %v27_v17 = vld [vmem:[#allocation2 + $0x8] sm:$0xff] }
   0xa   :  { %189 = vmatmul.mubr.msk.bf16.vlgmr.msra.gmra.mrb[0].mxu1 %vm57_vm2, %v43_v7  ;;  %185 = vmatmul.mubr.msk.bf16.vlgmr.msra.gmra.mrb[0].mxu0 %vm57_vm2, %v42_v8  ;;  %v30_v28 = vld [vmem:[#allocation2 + $0x20] sm:$0xff]  ;;  %v31_v31 = vld [vmem:[#allocation2 + $0x28] sm:$0xff] }
   0xb   :  { %192 = vmatprep.mubr.msk.bf16.mxu1 %vm205_vm1, %v204_v0 }
  0x12   :  { %193 = vmatmul.mubr.msk.bf16.gmra.mrb[4].mxu1 %vm57_vm2, %v44_v11 }
  0xdd   :  { %v109_v14 = vpop.f32.mrb[0].mxu1  ;;  %v101_v16 = vpop.f32.mrb[0].mxu0 }
  0xde   :  { %v126_v18 = vadd.f32 %v109_v14, %v28_v12  ;;  %v190_v19 = vpop.f32.mrb[1].mxu1  ;;  %v124_v20 = vadd.f32 %v101_v16, %v26_v13  ;;  %v186_v21 = vpop.f32.mrb[1].mxu0 }
  0xdf   :  { %v112_v22 = vpop.f32.mrb[2].mxu1  ;;  %v104_v23 = vpop.f32.mrb[2].mxu0 }
  0xe0   :  { %133 = vst.msk [vmem:[#allocation2 + $0x10] sm:$0xff] %vm19_vm0, %v126_v18  ;;  %v127_v24 = vadd.f32 %v112_v22, %v29_v15  ;;  %v191_v25 = vpop.f32.mrb[3].mxu1  ;;  %131 = vst.msk [vmem:[#allocation2] sm:$0xff] %vm19_vm0, %v124_v20  ;;  %v125_v26 = vadd.f32 %v104_v23, %v27_v17  ;;  %v187_v27 = vpop.f32.mrb[3].mxu0 }
  0xe2   :  { %134 = vst.msk [vmem:[#allocation2 + $0x18] sm:$0xff] %vm19_vm0, %v127_v24  ;;  %132 = vst.msk [vmem:[#allocation2 + $0x8] sm:$0xff] %vm19_vm0, %v125_v26 }
  0xe5   :  { %v117_v30 = vpop.f32.mrb[4].mxu1 }
  0xe6   :  { %v128_v32 = vadd.f32 %v117_v30, %v30_v28  ;;  %v194_v33 = vpop.f32.mrb[5].mxu1 }
  0xe7   :  { %v142_v34 = vld [vmem:[#allocation2 + $0x10] sm:$0xff]  ;;  %v140_v35 = vld [vmem:[#allocation2] sm:$0xff]  ;;  %v120_v36 = vpop.f32.mrb[6].mxu1 }
  0xe8   :  { %v155_v37 = vadd.f32 %v174_v29, %v142_v34  ;;  %v153_v38 = vadd.f32 %v174_v29, %v140_v35  ;;  %135 = vst.msk [vmem:[#allocation2 + $0x20] sm:$0xff] %vm19_vm0, %v128_v32  ;;  %v129_v39 = vadd.f32 %v120_v36, %v31_v31  ;;  %v195_v40 = vpop.f32.mrb[7].mxu1 }
  0xe9   :  { %v143_v41 = vld [vmem:[#allocation2 + $0x18] sm:$0xff]  ;;  %v141_v42 = vld [vmem:[#allocation2 + $0x8] sm:$0xff] }
  0xea   :  { %161 = vst.msk [vmem:[%s295_s3 + $0x10] sm:$0xff] %vm19_vm0, %v155_v37  ;;  %v156_v43 = vadd.f32 %v174_v29, %v143_v41  ;;  %159 = vst.msk [vmem:[%s295_s3] sm:$0xff] %vm19_vm0, %v153_v38  ;;  %v154_v44 = vadd.f32 %v174_v29, %v141_v42 }
  0xeb   :  { %136 = vst.msk [vmem:[#allocation2 + $0x28] sm:$0xff] %vm19_vm0, %v129_v39 }
  0xec   :  { %162 = vst.msk [vmem:[%s295_s3 + $0x18] sm:$0xff] %vm19_vm0, %v156_v43  ;;  %160 = vst.msk [vmem:[%s295_s3 + $0x8] sm:$0xff] %vm19_vm0, %v154_v44 }
  0xef   :  { %v144_v45 = vld [vmem:[#allocation2 + $0x20] sm:$0xff] }
  0xf0   :  { %v157_v46 = vadd.f32 %v174_v29, %v144_v45 }
  0xf2   :  { %v145_v47 = vld [vmem:[#allocation2 + $0x28] sm:$0xff]  ;;  %163 = vst.msk [vmem:[%s295_s3 + $0x20] sm:$0xff] %vm19_vm0, %v157_v46 }
  0xf3   :  { %v158_v48 = vadd.f32 %v174_v29, %v145_v47 }
  0xf5   :  { %164 = vst.msk [vmem:[%s295_s3 + $0x28] sm:$0xff] %vm19_vm0, %v158_v48 }

</bundles_post_ra>
